<compile_context>
chip_gen: v6e
topology: v6e:2x2x1
jax: 0.10.0
libtpu: 0.0.40
codegen_flags: <defaults>
</compile_context>

<pallas_src>
from functools import partial

import numpy as np
import jax
import jax.numpy as jnp
from jax import lax
from jax.experimental import pallas as pl
from jax.experimental.pallas import tpu as pltpu


# ----------------------------------------------------------------------------
# small math helpers (used both inside the kernel and in the reference)
# ----------------------------------------------------------------------------
def _leaky(x, slope):
    return jnp.where(x >= 0, x, slope * x)


def _pixel_norm_lastdim(x):
    return x * jax.lax.rsqrt(jnp.mean(x * x, axis=-1, keepdims=True) + 1e-8)


def _l2norm_lastdim(x):
    n = jnp.sqrt(jnp.sum(x * x, axis=-1, keepdims=True))
    return x / jnp.maximum(n, 1e-12)


# ----------------------------------------------------------------------------
# host-side constant construction (bilinear-2x matrices, interior masks)
# ----------------------------------------------------------------------------
def _bilinear_up_matrix_1d(n):
    # out = M @ in,  2x bilinear, align_corners=False, edge-clamped.
    m = np.zeros((2 * n, n), np.float32)
    for o in range(2 * n):
        src = (o + 0.5) / 2.0 - 0.5
        j0 = int(np.floor(src))
        f = src - j0
        j0c = min(max(j0, 0), n - 1)
        j1c = min(max(j0 + 1, 0), n - 1)
        m[o, j0c] += 1.0 - f
        m[o, j1c] += f
    return m


def _up_matrix_padded(r):
    # maps the padded-flat (r+2)^2 layout -> padded-flat (2r+2)^2 layout.
    rp_in, rp_out = r + 2, 2 * r + 2
    u1 = _bilinear_up_matrix_1d(r)                      # (2r, r)
    k2 = np.kron(u1, u1)                                # (4r^2, r^2)
    U = np.zeros((rp_out * rp_out, rp_in * rp_in), np.float32)
    out_idx = np.array([(ho + 1) * rp_out + (wo + 1)
                        for ho in range(2 * r) for wo in range(2 * r)])
    in_idx = np.array([(hi + 1) * rp_in + (wi + 1)
                       for hi in range(r) for wi in range(r)])
    U[np.ix_(out_idx, in_idx)] = k2
    return U


def _interior_mask(r):
    rp = r + 2
    m = np.zeros((rp * rp, 1), np.float32)
    idx = [(h + 1) * rp + (w + 1) for h in range(r) for w in range(r)]
    m[idx, 0] = 1.0
    return m


# ----------------------------------------------------------------------------
# parameter init (PyTorch layouts, EqualLR scale folded in) and pre-layout
# ----------------------------------------------------------------------------
def init_params(key, input_code_dim=32, in_channel=32, num_of_classes=10):
    keys = iter(jax.random.split(key, 64))
    dim, C = input_code_dim, in_channel

    def conv(cin, cout, k):
        w = jax.random.normal(next(keys), (cout, cin, k, k), jnp.float32)
        w = w * (2.0 / (cin * k * k)) ** 0.5           # EqualLR scale folded in
        b = 0.1 * jax.random.normal(next(keys), (cout,), jnp.float32)
        return w, b

    def conv_t(cin, cout, k):
        # ConvTranspose2d weight layout (Cin, Cout, k, k); EqualLR fan_in = Cout*k*k
        w = jax.random.normal(next(keys), (cin, cout, k, k), jnp.float32)
        w = w * (2.0 / (cout * k * k)) ** 0.5
        b = 0.1 * jax.random.normal(next(keys), (cout,), jnp.float32)
        return w, b

    embedding = jax.random.normal(next(keys), (num_of_classes, dim), jnp.float32)
    input_layer = conv_t(2 * dim, C, 4)
    progression = []
    for _ in range(4):                                  # progression_4 / _8 / _16 / _32
        w1, b1 = conv(C, C, 3)
        w2, b2 = conv(C, C, 3)
        progression.append((w1, b1, w2, b2))
    to_rgb = {r: conv(C, 1, 1) for r in (8, 16, 32)}
    return dict(embedding=embedding, input_layer=input_layer,
                progression=progression, to_rgb=to_rgb)


def _conv_w_to_taps(w):
    # OIHW (Cout, Cin, 3, 3) -> (9*Cin, Cout), tap-major rows ((dh*3+dw)*Cin + ci)
    cout, cin, kh, kw = w.shape
    return jnp.transpose(w, (2, 3, 1, 0)).reshape(kh * kw * cin, cout)


def prepare_params(params):
    """Pre-layout all weights ONCE (MXU-friendly matmul matrices) + constants."""
    wt, b_in = params["input_layer"]                    # (2dim, C, 4, 4), (C,)
    two_dim, C = wt.shape[0], wt.shape[1]
    w_in = jnp.transpose(wt, (0, 2, 3, 1)).reshape(two_dim, 16 * C)
    prog = []
    for (w1, b1, w2, b2) in params["progression"]:
        prog.append((_conv_w_to_taps(w1), b1.reshape(1, -1),
                     _conv_w_to_taps(w2), b2.reshape(1, -1)))
    to_rgb = {r: (w.reshape(1, -1), b.reshape(1, 1))
              for r, (w, b) in params["to_rgb"].items()}
    up_mats = {r: jnp.asarray(_up_matrix_padded(r)) for r in (4, 8, 16)}
    masks = {r: jnp.asarray(_interior_mask(r)) for r in (4, 8, 16, 32)}
    return dict(w_in=w_in, b_in=b_in.reshape(1, -1), progression=prog,
                to_rgb=to_rgb, up_mats=up_mats, masks=masks)


# ----------------------------------------------------------------------------
# the fused Pallas kernel (one pallas_call per step; grid over batch)
# ----------------------------------------------------------------------------
def _make_generator_kernel(step, alpha, dim, C):
    n_blocks = step + 1
    res = [4 * (2 ** k) for k in range(n_blocks)]
    rp = [r + 2 for r in res]
    use_blend = (step >= 2) and (0.0 <= alpha < 1.0)

    def conv3x3_pn_lrelu(buf, margin, rpk, w_ref, b_ref, mask_ref):
        # 3x3 / pad 1 conv as 9 shift-and-accumulate matmuls on the padded-flat
        # VMEM buffer, then bias + PixelNorm + LeakyReLU(0.1), then zero the
        # (garbage) border rows so they act as zero padding for the next conv.
        n = rpk * rpk
        acc = jnp.zeros((n, C), jnp.float32)
        for dh in range(3):
            for dw in range(3):
                off = (dh - 1) * rpk + (dw - 1)
                t = dh * 3 + dw
                acc = acc + jnp.dot(
                    buf[margin + off: margin + off + n, :],
                    w_ref[t * C:(t + 1) * C, :],
                    preferred_element_type=jnp.float32)
        acc = _leaky(_pixel_norm_lastdim(acc + b_ref[...]), 0.1)
        return jnp.where(mask_ref[...] > 0.0, acc, 0.0)

    def kernel(*refs):
        it = iter(refs)
        z_ref = next(it)
        e_ref = next(it)
        w_in_ref = next(it)
        b_in_ref = next(it)
        blocks = [tuple(next(it) for _ in range(4)) for _ in range(n_blocks)]
        ups = [next(it) for _ in range(step)]
        masks = [next(it) for _ in range(n_blocks)]
        w_rgb_ref = next(it)
        b_rgb_ref = next(it)
        if use_blend:
            w_rgbp_ref = next(it)
            b_rgbp_ref = next(it)
        out_ref = next(it)
        bufs = [next(it) for _ in range(n_blocks)]

        # ---- normalize(latent) / normalize(class embedding) + ConvTranspose 4x4 ----
        z = _l2norm_lastdim(z_ref[0])                       # (1, dim)
        e = _l2norm_lastdim(e_ref[0])                       # (1, dim)
        y = (jnp.dot(z, w_in_ref[0:dim, :], preferred_element_type=jnp.float32)
             + jnp.dot(e, w_in_ref[dim:2 * dim, :], preferred_element_type=jnp.float32))

        buf0 = bufs[0]
        rp0, m0 = rp[0], rp[0] + 1
        buf0[...] = jnp.zeros(buf0.shape, jnp.float32)
        for hw in range(16):                                # 4x4 spatial positions
            h, w = divmod(hw, 4)
            blk = _leaky(_pixel_norm_lastdim(
                y[:, hw * C:(hw + 1) * C] + b_in_ref[...]), 0.1)     # (1, C)
            r = m0 + (h + 1) * rp0 + (w + 1)
            buf0[r:r + 1, :] = blk

        # ---- progression blocks (4x4 .. 4*2^step) ----
        act = None
        act_prev = None
        for k in range(n_blocks):
            rpk = rp[k]
            n = rpk * rpk
            mk = rpk + 1
            buf = bufs[k]
            if k > 0:
                # fused 2x bilinear upsample (precomputed matrix, MXU)
                up = jnp.dot(ups[k - 1][...], act,
                             preferred_element_type=jnp.float32)     # (n, C)
                buf[mk:mk + n, :] = up
            w1, b1, w2, b2 = blocks[k]
            h1 = conv3x3_pn_lrelu(buf, mk, rpk, w1, b1, masks[k])
            buf[mk:mk + n, :] = h1
            act_new = conv3x3_pn_lrelu(buf, mk, rpk, w2, b2, masks[k])
            if k == n_blocks - 1:
                act_prev = act                          # stage output before last block
            act = act_new

        # ---- to_rgb (+ fade-in blend) + tanh, lane-dense (1, (R+2)^2) output ----
        rgb = lax.dot_general(w_rgb_ref[...], act, (((1,), (1,)), ((), ())),
                              preferred_element_type=jnp.float32) + b_rgb_ref[...]
        if use_blend:
            rgb_p = lax.dot_general(w_rgbp_ref[...], act_prev, (((1,), (1,)), ((), ())),
                                    preferred_element_type=jnp.float32) + b_rgbp_ref[...]
            skip = lax.dot_general(rgb_p, ups[step - 1][...], (((1,), (1,)), ((), ())),
                                   preferred_element_type=jnp.float32)
            rgb = (1.0 - alpha) * skip + alpha * rgb
        out_ref[0] = jnp.tanh(rgb)

    return kernel


def _pallas_forward(prep, z, emb, step, alpha):
    B, dim = z.shape
    C = prep["b_in"].shape[-1]
    n_blocks = step + 1
    res = [4 * (2 ** k) for k in range(n_blocks)]
    rp = [r + 2 for r in res]
    use_blend = (step >= 2) and (0.0 <= alpha < 1.0)

    inputs, in_specs = [], []

    def add_full(arr):
        arr = jnp.asarray(arr, jnp.float32)
        nd = arr.ndim
        inputs.append(arr)
        in_specs.append(pl.BlockSpec(arr.shape, lambda i, _nd=nd: (0,) * _nd))

    # per-sample inputs, one (1, 1, dim) block per grid step
    inputs.append(z.reshape(B, 1, dim).astype(jnp.float32))
    in_specs.append(pl.BlockSpec((1, 1, dim), lambda i: (i, 0, 0)))
    inputs.append(emb.reshape(B, 1, dim).astype(jnp.float32))
    in_specs.append(pl.BlockSpec((1, 1, dim), lambda i: (i, 0, 0)))

    add_full(prep["w_in"])
    add_full(prep["b_in"])
    for k in range(n_blocks):
        w1, b1, w2, b2 = prep["progression"][k]
        add_full(w1), add_full(b1), add_full(w2), add_full(b2)
    for k in range(1, n_blocks):
        add_full(prep["up_mats"][res[k - 1]])
    for k in range(n_blocks):
        add_full(prep["masks"][res[k]])
    w_rgb, b_rgb = prep["to_rgb"][res[-1]]
    add_full(w_rgb), add_full(b_rgb)
    if use_blend:
        w_rgbp, b_rgbp = prep["to_rgb"][res[-2]]
        add_full(w_rgbp), add_full(b_rgbp)

    n_last = rp[-1] * rp[-1]
    scratch = [pltpu.VMEM((rpk * rpk + 2 * (rpk + 1), C), jnp.float32) for rpk in rp]

    out = pl.pallas_call(
        _make_generator_kernel(step, alpha, dim, C),
        grid=(B,),
        in_specs=in_specs,
        out_specs=pl.BlockSpec((1, 1, n_last), lambda i: (i, 0, 0)),
        out_shape=jax.ShapeDtypeStruct((B, 1, n_last), jnp.float32),
        scratch_shapes=scratch,
        compiler_params=pltpu.CompilerParams(dimension_semantics=("parallel",)),
    )(*inputs)

    R = res[-1]
    img = out.reshape(B, rp[-1], rp[-1])[:, 1:R + 1, 1:R + 1]   # crop padded border (XLA)
    return img[:, None, :, :]                                    # (B, 1, R, R)


@partial(jax.jit, static_argnames=("step", "alpha"))
def _forward_pallas_jit(prep, embedding, z, label, step, alpha):
    emb = jnp.take(embedding, label, axis=0)                     # nn.Embedding lookup (XLA)
    return _pallas_forward(prep, z, emb, step, alpha)


def forward_pallas(params, prep, z, label, step=1, alpha=-1.0):
    step = int(min(max(int(step), 1), 3))
    return _forward_pallas_jit(prep, params["embedding"], z, label,
                               step=step, alpha=float(alpha))


# ----------------------------------------------------------------------------
# pure-JAX reference (mirrors the PyTorch module) for correctness checking
# ----------------------------------------------------------------------------
def _pixel_norm_nchw(x):
    return x * jax.lax.rsqrt(jnp.mean(x * x, axis=1, keepdims=True) + 1e-8)


def _conv3x3_ref(x, w, b):
    y = lax.conv_general_dilated(
        x, w, (1, 1), [(1, 1), (1, 1)],
        dimension_numbers=("NCHW", "OIHW", "NCHW"),
        precision=lax.Precision.HIGHEST)
    return y + b.reshape(1, -1, 1, 1)


def _block_ref(x, blk):
    w1, b1, w2, b2 = blk
    x = _leaky(_pixel_norm_nchw(_conv3x3_ref(x, w1, b1)), 0.1)
    x = _leaky(_pixel_norm_nchw(_conv3x3_ref(x, w2, b2)), 0.1)
    return x


def _up2x_axis(a, axis):
    n = a.shape[axis]
    first = lax.slice_in_dim(a, 0, 1, axis=axis)
    last = lax.slice_in_dim(a, n - 1, n, axis=axis)
    lo = jnp.concatenate([first, lax.slice_in_dim(a, 0, n - 1, axis=axis)], axis=axis)
    hi = jnp.concatenate([lax.slice_in_dim(a, 1, n, axis=axis), last], axis=axis)
    even = 0.25 * lo + 0.75 * a
    odd = 0.75 * a + 0.25 * hi
    out = jnp.stack([even, odd], axis=axis + 1)
    shape = list(a.shape)
    shape[axis] = 2 * n
    return out.reshape(shape)


def _up2x_ref(x):                    # bilinear 2x, align_corners=False, NCHW
    return _up2x_axis(_up2x_axis(x, 2), 3)


def _to_rgb_ref(x, w, b):            # w (1, C, 1, 1), b (1,)
    return jnp.einsum("bchw,oc->bohw", x, w[:, :, 0, 0],
                      precision=lax.Precision.HIGHEST) + b.reshape(1, -1, 1, 1)


def forward_ref(params, z, label, step=1, alpha=-1.0):
    step = int(min(max(int(step), 1), 3))
    emb = jnp.take(params["embedding"], label, axis=0)
    data = jnp.concatenate([_l2norm_lastdim(z), _l2norm_lastdim(emb)], axis=1)
    wt, b_in = params["input_layer"]
    out = jnp.einsum("bi,iohw->bohw", data, wt, precision=lax.Precision.HIGHEST)
    out = _leaky(_pixel_norm_nchw(out + b_in.reshape(1, -1, 1, 1)), 0.1)
    feats = [None]
    out = _block_ref(out, params["progression"][0])
    feats[0] = out
    for k in range(1, step + 1):
        out = _block_ref(_up2x_ref(out), params["progression"][k])
        feats.append(out)
    res_last = 4 * 2 ** step
    w_rgb, b_rgb = params["to_rgb"][res_last]
    rgb = _to_rgb_ref(feats[step], w_rgb, b_rgb)
    if step >= 2 and 0.0 <= alpha < 1.0:
        w_p, b_p = params["to_rgb"][res_last // 2]
        skip = _up2x_ref(_to_rgb_ref(feats[step - 1], w_p, b_p))
        rgb = (1.0 - alpha) * skip + alpha * rgb
    return jnp.tanh(rgb)


# ----------------------------------------------------------------------------
if __name__ == "__main__":
    root = jax.random.PRNGKey(0)
    k_par, k_z, k_lab = jax.random.split(root, 3)

    B, dim, C, n_cls = 2, 32, 32, 10
    params = init_params(k_par, input_code_dim=dim, in_channel=C, num_of_classes=n_cls)
    prep = prepare_params(params)                      # weight pre-layout done ONCE
    z = jax.random.normal(k_z, (B, dim), jnp.float32)
    label = jax.random.randint(k_lab, (B,), 0, n_cls)

    cases = [(1, -1.0, 8), (2, 0.5, 16), (3, 0.3, 32)]
    for step, alpha, r in cases:
        out = jax.block_until_ready(forward_pallas(params, prep, z, label, step, alpha))
        ref = jax.block_until_ready(forward_ref(params, z, label, step, alpha))
        assert out.shape == (B, 1, r, r), out.shape
        err = float(jnp.max(jnp.abs(out - ref)))
        assert jnp.allclose(out, ref, rtol=2e-3, atol=2e-3), (step, alpha, err)

    print("KERNEL_OK")
</pallas_src>

<mosaic_0001>
module attributes {stable_mosaic.version = 11 : i64} {
  func.func @kernel(%arg0: i32, %arg1: memref<1x1x32xf32, #tpu.memory_space<vmem>>, %arg2: memref<1x1x32xf32, #tpu.memory_space<vmem>>, %arg3: memref<64x512xf32, #tpu.memory_space<vmem>>, %arg4: memref<1x32xf32, #tpu.memory_space<vmem>>, %arg5: memref<288x32xf32, #tpu.memory_space<vmem>>, %arg6: memref<1x32xf32, #tpu.memory_space<vmem>>, %arg7: memref<288x32xf32, #tpu.memory_space<vmem>>, %arg8: memref<1x32xf32, #tpu.memory_space<vmem>>, %arg9: memref<288x32xf32, #tpu.memory_space<vmem>>, %arg10: memref<1x32xf32, #tpu.memory_space<vmem>>, %arg11: memref<288x32xf32, #tpu.memory_space<vmem>>, %arg12: memref<1x32xf32, #tpu.memory_space<vmem>>, %arg13: memref<100x36xf32, #tpu.memory_space<vmem>>, %arg14: memref<36x1xf32, #tpu.memory_space<vmem>>, %arg15: memref<100x1xf32, #tpu.memory_space<vmem>>, %arg16: memref<1x32xf32, #tpu.memory_space<vmem>>, %arg17: memref<1x1xf32, #tpu.memory_space<vmem>>, %arg18: memref<1x1x100xf32, #tpu.memory_space<vmem>>, %arg19: memref<50x32xf32, #tpu.memory_space<vmem>>, %arg20: memref<122x32xf32, #tpu.memory_space<vmem>>) attributes {dimension_semantics = [#tpu.dimension_semantics<parallel>], iteration_bounds = array<i64: 2>, scalar_prefetch = 0 : i64, scratch_operands = 2 : i64, tpu.core_type = #tpu.core_type<tc>, window_params = [{transform_indices = @transform_0, window_bounds = array<i64: 1, 1, 32>}, {transform_indices = @transform_1, window_bounds = array<i64: 1, 1, 32>}, {pipeline_mode = #tpu.pipeline_mode<synchronous>, transform_indices = @transform_2, window_bounds = array<i64: 64, 512>}, {pipeline_mode = #tpu.pipeline_mode<synchronous>, transform_indices = @transform_3, window_bounds = array<i64: 1, 32>}, {pipeline_mode = #tpu.pipeline_mode<synchronous>, transform_indices = @transform_4, window_bounds = array<i64: 288, 32>}, {pipeline_mode = #tpu.pipeline_mode<synchronous>, transform_indices = @transform_5, window_bounds = array<i64: 1, 32>}, {pipeline_mode = #tpu.pipeline_mode<synchronous>, transform_indices = @transform_6, window_bounds = array<i64: 288, 32>}, {pipeline_mode = #tpu.pipeline_mode<synchronous>, transform_indices = @transform_7, window_bounds = array<i64: 1, 32>}, {pipeline_mode = #tpu.pipeline_mode<synchronous>, transform_indices = @transform_8, window_bounds = array<i64: 288, 32>}, {pipeline_mode = #tpu.pipeline_mode<synchronous>, transform_indices = @transform_9, window_bounds = array<i64: 1, 32>}, {pipeline_mode = #tpu.pipeline_mode<synchronous>, transform_indices = @transform_10, window_bounds = array<i64: 288, 32>}, {pipeline_mode = #tpu.pipeline_mode<synchronous>, transform_indices = @transform_11, window_bounds = array<i64: 1, 32>}, {pipeline_mode = #tpu.pipeline_mode<synchronous>, transform_indices = @transform_12, window_bounds = array<i64: 100, 36>}, {pipeline_mode = #tpu.pipeline_mode<synchronous>, transform_indices = @transform_13, window_bounds = array<i64: 36, 1>}, {pipeline_mode = #tpu.pipeline_mode<synchronous>, transform_indices = @transform_14, window_bounds = array<i64: 100, 1>}, {pipeline_mode = #tpu.pipeline_mode<synchronous>, transform_indices = @transform_15, window_bounds = array<i64: 1, 32>}, {pipeline_mode = #tpu.pipeline_mode<synchronous>, transform_indices = @transform_16, window_bounds = array<i64: 1, 1>}, {transform_indices = @transform_17, window_bounds = array<i64: 1, 1, 100>}]} {
    %c0 = arith.constant 0 : index
    %c0_0 = arith.constant 0 : index
    %c0_1 = arith.constant 0 : index
    %0 = vector.load %arg1[%c0, %c0_0, %c0_1] : memref<1x1x32xf32, #tpu.memory_space<vmem>>, vector<1x1x32xf32>
    %1 = vector.shape_cast %0 : vector<1x1x32xf32> to vector<1x32xf32>
    %2 = arith.mulf %1, %1 : vector<1x32xf32>
    %cst = arith.constant dense<0.000000e+00> : vector<1xf32>
    %3 = vector.multi_reduction <add>, %2, %cst [1] : vector<1x32xf32> to vector<1xf32>
    %4 = vector.shape_cast %3 : vector<1xf32> to vector<1x1xf32>
    %5 = math.sqrt %4 : vector<1x1xf32>
    %cst_2 = arith.constant 9.99999996E-13 : f32
    %6 = vector.broadcast %cst_2 : f32 to vector<1x1xf32>
    %7 = arith.maximumf %5, %6 : vector<1x1xf32>
    %8 = vector.broadcast %7 : vector<1x1xf32> to vector<1x32xf32>
    %9 = arith.divf %1, %8 : vector<1x32xf32>
    %c0_3 = arith.constant 0 : index
    %c0_4 = arith.constant 0 : index
    %c0_5 = arith.constant 0 : index
    %10 = vector.load %arg2[%c0_3, %c0_4, %c0_5] : memref<1x1x32xf32, #tpu.memory_space<vmem>>, vector<1x1x32xf32>
    %11 = vector.shape_cast %10 : vector<1x1x32xf32> to vector<1x32xf32>
    %12 = arith.mulf %11, %11 : vector<1x32xf32>
    %cst_6 = arith.constant dense<0.000000e+00> : vector<1xf32>
    %13 = vector.multi_reduction <add>, %12, %cst_6 [1] : vector<1x32xf32> to vector<1xf32>
    %14 = vector.shape_cast %13 : vector<1xf32> to vector<1x1xf32>
    %15 = math.sqrt %14 : vector<1x1xf32>
    %cst_7 = arith.constant 9.99999996E-13 : f32
    %16 = vector.broadcast %cst_7 : f32 to vector<1x1xf32>
    %17 = arith.maximumf %15, %16 : vector<1x1xf32>
    %18 = vector.broadcast %17 : vector<1x1xf32> to vector<1x32xf32>
    %19 = arith.divf %11, %18 : vector<1x32xf32>
    %c0_8 = arith.constant 0 : index
    %c0_9 = arith.constant 0 : index
    %20 = vector.load %arg3[%c0_8, %c0_9] : memref<64x512xf32, #tpu.memory_space<vmem>>, vector<32x512xf32>
    %cst_10 = arith.constant dense<0.000000e+00> : vector<1x512xf32>
    %21 = tpu.matmul %9, %20, %cst_10 {dimension_numbers = #tpu.dot_dimension_numbers<[1], [0], [0], [1], [0, 0, 1, 1], [], []>} : vector<1x32xf32>, vector<32x512xf32>, vector<1x512xf32> -> vector<1x512xf32>
    %c32 = arith.constant 32 : index
    %c0_11 = arith.constant 0 : index
    %22 = vector.load %arg3[%c32, %c0_11] : memref<64x512xf32, #tpu.memory_space<vmem>>, vector<32x512xf32>
    %cst_12 = arith.constant dense<0.000000e+00> : vector<1x512xf32>
    %23 = tpu.matmul %19, %22, %cst_12 {dimension_numbers = #tpu.dot_dimension_numbers<[1], [0], [0], [1], [0, 0, 1, 1], [], []>} : vector<1x32xf32>, vector<32x512xf32>, vector<1x512xf32> -> vector<1x512xf32>
    %24 = arith.addf %21, %23 : vector<1x512xf32>
    %cst_13 = arith.constant 0.000000e+00 : f32
    %25 = vector.broadcast %cst_13 : f32 to vector<50x32xf32>
    %c0_14 = arith.constant 0 : index
    %c0_15 = arith.constant 0 : index
    %26 = vector.load %arg19[%c0_14, %c0_15] : memref<50x32xf32, #tpu.memory_space<vmem>>, vector<50x32xf32>
    tpu.vector_store %arg19[%c0_14, %c0_15], %25 {strides = array<i32>} : memref<50x32xf32, #tpu.memory_space<vmem>>, vector<50x32xf32>,
    %27 = vector.extract_strided_slice %24 {offsets = [0, 0], sizes = [1, 32], strides = [1, 1]} : vector<1x512xf32> to vector<1x32xf32>
    %c0_16 = arith.constant 0 : index
    %c0_17 = arith.constant 0 : index
    %28 = vector.load %arg4[%c0_16, %c0_17] : memref<1x32xf32, #tpu.memory_space<vmem>>, vector<1x32xf32>
    %29 = arith.addf %27, %28 : vector<1x32xf32>
    %30 = arith.mulf %29, %29 : vector<1x32xf32>
    %cst_18 = arith.constant dense<0.000000e+00> : vector<1xf32>
    %31 = vector.multi_reduction <add>, %30, %cst_18 [1] : vector<1x32xf32> to vector<1xf32>
    %32 = vector.shape_cast %31 : vector<1xf32> to vector<1x1xf32>
    %cst_19 = arith.constant 3.200000e+01 : f32
    %33 = vector.broadcast %cst_19 : f32 to vector<1x1xf32>
    %34 = arith.divf %32, %33 : vector<1x1xf32>
    %cst_20 = arith.constant 9.99999993E-9 : f32
    %35 = vector.broadcast %cst_20 : f32 to vector<1x1xf32>
    %36 = arith.addf %34, %35 : vector<1x1xf32>
    %37 = math.rsqrt %36 : vector<1x1xf32>
    %38 = vector.broadcast %37 : vector<1x1xf32> to vector<1x32xf32>
    %39 = arith.mulf %29, %38 : vector<1x32xf32>
    %cst_21 = arith.constant 0.000000e+00 : f32
    %40 = vector.broadcast %cst_21 : f32 to vector<1x32xf32>
    %41 = arith.cmpf oge, %39, %40 : vector<1x32xf32>
    %cst_22 = arith.constant 1.000000e-01 : f32
    %42 = vector.broadcast %cst_22 : f32 to vector<1x32xf32>
    %43 = arith.mulf %42, %39 : vector<1x32xf32>
    %44 = arith.select %41, %39, %43 : vector<1x32xi1>, vector<1x32xf32>
    %c14 = arith.constant 14 : index
    %c0_23 = arith.constant 0 : index
    %45 = vector.load %arg19[%c14, %c0_23] : memref<50x32xf32, #tpu.memory_space<vmem>>, vector<1x32xf32>
    tpu.vector_store %arg19[%c14, %c0_23], %44 {strides = array<i32>} : memref<50x32xf32, #tpu.memory_space<vmem>>, vector<1x32xf32>,
    %46 = vector.extract_strided_slice %24 {offsets = [0, 32], sizes = [1, 32], strides = [1, 1]} : vector<1x512xf32> to vector<1x32xf32>
    %c0_24 = arith.constant 0 : index
    %c0_25 = arith.constant 0 : index
    %47 = vector.load %arg4[%c0_24, %c0_25] : memref<1x32xf32, #tpu.memory_space<vmem>>, vector<1x32xf32>
    %48 = arith.addf %46, %47 : vector<1x32xf32>
    %49 = arith.mulf %48, %48 : vector<1x32xf32>
    %cst_26 = arith.constant dense<0.000000e+00> : vector<1xf32>
    %50 = vector.multi_reduction <add>, %49, %cst_26 [1] : vector<1x32xf32> to vector<1xf32>
    %51 = vector.shape_cast %50 : vector<1xf32> to vector<1x1xf32>
    %cst_27 = arith.constant 3.200000e+01 : f32
    %52 = vector.broadcast %cst_27 : f32 to vector<1x1xf32>
    %53 = arith.divf %51, %52 : vector<1x1xf32>
    %cst_28 = arith.constant 9.99999993E-9 : f32
    %54 = vector.broadcast %cst_28 : f32 to vector<1x1xf32>
    %55 = arith.addf %53, %54 : vector<1x1xf32>
    %56 = math.rsqrt %55 : vector<1x1xf32>
    %57 = vector.broadcast %56 : vector<1x1xf32> to vector<1x32xf32>
    %58 = arith.mulf %48, %57 : vector<1x32xf32>
    %cst_29 = arith.constant 0.000000e+00 : f32
    %59 = vector.broadcast %cst_29 : f32 to vector<1x32xf32>
    %60 = arith.cmpf oge, %58, %59 : vector<1x32xf32>
    %cst_30 = arith.constant 1.000000e-01 : f32
    %61 = vector.broadcast %cst_30 : f32 to vector<1x32xf32>
    %62 = arith.mulf %61, %58 : vector<1x32xf32>
    %63 = arith.select %60, %58, %62 : vector<1x32xi1>, vector<1x32xf32>
    %c15 = arith.constant 15 : index
    %c0_31 = arith.constant 0 : index
    %64 = vector.load %arg19[%c15, %c0_31] : memref<50x32xf32, #tpu.memory_space<vmem>>, vector<1x32xf32>
    tpu.vector_store %arg19[%c15, %c0_31], %63 {strides = array<i32>} : memref<50x32xf32, #tpu.memory_space<vmem>>, vector<1x32xf32>,
    %65 = vector.extract_strided_slice %24 {offsets = [0, 64], sizes = [1, 32], strides = [1, 1]} : vector<1x512xf32> to vector<1x32xf32>
    %c0_32 = arith.constant 0 : index
    %c0_33 = arith.constant 0 : index
    %66 = vector.load %arg4[%c0_32, %c0_33] : memref<1x32xf32, #tpu.memory_space<vmem>>, vector<1x32xf32>
    %67 = arith.addf %65, %66 : vector<1x32xf32>
    %68 = arith.mulf %67, %67 : vector<1x32xf32>
    %cst_34 = arith.constant dense<0.000000e+00> : vector<1xf32>
    %69 = vector.multi_reduction <add>, %68, %cst_34 [1] : vector<1x32xf32> to vector<1xf32>
    %70 = vector.shape_cast %69 : vector<1xf32> to vector<1x1xf32>
    %cst_35 = arith.constant 3.200000e+01 : f32
    %71 = vector.broadcast %cst_35 : f32 to vector<1x1xf32>
    %72 = arith.divf %70, %71 : vector<1x1xf32>
    %cst_36 = arith.constant 9.99999993E-9 : f32
    %73 = vector.broadcast %cst_36 : f32 to vector<1x1xf32>
    %74 = arith.addf %72, %73 : vector<1x1xf32>
    %75 = math.rsqrt %74 : vector<1x1xf32>
    %76 = vector.broadcast %75 : vector<1x1xf32> to vector<1x32xf32>
    %77 = arith.mulf %67, %76 : vector<1x32xf32>
    %cst_37 = arith.constant 0.000000e+00 : f32
    %78 = vector.broadcast %cst_37 : f32 to vector<1x32xf32>
    %79 = arith.cmpf oge, %77, %78 : vector<1x32xf32>
    %cst_38 = arith.constant 1.000000e-01 : f32
    %80 = vector.broadcast %cst_38 : f32 to vector<1x32xf32>
    %81 = arith.mulf %80, %77 : vector<1x32xf32>
    %82 = arith.select %79, %77, %81 : vector<1x32xi1>, vector<1x32xf32>
    %c16 = arith.constant 16 : index
    %c0_39 = arith.constant 0 : index
    %83 = vector.load %arg19[%c16, %c0_39] : memref<50x32xf32, #tpu.memory_space<vmem>>, vector<1x32xf32>
    tpu.vector_store %arg19[%c16, %c0_39], %82 {strides = array<i32>} : memref<50x32xf32, #tpu.memory_space<vmem>>, vector<1x32xf32>,
    %84 = vector.extract_strided_slice %24 {offsets = [0, 96], sizes = [1, 32], strides = [1, 1]} : vector<1x512xf32> to vector<1x32xf32>
    %c0_40 = arith.constant 0 : index
    %c0_41 = arith.constant 0 : index
    %85 = vector.load %arg4[%c0_40, %c0_41] : memref<1x32xf32, #tpu.memory_space<vmem>>, vector<1x32xf32>
    %86 = arith.addf %84, %85 : vector<1x32xf32>
    %87 = arith.mulf %86, %86 : vector<1x32xf32>
    %cst_42 = arith.constant dense<0.000000e+00> : vector<1xf32>
    %88 = vector.multi_reduction <add>, %87, %cst_42 [1] : vector<1x32xf32> to vector<1xf32>
    %89 = vector.shape_cast %88 : vector<1xf32> to vector<1x1xf32>
    %cst_43 = arith.constant 3.200000e+01 : f32
    %90 = vector.broadcast %cst_43 : f32 to vector<1x1xf32>
    %91 = arith.divf %89, %90 : vector<1x1xf32>
    %cst_44 = arith.constant 9.99999993E-9 : f32
    %92 = vector.broadcast %cst_44 : f32 to vector<1x1xf32>
    %93 = arith.addf %91, %92 : vector<1x1xf32>
    %94 = math.rsqrt %93 : vector<1x1xf32>
    %95 = vector.broadcast %94 : vector<1x1xf32> to vector<1x32xf32>
    %96 = arith.mulf %86, %95 : vector<1x32xf32>
    %cst_45 = arith.constant 0.000000e+00 : f32
    %97 = vector.broadcast %cst_45 : f32 to vector<1x32xf32>
    %98 = arith.cmpf oge, %96, %97 : vector<1x32xf32>
    %cst_46 = arith.constant 1.000000e-01 : f32
    %99 = vector.broadcast %cst_46 : f32 to vector<1x32xf32>
    %100 = arith.mulf %99, %96 : vector<1x32xf32>
    %101 = arith.select %98, %96, %100 : vector<1x32xi1>, vector<1x32xf32>
    %c17 = arith.constant 17 : index
    %c0_47 = arith.constant 0 : index
    %102 = vector.load %arg19[%c17, %c0_47] : memref<50x32xf32, #tpu.memory_space<vmem>>, vector<1x32xf32>
    tpu.vector_store %arg19[%c17, %c0_47], %101 {strides = array<i32>} : memref<50x32xf32, #tpu.memory_space<vmem>>, vector<1x32xf32>,
    %103 = vector.extract_strided_slice %24 {offsets = [0, 128], sizes = [1, 32], strides = [1, 1]} : vector<1x512xf32> to vector<1x32xf32>
    %c0_48 = arith.constant 0 : index
    %c0_49 = arith.constant 0 : index
    %104 = vector.load %arg4[%c0_48, %c0_49] : memref<1x32xf32, #tpu.memory_space<vmem>>, vector<1x32xf32>
    %105 = arith.addf %103, %104 : vector<1x32xf32>
    %106 = arith.mulf %105, %105 : vector<1x32xf32>
    %cst_50 = arith.constant dense<0.000000e+00> : vector<1xf32>
    %107 = vector.multi_reduction <add>, %106, %cst_50 [1] : vector<1x32xf32> to vector<1xf32>
    %108 = vector.shape_cast %107 : vector<1xf32> to vector<1x1xf32>
    %cst_51 = arith.constant 3.200000e+01 : f32
    %109 = vector.broadcast %cst_51 : f32 to vector<1x1xf32>
    %110 = arith.divf %108, %109 : vector<1x1xf32>
    %cst_52 = arith.constant 9.99999993E-9 : f32
    %111 = vector.broadcast %cst_52 : f32 to vector<1x1xf32>
    %112 = arith.addf %110, %111 : vector<1x1xf32>
    %113 = math.rsqrt %112 : vector<1x1xf32>
    %114 = vector.broadcast %113 : vector<1x1xf32> to vector<1x32xf32>
    %115 = arith.mulf %105, %114 : vector<1x32xf32>
    %cst_53 = arith.constant 0.000000e+00 : f32
    %116 = vector.broadcast %cst_53 : f32 to vector<1x32xf32>
    %117 = arith.cmpf oge, %115, %116 : vector<1x32xf32>
    %cst_54 = arith.constant 1.000000e-01 : f32
    %118 = vector.broadcast %cst_54 : f32 to vector<1x32xf32>
    %119 = arith.mulf %118, %115 : vector<1x32xf32>
    %120 = arith.select %117, %115, %119 : vector<1x32xi1>, vector<1x32xf32>
    %c20 = arith.constant 20 : index
    %c0_55 = arith.constant 0 : index
    %121 = vector.load %arg19[%c20, %c0_55] : memref<50x32xf32, #tpu.memory_space<vmem>>, vector<1x32xf32>
    tpu.vector_store %arg19[%c20, %c0_55], %120 {strides = array<i32>} : memref<50x32xf32, #tpu.memory_space<vmem>>, vector<1x32xf32>,
    %122 = vector.extract_strided_slice %24 {offsets = [0, 160], sizes = [1, 32], strides = [1, 1]} : vector<1x512xf32> to vector<1x32xf32>
    %c0_56 = arith.constant 0 : index
    %c0_57 = arith.constant 0 : index
    %123 = vector.load %arg4[%c0_56, %c0_57] : memref<1x32xf32, #tpu.memory_space<vmem>>, vector<1x32xf32>
    %124 = arith.addf %122, %123 : vector<1x32xf32>
    %125 = arith.mulf %124, %124 : vector<1x32xf32>
    %cst_58 = arith.constant dense<0.000000e+00> : vector<1xf32>
    %126 = vector.multi_reduction <add>, %125, %cst_58 [1] : vector<1x32xf32> to vector<1xf32>
    %127 = vector.shape_cast %126 : vector<1xf32> to vector<1x1xf32>
    %cst_59 = arith.constant 3.200000e+01 : f32
    %128 = vector.broadcast %cst_59 : f32 to vector<1x1xf32>
    %129 = arith.divf %127, %128 : vector<1x1xf32>
    %cst_60 = arith.constant 9.99999993E-9 : f32
    %130 = vector.broadcast %cst_60 : f32 to vector<1x1xf32>
    %131 = arith.addf %129, %130 : vector<1x1xf32>
    %132 = math.rsqrt %131 : vector<1x1xf32>
    %133 = vector.broadcast %132 : vector<1x1xf32> to vector<1x32xf32>
    %134 = arith.mulf %124, %133 : vector<1x32xf32>
    %cst_61 = arith.constant 0.000000e+00 : f32
    %135 = vector.broadcast %cst_61 : f32 to vector<1x32xf32>
    %136 = arith.cmpf oge, %134, %135 : vector<1x32xf32>
    %cst_62 = arith.constant 1.000000e-01 : f32
    %137 = vector.broadcast %cst_62 : f32 to vector<1x32xf32>
    %138 = arith.mulf %137, %134 : vector<1x32xf32>
    %139 = arith.select %136, %134, %138 : vector<1x32xi1>, vector<1x32xf32>
    %c21 = arith.constant 21 : index
    %c0_63 = arith.constant 0 : index
    %140 = vector.load %arg19[%c21, %c0_63] : memref<50x32xf32, #tpu.memory_space<vmem>>, vector<1x32xf32>
    tpu.vector_store %arg19[%c21, %c0_63], %139 {strides = array<i32>} : memref<50x32xf32, #tpu.memory_space<vmem>>, vector<1x32xf32>,
    %141 = vector.extract_strided_slice %24 {offsets = [0, 192], sizes = [1, 32], strides = [1, 1]} : vector<1x512xf32> to vector<1x32xf32>
    %c0_64 = arith.constant 0 : index
    %c0_65 = arith.constant 0 : index
    %142 = vector.load %arg4[%c0_64, %c0_65] : memref<1x32xf32, #tpu.memory_space<vmem>>, vector<1x32xf32>
    %143 = arith.addf %141, %142 : vector<1x32xf32>
    %144 = arith.mulf %143, %143 : vector<1x32xf32>
    %cst_66 = arith.constant dense<0.000000e+00> : vector<1xf32>
    %145 = vector.multi_reduction <add>, %144, %cst_66 [1] : vector<1x32xf32> to vector<1xf32>
    %146 = vector.shape_cast %145 : vector<1xf32> to vector<1x1xf32>
    %cst_67 = arith.constant 3.200000e+01 : f32
    %147 = vector.broadcast %cst_67 : f32 to vector<1x1xf32>
    %148 = arith.divf %146, %147 : vector<1x1xf32>
    %cst_68 = arith.constant 9.99999993E-9 : f32
    %149 = vector.broadcast %cst_68 : f32 to vector<1x1xf32>
    %150 = arith.addf %148, %149 : vector<1x1xf32>
    %151 = math.rsqrt %150 : vector<1x1xf32>
    %152 = vector.broadcast %151 : vector<1x1xf32> to vector<1x32xf32>
    %153 = arith.mulf %143, %152 : vector<1x32xf32>
    %cst_69 = arith.constant 0.000000e+00 : f32
    %154 = vector.broadcast %cst_69 : f32 to vector<1x32xf32>
    %155 = arith.cmpf oge, %153, %154 : vector<1x32xf32>
    %cst_70 = arith.constant 1.000000e-01 : f32
    %156 = vector.broadcast %cst_70 : f32 to vector<1x32xf32>
    %157 = arith.mulf %156, %153 : vector<1x32xf32>
    %158 = arith.select %155, %153, %157 : vector<1x32xi1>, vector<1x32xf32>
    %c22 = arith.constant 22 : index
    %c0_71 = arith.constant 0 : index
    %159 = vector.load %arg19[%c22, %c0_71] : memref<50x32xf32, #tpu.memory_space<vmem>>, vector<1x32xf32>
    tpu.vector_store %arg19[%c22, %c0_71], %158 {strides = array<i32>} : memref<50x32xf32, #tpu.memory_space<vmem>>, vector<1x32xf32>,
    %160 = vector.extract_strided_slice %24 {offsets = [0, 224], sizes = [1, 32], strides = [1, 1]} : vector<1x512xf32> to vector<1x32xf32>
    %c0_72 = arith.constant 0 : index
    %c0_73 = arith.constant 0 : index
    %161 = vector.load %arg4[%c0_72, %c0_73] : memref<1x32xf32, #tpu.memory_space<vmem>>, vector<1x32xf32>
    %162 = arith.addf %160, %161 : vector<1x32xf32>
    %163 = arith.mulf %162, %162 : vector<1x32xf32>
    %cst_74 = arith.constant dense<0.000000e+00> : vector<1xf32>
    %164 = vector.multi_reduction <add>, %163, %cst_74 [1] : vector<1x32xf32> to vector<1xf32>
    %165 = vector.shape_cast %164 : vector<1xf32> to vector<1x1xf32>
    %cst_75 = arith.constant 3.200000e+01 : f32
    %166 = vector.broadcast %cst_75 : f32 to vector<1x1xf32>
    %167 = arith.divf %165, %166 : vector<1x1xf32>
    %cst_76 = arith.constant 9.99999993E-9 : f32
    %168 = vector.broadcast %cst_76 : f32 to vector<1x1xf32>
    %169 = arith.addf %167, %168 : vector<1x1xf32>
    %170 = math.rsqrt %169 : vector<1x1xf32>
    %171 = vector.broadcast %170 : vector<1x1xf32> to vector<1x32xf32>
    %172 = arith.mulf %162, %171 : vector<1x32xf32>
    %cst_77 = arith.constant 0.000000e+00 : f32
    %173 = vector.broadcast %cst_77 : f32 to vector<1x32xf32>
    %174 = arith.cmpf oge, %172, %173 : vector<1x32xf32>
    %cst_78 = arith.constant 1.000000e-01 : f32
    %175 = vector.broadcast %cst_78 : f32 to vector<1x32xf32>
    %176 = arith.mulf %175, %172 : vector<1x32xf32>
    %177 = arith.select %174, %172, %176 : vector<1x32xi1>, vector<1x32xf32>
    %c23 = arith.constant 23 : index
    %c0_79 = arith.constant 0 : index
    %178 = vector.load %arg19[%c23, %c0_79] : memref<50x32xf32, #tpu.memory_space<vmem>>, vector<1x32xf32>
    tpu.vector_store %arg19[%c23, %c0_79], %177 {strides = array<i32>} : memref<50x32xf32, #tpu.memory_space<vmem>>, vector<1x32xf32>,
    %179 = vector.extract_strided_slice %24 {offsets = [0, 256], sizes = [1, 32], strides = [1, 1]} : vector<1x512xf32> to vector<1x32xf32>
    %c0_80 = arith.constant 0 : index
    %c0_81 = arith.constant 0 : index
    %180 = vector.load %arg4[%c0_80, %c0_81] : memref<1x32xf32, #tpu.memory_space<vmem>>, vector<1x32xf32>
    %181 = arith.addf %179, %180 : vector<1x32xf32>
    %182 = arith.mulf %181, %181 : vector<1x32xf32>
    %cst_82 = arith.constant dense<0.000000e+00> : vector<1xf32>
    %183 = vector.multi_reduction <add>, %182, %cst_82 [1] : vector<1x32xf32> to vector<1xf32>
    %184 = vector.shape_cast %183 : vector<1xf32> to vector<1x1xf32>
    %cst_83 = arith.constant 3.200000e+01 : f32
    %185 = vector.broadcast %cst_83 : f32 to vector<1x1xf32>
    %186 = arith.divf %184, %185 : vector<1x1xf32>
    %cst_84 = arith.constant 9.99999993E-9 : f32
    %187 = vector.broadcast %cst_84 : f32 to vector<1x1xf32>
    %188 = arith.addf %186, %187 : vector<1x1xf32>
    %189 = math.rsqrt %188 : vector<1x1xf32>
    %190 = vector.broadcast %189 : vector<1x1xf32> to vector<1x32xf32>
    %191 = arith.mulf %181, %190 : vector<1x32xf32>
    %cst_85 = arith.constant 0.000000e+00 : f32
    %192 = vector.broadcast %cst_85 : f32 to vector<1x32xf32>
    %193 = arith.cmpf oge, %191, %192 : vector<1x32xf32>
    %cst_86 = arith.constant 1.000000e-01 : f32
    %194 = vector.broadcast %cst_86 : f32 to vector<1x32xf32>
    %195 = arith.mulf %194, %191 : vector<1x32xf32>
    %196 = arith.select %193, %191, %195 : vector<1x32xi1>, vector<1x32xf32>
    %c26 = arith.constant 26 : index
    %c0_87 = arith.constant 0 : index
    %197 = vector.load %arg19[%c26, %c0_87] : memref<50x32xf32, #tpu.memory_space<vmem>>, vector<1x32xf32>
    tpu.vector_store %arg19[%c26, %c0_87], %196 {strides = array<i32>} : memref<50x32xf32, #tpu.memory_space<vmem>>, vector<1x32xf32>,
    %198 = vector.extract_strided_slice %24 {offsets = [0, 288], sizes = [1, 32], strides = [1, 1]} : vector<1x512xf32> to vector<1x32xf32>
    %c0_88 = arith.constant 0 : index
    %c0_89 = arith.constant 0 : index
    %199 = vector.load %arg4[%c0_88, %c0_89] : memref<1x32xf32, #tpu.memory_space<vmem>>, vector<1x32xf32>
    %200 = arith.addf %198, %199 : vector<1x32xf32>
    %201 = arith.mulf %200, %200 : vector<1x32xf32>
    %cst_90 = arith.constant dense<0.000000e+00> : vector<1xf32>
    %202 = vector.multi_reduction <add>, %201, %cst_90 [1] : vector<1x32xf32> to vector<1xf32>
    %203 = vector.shape_cast %202 : vector<1xf32> to vector<1x1xf32>
    %cst_91 = arith.constant 3.200000e+01 : f32
    %204 = vector.broadcast %cst_91 : f32 to vector<1x1xf32>
    %205 = arith.divf %203, %204 : vector<1x1xf32>
    %cst_92 = arith.constant 9.99999993E-9 : f32
    %206 = vector.broadcast %cst_92 : f32 to vector<1x1xf32>
    %207 = arith.addf %205, %206 : vector<1x1xf32>
    %208 = math.rsqrt %207 : vector<1x1xf32>
    %209 = vector.broadcast %208 : vector<1x1xf32> to vector<1x32xf32>
    %210 = arith.mulf %200, %209 : vector<1x32xf32>
    %cst_93 = arith.constant 0.000000e+00 : f32
    %211 = vector.broadcast %cst_93 : f32 to vector<1x32xf32>
    %212 = arith.cmpf oge, %210, %211 : vector<1x32xf32>
    %cst_94 = arith.constant 1.000000e-01 : f32
    %213 = vector.broadcast %cst_94 : f32 to vector<1x32xf32>
    %214 = arith.mulf %213, %210 : vector<1x32xf32>
    %215 = arith.select %212, %210, %214 : vector<1x32xi1>, vector<1x32xf32>
    %c27 = arith.constant 27 : index
    %c0_95 = arith.constant 0 : index
    %216 = vector.load %arg19[%c27, %c0_95] : memref<50x32xf32, #tpu.memory_space<vmem>>, vector<1x32xf32>
    tpu.vector_store %arg19[%c27, %c0_95], %215 {strides = array<i32>} : memref<50x32xf32, #tpu.memory_space<vmem>>, vector<1x32xf32>,
    %217 = vector.extract_strided_slice %24 {offsets = [0, 320], sizes = [1, 32], strides = [1, 1]} : vector<1x512xf32> to vector<1x32xf32>
    %c0_96 = arith.constant 0 : index
    %c0_97 = arith.constant 0 : index
    %218 = vector.load %arg4[%c0_96, %c0_97] : memref<1x32xf32, #tpu.memory_space<vmem>>, vector<1x32xf32>
    %219 = arith.addf %217, %218 : vector<1x32xf32>
    %220 = arith.mulf %219, %219 : vector<1x32xf32>
    %cst_98 = arith.constant dense<0.000000e+00> : vector<1xf32>
    %221 = vector.multi_reduction <add>, %220, %cst_98 [1] : vector<1x32xf32> to vector<1xf32>
    %222 = vector.shape_cast %221 : vector<1xf32> to vector<1x1xf32>
    %cst_99 = arith.constant 3.200000e+01 : f32
    %223 = vector.broadcast %cst_99 : f32 to vector<1x1xf32>
    %224 = arith.divf %222, %223 : vector<1x1xf32>
    %cst_100 = arith.constant 9.99999993E-9 : f32
    %225 = vector.broadcast %cst_100 : f32 to vector<1x1xf32>
    %226 = arith.addf %224, %225 : vector<1x1xf32>
    %227 = math.rsqrt %226 : vector<1x1xf32>
    %228 = vector.broadcast %227 : vector<1x1xf32> to vector<1x32xf32>
    %229 = arith.mulf %219, %228 : vector<1x32xf32>
    %cst_101 = arith.constant 0.000000e+00 : f32
    %230 = vector.broadcast %cst_101 : f32 to vector<1x32xf32>
    %231 = arith.cmpf oge, %229, %230 : vector<1x32xf32>
    %cst_102 = arith.constant 1.000000e-01 : f32
    %232 = vector.broadcast %cst_102 : f32 to vector<1x32xf32>
    %233 = arith.mulf %232, %229 : vector<1x32xf32>
    %234 = arith.select %231, %229, %233 : vector<1x32xi1>, vector<1x32xf32>
    %c28 = arith.constant 28 : index
    %c0_103 = arith.constant 0 : index
    %235 = vector.load %arg19[%c28, %c0_103] : memref<50x32xf32, #tpu.memory_space<vmem>>, vector<1x32xf32>
    tpu.vector_store %arg19[%c28, %c0_103], %234 {strides = array<i32>} : memref<50x32xf32, #tpu.memory_space<vmem>>, vector<1x32xf32>,
    %236 = vector.extract_strided_slice %24 {offsets = [0, 352], sizes = [1, 32], strides = [1, 1]} : vector<1x512xf32> to vector<1x32xf32>
    %c0_104 = arith.constant 0 : index
    %c0_105 = arith.constant 0 : index
    %237 = vector.load %arg4[%c0_104, %c0_105] : memref<1x32xf32, #tpu.memory_space<vmem>>, vector<1x32xf32>
    %238 = arith.addf %236, %237 : vector<1x32xf32>
    %239 = arith.mulf %238, %238 : vector<1x32xf32>
    %cst_106 = arith.constant dense<0.000000e+00> : vector<1xf32>
    %240 = vector.multi_reduction <add>, %239, %cst_106 [1] : vector<1x32xf32> to vector<1xf32>
    %241 = vector.shape_cast %240 : vector<1xf32> to vector<1x1xf32>
    %cst_107 = arith.constant 3.200000e+01 : f32
    %242 = vector.broadcast %cst_107 : f32 to vector<1x1xf32>
    %243 = arith.divf %241, %242 : vector<1x1xf32>
    %cst_108 = arith.constant 9.99999993E-9 : f32
    %244 = vector.broadcast %cst_108 : f32 to vector<1x1xf32>
    %245 = arith.addf %243, %244 : vector<1x1xf32>
    %246 = math.rsqrt %245 : vector<1x1xf32>
    %247 = vector.broadcast %246 : vector<1x1xf32> to vector<1x32xf32>
    %248 = arith.mulf %238, %247 : vector<1x32xf32>
    %cst_109 = arith.constant 0.000000e+00 : f32
    %249 = vector.broadcast %cst_109 : f32 to vector<1x32xf32>
    %250 = arith.cmpf oge, %248, %249 : vector<1x32xf32>
    %cst_110 = arith.constant 1.000000e-01 : f32
    %251 = vector.broadcast %cst_110 : f32 to vector<1x32xf32>
    %252 = arith.mulf %251, %248 : vector<1x32xf32>
    %253 = arith.select %250, %248, %252 : vector<1x32xi1>, vector<1x32xf32>
    %c29 = arith.constant 29 : index
    %c0_111 = arith.constant 0 : index
    %254 = vector.load %arg19[%c29, %c0_111] : memref<50x32xf32, #tpu.memory_space<vmem>>, vector<1x32xf32>
    tpu.vector_store %arg19[%c29, %c0_111], %253 {strides = array<i32>} : memref<50x32xf32, #tpu.memory_space<vmem>>, vector<1x32xf32>,
    %255 = vector.extract_strided_slice %24 {offsets = [0, 384], sizes = [1, 32], strides = [1, 1]} : vector<1x512xf32> to vector<1x32xf32>
    %c0_112 = arith.constant 0 : index
    %c0_113 = arith.constant 0 : index
    %256 = vector.load %arg4[%c0_112, %c0_113] : memref<1x32xf32, #tpu.memory_space<vmem>>, vector<1x32xf32>
    %257 = arith.addf %255, %256 : vector<1x32xf32>
    %258 = arith.mulf %257, %257 : vector<1x32xf32>
    %cst_114 = arith.constant dense<0.000000e+00> : vector<1xf32>
    %259 = vector.multi_reduction <add>, %258, %cst_114 [1] : vector<1x32xf32> to vector<1xf32>
    %260 = vector.shape_cast %259 : vector<1xf32> to vector<1x1xf32>
    %cst_115 = arith.constant 3.200000e+01 : f32
    %261 = vector.broadcast %cst_115 : f32 to vector<1x1xf32>
    %262 = arith.divf %260, %261 : vector<1x1xf32>
    %cst_116 = arith.constant 9.99999993E-9 : f32
    %263 = vector.broadcast %cst_116 : f32 to vector<1x1xf32>
    %264 = arith.addf %262, %263 : vector<1x1xf32>
    %265 = math.rsqrt %264 : vector<1x1xf32>
    %266 = vector.broadcast %265 : vector<1x1xf32> to vector<1x32xf32>
    %267 = arith.mulf %257, %266 : vector<1x32xf32>
    %cst_117 = arith.constant 0.000000e+00 : f32
    %268 = vector.broadcast %cst_117 : f32 to vector<1x32xf32>
    %269 = arith.cmpf oge, %267, %268 : vector<1x32xf32>
    %cst_118 = arith.constant 1.000000e-01 : f32
    %270 = vector.broadcast %cst_118 : f32 to vector<1x32xf32>
    %271 = arith.mulf %270, %267 : vector<1x32xf32>
    %272 = arith.select %269, %267, %271 : vector<1x32xi1>, vector<1x32xf32>
    %c32_119 = arith.constant 32 : index
    %c0_120 = arith.constant 0 : index
    %273 = vector.load %arg19[%c32_119, %c0_120] : memref<50x32xf32, #tpu.memory_space<vmem>>, vector<1x32xf32>
    tpu.vector_store %arg19[%c32_119, %c0_120], %272 {strides = array<i32>} : memref<50x32xf32, #tpu.memory_space<vmem>>, vector<1x32xf32>,
    %274 = vector.extract_strided_slice %24 {offsets = [0, 416], sizes = [1, 32], strides = [1, 1]} : vector<1x512xf32> to vector<1x32xf32>
    %c0_121 = arith.constant 0 : index
    %c0_122 = arith.constant 0 : index
    %275 = vector.load %arg4[%c0_121, %c0_122] : memref<1x32xf32, #tpu.memory_space<vmem>>, vector<1x32xf32>
    %276 = arith.addf %274, %275 : vector<1x32xf32>
    %277 = arith.mulf %276, %276 : vector<1x32xf32>
    %cst_123 = arith.constant dense<0.000000e+00> : vector<1xf32>
    %278 = vector.multi_reduction <add>, %277, %cst_123 [1] : vector<1x32xf32> to vector<1xf32>
    %279 = vector.shape_cast %278 : vector<1xf32> to vector<1x1xf32>
    %cst_124 = arith.constant 3.200000e+01 : f32
    %280 = vector.broadcast %cst_124 : f32 to vector<1x1xf32>
    %281 = arith.divf %279, %280 : vector<1x1xf32>
    %cst_125 = arith.constant 9.99999993E-9 : f32
    %282 = vector.broadcast %cst_125 : f32 to vector<1x1xf32>
    %283 = arith.addf %281, %282 : vector<1x1xf32>
    %284 = math.rsqrt %283 : vector<1x1xf32>
    %285 = vector.broadcast %284 : vector<1x1xf32> to vector<1x32xf32>
    %286 = arith.mulf %276, %285 : vector<1x32xf32>
    %cst_126 = arith.constant 0.000000e+00 : f32
    %287 = vector.broadcast %cst_126 : f32 to vector<1x32xf32>
    %288 = arith.cmpf oge, %286, %287 : vector<1x32xf32>
    %cst_127 = arith.constant 1.000000e-01 : f32
    %289 = vector.broadcast %cst_127 : f32 to vector<1x32xf32>
    %290 = arith.mulf %289, %286 : vector<1x32xf32>
    %291 = arith.select %288, %286, %290 : vector<1x32xi1>, vector<1x32xf32>
    %c33 = arith.constant 33 : index
    %c0_128 = arith.constant 0 : index
    %292 = vector.load %arg19[%c33, %c0_128] : memref<50x32xf32, #tpu.memory_space<vmem>>, vector<1x32xf32>
    tpu.vector_store %arg19[%c33, %c0_128], %291 {strides = array<i32>} : memref<50x32xf32, #tpu.memory_space<vmem>>, vector<1x32xf32>,
    %293 = vector.extract_strided_slice %24 {offsets = [0, 448], sizes = [1, 32], strides = [1, 1]} : vector<1x512xf32> to vector<1x32xf32>
    %c0_129 = arith.constant 0 : index
    %c0_130 = arith.constant 0 : index
    %294 = vector.load %arg4[%c0_129, %c0_130] : memref<1x32xf32, #tpu.memory_space<vmem>>, vector<1x32xf32>
    %295 = arith.addf %293, %294 : vector<1x32xf32>
    %296 = arith.mulf %295, %295 : vector<1x32xf32>
    %cst_131 = arith.constant dense<0.000000e+00> : vector<1xf32>
    %297 = vector.multi_reduction <add>, %296, %cst_131 [1] : vector<1x32xf32> to vector<1xf32>
    %298 = vector.shape_cast %297 : vector<1xf32> to vector<1x1xf32>
    %cst_132 = arith.constant 3.200000e+01 : f32
    %299 = vector.broadcast %cst_132 : f32 to vector<1x1xf32>
    %300 = arith.divf %298, %299 : vector<1x1xf32>
    %cst_133 = arith.constant 9.99999993E-9 : f32
    %301 = vector.broadcast %cst_133 : f32 to vector<1x1xf32>
    %302 = arith.addf %300, %301 : vector<1x1xf32>
    %303 = math.rsqrt %302 : vector<1x1xf32>
    %304 = vector.broadcast %303 : vector<1x1xf32> to vector<1x32xf32>
    %305 = arith.mulf %295, %304 : vector<1x32xf32>
    %cst_134 = arith.constant 0.000000e+00 : f32
    %306 = vector.broadcast %cst_134 : f32 to vector<1x32xf32>
    %307 = arith.cmpf oge, %305, %306 : vector<1x32xf32>
    %cst_135 = arith.constant 1.000000e-01 : f32
    %308 = vector.broadcast %cst_135 : f32 to vector<1x32xf32>
    %309 = arith.mulf %308, %305 : vector<1x32xf32>
    %310 = arith.select %307, %305, %309 : vector<1x32xi1>, vector<1x32xf32>
    %c34 = arith.constant 34 : index
    %c0_136 = arith.constant 0 : index
    %311 = vector.load %arg19[%c34, %c0_136] : memref<50x32xf32, #tpu.memory_space<vmem>>, vector<1x32xf32>
    tpu.vector_store %arg19[%c34, %c0_136], %310 {strides = array<i32>} : memref<50x32xf32, #tpu.memory_space<vmem>>, vector<1x32xf32>,
    %312 = vector.extract_strided_slice %24 {offsets = [0, 480], sizes = [1, 32], strides = [1, 1]} : vector<1x512xf32> to vector<1x32xf32>
    %c0_137 = arith.constant 0 : index
    %c0_138 = arith.constant 0 : index
    %313 = vector.load %arg4[%c0_137, %c0_138] : memref<1x32xf32, #tpu.memory_space<vmem>>, vector<1x32xf32>
    %314 = arith.addf %312, %313 : vector<1x32xf32>
    %315 = arith.mulf %314, %314 : vector<1x32xf32>
    %cst_139 = arith.constant dense<0.000000e+00> : vector<1xf32>
    %316 = vector.multi_reduction <add>, %315, %cst_139 [1] : vector<1x32xf32> to vector<1xf32>
    %317 = vector.shape_cast %316 : vector<1xf32> to vector<1x1xf32>
    %cst_140 = arith.constant 3.200000e+01 : f32
    %318 = vector.broadcast %cst_140 : f32 to vector<1x1xf32>
    %319 = arith.divf %317, %318 : vector<1x1xf32>
    %cst_141 = arith.constant 9.99999993E-9 : f32
    %320 = vector.broadcast %cst_141 : f32 to vector<1x1xf32>
    %321 = arith.addf %319, %320 : vector<1x1xf32>
    %322 = math.rsqrt %321 : vector<1x1xf32>
    %323 = vector.broadcast %322 : vector<1x1xf32> to vector<1x32xf32>
    %324 = arith.mulf %314, %323 : vector<1x32xf32>
    %cst_142 = arith.constant 0.000000e+00 : f32
    %325 = vector.broadcast %cst_142 : f32 to vector<1x32xf32>
    %326 = arith.cmpf oge, %324, %325 : vector<1x32xf32>
    %cst_143 = arith.constant 1.000000e-01 : f32
    %327 = vector.broadcast %cst_143 : f32 to vector<1x32xf32>
    %328 = arith.mulf %327, %324 : vector<1x32xf32>
    %329 = arith.select %326, %324, %328 : vector<1x32xi1>, vector<1x32xf32>
    %c35 = arith.constant 35 : index
    %c0_144 = arith.constant 0 : index
    %330 = vector.load %arg19[%c35, %c0_144] : memref<50x32xf32, #tpu.memory_space<vmem>>, vector<1x32xf32>
    tpu.vector_store %arg19[%c35, %c0_144], %329 {strides = array<i32>} : memref<50x32xf32, #tpu.memory_space<vmem>>, vector<1x32xf32>,
    %cst_145 = arith.constant 0.000000e+00 : f32
    %331 = vector.broadcast %cst_145 : f32 to vector<36x32xf32>
    %c0_146 = arith.constant 0 : index
    %c0_147 = arith.constant 0 : index
    %332 = vector.load %arg19[%c0_146, %c0_147] : memref<50x32xf32, #tpu.memory_space<vmem>>, vector<36x32xf32>
    %c0_148 = arith.constant 0 : index
    %c0_149 = arith.constant 0 : index
    %333 = vector.load %arg5[%c0_148, %c0_149] : memref<288x32xf32, #tpu.memory_space<vmem>>, vector<32x32xf32>
    %cst_150 = arith.constant dense<0.000000e+00> : vector<36x32xf32>
    %334 = tpu.matmul %332, %333, %cst_150 {dimension_numbers = #tpu.dot_dimension_numbers<[1], [0], [0], [1], [0, 0, 1, 1], [], []>} : vector<36x32xf32>, vector<32x32xf32>, vector<36x32xf32> -> vector<36x32xf32>
    %335 = arith.addf %331, %334 : vector<36x32xf32>
    %c1 = arith.constant 1 : index
    %c0_151 = arith.constant 0 : index
    %336 = vector.load %arg19[%c1, %c0_151] : memref<50x32xf32, #tpu.memory_space<vmem>>, vector<36x32xf32>
    %c32_152 = arith.constant 32 : index
    %c0_153 = arith.constant 0 : index
    %337 = vector.load %arg5[%c32_152, %c0_153] : memref<288x32xf32, #tpu.memory_space<vmem>>, vector<32x32xf32>
    %cst_154 = arith.constant dense<0.000000e+00> : vector<36x32xf32>
    %338 = tpu.matmul %336, %337, %cst_154 {dimension_numbers = #tpu.dot_dimension_numbers<[1], [0], [0], [1], [0, 0, 1, 1], [], []>} : vector<36x32xf32>, vector<32x32xf32>, vector<36x32xf32> -> vector<36x32xf32>
    %339 = arith.addf %335, %338 : vector<36x32xf32>
    %c2 = arith.constant 2 : index
    %c0_155 = arith.constant 0 : index
    %340 = vector.load %arg19[%c2, %c0_155] : memref<50x32xf32, #tpu.memory_space<vmem>>, vector<36x32xf32>
    %c64 = arith.constant 64 : index
    %c0_156 = arith.constant 0 : index
    %341 = vector.load %arg5[%c64, %c0_156] : memref<288x32xf32, #tpu.memory_space<vmem>>, vector<32x32xf32>
    %cst_157 = arith.constant dense<0.000000e+00> : vector<36x32xf32>
    %342 = tpu.matmul %340, %341, %cst_157 {dimension_numbers = #tpu.dot_dimension_numbers<[1], [0], [0], [1], [0, 0, 1, 1], [], []>} : vector<36x32xf32>, vector<32x32xf32>, vector<36x32xf32> -> vector<36x32xf32>
    %343 = arith.addf %339, %342 : vector<36x32xf32>
    %c6 = arith.constant 6 : index
    %c0_158 = arith.constant 0 : index
    %344 = vector.load %arg19[%c6, %c0_158] : memref<50x32xf32, #tpu.memory_space<vmem>>, vector<36x32xf32>
    %c96 = arith.constant 96 : index
    %c0_159 = arith.constant 0 : index
    %345 = vector.load %arg5[%c96, %c0_159] : memref<288x32xf32, #tpu.memory_space<vmem>>, vector<32x32xf32>
    %cst_160 = arith.constant dense<0.000000e+00> : vector<36x32xf32>
    %346 = tpu.matmul %344, %345, %cst_160 {dimension_numbers = #tpu.dot_dimension_numbers<[1], [0], [0], [1], [0, 0, 1, 1], [], []>} : vector<36x32xf32>, vector<32x32xf32>, vector<36x32xf32> -> vector<36x32xf32>
    %347 = arith.addf %343, %346 : vector<36x32xf32>
    %c7 = arith.constant 7 : index
    %c0_161 = arith.constant 0 : index
    %348 = vector.load %arg19[%c7, %c0_161] : memref<50x32xf32, #tpu.memory_space<vmem>>, vector<36x32xf32>
    %c128 = arith.constant 128 : index
    %c0_162 = arith.constant 0 : index
    %349 = vector.load %arg5[%c128, %c0_162] : memref<288x32xf32, #tpu.memory_space<vmem>>, vector<32x32xf32>
    %cst_163 = arith.constant dense<0.000000e+00> : vector<36x32xf32>
    %350 = tpu.matmul %348, %349, %cst_163 {dimension_numbers = #tpu.dot_dimension_numbers<[1], [0], [0], [1], [0, 0, 1, 1], [], []>} : vector<36x32xf32>, vector<32x32xf32>, vector<36x32xf32> -> vector<36x32xf32>
    %351 = arith.addf %347, %350 : vector<36x32xf32>
    %c8 = arith.constant 8 : index
    %c0_164 = arith.constant 0 : index
    %352 = vector.load %arg19[%c8, %c0_164] : memref<50x32xf32, #tpu.memory_space<vmem>>, vector<36x32xf32>
    %c160 = arith.constant 160 : index
    %c0_165 = arith.constant 0 : index
    %353 = vector.load %arg5[%c160, %c0_165] : memref<288x32xf32, #tpu.memory_space<vmem>>, vector<32x32xf32>
    %cst_166 = arith.constant dense<0.000000e+00> : vector<36x32xf32>
    %354 = tpu.matmul %352, %353, %cst_166 {dimension_numbers = #tpu.dot_dimension_numbers<[1], [0], [0], [1], [0, 0, 1, 1], [], []>} : vector<36x32xf32>, vector<32x32xf32>, vector<36x32xf32> -> vector<36x32xf32>
    %355 = arith.addf %351, %354 : vector<36x32xf32>
    %c12 = arith.constant 12 : index
    %c0_167 = arith.constant 0 : index
    %356 = vector.load %arg19[%c12, %c0_167] : memref<50x32xf32, #tpu.memory_space<vmem>>, vector<36x32xf32>
    %c192 = arith.constant 192 : index
    %c0_168 = arith.constant 0 : index
    %357 = vector.load %arg5[%c192, %c0_168] : memref<288x32xf32, #tpu.memory_space<vmem>>, vector<32x32xf32>
    %cst_169 = arith.constant dense<0.000000e+00> : vector<36x32xf32>
    %358 = tpu.matmul %356, %357, %cst_169 {dimension_numbers = #tpu.dot_dimension_numbers<[1], [0], [0], [1], [0, 0, 1, 1], [], []>} : vector<36x32xf32>, vector<32x32xf32>, vector<36x32xf32> -> vector<36x32xf32>
    %359 = arith.addf %355, %358 : vector<36x32xf32>
    %c13 = arith.constant 13 : index
    %c0_170 = arith.constant 0 : index
    %360 = vector.load %arg19[%c13, %c0_170] : memref<50x32xf32, #tpu.memory_space<vmem>>, vector<36x32xf32>
    %c224 = arith.constant 224 : index
    %c0_171 = arith.constant 0 : index
    %361 = vector.load %arg5[%c224, %c0_171] : memref<288x32xf32, #tpu.memory_space<vmem>>, vector<32x32xf32>
    %cst_172 = arith.constant dense<0.000000e+00> : vector<36x32xf32>
    %362 = tpu.matmul %360, %361, %cst_172 {dimension_numbers = #tpu.dot_dimension_numbers<[1], [0], [0], [1], [0, 0, 1, 1], [], []>} : vector<36x32xf32>, vector<32x32xf32>, vector<36x32xf32> -> vector<36x32xf32>
    %363 = arith.addf %359, %362 : vector<36x32xf32>
    %c14_173 = arith.constant 14 : index
    %c0_174 = arith.constant 0 : index
    %364 = vector.load %arg19[%c14_173, %c0_174] : memref<50x32xf32, #tpu.memory_space<vmem>>, vector<36x32xf32>
    %c256 = arith.constant 256 : index
    %c0_175 = arith.constant 0 : index
    %365 = vector.load %arg5[%c256, %c0_175] : memref<288x32xf32, #tpu.memory_space<vmem>>, vector<32x32xf32>
    %cst_176 = arith.constant dense<0.000000e+00> : vector<36x32xf32>
    %366 = tpu.matmul %364, %365, %cst_176 {dimension_numbers = #tpu.dot_dimension_numbers<[1], [0], [0], [1], [0, 0, 1, 1], [], []>} : vector<36x32xf32>, vector<32x32xf32>, vector<36x32xf32> -> vector<36x32xf32>
    %367 = arith.addf %363, %366 : vector<36x32xf32>
    %c0_177 = arith.constant 0 : index
    %c0_178 = arith.constant 0 : index
    %368 = vector.load %arg6[%c0_177, %c0_178] : memref<1x32xf32, #tpu.memory_space<vmem>>, vector<1x32xf32>
    %369 = vector.broadcast %368 : vector<1x32xf32> to vector<36x32xf32>
    %370 = arith.addf %367, %369 : vector<36x32xf32>
    %371 = arith.mulf %370, %370 : vector<36x32xf32>
    %cst_179 = arith.constant dense<0.000000e+00> : vector<36xf32>
    %372 = vector.multi_reduction <add>, %371, %cst_179 [1] : vector<36x32xf32> to vector<36xf32>
    %373 = vector.shape_cast %372 : vector<36xf32> to vector<36x1xf32>
    %cst_180 = arith.constant 3.200000e+01 : f32
    %374 = vector.broadcast %cst_180 : f32 to vector<36x1xf32>
    %375 = arith.divf %373, %374 : vector<36x1xf32>
    %cst_181 = arith.constant 9.99999993E-9 : f32
    %376 = vector.broadcast %cst_181 : f32 to vector<36x1xf32>
    %377 = arith.addf %375, %376 : vector<36x1xf32>
    %378 = math.rsqrt %377 : vector<36x1xf32>
    %379 = vector.broadcast %378 : vector<36x1xf32> to vector<36x32xf32>
    %380 = arith.mulf %370, %379 : vector<36x32xf32>
    %cst_182 = arith.constant 0.000000e+00 : f32
    %381 = vector.broadcast %cst_182 : f32 to vector<36x32xf32>
    %382 = arith.cmpf oge, %380, %381 : vector<36x32xf32>
    %cst_183 = arith.constant 1.000000e-01 : f32
    %383 = vector.broadcast %cst_183 : f32 to vector<36x32xf32>
    %384 = arith.mulf %383, %380 : vector<36x32xf32>
    %385 = arith.select %382, %380, %384 : vector<36x32xi1>, vector<36x32xf32>
    %c0_184 = arith.constant 0 : index
    %c0_185 = arith.constant 0 : index
    %386 = vector.load %arg14[%c0_184, %c0_185] : memref<36x1xf32, #tpu.memory_space<vmem>>, vector<36x1xf32>
    %cst_186 = arith.constant 0.000000e+00 : f32
    %387 = vector.broadcast %cst_186 : f32 to vector<36x1xf32>
    %388 = arith.cmpf ogt, %386, %387 : vector<36x1xf32>
    %cst_187 = arith.constant 0.000000e+00 : f32
    %389 = vector.shape_cast %388 : vector<36x1xi1> to vector<36x1xi1>
    %390 = vector.broadcast %389 : vector<36x1xi1> to vector<36x32xi1>
    %391 = vector.broadcast %cst_187 : f32 to vector<36x32xf32>
    %392 = arith.select %390, %385, %391 : vector<36x32xi1>, vector<36x32xf32>
    %c7_188 = arith.constant 7 : index
    %c0_189 = arith.constant 0 : index
    %393 = vector.load %arg19[%c7_188, %c0_189] : memref<50x32xf32, #tpu.memory_space<vmem>>, vector<36x32xf32>
    tpu.vector_store %arg19[%c7_188, %c0_189], %392 {strides = array<i32>} : memref<50x32xf32, #tpu.memory_space<vmem>>, vector<36x32xf32>,
    %cst_190 = arith.constant 0.000000e+00 : f32
    %394 = vector.broadcast %cst_190 : f32 to vector<36x32xf32>
    %c0_191 = arith.constant 0 : index
    %c0_192 = arith.constant 0 : index
    %395 = vector.load %arg19[%c0_191, %c0_192] : memref<50x32xf32, #tpu.memory_space<vmem>>, vector<36x32xf32>
    %c0_193 = arith.constant 0 : index
    %c0_194 = arith.constant 0 : index
    %396 = vector.load %arg7[%c0_193, %c0_194] : memref<288x32xf32, #tpu.memory_space<vmem>>, vector<32x32xf32>
    %cst_195 = arith.constant dense<0.000000e+00> : vector<36x32xf32>
    %397 = tpu.matmul %395, %396, %cst_195 {dimension_numbers = #tpu.dot_dimension_numbers<[1], [0], [0], [1], [0, 0, 1, 1], [], []>} : vector<36x32xf32>, vector<32x32xf32>, vector<36x32xf32> -> vector<36x32xf32>
    %398 = arith.addf %394, %397 : vector<36x32xf32>
    %c1_196 = arith.constant 1 : index
    %c0_197 = arith.constant 0 : index
    %399 = vector.load %arg19[%c1_196, %c0_197] : memref<50x32xf32, #tpu.memory_space<vmem>>, vector<36x32xf32>
    %c32_198 = arith.constant 32 : index
    %c0_199 = arith.constant 0 : index
    %400 = vector.load %arg7[%c32_198, %c0_199] : memref<288x32xf32, #tpu.memory_space<vmem>>, vector<32x32xf32>
    %cst_200 = arith.constant dense<0.000000e+00> : vector<36x32xf32>
    %401 = tpu.matmul %399, %400, %cst_200 {dimension_numbers = #tpu.dot_dimension_numbers<[1], [0], [0], [1], [0, 0, 1, 1], [], []>} : vector<36x32xf32>, vector<32x32xf32>, vector<36x32xf32> -> vector<36x32xf32>
    %402 = arith.addf %398, %401 : vector<36x32xf32>
    %c2_201 = arith.constant 2 : index
    %c0_202 = arith.constant 0 : index
    %403 = vector.load %arg19[%c2_201, %c0_202] : memref<50x32xf32, #tpu.memory_space<vmem>>, vector<36x32xf32>
    %c64_203 = arith.constant 64 : index
    %c0_204 = arith.constant 0 : index
    %404 = vector.load %arg7[%c64_203, %c0_204] : memref<288x32xf32, #tpu.memory_space<vmem>>, vector<32x32xf32>
    %cst_205 = arith.constant dense<0.000000e+00> : vector<36x32xf32>
    %405 = tpu.matmul %403, %404, %cst_205 {dimension_numbers = #tpu.dot_dimension_numbers<[1], [0], [0], [1], [0, 0, 1, 1], [], []>} : vector<36x32xf32>, vector<32x32xf32>, vector<36x32xf32> -> vector<36x32xf32>
    %406 = arith.addf %402, %405 : vector<36x32xf32>
    %c6_206 = arith.constant 6 : index
    %c0_207 = arith.constant 0 : index
    %407 = vector.load %arg19[%c6_206, %c0_207] : memref<50x32xf32, #tpu.memory_space<vmem>>, vector<36x32xf32>
    %c96_208 = arith.constant 96 : index
    %c0_209 = arith.constant 0 : index
    %408 = vector.load %arg7[%c96_208, %c0_209] : memref<288x32xf32, #tpu.memory_space<vmem>>, vector<32x32xf32>
    %cst_210 = arith.constant dense<0.000000e+00> : vector<36x32xf32>
    %409 = tpu.matmul %407, %408, %cst_210 {dimension_numbers = #tpu.dot_dimension_numbers<[1], [0], [0], [1], [0, 0, 1, 1], [], []>} : vector<36x32xf32>, vector<32x32xf32>, vector<36x32xf32> -> vector<36x32xf32>
    %410 = arith.addf %406, %409 : vector<36x32xf32>
    %c7_211 = arith.constant 7 : index
    %c0_212 = arith.constant 0 : index
    %411 = vector.load %arg19[%c7_211, %c0_212] : memref<50x32xf32, #tpu.memory_space<vmem>>, vector<36x32xf32>
    %c128_213 = arith.constant 128 : index
    %c0_214 = arith.constant 0 : index
    %412 = vector.load %arg7[%c128_213, %c0_214] : memref<288x32xf32, #tpu.memory_space<vmem>>, vector<32x32xf32>
    %cst_215 = arith.constant dense<0.000000e+00> : vector<36x32xf32>
    %413 = tpu.matmul %411, %412, %cst_215 {dimension_numbers = #tpu.dot_dimension_numbers<[1], [0], [0], [1], [0, 0, 1, 1], [], []>} : vector<36x32xf32>, vector<32x32xf32>, vector<36x32xf32> -> vector<36x32xf32>
    %414 = arith.addf %410, %413 : vector<36x32xf32>
    %c8_216 = arith.constant 8 : index
    %c0_217 = arith.constant 0 : index
    %415 = vector.load %arg19[%c8_216, %c0_217] : memref<50x32xf32, #tpu.memory_space<vmem>>, vector<36x32xf32>
    %c160_218 = arith.constant 160 : index
    %c0_219 = arith.constant 0 : index
    %416 = vector.load %arg7[%c160_218, %c0_219] : memref<288x32xf32, #tpu.memory_space<vmem>>, vector<32x32xf32>
    %cst_220 = arith.constant dense<0.000000e+00> : vector<36x32xf32>
    %417 = tpu.matmul %415, %416, %cst_220 {dimension_numbers = #tpu.dot_dimension_numbers<[1], [0], [0], [1], [0, 0, 1, 1], [], []>} : vector<36x32xf32>, vector<32x32xf32>, vector<36x32xf32> -> vector<36x32xf32>
    %418 = arith.addf %414, %417 : vector<36x32xf32>
    %c12_221 = arith.constant 12 : index
    %c0_222 = arith.constant 0 : index
    %419 = vector.load %arg19[%c12_221, %c0_222] : memref<50x32xf32, #tpu.memory_space<vmem>>, vector<36x32xf32>
    %c192_223 = arith.constant 192 : index
    %c0_224 = arith.constant 0 : index
    %420 = vector.load %arg7[%c192_223, %c0_224] : memref<288x32xf32, #tpu.memory_space<vmem>>, vector<32x32xf32>
    %cst_225 = arith.constant dense<0.000000e+00> : vector<36x32xf32>
    %421 = tpu.matmul %419, %420, %cst_225 {dimension_numbers = #tpu.dot_dimension_numbers<[1], [0], [0], [1], [0, 0, 1, 1], [], []>} : vector<36x32xf32>, vector<32x32xf32>, vector<36x32xf32> -> vector<36x32xf32>
    %422 = arith.addf %418, %421 : vector<36x32xf32>
    %c13_226 = arith.constant 13 : index
    %c0_227 = arith.constant 0 : index
    %423 = vector.load %arg19[%c13_226, %c0_227] : memref<50x32xf32, #tpu.memory_space<vmem>>, vector<36x32xf32>
    %c224_228 = arith.constant 224 : index
    %c0_229 = arith.constant 0 : index
    %424 = vector.load %arg7[%c224_228, %c0_229] : memref<288x32xf32, #tpu.memory_space<vmem>>, vector<32x32xf32>
    %cst_230 = arith.constant dense<0.000000e+00> : vector<36x32xf32>
    %425 = tpu.matmul %423, %424, %cst_230 {dimension_numbers = #tpu.dot_dimension_numbers<[1], [0], [0], [1], [0, 0, 1, 1], [], []>} : vector<36x32xf32>, vector<32x32xf32>, vector<36x32xf32> -> vector<36x32xf32>
    %426 = arith.addf %422, %425 : vector<36x32xf32>
    %c14_231 = arith.constant 14 : index
    %c0_232 = arith.constant 0 : index
    %427 = vector.load %arg19[%c14_231, %c0_232] : memref<50x32xf32, #tpu.memory_space<vmem>>, vector<36x32xf32>
    %c256_233 = arith.constant 256 : index
    %c0_234 = arith.constant 0 : index
    %428 = vector.load %arg7[%c256_233, %c0_234] : memref<288x32xf32, #tpu.memory_space<vmem>>, vector<32x32xf32>
    %cst_235 = arith.constant dense<0.000000e+00> : vector<36x32xf32>
    %429 = tpu.matmul %427, %428, %cst_235 {dimension_numbers = #tpu.dot_dimension_numbers<[1], [0], [0], [1], [0, 0, 1, 1], [], []>} : vector<36x32xf32>, vector<32x32xf32>, vector<36x32xf32> -> vector<36x32xf32>
    %430 = arith.addf %426, %429 : vector<36x32xf32>
    %c0_236 = arith.constant 0 : index
    %c0_237 = arith.constant 0 : index
    %431 = vector.load %arg8[%c0_236, %c0_237] : memref<1x32xf32, #tpu.memory_space<vmem>>, vector<1x32xf32>
    %432 = vector.broadcast %431 : vector<1x32xf32> to vector<36x32xf32>
    %433 = arith.addf %430, %432 : vector<36x32xf32>
    %434 = arith.mulf %433, %433 : vector<36x32xf32>
    %cst_238 = arith.constant dense<0.000000e+00> : vector<36xf32>
    %435 = vector.multi_reduction <add>, %434, %cst_238 [1] : vector<36x32xf32> to vector<36xf32>
    %436 = vector.shape_cast %435 : vector<36xf32> to vector<36x1xf32>
    %cst_239 = arith.constant 3.200000e+01 : f32
    %437 = vector.broadcast %cst_239 : f32 to vector<36x1xf32>
    %438 = arith.divf %436, %437 : vector<36x1xf32>
    %cst_240 = arith.constant 9.99999993E-9 : f32
    %439 = vector.broadcast %cst_240 : f32 to vector<36x1xf32>
    %440 = arith.addf %438, %439 : vector<36x1xf32>
    %441 = math.rsqrt %440 : vector<36x1xf32>
    %442 = vector.broadcast %441 : vector<36x1xf32> to vector<36x32xf32>
    %443 = arith.mulf %433, %442 : vector<36x32xf32>
    %cst_241 = arith.constant 0.000000e+00 : f32
    %444 = vector.broadcast %cst_241 : f32 to vector<36x32xf32>
    %445 = arith.cmpf oge, %443, %444 : vector<36x32xf32>
    %cst_242 = arith.constant 1.000000e-01 : f32
    %446 = vector.broadcast %cst_242 : f32 to vector<36x32xf32>
    %447 = arith.mulf %446, %443 : vector<36x32xf32>
    %448 = arith.select %445, %443, %447 : vector<36x32xi1>, vector<36x32xf32>
    %c0_243 = arith.constant 0 : index
    %c0_244 = arith.constant 0 : index
    %449 = vector.load %arg14[%c0_243, %c0_244] : memref<36x1xf32, #tpu.memory_space<vmem>>, vector<36x1xf32>
    %cst_245 = arith.constant 0.000000e+00 : f32
    %450 = vector.broadcast %cst_245 : f32 to vector<36x1xf32>
    %451 = arith.cmpf ogt, %449, %450 : vector<36x1xf32>
    %cst_246 = arith.constant 0.000000e+00 : f32
    %452 = vector.shape_cast %451 : vector<36x1xi1> to vector<36x1xi1>
    %453 = vector.broadcast %452 : vector<36x1xi1> to vector<36x32xi1>
    %454 = vector.broadcast %cst_246 : f32 to vector<36x32xf32>
    %455 = arith.select %453, %448, %454 : vector<36x32xi1>, vector<36x32xf32>
    %c0_247 = arith.constant 0 : index
    %c0_248 = arith.constant 0 : index
    %456 = vector.load %arg13[%c0_247, %c0_248] : memref<100x36xf32, #tpu.memory_space<vmem>>, vector<100x36xf32>
    %cst_249 = arith.constant dense<0.000000e+00> : vector<100x32xf32>
    %457 = tpu.matmul %456, %455, %cst_249 {dimension_numbers = #tpu.dot_dimension_numbers<[1], [0], [0], [1], [0, 0, 1, 1], [], []>} : vector<100x36xf32>, vector<36x32xf32>, vector<100x32xf32> -> vector<100x32xf32>
    %c11 = arith.constant 11 : index
    %c0_250 = arith.constant 0 : index
    %458 = vector.load %arg20[%c11, %c0_250] : memref<122x32xf32, #tpu.memory_space<vmem>>, vector<100x32xf32>
    tpu.vector_store %arg20[%c11, %c0_250], %457 {strides = array<i32>} : memref<122x32xf32, #tpu.memory_space<vmem>>, vector<100x32xf32>,
    %cst_251 = arith.constant 0.000000e+00 : f32
    %459 = vector.broadcast %cst_251 : f32 to vector<100x32xf32>
    %c0_252 = arith.constant 0 : index
    %c0_253 = arith.constant 0 : index
    %460 = vector.load %arg20[%c0_252, %c0_253] : memref<122x32xf32, #tpu.memory_space<vmem>>, vector<100x32xf32>
    %c0_254 = arith.constant 0 : index
    %c0_255 = arith.constant 0 : index
    %461 = vector.load %arg9[%c0_254, %c0_255] : memref<288x32xf32, #tpu.memory_space<vmem>>, vector<32x32xf32>
    %cst_256 = arith.constant dense<0.000000e+00> : vector<100x32xf32>
    %462 = tpu.matmul %460, %461, %cst_256 {dimension_numbers = #tpu.dot_dimension_numbers<[1], [0], [0], [1], [0, 0, 1, 1], [], []>} : vector<100x32xf32>, vector<32x32xf32>, vector<100x32xf32> -> vector<100x32xf32>
    %463 = arith.addf %459, %462 : vector<100x32xf32>
    %c1_257 = arith.constant 1 : index
    %c0_258 = arith.constant 0 : index
    %464 = vector.load %arg20[%c1_257, %c0_258] : memref<122x32xf32, #tpu.memory_space<vmem>>, vector<100x32xf32>
    %c32_259 = arith.constant 32 : index
    %c0_260 = arith.constant 0 : index
    %465 = vector.load %arg9[%c32_259, %c0_260] : memref<288x32xf32, #tpu.memory_space<vmem>>, vector<32x32xf32>
    %cst_261 = arith.constant dense<0.000000e+00> : vector<100x32xf32>
    %466 = tpu.matmul %464, %465, %cst_261 {dimension_numbers = #tpu.dot_dimension_numbers<[1], [0], [0], [1], [0, 0, 1, 1], [], []>} : vector<100x32xf32>, vector<32x32xf32>, vector<100x32xf32> -> vector<100x32xf32>
    %467 = arith.addf %463, %466 : vector<100x32xf32>
    %c2_262 = arith.constant 2 : index
    %c0_263 = arith.constant 0 : index
    %468 = vector.load %arg20[%c2_262, %c0_263] : memref<122x32xf32, #tpu.memory_space<vmem>>, vector<100x32xf32>
    %c64_264 = arith.constant 64 : index
    %c0_265 = arith.constant 0 : index
    %469 = vector.load %arg9[%c64_264, %c0_265] : memref<288x32xf32, #tpu.memory_space<vmem>>, vector<32x32xf32>
    %cst_266 = arith.constant dense<0.000000e+00> : vector<100x32xf32>
    %470 = tpu.matmul %468, %469, %cst_266 {dimension_numbers = #tpu.dot_dimension_numbers<[1], [0], [0], [1], [0, 0, 1, 1], [], []>} : vector<100x32xf32>, vector<32x32xf32>, vector<100x32xf32> -> vector<100x32xf32>
    %471 = arith.addf %467, %470 : vector<100x32xf32>
    %c10 = arith.constant 10 : index
    %c0_267 = arith.constant 0 : index
    %472 = vector.load %arg20[%c10, %c0_267] : memref<122x32xf32, #tpu.memory_space<vmem>>, vector<100x32xf32>
    %c96_268 = arith.constant 96 : index
    %c0_269 = arith.constant 0 : index
    %473 = vector.load %arg9[%c96_268, %c0_269] : memref<288x32xf32, #tpu.memory_space<vmem>>, vector<32x32xf32>
    %cst_270 = arith.constant dense<0.000000e+00> : vector<100x32xf32>
    %474 = tpu.matmul %472, %473, %cst_270 {dimension_numbers = #tpu.dot_dimension_numbers<[1], [0], [0], [1], [0, 0, 1, 1], [], []>} : vector<100x32xf32>, vector<32x32xf32>, vector<100x32xf32> -> vector<100x32xf32>
    %475 = arith.addf %471, %474 : vector<100x32xf32>
    %c11_271 = arith.constant 11 : index
    %c0_272 = arith.constant 0 : index
    %476 = vector.load %arg20[%c11_271, %c0_272] : memref<122x32xf32, #tpu.memory_space<vmem>>, vector<100x32xf32>
    %c128_273 = arith.constant 128 : index
    %c0_274 = arith.constant 0 : index
    %477 = vector.load %arg9[%c128_273, %c0_274] : memref<288x32xf32, #tpu.memory_space<vmem>>, vector<32x32xf32>
    %cst_275 = arith.constant dense<0.000000e+00> : vector<100x32xf32>
    %478 = tpu.matmul %476, %477, %cst_275 {dimension_numbers = #tpu.dot_dimension_numbers<[1], [0], [0], [1], [0, 0, 1, 1], [], []>} : vector<100x32xf32>, vector<32x32xf32>, vector<100x32xf32> -> vector<100x32xf32>
    %479 = arith.addf %475, %478 : vector<100x32xf32>
    %c12_276 = arith.constant 12 : index
    %c0_277 = arith.constant 0 : index
    %480 = vector.load %arg20[%c12_276, %c0_277] : memref<122x32xf32, #tpu.memory_space<vmem>>, vector<100x32xf32>
    %c160_278 = arith.constant 160 : index
    %c0_279 = arith.constant 0 : index
    %481 = vector.load %arg9[%c160_278, %c0_279] : memref<288x32xf32, #tpu.memory_space<vmem>>, vector<32x32xf32>
    %cst_280 = arith.constant dense<0.000000e+00> : vector<100x32xf32>
    %482 = tpu.matmul %480, %481, %cst_280 {dimension_numbers = #tpu.dot_dimension_numbers<[1], [0], [0], [1], [0, 0, 1, 1], [], []>} : vector<100x32xf32>, vector<32x32xf32>, vector<100x32xf32> -> vector<100x32xf32>
    %483 = arith.addf %479, %482 : vector<100x32xf32>
    %c20_281 = arith.constant 20 : index
    %c0_282 = arith.constant 0 : index
    %484 = vector.load %arg20[%c20_281, %c0_282] : memref<122x32xf32, #tpu.memory_space<vmem>>, vector<100x32xf32>
    %c192_283 = arith.constant 192 : index
    %c0_284 = arith.constant 0 : index
    %485 = vector.load %arg9[%c192_283, %c0_284] : memref<288x32xf32, #tpu.memory_space<vmem>>, vector<32x32xf32>
    %cst_285 = arith.constant dense<0.000000e+00> : vector<100x32xf32>
    %486 = tpu.matmul %484, %485, %cst_285 {dimension_numbers = #tpu.dot_dimension_numbers<[1], [0], [0], [1], [0, 0, 1, 1], [], []>} : vector<100x32xf32>, vector<32x32xf32>, vector<100x32xf32> -> vector<100x32xf32>
    %487 = arith.addf %483, %486 : vector<100x32xf32>
    %c21_286 = arith.constant 21 : index
    %c0_287 = arith.constant 0 : index
    %488 = vector.load %arg20[%c21_286, %c0_287] : memref<122x32xf32, #tpu.memory_space<vmem>>, vector<100x32xf32>
    %c224_288 = arith.constant 224 : index
    %c0_289 = arith.constant 0 : index
    %489 = vector.load %arg9[%c224_288, %c0_289] : memref<288x32xf32, #tpu.memory_space<vmem>>, vector<32x32xf32>
    %cst_290 = arith.constant dense<0.000000e+00> : vector<100x32xf32>
    %490 = tpu.matmul %488, %489, %cst_290 {dimension_numbers = #tpu.dot_dimension_numbers<[1], [0], [0], [1], [0, 0, 1, 1], [], []>} : vector<100x32xf32>, vector<32x32xf32>, vector<100x32xf32> -> vector<100x32xf32>
    %491 = arith.addf %487, %490 : vector<100x32xf32>
    %c22_291 = arith.constant 22 : index
    %c0_292 = arith.constant 0 : index
    %492 = vector.load %arg20[%c22_291, %c0_292] : memref<122x32xf32, #tpu.memory_space<vmem>>, vector<100x32xf32>
    %c256_293 = arith.constant 256 : index
    %c0_294 = arith.constant 0 : index
    %493 = vector.load %arg9[%c256_293, %c0_294] : memref<288x32xf32, #tpu.memory_space<vmem>>, vector<32x32xf32>
    %cst_295 = arith.constant dense<0.000000e+00> : vector<100x32xf32>
    %494 = tpu.matmul %492, %493, %cst_295 {dimension_numbers = #tpu.dot_dimension_numbers<[1], [0], [0], [1], [0, 0, 1, 1], [], []>} : vector<100x32xf32>, vector<32x32xf32>, vector<100x32xf32> -> vector<100x32xf32>
    %495 = arith.addf %491, %494 : vector<100x32xf32>
    %c0_296 = arith.constant 0 : index
    %c0_297 = arith.constant 0 : index
    %496 = vector.load %arg10[%c0_296, %c0_297] : memref<1x32xf32, #tpu.memory_space<vmem>>, vector<1x32xf32>
    %497 = vector.broadcast %496 : vector<1x32xf32> to vector<100x32xf32>
    %498 = arith.addf %495, %497 : vector<100x32xf32>
    %499 = arith.mulf %498, %498 : vector<100x32xf32>
    %cst_298 = arith.constant dense<0.000000e+00> : vector<100xf32>
    %500 = vector.multi_reduction <add>, %499, %cst_298 [1] : vector<100x32xf32> to vector<100xf32>
    %501 = vector.shape_cast %500 : vector<100xf32> to vector<100x1xf32>
    %cst_299 = arith.constant 3.200000e+01 : f32
    %502 = vector.broadcast %cst_299 : f32 to vector<100x1xf32>
    %503 = arith.divf %501, %502 : vector<100x1xf32>
    %cst_300 = arith.constant 9.99999993E-9 : f32
    %504 = vector.broadcast %cst_300 : f32 to vector<100x1xf32>
    %505 = arith.addf %503, %504 : vector<100x1xf32>
    %506 = math.rsqrt %505 : vector<100x1xf32>
    %507 = vector.broadcast %506 : vector<100x1xf32> to vector<100x32xf32>
    %508 = arith.mulf %498, %507 : vector<100x32xf32>
    %cst_301 = arith.constant 0.000000e+00 : f32
    %509 = vector.broadcast %cst_301 : f32 to vector<100x32xf32>
    %510 = arith.cmpf oge, %508, %509 : vector<100x32xf32>
    %cst_302 = arith.constant 1.000000e-01 : f32
    %511 = vector.broadcast %cst_302 : f32 to vector<100x32xf32>
    %512 = arith.mulf %511, %508 : vector<100x32xf32>
    %513 = arith.select %510, %508, %512 : vector<100x32xi1>, vector<100x32xf32>
    %c0_303 = arith.constant 0 : index
    %c0_304 = arith.constant 0 : index
    %514 = vector.load %arg15[%c0_303, %c0_304] : memref<100x1xf32, #tpu.memory_space<vmem>>, vector<100x1xf32>
    %cst_305 = arith.constant 0.000000e+00 : f32
    %515 = vector.broadcast %cst_305 : f32 to vector<100x1xf32>
    %516 = arith.cmpf ogt, %514, %515 : vector<100x1xf32>
    %cst_306 = arith.constant 0.000000e+00 : f32
    %517 = vector.shape_cast %516 : vector<100x1xi1> to vector<100x1xi1>
    %518 = vector.broadcast %517 : vector<100x1xi1> to vector<100x32xi1>
    %519 = vector.broadcast %cst_306 : f32 to vector<100x32xf32>
    %520 = arith.select %518, %513, %519 : vector<100x32xi1>, vector<100x32xf32>
    %c11_307 = arith.constant 11 : index
    %c0_308 = arith.constant 0 : index
    %521 = vector.load %arg20[%c11_307, %c0_308] : memref<122x32xf32, #tpu.memory_space<vmem>>, vector<100x32xf32>
    tpu.vector_store %arg20[%c11_307, %c0_308], %520 {strides = array<i32>} : memref<122x32xf32, #tpu.memory_space<vmem>>, vector<100x32xf32>,
    %cst_309 = arith.constant 0.000000e+00 : f32
    %522 = vector.broadcast %cst_309 : f32 to vector<100x32xf32>
    %c0_310 = arith.constant 0 : index
    %c0_311 = arith.constant 0 : index
    %523 = vector.load %arg20[%c0_310, %c0_311] : memref<122x32xf32, #tpu.memory_space<vmem>>, vector<100x32xf32>
    %c0_312 = arith.constant 0 : index
    %c0_313 = arith.constant 0 : index
    %524 = vector.load %arg11[%c0_312, %c0_313] : memref<288x32xf32, #tpu.memory_space<vmem>>, vector<32x32xf32>
    %cst_314 = arith.constant dense<0.000000e+00> : vector<100x32xf32>
    %525 = tpu.matmul %523, %524, %cst_314 {dimension_numbers = #tpu.dot_dimension_numbers<[1], [0], [0], [1], [0, 0, 1, 1], [], []>} : vector<100x32xf32>, vector<32x32xf32>, vector<100x32xf32> -> vector<100x32xf32>
    %526 = arith.addf %522, %525 : vector<100x32xf32>
    %c1_315 = arith.constant 1 : index
    %c0_316 = arith.constant 0 : index
    %527 = vector.load %arg20[%c1_315, %c0_316] : memref<122x32xf32, #tpu.memory_space<vmem>>, vector<100x32xf32>
    %c32_317 = arith.constant 32 : index
    %c0_318 = arith.constant 0 : index
    %528 = vector.load %arg11[%c32_317, %c0_318] : memref<288x32xf32, #tpu.memory_space<vmem>>, vector<32x32xf32>
    %cst_319 = arith.constant dense<0.000000e+00> : vector<100x32xf32>
    %529 = tpu.matmul %527, %528, %cst_319 {dimension_numbers = #tpu.dot_dimension_numbers<[1], [0], [0], [1], [0, 0, 1, 1], [], []>} : vector<100x32xf32>, vector<32x32xf32>, vector<100x32xf32> -> vector<100x32xf32>
    %530 = arith.addf %526, %529 : vector<100x32xf32>
    %c2_320 = arith.constant 2 : index
    %c0_321 = arith.constant 0 : index
    %531 = vector.load %arg20[%c2_320, %c0_321] : memref<122x32xf32, #tpu.memory_space<vmem>>, vector<100x32xf32>
    %c64_322 = arith.constant 64 : index
    %c0_323 = arith.constant 0 : index
    %532 = vector.load %arg11[%c64_322, %c0_323] : memref<288x32xf32, #tpu.memory_space<vmem>>, vector<32x32xf32>
    %cst_324 = arith.constant dense<0.000000e+00> : vector<100x32xf32>
    %533 = tpu.matmul %531, %532, %cst_324 {dimension_numbers = #tpu.dot_dimension_numbers<[1], [0], [0], [1], [0, 0, 1, 1], [], []>} : vector<100x32xf32>, vector<32x32xf32>, vector<100x32xf32> -> vector<100x32xf32>
    %534 = arith.addf %530, %533 : vector<100x32xf32>
    %c10_325 = arith.constant 10 : index
    %c0_326 = arith.constant 0 : index
    %535 = vector.load %arg20[%c10_325, %c0_326] : memref<122x32xf32, #tpu.memory_space<vmem>>, vector<100x32xf32>
    %c96_327 = arith.constant 96 : index
    %c0_328 = arith.constant 0 : index
    %536 = vector.load %arg11[%c96_327, %c0_328] : memref<288x32xf32, #tpu.memory_space<vmem>>, vector<32x32xf32>
    %cst_329 = arith.constant dense<0.000000e+00> : vector<100x32xf32>
    %537 = tpu.matmul %535, %536, %cst_329 {dimension_numbers = #tpu.dot_dimension_numbers<[1], [0], [0], [1], [0, 0, 1, 1], [], []>} : vector<100x32xf32>, vector<32x32xf32>, vector<100x32xf32> -> vector<100x32xf32>
    %538 = arith.addf %534, %537 : vector<100x32xf32>
    %c11_330 = arith.constant 11 : index
    %c0_331 = arith.constant 0 : index
    %539 = vector.load %arg20[%c11_330, %c0_331] : memref<122x32xf32, #tpu.memory_space<vmem>>, vector<100x32xf32>
    %c128_332 = arith.constant 128 : index
    %c0_333 = arith.constant 0 : index
    %540 = vector.load %arg11[%c128_332, %c0_333] : memref<288x32xf32, #tpu.memory_space<vmem>>, vector<32x32xf32>
    %cst_334 = arith.constant dense<0.000000e+00> : vector<100x32xf32>
    %541 = tpu.matmul %539, %540, %cst_334 {dimension_numbers = #tpu.dot_dimension_numbers<[1], [0], [0], [1], [0, 0, 1, 1], [], []>} : vector<100x32xf32>, vector<32x32xf32>, vector<100x32xf32> -> vector<100x32xf32>
    %542 = arith.addf %538, %541 : vector<100x32xf32>
    %c12_335 = arith.constant 12 : index
    %c0_336 = arith.constant 0 : index
    %543 = vector.load %arg20[%c12_335, %c0_336] : memref<122x32xf32, #tpu.memory_space<vmem>>, vector<100x32xf32>
    %c160_337 = arith.constant 160 : index
    %c0_338 = arith.constant 0 : index
    %544 = vector.load %arg11[%c160_337, %c0_338] : memref<288x32xf32, #tpu.memory_space<vmem>>, vector<32x32xf32>
    %cst_339 = arith.constant dense<0.000000e+00> : vector<100x32xf32>
    %545 = tpu.matmul %543, %544, %cst_339 {dimension_numbers = #tpu.dot_dimension_numbers<[1], [0], [0], [1], [0, 0, 1, 1], [], []>} : vector<100x32xf32>, vector<32x32xf32>, vector<100x32xf32> -> vector<100x32xf32>
    %546 = arith.addf %542, %545 : vector<100x32xf32>
    %c20_340 = arith.constant 20 : index
    %c0_341 = arith.constant 0 : index
    %547 = vector.load %arg20[%c20_340, %c0_341] : memref<122x32xf32, #tpu.memory_space<vmem>>, vector<100x32xf32>
    %c192_342 = arith.constant 192 : index
    %c0_343 = arith.constant 0 : index
    %548 = vector.load %arg11[%c192_342, %c0_343] : memref<288x32xf32, #tpu.memory_space<vmem>>, vector<32x32xf32>
    %cst_344 = arith.constant dense<0.000000e+00> : vector<100x32xf32>
    %549 = tpu.matmul %547, %548, %cst_344 {dimension_numbers = #tpu.dot_dimension_numbers<[1], [0], [0], [1], [0, 0, 1, 1], [], []>} : vector<100x32xf32>, vector<32x32xf32>, vector<100x32xf32> -> vector<100x32xf32>
    %550 = arith.addf %546, %549 : vector<100x32xf32>
    %c21_345 = arith.constant 21 : index
    %c0_346 = arith.constant 0 : index
    %551 = vector.load %arg20[%c21_345, %c0_346] : memref<122x32xf32, #tpu.memory_space<vmem>>, vector<100x32xf32>
    %c224_347 = arith.constant 224 : index
    %c0_348 = arith.constant 0 : index
    %552 = vector.load %arg11[%c224_347, %c0_348] : memref<288x32xf32, #tpu.memory_space<vmem>>, vector<32x32xf32>
    %cst_349 = arith.constant dense<0.000000e+00> : vector<100x32xf32>
    %553 = tpu.matmul %551, %552, %cst_349 {dimension_numbers = #tpu.dot_dimension_numbers<[1], [0], [0], [1], [0, 0, 1, 1], [], []>} : vector<100x32xf32>, vector<32x32xf32>, vector<100x32xf32> -> vector<100x32xf32>
    %554 = arith.addf %550, %553 : vector<100x32xf32>
    %c22_350 = arith.constant 22 : index
    %c0_351 = arith.constant 0 : index
    %555 = vector.load %arg20[%c22_350, %c0_351] : memref<122x32xf32, #tpu.memory_space<vmem>>, vector<100x32xf32>
    %c256_352 = arith.constant 256 : index
    %c0_353 = arith.constant 0 : index
    %556 = vector.load %arg11[%c256_352, %c0_353] : memref<288x32xf32, #tpu.memory_space<vmem>>, vector<32x32xf32>
    %cst_354 = arith.constant dense<0.000000e+00> : vector<100x32xf32>
    %557 = tpu.matmul %555, %556, %cst_354 {dimension_numbers = #tpu.dot_dimension_numbers<[1], [0], [0], [1], [0, 0, 1, 1], [], []>} : vector<100x32xf32>, vector<32x32xf32>, vector<100x32xf32> -> vector<100x32xf32>
    %558 = arith.addf %554, %557 : vector<100x32xf32>
    %c0_355 = arith.constant 0 : index
    %c0_356 = arith.constant 0 : index
    %559 = vector.load %arg12[%c0_355, %c0_356] : memref<1x32xf32, #tpu.memory_space<vmem>>, vector<1x32xf32>
    %560 = vector.broadcast %559 : vector<1x32xf32> to vector<100x32xf32>
    %561 = arith.addf %558, %560 : vector<100x32xf32>
    %562 = arith.mulf %561, %561 : vector<100x32xf32>
    %cst_357 = arith.constant dense<0.000000e+00> : vector<100xf32>
    %563 = vector.multi_reduction <add>, %562, %cst_357 [1] : vector<100x32xf32> to vector<100xf32>
    %564 = vector.shape_cast %563 : vector<100xf32> to vector<100x1xf32>
    %cst_358 = arith.constant 3.200000e+01 : f32
    %565 = vector.broadcast %cst_358 : f32 to vector<100x1xf32>
    %566 = arith.divf %564, %565 : vector<100x1xf32>
    %cst_359 = arith.constant 9.99999993E-9 : f32
    %567 = vector.broadcast %cst_359 : f32 to vector<100x1xf32>
    %568 = arith.addf %566, %567 : vector<100x1xf32>
    %569 = math.rsqrt %568 : vector<100x1xf32>
    %570 = vector.broadcast %569 : vector<100x1xf32> to vector<100x32xf32>
    %571 = arith.mulf %561, %570 : vector<100x32xf32>
    %cst_360 = arith.constant 0.000000e+00 : f32
    %572 = vector.broadcast %cst_360 : f32 to vector<100x32xf32>
    %573 = arith.cmpf oge, %571, %572 : vector<100x32xf32>
    %cst_361 = arith.constant 1.000000e-01 : f32
    %574 = vector.broadcast %cst_361 : f32 to vector<100x32xf32>
    %575 = arith.mulf %574, %571 : vector<100x32xf32>
    %576 = arith.select %573, %571, %575 : vector<100x32xi1>, vector<100x32xf32>
    %c0_362 = arith.constant 0 : index
    %c0_363 = arith.constant 0 : index
    %577 = vector.load %arg15[%c0_362, %c0_363] : memref<100x1xf32, #tpu.memory_space<vmem>>, vector<100x1xf32>
    %cst_364 = arith.constant 0.000000e+00 : f32
    %578 = vector.broadcast %cst_364 : f32 to vector<100x1xf32>
    %579 = arith.cmpf ogt, %577, %578 : vector<100x1xf32>
    %cst_365 = arith.constant 0.000000e+00 : f32
    %580 = vector.shape_cast %579 : vector<100x1xi1> to vector<100x1xi1>
    %581 = vector.broadcast %580 : vector<100x1xi1> to vector<100x32xi1>
    %582 = vector.broadcast %cst_365 : f32 to vector<100x32xf32>
    %583 = arith.select %581, %576, %582 : vector<100x32xi1>, vector<100x32xf32>
    %c0_366 = arith.constant 0 : index
    %c0_367 = arith.constant 0 : index
    %584 = vector.load %arg16[%c0_366, %c0_367] : memref<1x32xf32, #tpu.memory_space<vmem>>, vector<1x32xf32>
    %cst_368 = arith.constant dense<0.000000e+00> : vector<1x100xf32>
    %585 = tpu.matmul %584, %583, %cst_368 {dimension_numbers = #tpu.dot_dimension_numbers<[1], [1], [0], [0], [0, 0, 1, 0], [], []>} : vector<1x32xf32>, vector<100x32xf32>, vector<1x100xf32> -> vector<1x100xf32>
    %c0_369 = arith.constant 0 : index
    %c0_370 = arith.constant 0 : index
    %586 = vector.load %arg17[%c0_369, %c0_370] : memref<1x1xf32, #tpu.memory_space<vmem>>, vector<1x1xf32>
    %587 = vector.broadcast %586 : vector<1x1xf32> to vector<1x100xf32>
    %588 = arith.addf %585, %587 : vector<1x100xf32>
    %589 = math.tanh %588 : vector<1x100xf32>
    %c0_371 = arith.constant 0 : index
    %c0_372 = arith.constant 0 : index
    %c0_373 = arith.constant 0 : index
    %590 = vector.load %arg18[%c0_371, %c0_372, %c0_373] : memref<1x1x100xf32, #tpu.memory_space<vmem>>, vector<1x1x100xf32>
    %591 = vector.shape_cast %590 : vector<1x1x100xf32> to vector<1x100xf32>
    %592 = vector.shape_cast %589 : vector<1x100xf32> to vector<1x1x100xf32>
    tpu.vector_store %arg18[%c0_371, %c0_372, %c0_373], %592 {strides = array<i32>} : memref<1x1x100xf32, #tpu.memory_space<vmem>>, vector<1x1x100xf32>,
    return
  }
  func.func @transform_0(%arg0: i32) -> (i32, i32, i32) {
    %c0_i32 = arith.constant 0 : i32
    %c0_i32_0 = arith.constant 0 : i32
    %c0_i32_1 = arith.constant 0 : i32
    return %arg0, %c0_i32, %c0_i32_0 : i32, i32, i32
  }
  func.func @transform_1(%arg0: i32) -> (i32, i32, i32) {
    %c0_i32 = arith.constant 0 : i32
    %c0_i32_0 = arith.constant 0 : i32
    %c0_i32_1 = arith.constant 0 : i32
    return %arg0, %c0_i32, %c0_i32_0 : i32, i32, i32
  }
  func.func @transform_2(%arg0: i32) -> (i32, i32) {
    %c0_i32 = arith.constant 0 : i32
    %c0_i32_0 = arith.constant 0 : i32
    %c0_i32_1 = arith.constant 0 : i32
    return %c0_i32, %c0_i32_0 : i32, i32
  }
  func.func @transform_3(%arg0: i32) -> (i32, i32) {
    %c0_i32 = arith.constant 0 : i32
    %c0_i32_0 = arith.constant 0 : i32
    %c0_i32_1 = arith.constant 0 : i32
    return %c0_i32, %c0_i32_0 : i32, i32
  }
  func.func @transform_4(%arg0: i32) -> (i32, i32) {
    %c0_i32 = arith.constant 0 : i32
    %c0_i32_0 = arith.constant 0 : i32
    %c0_i32_1 = arith.constant 0 : i32
    return %c0_i32, %c0_i32_0 : i32, i32
  }
  func.func @transform_5(%arg0: i32) -> (i32, i32) {
    %c0_i32 = arith.constant 0 : i32
    %c0_i32_0 = arith.constant 0 : i32
    %c0_i32_1 = arith.constant 0 : i32
    return %c0_i32, %c0_i32_0 : i32, i32
  }
  func.func @transform_6(%arg0: i32) -> (i32, i32) {
    %c0_i32 = arith.constant 0 : i32
    %c0_i32_0 = arith.constant 0 : i32
    %c0_i32_1 = arith.constant 0 : i32
    return %c0_i32, %c0_i32_0 : i32, i32
  }
  func.func @transform_7(%arg0: i32) -> (i32, i32) {
    %c0_i32 = arith.constant 0 : i32
    %c0_i32_0 = arith.constant 0 : i32
    %c0_i32_1 = arith.constant 0 : i32
    return %c0_i32, %c0_i32_0 : i32, i32
  }
  func.func @transform_8(%arg0: i32) -> (i32, i32) {
    %c0_i32 = arith.constant 0 : i32
    %c0_i32_0 = arith.constant 0 : i32
    %c0_i32_1 = arith.constant 0 : i32
    return %c0_i32, %c0_i32_0 : i32, i32
  }
  func.func @transform_9(%arg0: i32) -> (i32, i32) {
    %c0_i32 = arith.constant 0 : i32
    %c0_i32_0 = arith.constant 0 : i32
    %c0_i32_1 = arith.constant 0 : i32
    return %c0_i32, %c0_i32_0 : i32, i32
  }
  func.func @transform_10(%arg0: i32) -> (i32, i32) {
    %c0_i32 = arith.constant 0 : i32
    %c0_i32_0 = arith.constant 0 : i32
    %c0_i32_1 = arith.constant 0 : i32
    return %c0_i32, %c0_i32_0 : i32, i32
  }
  func.func @transform_11(%arg0: i32) -> (i32, i32) {
    %c0_i32 = arith.constant 0 : i32
    %c0_i32_0 = arith.constant 0 : i32
    %c0_i32_1 = arith.constant 0 : i32
    return %c0_i32, %c0_i32_0 : i32, i32
  }
  func.func @transform_12(%arg0: i32) -> (i32, i32) {
    %c0_i32 = arith.constant 0 : i32
    %c0_i32_0 = arith.constant 0 : i32
    %c0_i32_1 = arith.constant 0 : i32
    return %c0_i32, %c0_i32_0 : i32, i32
  }
  func.func @transform_13(%arg0: i32) -> (i32, i32) {
    %c0_i32 = arith.constant 0 : i32
    %c0_i32_0 = arith.constant 0 : i32
    %c0_i32_1 = arith.constant 0 : i32
    return %c0_i32, %c0_i32_0 : i32, i32
  }
  func.func @transform_14(%arg0: i32) -> (i32, i32) {
    %c0_i32 = arith.constant 0 : i32
    %c0_i32_0 = arith.constant 0 : i32
    %c0_i32_1 = arith.constant 0 : i32
    return %c0_i32, %c0_i32_0 : i32, i32
  }
  func.func @transform_15(%arg0: i32) -> (i32, i32) {
    %c0_i32 = arith.constant 0 : i32
    %c0_i32_0 = arith.constant 0 : i32
    %c0_i32_1 = arith.constant 0 : i32
    return %c0_i32, %c0_i32_0 : i32, i32
  }
  func.func @transform_16(%arg0: i32) -> (i32, i32) {
    %c0_i32 = arith.constant 0 : i32
    %c0_i32_0 = arith.constant 0 : i32
    %c0_i32_1 = arith.constant 0 : i32
    return %c0_i32, %c0_i32_0 : i32, i32
  }
  func.func @transform_17(%arg0: i32) -> (i32, i32, i32) {
    %c0_i32 = arith.constant 0 : i32
    %c0_i32_0 = arith.constant 0 : i32
    %c0_i32_1 = arith.constant 0 : i32
    return %arg0, %c0_i32, %c0_i32_0 : i32, i32, i32
  }
}

</mosaic_0001>

<bundles_post_ra>
// kernel: _forward_pallas_jit.1
= control target key start
LH: loop header
LB: loop body
LE: loop exit
PB: predicated region body
PF: predicated region fallthrough
CT: control target
= control target key end

     0   :  { %s10600_s26 = smov 0   ;;  %s13542_s0 = inlined_call_operand.vmem [shape: f32[2,1,32], index: 0, kind: input, shape index: {}]   ;;  %s13543_s1 = inlined_call_operand.vmem [shape: f32[2,1,32], index: 1, kind: input, shape index: {}]   ;;  %s13544_s2 = inlined_call_operand.vmem [shape: f32[64,512], index: 2, kind: input, shape index: {}]   ;;  %s13545_s3 = inlined_call_operand.vmem [shape: f32[1,32], index: 3, kind: input, shape index: {}]   ;;  %s13546_s4 = inlined_call_operand.vmem [shape: f32[288,32], index: 4, kind: input, shape index: {}]   ;;  %s13547_s5 = inlined_call_operand.vmem [shape: f32[1,32], index: 5, kind: input, shape index: {}]   ;;  %s13548_s6 = inlined_call_operand.vmem [shape: f32[288,32], index: 6, kind: input, shape index: {}]   ;;  %s13549_s7 = inlined_call_operand.vmem [shape: f32[1,32], index: 7, kind: input, shape index: {}]   ;;  %s13550_s8 = inlined_call_operand.vmem [shape: f32[288,32], index: 8, kind: input, shape index: {}]   ;;  %s13551_s9 = inlined_call_operand.vmem [shape: f32[1,32], index: 9, kind: input, shape index: {}]   ;;  %s13552_s10 = inlined_call_operand.vmem [shape: f32[288,32], index: 10, kind: input, shape index: {}]   ;;  %s13553_s11 = inlined_call_operand.vmem [shape: f32[1,32], index: 11, kind: input, shape index: {}]   ;;  %s13554_s12 = inlined_call_operand.vmem [shape: f32[100,36], index: 12, kind: input, shape index: {}]   ;;  %s13555_s13 = inlined_call_operand.vmem [shape: f32[36,1], index: 13, kind: input, shape index: {}]   ;;  %s13556_s14 = inlined_call_operand.vmem [shape: f32[100,1], index: 14, kind: input, shape index: {}]   ;;  %s13557_s15 = inlined_call_operand.vmem [shape: f32[1,32], index: 15, kind: input, shape index: {}]   ;;  %s13558_s16 = inlined_call_operand.<no memory space> [shape: f32[1,1], index: 16, kind: input, shape index: {}]   ;;  %s13559_s17 = inlined_call_operand.vmem [shape: f32[2,1,100], index: 17, kind: output, shape index: {}]  }
   0x1   :  { %13560 = sst [smem:[#allocation5_spill]] %s13542_s0  ;;  %v22_v0 = vstv %s13558_s16 }
   0x2   :  { %13561 = sst [smem:[#allocation6_spill]] %s13543_s1  ;;  %23 = vst [vmem:[#allocation4] sm:$0x1] %v22_v0 }
   0x3 LB: > { %s8132_s27 = sadd.s32 4294967295, %s10499_s26   ;;  %p8136_p0 = scmp.ge.s32.totalorder %s10499_s26, 1  ;;  %s10499_s26 = sphi %s10600_s26, %s29_s26  }
   0x4   : > { %p495_p1 = scmp.lt.s32.totalorder %s10499_s26, 3 }
   0x6   : > { %p496_p2 = pnand %p8136_p0, %p495_p1 }
   0x7   : > { %p546_p3 = scmp.lt.s32.totalorder (!%p496_p2), %s8132_s27, 1  ;;  %s13562_s29 = sld [smem:[#allocation6_spill]] (!%p496_p2) }
   0x8   : > { %499 = sbr.rel (%p496_p2) target bundleno = 3546 (0xdda), region = 88  ;;  %s13563_s19 = sld [smem:[#allocation5_spill]] (!%p496_p2) }
   0x9   : > { %s10502_s30 = smov (!%p496_p2), 32   ;;  %s10503_s18 = smov (!%p496_p2), 96  }
   0xd   : > { %s13565_s27 = smov (!%p546_p3, %s8132_s27), 1  ;;  %vm557_vm0 = vcmask 253952   ;;  %v615_v7 = vld [vmem:[%s13544_s2 + $0xe8] sm:$0xff]  ;;  %v617_v8 = vld [vmem:[%s13544_s2 + $0xf8] sm:$0xff]  ;;  %v614_v9 = vld [vmem:[%s13544_s2 + $0xe0] sm:$0xff]  ;;  %v10501_v25 = vmov 0.0  }
   0xe   : > { %s551_s0 = scalar_lea.vmem %s13562_s29, %s13565_s27  ;;  %s548_s1 = scalar_lea.vmem %s13563_s19, %s13565_s27  ;;  %646 = vmatprep.subr.mxu0 %v615_v7  ;;  %717 = vmatprep.subr.mxu1 %v617_v8  ;;  %v616_v10 = vld [vmem:[%s13544_s2 + $0xf0] sm:$0xff]  ;;  %v611_v11 = vld [vmem:[%s13544_s2 + $0xc8] sm:$0xff]  ;;  %v613_v12 = vld [vmem:[%s13544_s2 + $0xd8] sm:$0xff]  ;;  %vm618_vm1 = vcmask 261120   ;;  %vm10505_vm6 = vmmov 0  }
   0xf   : > { %v10614_v1 = vld [vmem:[%s551_s0] sm:$0x1]  ;;  %647 = vmatpush1.msra.mxu0 %v614_v9  ;;  %718 = vmatpush1.msra.mxu1 %v616_v10  ;;  %v612_v14 = vld [vmem:[%s13544_s2 + $0xd0] sm:$0xff]  ;;  %v607_v15 = vld [vmem:[%s13544_s2 + $0xa8] sm:$0xff]  ;;  %909 = vst.msk [vmem:[#allocation2] sm:$0xff] %vm618_vm1, %v10501_v25  ;;  %s10504_s19 = smov 64   ;;  %s554_s24 = scalar_lea.vmem %s13559_s17, %s13565_s27 }
  0x10   : > { %v572_v2 = vmul.f32 %v10614_v1, %v10614_v1  ;;  %v10622_v3 = vld [vmem:[%s548_s1] sm:$0x1]  ;;  %648 = vmatprep.subr.mxu0 %v611_v11  ;;  %719 = vmatprep.subr.mxu1 %v613_v12  ;;  %v609_v16 = vld [vmem:[%s13544_s2 + $0xb8] sm:$0xff]  ;;  %v608_v18 = vld [vmem:[%s13544_s2 + $0xb0] sm:$0xff]  ;;  %910 = vst.msk [vmem:[#allocation2 + $0x8] sm:$0xff] %vm618_vm1, %v10501_v25 }
  0x11   : > { %v556_v4 = vmul.f32 %v10622_v3, %v10622_v3  ;;  %v610_v13 = vld [vmem:[%s13544_s2 + $0xc0] sm:$0xff]  ;;  %720 = vmatpush1.msra.mxu1 %v612_v14  ;;  %v603_v19 = vld [vmem:[%s13544_s2 + $0x88] sm:$0xff]  ;;  %v605_v20 = vld [vmem:[%s13544_s2 + $0x98] sm:$0xff]  ;;  %686 = vmatprep.mubr.f32.mxu0 %v10501_v25  ;;  %911 = vst.msk [vmem:[#allocation2 + $0x10] sm:$0xff] %vm618_vm1, %v10501_v25 }
  0x12   : > { %v573_v5 = vsel %vm557_vm0, %v572_v2, 0.0  ;;  %v606_v17 = vld [vmem:[%s13544_s2 + $0xa0] sm:$0xff]  ;;  %649 = vmatpush1.msra.mxu0 %v610_v13  ;;  %721 = vmatprep.subr.mxu1 %v609_v16  ;;  %v604_v22 = vld [vmem:[%s13544_s2 + $0x90] sm:$0xff]  ;;  %v599_v23 = vld [vmem:[%s13544_s2 + $0x68] sm:$0xff]  ;;  %912 = vst.msk [vmem:[#allocation2 + $0x18] sm:$0xff] %vm618_vm1, %v10501_v25 }
  0x13   : > { %574 = vadd.xlane.f32.xlu0 %v573_v5  ;;  %v558_v6 = vsel %vm557_vm0, %v556_v4, 0.0  ;;  %650 = vmatprep.subr.mxu0 %v607_v15  ;;  %v602_v21 = vld [vmem:[%s13544_s2 + $0x80] sm:$0xff]  ;;  %v601_v24 = vld [vmem:[%s13544_s2 + $0x78] sm:$0xff]  ;;  %913 = vst.msk [vmem:[#allocation2 + $0x20] sm:$0xff] %vm618_vm1, %v10501_v25  ;;  %914 = vst.msk [vmem:[#allocation2 + $0x28] sm:$0xff] %vm618_vm1, %v10501_v25 }
  0x14   : > { %651 = vmatpush1.msra.mxu0 %v606_v17  ;;  %722 = vmatpush1.msra.mxu1 %v608_v18  ;;  %v8141_v26 = vld [vmem:[%s13545_s3] ss:$0 sm:$0xff]  ;;  %v600_v44 = vld [vmem:[%s13544_s2 + $0x70] sm:$0xff]  ;;  %v595_v45 = vld [vmem:[%s13544_s2 + $0x48] sm:$0xff] }
  0x15   : > { %652 = vmatprep.subr.mxu0 %v603_v19  ;;  %723 = vmatprep.subr.mxu1 %v605_v20  ;;  %v598_v43 = vld [vmem:[%s13544_s2 + $0x60] sm:$0xff]  ;;  %v597_v46 = vld [vmem:[%s13544_s2 + $0x58] sm:$0xff]  ;;  %v596_v48 = vld [vmem:[%s13544_s2 + $0x50] sm:$0xff] }
  0x16   : > { %653 = vmatpush1.msra.mxu0 %v602_v21  ;;  %724 = vmatpush1.msra.mxu1 %v604_v22  ;;  %v594_v47 = vld [vmem:[%s13544_s2 + $0x40] sm:$0xff]  ;;  %v591_v49 = vld [vmem:[%s13544_s2 + $0x28] sm:$0xff]  ;;  %v593_v50 = vld [vmem:[%s13544_s2 + $0x38] sm:$0xff] }
  0x17   : > { %559 = vadd.xlane.f32.xlu0 %v558_v6  ;;  %757 = vmatprep.mubr.f32.mxu1 %v10501_v25  ;;  %v590_v51 = vld [vmem:[%s13544_s2 + $0x20] sm:$0xff]  ;;  %v592_v52 = vld [vmem:[%s13544_s2 + $0x30] sm:$0xff]  ;;  %v587_v53 = vld [vmem:[%s13544_s2 + $0x8] sm:$0xff] }
  0x18   : > { %791 = vmatprep.subr.mxu0 %v599_v23  ;;  %862 = vmatprep.subr.mxu1 %v601_v24  ;;  %v589_v54 = vld [vmem:[%s13544_s2 + $0x18] sm:$0xff]  ;;  %v586_v56 = vld [vmem:[%s13544_s2] sm:$0xff]  ;;  %v588_v57 = vld [vmem:[%s13544_s2 + $0x10] sm:$0xff] }
  0x19   : > { %938 = vrot.lane.b32.xlu1 %v8141_v26, %s10502_s30 }
  0x1d   : > { %968 = vrot.lane.b32.xlu1 %v8141_v26, %s10504_s19 }
  0x21   : > { %1042 = vrot.lane.b32.xlu1 %v8141_v26, %s10502_s30 }
  0x25   : > { %1072 = vrot.lane.b32.xlu1 %v8141_v26, %s10504_s19 }
  0x29   : > { %1102 = vrot.lane.b32.xlu1 %v8141_v26, %s10503_s18 }
  0x2d   : > { %998 = vrot.lane.b32.xlu0 %v8141_v26, %s10503_s18  ;;  %1146 = vrot.lane.b32.xlu1 %v8141_v26, %s10502_s30 }
  0x31   : > { %1250 = vrot.lane.b32.xlu0 %v8141_v26, %s10502_s30  ;;  %1176 = vrot.lane.b32.xlu1 %v8141_v26, %s10504_s19 }
  0x35   : > { %1310 = vrot.lane.b32.xlu0 %v8141_v26, %s10503_s18  ;;  %1206 = vrot.lane.b32.xlu1 %v8141_v26, %s10503_s18 }
  0x39   : > { %1280 = vrot.lane.b32.xlu1 %v8141_v26, %s10504_s19 }
  0x8b   : > { %v939_v59 = vpop.permute.xlu1 %938 }
  0x8f   : > { %v969_v60 = vpop.permute.xlu1 %968 }
  0x93   : > { %v1043_v61 = vpop.permute.xlu1 %1042 }
  0x97   : > { %v1073_v62 = vpop.permute.xlu1 %1072 }
  0x9b   : > { %v1103_v63 = vpop.permute.xlu1 %1102 }
  0x9c   : > { %v575_v27 = vpop.xlane.xlu0 %574 }
  0x9d   : > { %10379 = vrsqrt.f32 %v575_v27  ;;  %vm578_vm2 = vcmp.eq.f32.partialorder %v575_v27, inf  ;;  %v581_v31 = vand.u32 2147483648, %v575_v27  ;;  %vm580_vm3 = vcmp.eq.f32.partialorder %v575_v27, 0.0 }
  0x9f   : > { %v1147_v2 = vpop.permute.xlu1 %1146 }
  0xa0   : > { %v560_v28 = vpop.xlane.xlu0 %559 }
  0xa1   : > { %10381 = vrsqrt.f32 %v560_v28  ;;  %vm563_vm4 = vcmp.eq.f32.partialorder %v560_v28, inf  ;;  %v566_v37 = vand.u32 2147483648, %v560_v28  ;;  %vm565_vm5 = vcmp.eq.f32.partialorder %v560_v28, 0.0 }
  0xa3   : > { %v1177_v12 = vpop.permute.xlu1 %1176 }
  0xa4   : > { %v999_v13 = vpop.permute.xlu0 %998 }
  0xa7   : > { %v1207_v24 = vpop.permute.xlu1 %1206 }
  0xa8   : > { %v1251_v26 = vpop.permute.xlu0 %1250 }
  0xaa   : > { %v10380_v29 = vpop.eup %10379 }
  0xab   : > { %v577_v30 = vmul.f32 %v10380_v29, %v575_v27 }
  0xad   : > { %v579_v32 = vsel %vm578_vm2, %v575_v27, %v577_v30 }
  0xae   : > { %v10382_v33 = vpop.eup %10381  ;;  %v582_v34 = vsel %vm580_vm3, %v581_v31, %v579_v32 }
  0xaf   : > { %v583_v35 = vmax.f32 %v582_v34, 1e-12  ;;  %v562_v36 = vmul.f32 %v10382_v33, %v560_v28 }
  0xb1   : > { %10383 = vrcp.f32 %v583_v35  ;;  %v564_v38 = vsel %vm563_vm4, %v560_v28, %v562_v36  ;;  %v1281_v36 = vpop.permute.xlu1 %1280 }
  0xb2   : > { %v567_v39 = vsel %vm565_vm5, %v566_v37, %v564_v38  ;;  %v1311_v37 = vpop.permute.xlu0 %1310 }
  0xb3   : > { %v568_v40 = vmax.f32 %v567_v39, 1e-12 }
  0xb5   : > { %10385 = vrcp.f32 %v568_v40 }
  0xbe   : > { %v10384_v41 = vpop.eup %10383 }
  0xbf   : > { %v585_v42 = vmul.f32 %v10384_v41, %v10614_v1 }
  0xc1   : > { %8137 = vmatmul.mubr.msk.f32.vlgmr.msra.gmra.mxu0 %vm618_vm1, %v585_v42  ;;  %8138 = vmatmul.mubr.msk.f32.vlgmr.msra.gmra.mxu1 %vm618_vm1, %v585_v42 }
  0xc2   : > { %792 = vmatpush1.msra.mxu0 %v598_v43  ;;  %863 = vmatpush1.msra.mxu1 %v600_v44  ;;  %v10386_v55 = vpop.eup %10385 }
  0xc3   : > { %793 = vmatprep.subr.mxu0 %v595_v45  ;;  %864 = vmatprep.subr.mxu1 %v597_v46  ;;  %v570_v58 = vmul.f32 %v10386_v55, %v10622_v3 }
  0xc4   : > { %794 = vmatpush1.msra.mxu0 %v594_v47  ;;  %865 = vmatpush1.msra.mxu1 %v596_v48 }
  0xc5   : > { %795 = vmatprep.subr.mxu0 %v591_v49  ;;  %866 = vmatprep.subr.mxu1 %v593_v50 }
  0xc6   : > { %796 = vmatpush1.msra.mxu0 %v590_v51  ;;  %867 = vmatpush1.msra.mxu1 %v592_v52 }
  0xc7   : > { %797 = vmatprep.subr.mxu0 %v587_v53  ;;  %868 = vmatprep.subr.mxu1 %v589_v54 }
  0xc8   : > { %798 = vmatpush1.msra.mxu0 %v586_v56  ;;  %831 = vmatprep.mubr.f32.mxu0 %v10501_v25 }
  0xc9   : > { %869 = vmatpush1.msra.mxu1 %v588_v57  ;;  %902 = vmatprep.mubr.f32.mxu1 %v10501_v25 }
  0xca   : > { %8139 = vmatmul.mubr.msk.f32.vlgmr.msra.gmra.mxu0 %vm618_vm1, %v570_v58  ;;  %8140 = vmatmul.mubr.msk.f32.vlgmr.msra.gmra.mxu1 %vm618_vm1, %v570_v58 }
  0xcb   : > { %9015 = vmatprep.subr.mxu0 %v10501_v25  ;;  %9038 = vmatprep.subr.mxu1 %v10501_v25 }
  0xcc   : > { %9023 = vmatprep.mubr.msk.f32.mxu0 %vm10505_vm6, %v10501_v25  ;;  %9046 = vmatprep.mubr.msk.f32.mxu1 %vm10505_vm6, %v10501_v25 }
 0x181   : > { %v688_v0 = vpop.f32.mrf.mxu0  ;;  %v759_v1 = vpop.f32.mrf.mxu1 }
 0x183   : > { %v690_v3 = vpop.f32.mrf.mxu0  ;;  %v761_v4 = vpop.f32.mrf.mxu1 }
 0x18a   : > { %v833_v5 = vpop.f32.mrf.mxu0  ;;  %v904_v6 = vpop.f32.mrf.mxu1 }
 0x18b   : > { %v10763_v7 = vadd.f32 %v833_v5, %v688_v0  ;;  %v10765_v8 = vadd.f32 %v904_v6, %v759_v1  ;;  %v1230_v5 = vld [vmem:[%s13545_s3] sm:$0x1] }
 0x18c   : > { %v835_v9 = vpop.f32.mrf.mxu0  ;;  %v906_v19 = vpop.f32.mrf.mxu1 }
 0x18d   : > { %v10768_v10 = vadd.f32 %v969_v60, %v10763_v7  ;;  %v10771_v11 = vadd.f32 %v939_v59, %v10763_v7  ;;  %v10773_v14 = vadd.f32 %v835_v9, %v690_v3  ;;  %v10780_v17 = vadd.f32 %v1177_v12, %v10765_v8  ;;  %v917_v60 = vld [vmem:[%s13545_s3] sm:$0x1] }
 0x18e   : > { %v10783_v18 = vadd.f32 %v999_v13, %v10763_v7  ;;  %v10795_v23 = vadd.f32 %v1147_v2, %v10765_v8  ;;  %v10799_v27 = vadd.f32 %v906_v19, %v761_v4  ;;  %v10818_v34 = vadd.f32 %v1207_v24, %v10765_v8  ;;  %v1126_v4 = vld [vmem:[%s13545_s3] sm:$0x1] }
 0x18f   : > { %v972_v15 = vmul.f32 %v10768_v10, %v10768_v10  ;;  %v942_v16 = vmul.f32 %v10771_v11, %v10771_v11  ;;  %v1180_v20 = vmul.f32 %v10780_v17, %v10780_v17  ;;  %v10792_v22 = vadd.f32 %v1043_v61, %v10773_v14  ;;  %v1022_v61 = vld [vmem:[%s13545_s3] sm:$0x1] }
 0x190   : > { %v1002_v21 = vmul.f32 %v10783_v18, %v10783_v18  ;;  %v1150_v29 = vmul.f32 %v10795_v23, %v10795_v23  ;;  %v10806_v30 = vadd.f32 %v1103_v63, %v10773_v14  ;;  %v10809_v31 = vadd.f32 %v1073_v62, %v10773_v14 }
 0x191   : > { %974 = vrot.lane.b32.xlu0 %v972_v15, %s10504_s19  ;;  %944 = vrot.lane.b32.xlu1 %v942_v16, %s10503_s18  ;;  %v1046_v28 = vmul.f32 %v10792_v22, %v10792_v22  ;;  %v10821_v35 = vadd.f32 %v1251_v26, %v10799_v27  ;;  %v10826_v38 = vadd.f32 %v1281_v36, %v10799_v27 }
 0x192   : > { %v1106_v32 = vmul.f32 %v10806_v30, %v10806_v30  ;;  %v1076_v33 = vmul.f32 %v10809_v31, %v10809_v31  ;;  %v10829_v39 = vadd.f32 %v1311_v37, %v10799_v27  ;;  %v1210_v40 = vmul.f32 %v10818_v34, %v10818_v34 }
 0x193   : > { %v1254_v41 = vmul.f32 %v10821_v35, %v10821_v35  ;;  %v1284_v42 = vmul.f32 %v10826_v38, %v10826_v38  ;;  %v10860_v2 = vadd.f32 %v917_v60, %v10763_v7  ;;  %v10863_v3 = vadd.f32 %v1022_v61, %v10773_v14 }
 0x194   : > { %v1314_v43 = vmul.f32 %v10829_v39, %v10829_v39  ;;  %v10872_v12 = vadd.f32 %v1126_v4, %v10765_v8  ;;  %v10875_v7 = vadd.f32 %v1230_v5, %v10799_v27  ;;  %v1351_v27 = vld [vmem:[%s13546_s4 + $0x38] sm:$0xff]  ;;  %v1343_v5 = vld [vmem:[#allocation2 + $0x1] sm:$0xff] }
 0x195   : > { %1182 = vrot.lane.b32.xlu0 %v1180_v20, %s10504_s19  ;;  %1004 = vrot.lane.b32.xlu1 %v1002_v21, %s10502_s30  ;;  %v919_v15 = vmul.f32 %v10860_v2, %v10860_v2  ;;  %v1024_v16 = vmul.f32 %v10863_v3, %v10863_v3 }
 0x196   : > { %v1128_v20 = vmul.f32 %v10872_v12, %v10872_v12  ;;  %v1232_v21 = vmul.f32 %v10875_v7, %v10875_v7  ;;  %9016 = vmatpush3.msra.mxu0 %v1351_v27 }
 0x197   : > { %v920_v19 = vsel %vm557_vm0, %v919_v15, 0.0  ;;  %v1025_v8 = vsel %vm557_vm0, %v1024_v16, 0.0  ;;  %9017 = vmatprep.subr.mxu0 %v10501_v25 }
 0x198   : > { %v1129_v24 = vsel %vm557_vm0, %v1128_v20, 0.0  ;;  %v1233_v26 = vsel %vm557_vm0, %v1232_v21, 0.0 }
 0x199   : > { %1048 = vrot.lane.b32.xlu0 %v1046_v28, %s10503_s18  ;;  %1152 = vrot.lane.b32.xlu1 %v1150_v29, %s10503_s18  ;;  %v1342_v28 = vld [vmem:[%s13546_s4 + $0x18] sm:$0xff]  ;;  %v1350_v29 = vld [vmem:[%s13546_s4 + $0x30] sm:$0xff] }
 0x19a   : > { %9039 = vmatpush3.msra.mxu1 %v1342_v28  ;;  %9018 = vmatpush3.msra.mxu0 %v1350_v29 }
 0x19b   : > { %9040 = vmatprep.subr.mxu1 %v10501_v25  ;;  %9019 = vmatprep.subr.mxu0 %v10501_v25 }
 0x19d   : > { %1108 = vrot.lane.b32.xlu0 %v1106_v32, %s10502_s30  ;;  %1078 = vrot.lane.b32.xlu1 %v1076_v33, %s10504_s19  ;;  %v1341_v32 = vld [vmem:[%s13546_s4 + $0x10] sm:$0xff] }
 0x19e   : > { %9041 = vmatpush3.msra.mxu1 %v1341_v32 }
 0x19f   : > { %9042 = vmatprep.subr.mxu1 %v10501_v25 }
 0x1a1   : > { %1212 = vrot.lane.b32.xlu1 %v1210_v40, %s10502_s30  ;;  %1256 = vrot.lane.b32.xlu0 %v1254_v41, %s10503_s18 }
 0x1a5   : > { %1286 = vrot.lane.b32.xlu1 %v1284_v42, %s10504_s19  ;;  %1316 = vrot.lane.b32.xlu0 %v1314_v43, %s10502_s30 }
 0x203   : > { %v945_v44 = vpop.permute.xlu1 %944  ;;  %v975_v45 = vpop.permute.xlu0 %974 }
 0x204   : > { %v947_v46 = vsel %vm557_vm0, %v945_v44, 0.0  ;;  %v977_v47 = vsel %vm557_vm0, %v975_v45, 0.0 }
 0x205   : > { %948 = vadd.xlane.f32.xlu1 %v947_v46  ;;  %978 = vadd.xlane.f32.xlu0 %v977_v47 }
 0x207   : > { %v1005_v48 = vpop.permute.xlu1 %1004  ;;  %v1183_v49 = vpop.permute.xlu0 %1182 }
 0x208   : > { %v1007_v50 = vsel %vm557_vm0, %v1005_v48, 0.0  ;;  %v1185_v51 = vsel %vm557_vm0, %v1183_v49, 0.0 }
 0x209   : > { %1008 = vadd.xlane.f32.xlu0 %v1007_v50  ;;  %1186 = vadd.xlane.f32.xlu1 %v1185_v51 }
 0x20b   : > { %v1153_v52 = vpop.permute.xlu1 %1152  ;;  %v1049_v53 = vpop.permute.xlu0 %1048 }
 0x20c   : > { %v1155_v54 = vsel %vm557_vm0, %v1153_v52, 0.0  ;;  %v1051_v55 = vsel %vm557_vm0, %v1049_v53, 0.0 }
 0x20d   : > { %1156 = vadd.xlane.f32.xlu0 %v1155_v54  ;;  %1052 = vadd.xlane.f32.xlu1 %v1051_v55 }
 0x20f   : > { %v1079_v56 = vpop.permute.xlu1 %1078  ;;  %v1109_v57 = vpop.permute.xlu0 %1108 }
 0x210   : > { %v1081_v58 = vsel %vm557_vm0, %v1079_v56, 0.0  ;;  %v1111_v59 = vsel %vm557_vm0, %v1109_v57, 0.0  ;;  %v1349_v57 = vld [vmem:[%s13546_s4 + $0x28] sm:$0xff] }
 0x211   : > { %1082 = vadd.xlane.f32.xlu0 %v1081_v58  ;;  %1112 = vadd.xlane.f32.xlu1 %v1111_v59  ;;  %v1340_v58 = vld [vmem:[%s13546_s4 + $0x8] sm:$0xff]  ;;  %v1348_v59 = vld [vmem:[%s13546_s4 + $0x20] sm:$0xff] }
 0x212   : > { %9020 = vmatpush3.msra.mxu0 %v1349_v57  ;;  %9043 = vmatpush3.msra.mxu1 %v1340_v58 }
 0x213   : > { %v1213_v62 = vpop.permute.xlu1 %1212  ;;  %v1257_v63 = vpop.permute.xlu0 %1256  ;;  %9021 = vmatprep.subr.mxu0 %v10501_v25  ;;  %9044 = vmatprep.subr.mxu1 %v10501_v25 }
 0x214   : > { %v1215_v0 = vsel %vm557_vm0, %v1213_v62, 0.0  ;;  %v1259_v1 = vsel %vm557_vm0, %v1257_v63, 0.0  ;;  %v1339_v62 = vld [vmem:[%s13546_s4] sm:$0xff]  ;;  %9022 = vmatpush3.msra.mxu0 %v1348_v59 }
 0x215   : > { %1216 = vadd.xlane.f32.xlu0 %v1215_v0  ;;  %1260 = vadd.xlane.f32.xlu1 %v1259_v1 }
 0x216   : > { %9045 = vmatpush3.msra.mxu1 %v1339_v62  ;;  %9024 = vmatmul.mubr.msk.f32.vlgmr.msra.gmra.mxu0 %vm618_vm1, %v1343_v5  ;;  %v1570_v5 = vld [vmem:[%s13546_s4 + $0x58] sm:$0xff] }
 0x217   : > { %v1287_v6 = vpop.permute.xlu1 %1286  ;;  %v1317_v9 = vpop.permute.xlu0 %1316  ;;  %9026 = vmatprep.mubr.msk.f32.mxu0 %vm10505_vm6, %v10501_v25  ;;  %9061 = vmatprep.subr.mxu0 %v10501_v25 }
 0x218   : > { %v1289_v13 = vsel %vm557_vm0, %v1287_v6, 0.0  ;;  %v1319_v14 = vsel %vm557_vm0, %v1317_v9, 0.0  ;;  %v1334_v6 = vld [vmem:[#allocation2] sm:$0xff]  ;;  %9084 = vmatprep.subr.mxu1 %v10501_v25  ;;  %9062 = vmatpush3.msra.mxu0 %v1570_v5 }
 0x219   : > { %1290 = vadd.xlane.f32.xlu0 %v1289_v13  ;;  %1320 = vadd.xlane.f32.xlu1 %v1319_v14  ;;  %v1562_v5 = vld [vmem:[#allocation2 + $0x2] sm:$0xff] }
 0x21a   : > { %9047 = vmatmul.mubr.msk.f32.vlgmr.msra.gmra.mxu1 %vm618_vm1, %v1334_v6  ;;  %9063 = vmatprep.subr.mxu0 %v10501_v25 }
 0x21b   : > { %9049 = vmatprep.mubr.msk.f32.mxu1 %vm10505_vm6, %v10501_v25 }
 0x21d   : > { %921 = vadd.xlane.f32.xlu0 %v920_v19  ;;  %1026 = vadd.xlane.f32.xlu1 %v1025_v8 }
 0x221   : > { %1130 = vadd.xlane.f32.xlu0 %v1129_v24  ;;  %1234 = vadd.xlane.f32.xlu1 %v1233_v26 }
 0x28e   : > { %v949_v33 = vpop.xlane.xlu1 %948  ;;  %v979_v36 = vpop.xlane.xlu0 %978 }
 0x28f   : > { %v950_v37 = vmul.f32 0.03125, %v949_v33  ;;  %v980_v40 = vmul.f32 0.03125, %v979_v36 }
 0x291   : > { %v951_v41 = vadd.f32 1e-08, %v950_v37  ;;  %v981_v42 = vadd.f32 1e-08, %v980_v40 }
 0x292   : > { %v1187_v43 = vpop.xlane.xlu1 %1186  ;;  %v1009_v44 = vpop.xlane.xlu0 %1008 }
 0x293   : > { %10387 = vrsqrt.f32 %v951_v41  ;;  %v1188_v45 = vmul.f32 0.03125, %v1187_v43  ;;  %v1010_v46 = vmul.f32 0.03125, %v1009_v44 }
 0x294   : > { %10389 = vrsqrt.f32 %v981_v42 }
 0x295   : > { %v1189_v47 = vadd.f32 1e-08, %v1188_v45  ;;  %v1011_v48 = vadd.f32 1e-08, %v1010_v46 }
 0x296   : > { %v1053_v49 = vpop.xlane.xlu1 %1052  ;;  %v1157_v50 = vpop.xlane.xlu0 %1156 }
 0x297   : > { %10391 = vrsqrt.f32 %v1189_v47  ;;  %v1054_v51 = vmul.f32 0.03125, %v1053_v49  ;;  %v1158_v52 = vmul.f32 0.03125, %v1157_v50 }
 0x298   : > { %10393 = vrsqrt.f32 %v1011_v48 }
 0x299   : > { %v1055_v53 = vadd.f32 1e-08, %v1054_v51  ;;  %v1159_v54 = vadd.f32 1e-08, %v1158_v52 }
 0x29a   : > { %v1113_v55 = vpop.xlane.xlu1 %1112  ;;  %v1083_v56 = vpop.xlane.xlu0 %1082 }
 0x29b   : > { %10395 = vrsqrt.f32 %v1055_v53  ;;  %v1114_v60 = vmul.f32 0.03125, %v1113_v55  ;;  %v1084_v61 = vmul.f32 0.03125, %v1083_v56 }
 0x29c   : > { %10397 = vrsqrt.f32 %v1159_v54 }
 0x29d   : > { %v1115_v63 = vadd.f32 1e-08, %v1114_v60  ;;  %v1085_v0 = vadd.f32 1e-08, %v1084_v61 }
 0x29e   : > { %v1261_v1 = vpop.xlane.xlu1 %1260  ;;  %v1217_v4 = vpop.xlane.xlu0 %1216 }
 0x29f   : > { %10399 = vrsqrt.f32 %v1115_v63  ;;  %v1262_v9 = vmul.f32 0.03125, %v1261_v1  ;;  %v1218_v13 = vmul.f32 0.03125, %v1217_v4 }
 0x2a0   : > { %v10388_v14 = vpop.eup %10387  ;;  %10401 = vrsqrt.f32 %v1085_v0 }
 0x2a1   : > { %v10390_v15 = vpop.eup %10389  ;;  %v1263_v16 = vadd.f32 1e-08, %v1262_v9  ;;  %v1219_v19 = vadd.f32 1e-08, %v1218_v13  ;;  %v953_v8 = vmul.f32 %v10388_v14, %v10771_v11 }
 0x2a2   : > { %v1321_v20 = vpop.xlane.xlu1 %1320  ;;  %v1291_v21 = vpop.xlane.xlu0 %1290  ;;  %v983_v24 = vmul.f32 %v10390_v15, %v10768_v10 }
 0x2a3   : > { %10403 = vrsqrt.f32 %v1263_v16  ;;  %v1322_v26 = vmul.f32 0.03125, %v1321_v20  ;;  %v1292_v27 = vmul.f32 0.03125, %v1291_v21  ;;  %vm954_vm7 = vcmp.ge.f32.partialorder %v953_v8, 0.0  ;;  %v1689_v16 = vld [vmem:[%s13546_s4 + $0x78] sm:$0xff] }
 0x2a4   : > { %v10392_v28 = vpop.eup %10391  ;;  %10405 = vrsqrt.f32 %v1219_v19  ;;  %v955_v29 = vmul.f32 0.1, %v953_v8  ;;  %vm984_vm8 = vcmp.ge.f32.partialorder %v983_v24, 0.0  ;;  %v985_v32 = vmul.f32 0.1, %v983_v24  ;;  %9085 = vmatpush3.msra.mxu1 %v1689_v16  ;;  %v1806_v16 = vld [vmem:[%s13546_s4 + $0x88] sm:$0xff] }
 0x2a5   : > { %v10394_v33 = vpop.eup %10393  ;;  %v1323_v36 = vadd.f32 1e-08, %v1322_v26  ;;  %v1293_v11 = vadd.f32 1e-08, %v1292_v27  ;;  %v1191_v37 = vmul.f32 %v10392_v28, %v10780_v17  ;;  %9086 = vmatprep.subr.mxu1 %v10501_v25 }
 0x2a6   : > { %v956_v40 = vsel %vm954_vm7, %v953_v8, %v955_v29  ;;  %v1027_v41 = vpop.xlane.xlu1 %1026  ;;  %v986_v42 = vsel %vm984_vm8, %v983_v24, %v985_v32  ;;  %v922_v43 = vpop.xlane.xlu0 %921  ;;  %v1013_v10 = vmul.f32 %v10394_v33, %v10783_v18  ;;  %v1569_v8 = vld [vmem:[%s13546_s4 + $0x50] sm:$0xff]  ;;  %v1568_v29 = vld [vmem:[%s13546_s4 + $0x48] sm:$0xff]  ;;  %v1567_v33 = vld [vmem:[%s13546_s4 + $0x40] sm:$0xff] }
 0x2a7   : > { %10407 = vrsqrt.f32 %v1323_v36  ;;  %958 = vrot.lane.b32.xlu0 %v956_v40, %s10503_s18  ;;  %v1028_v44 = vmul.f32 0.03125, %v1027_v41  ;;  %988 = vrot.lane.b32.xlu1 %v986_v42, %s10504_s19  ;;  %v924_v45 = vmul.f32 0.03125, %v922_v43  ;;  %vm1192_vm9 = vcmp.ge.f32.partialorder %v1191_v37, 0.0  ;;  %v1687_v32 = vld [vmem:[%s13546_s4 + $0x68] sm:$0xff]  ;;  %v1686_v41 = vld [vmem:[%s13546_s4 + $0x60] sm:$0xff] }
 0x2a8   : > { %v10396_v46 = vpop.eup %10395  ;;  %10409 = vrsqrt.f32 %v1293_v11  ;;  %v1193_v47 = vmul.f32 0.1, %v1191_v37  ;;  %vm1014_vm10 = vcmp.ge.f32.partialorder %v1013_v10, 0.0  ;;  %v1015_v48 = vmul.f32 0.1, %v1013_v10  ;;  %9064 = vmatpush3.msra.mxu0 %v1569_v8 }
 0x2a9   : > { %v10398_v17 = vpop.eup %10397  ;;  %v1029_v49 = vadd.f32 1e-08, %v1028_v44  ;;  %v925_v50 = vadd.f32 1e-08, %v924_v45  ;;  %v1057_v51 = vmul.f32 %v10396_v46, %v10792_v22  ;;  %9065 = vmatprep.subr.mxu0 %v10501_v25 }
 0x2aa   : > { %v1194_v52 = vsel %vm1192_vm9, %v1191_v37, %v1193_v47  ;;  %v1235_v18 = vpop.xlane.xlu1 %1234  ;;  %v1016_v53 = vsel %vm1014_vm10, %v1013_v10, %v1015_v48  ;;  %v1131_v54 = vpop.xlane.xlu0 %1130  ;;  %v1161_v55 = vmul.f32 %v10398_v17, %v10795_v23  ;;  %9066 = vmatpush3.msra.mxu0 %v1568_v29  ;;  %vm915_vm10 = vcmask 254976   ;;  %v2046_v29 = vld [vmem:[%s13546_s4 + $0xd8] sm:$0xff] }
 0x2ab   : > { %10411 = vrsqrt.f32 %v1029_v49  ;;  %1196 = vrot.lane.b32.xlu0 %v1194_v52, %s10504_s19  ;;  %v1236_v56 = vmul.f32 0.03125, %v1235_v18  ;;  %1018 = vrot.lane.b32.xlu1 %v1016_v53, %s10502_s30  ;;  %v1132_v57 = vmul.f32 0.03125, %v1131_v54  ;;  %vm1058_vm11 = vcmp.ge.f32.partialorder %v1057_v51, 0.0  ;;  %916 = vst.msk [vmem:[#allocation2 + $0x30] sm:$0x3] %vm915_vm10, %v10501_v25 }
 0x2ac   : > { %v10400_v58 = vpop.eup %10399  ;;  %10413 = vrsqrt.f32 %v925_v50  ;;  %v1059_v59 = vmul.f32 0.1, %v1057_v51  ;;  %vm1162_vm12 = vcmp.ge.f32.partialorder %v1161_v55, 0.0  ;;  %v1163_v60 = vmul.f32 0.1, %v1161_v55  ;;  %9067 = vmatprep.subr.mxu0 %v10501_v25 }
 0x2ad   : > { %v10402_v22 = vpop.eup %10401  ;;  %v1237_v61 = vadd.f32 1e-08, %v1236_v56  ;;  %v1133_v62 = vadd.f32 1e-08, %v1132_v57  ;;  %v1117_v63 = vmul.f32 %v10400_v58, %v10806_v30  ;;  %9068 = vmatpush3.msra.mxu0 %v1567_v33  ;;  %v2045_v33 = vld [vmem:[%s13546_s4 + $0xd0] sm:$0xff] }
 0x2ae   : > { %v1060_v0 = vsel %vm1058_vm11, %v1057_v51, %v1059_v59  ;;  %v1164_v23 = vsel %vm1162_vm12, %v1161_v55, %v1163_v60  ;;  %v1087_v1 = vmul.f32 %v10402_v22, %v10809_v31  ;;  %9107 = vmatprep.subr.mxu0 %v10501_v25 }
 0x2af   : > { %10415 = vrsqrt.f32 %v1237_v61  ;;  %1062 = vrot.lane.b32.xlu0 %v1060_v0, %s10503_s18  ;;  %1166 = vrot.lane.b32.xlu1 %v1164_v23, %s10503_s18  ;;  %vm1118_vm13 = vcmp.ge.f32.partialorder %v1117_v63, 0.0  ;;  %v1119_v4 = vmul.f32 0.1, %v1117_v63 }
 0x2b0   : > { %v10404_v6 = vpop.eup %10403  ;;  %10417 = vrsqrt.f32 %v1133_v62  ;;  %vm1088_vm14 = vcmp.ge.f32.partialorder %v1087_v1, 0.0  ;;  %v1089_v9 = vmul.f32 0.1, %v1087_v1 }
 0x2b1   : > { %v10406_v30 = vpop.eup %10405  ;;  %v1120_v13 = vsel %vm1118_vm13, %v1117_v63, %v1119_v4  ;;  %v1265_v31 = vmul.f32 %v10404_v6, %v10821_v35  ;;  %v1688_v35 = vld [vmem:[%s13546_s4 + $0x70] sm:$0xff]  ;;  %v1681_v6 = vld [vmem:[#allocation2 + $0x6] sm:$0xff] }
 0x2b2   : > { %v1090_v14 = vsel %vm1088_vm14, %v1087_v1, %v1089_v9  ;;  %v1221_v15 = vmul.f32 %v10406_v30, %v10818_v34  ;;  %9087 = vmatpush3.msra.mxu1 %v1688_v35  ;;  %v1808_v9 = vld [vmem:[%s13546_s4 + $0x98] sm:$0xff]  ;;  %v1925_v35 = vld [vmem:[%s13546_s4 + $0xa8] sm:$0xff] }
 0x2b3   : > { %1122 = vrot.lane.b32.xlu0 %v1120_v13, %s10502_s30  ;;  %1092 = vrot.lane.b32.xlu1 %v1090_v14, %s10504_s19  ;;  %vm1266_vm15 = vcmp.ge.f32.partialorder %v1265_v31, 0.0  ;;  %v1267_v19 = vmul.f32 0.1, %v1265_v31  ;;  %v1927_v30 = vld [vmem:[%s13546_s4 + $0xb8] sm:$0xff]  ;;  %v1807_v13 = vld [vmem:[%s13546_s4 + $0x90] sm:$0xff] }
 0x2b4   : > { %v10408_v20 = vpop.eup %10407  ;;  %vm1222_vm2 = vcmp.ge.f32.partialorder %v1221_v15, 0.0  ;;  %v1223_v34 = vmul.f32 0.1, %v1221_v15  ;;  %9088 = vmatprep.subr.mxu1 %v10501_v25 }
 0x2b5   : > { %v10410_v21 = vpop.eup %10409  ;;  %v1268_v24 = vsel %vm1266_vm15, %v1265_v31, %v1267_v19  ;;  %v1325_v26 = vmul.f32 %v10408_v20, %v10829_v39  ;;  %9089 = vmatpush3.msra.mxu1 %v1687_v32  ;;  %v1805_v20 = vld [vmem:[%s13546_s4 + $0x80] sm:$0xff]  ;;  %v2165_v32 = vld [vmem:[%s13546_s4 + $0xf8] sm:$0xff]  ;;  %vm2424_vm15 = vcmask 257024  }
 0x2b6   : > { %v1224_v27 = vsel %vm1222_vm2, %v1221_v15, %v1223_v34  ;;  %v1295_v28 = vmul.f32 %v10410_v21, %v10826_v38  ;;  %9090 = vmatprep.subr.mxu1 %v10501_v25  ;;  %v1926_v15 = vld [vmem:[%s13546_s4 + $0xb0] sm:$0xff] }
 0x2b7   : > { %1270 = vrot.lane.b32.xlu0 %v1268_v24, %s10503_s18  ;;  %1226 = vrot.lane.b32.xlu1 %v1224_v27, %s10502_s30  ;;  %vm1326_vm3 = vcmp.ge.f32.partialorder %v1325_v26, 0.0  ;;  %v1327_v39 = vmul.f32 0.1, %v1325_v26  ;;  %v1924_v24 = vld [vmem:[%s13546_s4 + $0xa0] sm:$0xff] }
 0x2b8   : > { %v10412_v38 = vpop.eup %10411  ;;  %vm1296_vm4 = vcmp.ge.f32.partialorder %v1295_v28, 0.0  ;;  %v1297_v36 = vmul.f32 0.1, %v1295_v28  ;;  %9091 = vmatpush3.msra.mxu1 %v1686_v41 }
 0x2b9   : > { %v10414_v11 = vpop.eup %10413  ;;  %v1031_v37 = vmul.f32 %v10412_v38, %v10863_v3  ;;  %v1328_v40 = vsel %vm1326_vm3, %v1325_v26, %v1327_v39  ;;  %9130 = vmatprep.subr.mxu1 %v10501_v25  ;;  %v1685_v26 = vld [vmem:[#allocation2 + $0x26] sm:$0xf]  ;;  %v2164_v38 = vld [vmem:[%s13546_s4 + $0xf0] sm:$0xff] }
 0x2ba   : > { %v927_v42 = vmul.f32 %v10414_v11, %v10860_v2  ;;  %v1298_v43 = vsel %vm1296_vm4, %v1295_v28, %v1297_v36  ;;  %v2044_v11 = vld [vmem:[%s13546_s4 + $0xc8] sm:$0xff] }
 0x2bb   : > { %vm1032_vm5 = vcmp.ge.f32.partialorder %v1031_v37, 0.0  ;;  %v1033_v10 = vmul.f32 0.1, %v1031_v37  ;;  %1330 = vrot.lane.b32.xlu0 %v1328_v40, %s10502_s30  ;;  %1300 = vrot.lane.b32.xlu1 %v1298_v43, %s10504_s19  ;;  %v2043_v40 = vld [vmem:[%s13546_s4 + $0xc0] sm:$0xff] }
 0x2bc   : > { %v10416_v3 = vpop.eup %10415  ;;  %vm928_vm7 = vcmp.ge.f32.partialorder %v927_v42, 0.0  ;;  %v929_v44 = vmul.f32 0.1, %v927_v42  ;;  %v2162_v43 = vld [vmem:[%s13546_s4 + $0xe0] sm:$0xff] }
 0x2bd   : > { %v10418_v45 = vpop.eup %10417  ;;  %v1034_v46 = vsel %vm1032_vm5, %v1031_v37, %v1033_v10  ;;  %v1239_v2 = vmul.f32 %v10416_v3, %v10875_v7  ;;  %v2163_v37 = vld [vmem:[%s13546_s4 + $0xe8] sm:$0xff] }
 0x2be   : > { %1035 = vst.msk [vmem:[#allocation2 + $0x14] sm:$0x1] %vm557_vm0, %v1034_v46  ;;  %v930_v47 = vsel %vm928_vm7, %v927_v42, %v929_v44  ;;  %v1135_v48 = vmul.f32 %v10418_v45, %v10872_v12  ;;  %v1804_v10 = vld [vmem:[#allocation2 + $0x27] sm:$0xf] }
 0x2bf   : > { %931 = vst.msk [vmem:[#allocation2 + $0xe] sm:$0x1] %vm557_vm0, %v930_v47  ;;  %vm1240_vm8 = vcmp.ge.f32.partialorder %v1239_v2, 0.0  ;;  %v1241_v17 = vmul.f32 0.1, %v1239_v2 }
 0x2c0   : > { %vm1136_vm9 = vcmp.ge.f32.partialorder %v1135_v48, 0.0  ;;  %v1137_v49 = vmul.f32 0.1, %v1135_v48  ;;  %v1923_v3 = vld [vmem:[#allocation2 + $0x28] sm:$0xf] }
 0x2c1   : > { %v1242_v50 = vsel %vm1240_vm8, %v1239_v2, %v1241_v17 }
 0x2c2   : > { %1243 = vst.msk [vmem:[#allocation2 + $0x20] sm:$0x1] %vm557_vm0, %v1242_v50  ;;  %v1138_v51 = vsel %vm1136_vm9, %v1135_v48, %v1137_v49  ;;  %v2284_v48 = vld [vmem:[%s13546_s4 + $0x118] sm:$0xff] }
 0x2c3   : > { %1139 = vst.msk [vmem:[#allocation2 + $0x1a] sm:$0x1] %vm557_vm0, %v1138_v51 }
 0x2c6   : > { %v1800_v28 = vld [vmem:[#allocation2 + $0x7] sm:$0xff] }
 0x2d6   : > { %v1433_v44 = vpop.f32.mrf.mxu0 }
 0x2d8   : > { %v9025_v17 = vpop.f32.mrf.mxu0 }
 0x2da   : > { %v1538_v45 = vpop.f32.mrf.mxu1 }
 0x2db   : > { %v11179_v46 = vadd.f32 %v1538_v45, %v1433_v44 }
 0x2dc   : > { %v9048_v49 = vpop.f32.mrf.mxu1 }
 0x319   : > { %v989_v7 = vpop.permute.xlu1 %988  ;;  %v959_v52 = vpop.permute.xlu0 %958 }
 0x31a   : > { %991 = vst.msk [vmem:[#allocation2 + $0x10] sm:$0x1] %vm557_vm0, %v989_v7  ;;  %961 = vst.msk [vmem:[#allocation2 + $0xf] sm:$0x1] %vm557_vm0, %v959_v52  ;;  %v2283_v7 = vld [vmem:[%s13546_s4 + $0x110] sm:$0xff] }
 0x31d   : > { %v1019_v12 = vpop.permute.xlu1 %1018  ;;  %v1197_v18 = vpop.permute.xlu0 %1196 }
 0x31e   : > { %1021 = vst.msk [vmem:[#allocation2 + $0x11] sm:$0x1] %vm557_vm0, %v1019_v12  ;;  %1199 = vst.msk [vmem:[#allocation2 + $0x1c] sm:$0x1] %vm557_vm0, %v1197_v18  ;;  %v2282_v18 = vld [vmem:[%s13546_s4 + $0x108] sm:$0xff] }
 0x321   : > { %v1167_v53 = vpop.permute.xlu1 %1166  ;;  %v1063_v54 = vpop.permute.xlu0 %1062  ;;  %v1344_v55 = vld [vmem:[#allocation2 + $0x9] sm:$0xff] }
 0x322   : > { %v11002_v56 = vld [vmem:[#allocation2 + $0x8] sm:$0xff]  ;;  %1169 = vst.msk [vmem:[#allocation2 + $0x1b] sm:$0x1] %vm557_vm0, %v1167_v53  ;;  %1065 = vst.msk [vmem:[#allocation2 + $0x15] sm:$0x1] %vm557_vm0, %v1063_v54  ;;  %9027 = vmatmul.mubr.msk.f32.gmra.mxu0 %vm618_vm1, %v1344_v55  ;;  %v2281_v55 = vld [vmem:[%s13546_s4 + $0x100] sm:$0xff] }
 0x323   : > { %9050 = vmatmul.mubr.msk.f32.gmra.mxu1 %vm618_vm1, %v11002_v56  ;;  %9029 = vmatprep.mubr.msk.f32.mxu0 %vm10505_vm6, %v10501_v25  ;;  %v2041_v53 = vld [vmem:[#allocation2 + $0x24] sm:$0xff] }
 0x324   : > { %9052 = vmatprep.mubr.msk.f32.mxu1 %vm10505_vm6, %v10501_v25  ;;  %v2160_v54 = vld [vmem:[#allocation2 + $0x25] sm:$0xff] }
 0x325   : > { %v1093_v57 = vpop.permute.xlu1 %1092  ;;  %v1123_v58 = vpop.permute.xlu0 %1122  ;;  %v1563_v31 = vld [vmem:[#allocation2 + $0xa] sm:$0xff] }
 0x326   : > { %1095 = vst.msk [vmem:[#allocation2 + $0x16] sm:$0x1] %vm557_vm0, %v1093_v57  ;;  %1125 = vst.msk [vmem:[#allocation2 + $0x17] sm:$0x1] %vm557_vm0, %v1123_v58  ;;  %v2038_v2 = vld [vmem:[#allocation2 + $0xc] sm:$0xff] }
 0x327   : > { %v2157_v47 = vld [vmem:[#allocation2 + $0xd] sm:$0xff] }
 0x328   : > { %v2161_v57 = vld [vmem:[#allocation2 + $0x2d] sm:$0xf] }
 0x329   : > { %v1227_v59 = vpop.permute.xlu1 %1226  ;;  %v1271_v60 = vpop.permute.xlu0 %1270  ;;  %v11058_v14 = vld [vmem:[#allocation2 + $0xe] sm:$0xff]  ;;  %v2279_v58 = vld [vmem:[#allocation2 + $0x26] sm:$0xff] }
 0x32a   : > { %1229 = vst.msk [vmem:[#allocation2 + $0x1d] sm:$0x1] %vm557_vm0, %v1227_v59  ;;  %1273 = vst.msk [vmem:[#allocation2 + $0x21] sm:$0x1] %vm557_vm0, %v1271_v60  ;;  %v2280_v59 = vld [vmem:[#allocation2 + $0x2e] sm:$0xf] }
 0x32b   : > { %v10506_v60 = vmov 0  }
 0x32c   : > { %10378 = vset.pattern.permute.xlu1 %v10506_v60  ;;  %10377 = vset.pattern.permute.xlu0 %v10506_v60 }
 0x32d   : > { %v1301_v22 = vpop.permute.xlu1 %1300  ;;  %v1331_v61 = vpop.permute.xlu0 %1330  ;;  %v1345_v62 = vld [vmem:[#allocation2 + $0x11] sm:$0xff] }
 0x32e   : > { %v11017_v63 = vld [vmem:[#allocation2 + $0x10] sm:$0xff]  ;;  %1303 = vst.msk [vmem:[#allocation2 + $0x22] sm:$0x1] %vm557_vm0, %v1301_v22  ;;  %1333 = vst.msk [vmem:[#allocation2 + $0x23] sm:$0x1] %vm557_vm0, %v1331_v61  ;;  %9030 = vmatmul.mubr.msk.f32.gmra.mxu0 %vm618_vm1, %v1345_v62 }
 0x32f   : > { %9053 = vmatmul.mubr.msk.f32.gmra.mxu1 %vm618_vm1, %v11017_v63  ;;  %9032 = vmatprep.mubr.msk.f32.mxu0 %vm10505_vm6, %v10501_v25  ;;  %v1564_v19 = vld [vmem:[#allocation2 + $0x12] sm:$0xff] }
 0x330   : > { %9055 = vmatprep.mubr.msk.f32.mxu1 %vm10505_vm6, %v10501_v25  ;;  %v1801_v39 = vld [vmem:[#allocation2 + $0xf] sm:$0xff] }
 0x331   : > { %v1346_v0 = vld [vmem:[#allocation2 + $0x19] sm:$0xff] }
 0x332   : > { %v11028_v23 = vld [vmem:[#allocation2 + $0x18] sm:$0xff]  ;;  %9033 = vmatmul.mubr.msk.f32.gmra.mxu0 %vm618_vm1, %v1346_v0 }
 0x333   : > { %9056 = vmatmul.mubr.msk.f32.gmra.mxu1 %vm618_vm1, %v11028_v23  ;;  %9035 = vmatprep.mubr.msk.f32.mxu0 %vm10505_vm6, %v10501_v25  ;;  %v11075_v8 = vld [vmem:[#allocation2 + $0x16] sm:$0xff] }
 0x334   : > { %9058 = vmatprep.mubr.msk.f32.mxu1 %vm10505_vm6, %v10501_v25  ;;  %v1565_v34 = vld [vmem:[#allocation2 + $0x1a] sm:$0xff] }
 0x335   : > { %v1347_v1 = vld [vmem:[#allocation2 + $0x21] sm:$0xf]  ;;  %v1802_v36 = vld [vmem:[#allocation2 + $0x17] sm:$0xff] }
 0x336   : > { %v1338_v4 = vld [vmem:[#allocation2 + $0x20] sm:$0xf]  ;;  %9036 = vmatmul.mubr.msk.f32.gmra.mxu0 %vm618_vm1, %v1347_v1  ;;  %v2039_v50 = vld [vmem:[#allocation2 + $0x14] sm:$0xff] }
 0x337   : > { %9059 = vmatmul.mubr.msk.f32.gmra.mxu1 %vm618_vm1, %v1338_v4  ;;  %9069 = vmatprep.mubr.msk.f32.mxu0 %vm10505_vm6, %v10501_v25  ;;  %v11092_v21 = vld [vmem:[#allocation2 + $0x1e] sm:$0xff]  ;;  %v2158_v51 = vld [vmem:[#allocation2 + $0x15] sm:$0xff] }
 0x338   : > { %9092 = vmatprep.mubr.msk.f32.mxu1 %vm10505_vm6, %v10501_v25  ;;  %v1566_v27 = vld [vmem:[#allocation2 + $0x22] sm:$0xf] }
 0x339   : > { %v1803_v41 = vld [vmem:[#allocation2 + $0x1f] sm:$0xff] }
 0x33a   : > { %9070 = vmatmul.mubr.msk.f32.vlgmr.msra.gmra.mxu0 %vm618_vm1, %v1562_v5  ;;  %v1922_v42 = vld [vmem:[#allocation2 + $0x20] sm:$0xff] }
 0x33b   : > { %9093 = vmatmul.mubr.msk.f32.vlgmr.msra.gmra.mxu1 %vm618_vm1, %v1681_v6  ;;  %9072 = vmatprep.mubr.msk.f32.mxu0 %vm10505_vm6, %v10501_v25  ;;  %v2040_v52 = vld [vmem:[#allocation2 + $0x1c] sm:$0xff] }
 0x33c   : > { %9095 = vmatprep.mubr.msk.f32.mxu1 %vm10505_vm6, %v10501_v25  ;;  %9108 = vmatpush3.msra.mxu0 %v1808_v9  ;;  %v2159_v12 = vld [vmem:[#allocation2 + $0x1d] sm:$0xff] }
 0x33d   : > { %9131 = vmatpush3.msra.mxu1 %v1927_v30  ;;  %9109 = vmatprep.subr.mxu0 %v10501_v25 }
 0x33e   : > { %9132 = vmatprep.subr.mxu1 %v10501_v25  ;;  %9073 = vmatmul.mubr.msk.f32.gmra.mxu0 %vm618_vm1, %v1563_v31 }
 0x33f   : > { %9096 = vmatmul.mubr.msk.f32.gmra.mxu1 %vm618_vm1, %v11058_v14  ;;  %9075 = vmatprep.mubr.msk.f32.mxu0 %vm10505_vm6, %v10501_v25 }
 0x340   : > { %9098 = vmatprep.mubr.msk.f32.mxu1 %vm10505_vm6, %v10501_v25  ;;  %9110 = vmatpush3.msra.mxu0 %v1807_v13 }
 0x341   : > { %9133 = vmatpush3.msra.mxu1 %v1926_v15  ;;  %9111 = vmatprep.subr.mxu0 %v10501_v25 }
 0x342   : > { %9134 = vmatprep.subr.mxu1 %v10501_v25  ;;  %9076 = vmatmul.mubr.msk.f32.gmra.mxu0 %vm618_vm1, %v1564_v19 }
 0x343   : > { %9099 = vmatmul.mubr.msk.f32.gmra.mxu1 %vm618_vm1, %v11075_v8  ;;  %9078 = vmatprep.mubr.msk.f32.mxu0 %vm10505_vm6, %v10501_v25 }
 0x344   : > { %9101 = vmatprep.mubr.msk.f32.mxu1 %vm10505_vm6, %v10501_v25  ;;  %9112 = vmatpush3.msra.mxu0 %v1806_v16 }
 0x345   : > { %9135 = vmatpush3.msra.mxu1 %v1925_v35  ;;  %9113 = vmatprep.subr.mxu0 %v10501_v25 }
 0x346   : > { %9136 = vmatprep.subr.mxu1 %v10501_v25  ;;  %9079 = vmatmul.mubr.msk.f32.gmra.mxu0 %vm618_vm1, %v1565_v34 }
 0x347   : > { %9102 = vmatmul.mubr.msk.f32.gmra.mxu1 %vm618_vm1, %v11092_v21  ;;  %9081 = vmatprep.mubr.msk.f32.mxu0 %vm10505_vm6, %v10501_v25 }
 0x348   : > { %9104 = vmatprep.mubr.msk.f32.mxu1 %vm10505_vm6, %v10501_v25  ;;  %9114 = vmatpush3.msra.mxu0 %v1805_v20 }
 0x349   : > { %9137 = vmatpush3.msra.mxu1 %v1924_v24  ;;  %9153 = vmatprep.subr.mxu0 %v10501_v25 }
 0x34a   : > { %9176 = vmatprep.subr.mxu1 %v10501_v25  ;;  %9082 = vmatmul.mubr.msk.f32.gmra.mxu0 %vm618_vm1, %v1566_v27 }
 0x34b   : > { %9105 = vmatmul.mubr.msk.f32.gmra.mxu1 %vm618_vm1, %v1685_v26  ;;  %9115 = vmatprep.mubr.msk.f32.mxu0 %vm10505_vm6, %v10501_v25 }
 0x34c   : > { %9138 = vmatprep.mubr.msk.f32.mxu1 %vm10505_vm6, %v10501_v25 }
 0x34e   : > { %9116 = vmatmul.mubr.msk.f32.vlgmr.msra.gmra.mxu0 %vm618_vm1, %v1800_v28 }
 0x34f   : > { %9139 = vmatmul.mubr.msk.f32.vlgmr.msra.gmra.mxu1 %vm618_vm1, %v11002_v56  ;;  %9118 = vmatprep.mubr.msk.f32.mxu0 %vm10505_vm6, %v10501_v25  ;;  %v2042_v56 = vld [vmem:[#allocation2 + $0x2c] sm:$0xf] }
 0x350   : > { %9141 = vmatprep.mubr.msk.f32.mxu1 %vm10505_vm6, %v10501_v25  ;;  %9154 = vmatpush3.msra.mxu0 %v2046_v29 }
 0x351   : > { %9177 = vmatpush3.msra.mxu1 %v2165_v32  ;;  %9155 = vmatprep.subr.mxu0 %v10501_v25 }
 0x352   : > { %9178 = vmatprep.subr.mxu1 %v10501_v25  ;;  %9119 = vmatmul.mubr.msk.f32.gmra.mxu0 %vm618_vm1, %v1801_v39 }
 0x353   : > { %9142 = vmatmul.mubr.msk.f32.gmra.mxu1 %vm618_vm1, %v11017_v63  ;;  %9121 = vmatprep.mubr.msk.f32.mxu0 %vm10505_vm6, %v10501_v25 }
 0x354   : > { %9144 = vmatprep.mubr.msk.f32.mxu1 %vm10505_vm6, %v10501_v25  ;;  %9156 = vmatpush3.msra.mxu0 %v2045_v33 }
 0x355   : > { %9179 = vmatpush3.msra.mxu1 %v2164_v38  ;;  %9157 = vmatprep.subr.mxu0 %v10501_v25 }
 0x356   : > { %9180 = vmatprep.subr.mxu1 %v10501_v25  ;;  %9122 = vmatmul.mubr.msk.f32.gmra.mxu0 %vm618_vm1, %v1802_v36 }
 0x357   : > { %9145 = vmatmul.mubr.msk.f32.gmra.mxu1 %vm618_vm1, %v11028_v23  ;;  %9124 = vmatprep.mubr.msk.f32.mxu0 %vm10505_vm6, %v10501_v25 }
 0x358   : > { %9147 = vmatprep.mubr.msk.f32.mxu1 %vm10505_vm6, %v10501_v25  ;;  %9158 = vmatpush3.msra.mxu0 %v2044_v11 }
 0x359   : > { %9181 = vmatpush3.msra.mxu1 %v2163_v37  ;;  %9159 = vmatprep.subr.mxu0 %v10501_v25 }
 0x35a   : > { %9182 = vmatprep.subr.mxu1 %v10501_v25  ;;  %9125 = vmatmul.mubr.msk.f32.gmra.mxu0 %vm618_vm1, %v1803_v41 }
 0x35b   : > { %9148 = vmatmul.mubr.msk.f32.gmra.mxu1 %vm618_vm1, %v1922_v42  ;;  %9127 = vmatprep.mubr.msk.f32.mxu0 %vm10505_vm6, %v10501_v25 }
 0x35c   : > { %9150 = vmatprep.mubr.msk.f32.mxu1 %vm10505_vm6, %v10501_v25  ;;  %9160 = vmatpush3.msra.mxu0 %v2043_v40 }
 0x35d   : > { %9183 = vmatpush3.msra.mxu1 %v2162_v43  ;;  %9199 = vmatprep.subr.mxu0 %v10501_v25 }
 0x35e   : > { %9222 = vmatprep.subr.mxu1 %v10501_v25  ;;  %9128 = vmatmul.mubr.msk.f32.gmra.mxu0 %vm618_vm1, %v1804_v10 }
 0x35f   : > { %9151 = vmatmul.mubr.msk.f32.gmra.mxu1 %vm618_vm1, %v1923_v3  ;;  %9161 = vmatprep.mubr.msk.f32.mxu0 %vm10505_vm6, %v10501_v25 }
 0x360   : > { %9184 = vmatprep.mubr.msk.f32.mxu1 %vm10505_vm6, %v10501_v25 }
 0x362   : > { %9162 = vmatmul.mubr.msk.f32.vlgmr.msra.gmra.mxu0 %vm618_vm1, %v2038_v2 }
 0x363   : > { %9185 = vmatmul.mubr.msk.f32.vlgmr.msra.gmra.mxu1 %vm618_vm1, %v2157_v47  ;;  %9164 = vmatprep.mubr.msk.f32.mxu0 %vm10505_vm6, %v10501_v25 }
 0x364   : > { %9187 = vmatprep.mubr.msk.f32.mxu1 %vm10505_vm6, %v10501_v25  ;;  %9200 = vmatpush3.msra.mxu0 %v2284_v48 }
 0x365   : > { %9201 = vmatprep.subr.mxu0 %v10501_v25 }
 0x366   : > { %9165 = vmatmul.mubr.msk.f32.gmra.mxu0 %vm618_vm1, %v2039_v50 }
 0x367   : > { %9188 = vmatmul.mubr.msk.f32.gmra.mxu1 %vm618_vm1, %v2158_v51  ;;  %9167 = vmatprep.mubr.msk.f32.mxu0 %vm10505_vm6, %v10501_v25 }
 0x368   : > { %9190 = vmatprep.mubr.msk.f32.mxu1 %vm10505_vm6, %v10501_v25  ;;  %9202 = vmatpush3.msra.mxu0 %v2283_v7 }
 0x369   : > { %9203 = vmatprep.subr.mxu0 %v10501_v25 }
 0x36a   : > { %9168 = vmatmul.mubr.msk.f32.gmra.mxu0 %vm618_vm1, %v2040_v52 }
 0x36b   : > { %9191 = vmatmul.mubr.msk.f32.gmra.mxu1 %vm618_vm1, %v2159_v12  ;;  %9170 = vmatprep.mubr.msk.f32.mxu0 %vm10505_vm6, %v10501_v25 }
 0x36c   : > { %9193 = vmatprep.mubr.msk.f32.mxu1 %vm10505_vm6, %v10501_v25  ;;  %9204 = vmatpush3.msra.mxu0 %v2282_v18 }
 0x36d   : > { %9205 = vmatprep.subr.mxu0 %v10501_v25 }
 0x36e   : > { %9171 = vmatmul.mubr.msk.f32.gmra.mxu0 %vm618_vm1, %v2041_v53 }
 0x36f   : > { %9194 = vmatmul.mubr.msk.f32.gmra.mxu1 %vm618_vm1, %v2160_v54  ;;  %9173 = vmatprep.mubr.msk.f32.mxu0 %vm10505_vm6, %v10501_v25 }
 0x370   : > { %9196 = vmatprep.mubr.msk.f32.mxu1 %vm10505_vm6, %v10501_v25  ;;  %9206 = vmatpush3.msra.mxu0 %v2281_v55 }
 0x371   : > { %9245 = vmatprep.subr.mxu0 %v10501_v25 }
 0x372   : > { %9174 = vmatmul.mubr.msk.f32.gmra.mxu0 %vm618_vm1, %v2042_v56 }
 0x373   : > { %9197 = vmatmul.mubr.msk.f32.gmra.mxu1 %vm618_vm1, %v2161_v57  ;;  %9207 = vmatprep.mubr.msk.f32.mxu0 %vm10505_vm6, %v10501_v25 }
 0x374   : > { %9230 = vmatprep.mubr.msk.f32.mxu1 %vm10505_vm6, %v10501_v25 }
 0x376   : > { %9208 = vmatmul.mubr.msk.f32.vlgmr.msra.gmra.mxu0 %vm618_vm1, %v11058_v14 }
 0x377   : > { %9210 = vmatprep.mubr.msk.f32.mxu0 %vm10505_vm6, %v10501_v25 }
 0x37a   : > { %9211 = vmatmul.mubr.msk.f32.gmra.mxu0 %vm618_vm1, %v11075_v8 }
 0x37b   : > { %9213 = vmatprep.mubr.msk.f32.mxu0 %vm10505_vm6, %v10501_v25 }
 0x37e   : > { %9214 = vmatmul.mubr.msk.f32.gmra.mxu0 %vm618_vm1, %v11092_v21 }
 0x37f   : > { %9216 = vmatprep.mubr.msk.f32.mxu0 %vm10505_vm6, %v10501_v25 }
 0x382   : > { %9217 = vmatmul.mubr.msk.f32.gmra.mxu0 %vm618_vm1, %v2279_v58 }
 0x383   : > { %9219 = vmatprep.mubr.msk.f32.mxu0 %vm10505_vm6, %v10501_v25 }
 0x386   : > { %9220 = vmatmul.mubr.msk.f32.gmra.mxu0 %vm618_vm1, %v2280_v59 }
 0x387   : > { %9253 = vmatprep.mubr.msk.f32.mxu0 %vm10505_vm6, %v10501_v25 }
 0x3e2   : > { %v1438_v22 = vpop.f32.mrf.mxu0 }
 0x3e3   : > { %v1543_v61 = vpop.f32.mrf.mxu1 }
 0x3e4   : > { %v11247_v62 = vadd.f32 %v1543_v61, %v1438_v22  ;;  %v9028_v63 = vpop.f32.mrf.mxu0 }
 0x3e5   : > { %v9051_v0 = vpop.f32.mrf.mxu1 }
 0x3ee   : > { %v1443_v23 = vpop.f32.mrf.mxu0 }
 0x3ef   : > { %v1548_v1 = vpop.f32.mrf.mxu1 }
 0x3f0   : > { %v11249_v4 = vadd.f32 %v1548_v1, %v1443_v23  ;;  %v9031_v5 = vpop.f32.mrf.mxu0 }
 0x3f1   : > { %v9054_v6 = vpop.f32.mrf.mxu1 }
 0x3f2   : > { %v1448_v9 = vpop.f32.mrf.mxu0 }
 0x3f3   : > { %v1553_v30 = vpop.f32.mrf.mxu1 }
 0x3f4   : > { %v1554_v13 = vadd.f32 %v1553_v30, %v1448_v9  ;;  %v9034_v31 = vpop.f32.mrf.mxu0 }
 0x3f5   : > { %v9057_v14 = vpop.f32.mrf.mxu1 }
 0x3f6   : > { %v1453_v15 = vpop.f32.mrf.mxu0 }
 0x3f7   : > { %v1558_v16 = vpop.f32.mrf.mxu1 }
 0x3f8   : > { %v1559_v19 = vadd.f32 %v1558_v16, %v1453_v15  ;;  %v9037_v8 = vpop.f32.mrf.mxu0 }
 0x3f9   : > { %v9060_v35 = vpop.f32.mrf.mxu1 }
 0x3fa   : > { %v1652_v20 = vpop.f32.mrf.mxu0 }
 0x3fb   : > { %v1771_v34 = vpop.f32.mrf.mxu1  ;;  %v1676_v31 = vadd.f32 %v1652_v20, %v11179_v46 }
 0x3fc   : > { %v9071_v21 = vpop.f32.mrf.mxu0 }
 0x3fd   : > { %v9094_v24 = vpop.f32.mrf.mxu1  ;;  %v1795_v8 = vadd.f32 %v1771_v34, %v1676_v31 }
 0x3fe   : > { %v1657_v26 = vpop.f32.mrf.mxu0 }
 0x3ff   : > { %v1776_v27 = vpop.f32.mrf.mxu1  ;;  %v1677_v35 = vadd.f32 %v1657_v26, %v11247_v62 }
 0x400   : > { %v9074_v28 = vpop.f32.mrf.mxu0 }
 0x401   : > { %v9097_v29 = vpop.f32.mrf.mxu1 }
 0x402   : > { %v1662_v32 = vpop.f32.mrf.mxu0 }
 0x403   : > { %v11251_v39 = vpop.f32.mrf.mxu1 }
 0x404   : > { %v9077_v33 = vpop.f32.mrf.mxu0 }
 0x405   : > { %v9100_v38 = vpop.f32.mrf.mxu1 }
 0x406   : > { %v1667_v36 = vpop.f32.mrf.mxu0  ;;  %v1796_v38 = vadd.f32 %v1776_v27, %v1677_v35 }
 0x407   : > { %v1786_v11 = vpop.f32.mrf.mxu1  ;;  %v1679_v37 = vadd.f32 %v1667_v36, %v1554_v13  ;;  %v1678_v36 = vadd.f32 %v1662_v32, %v11249_v4 }
 0x408   : > { %v9080_v40 = vpop.f32.mrf.mxu0 }
 0x409   : > { %v9103_v41 = vpop.f32.mrf.mxu1  ;;  %v1798_v42 = vadd.f32 %v1786_v11, %v1679_v37  ;;  %v1797_v34 = vadd.f32 %v11251_v39, %v1678_v36  ;;  %v2523_v36 = vld [vmem:[%s13548_s6 + $0x28] sm:$0xff] }
 0x40a   : > { %v1672_v43 = vpop.f32.mrf.mxu0 }
 0x40b   : > { %v1791_v10 = vpop.f32.mrf.mxu1  ;;  %v1680_v3 = vadd.f32 %v1672_v43, %v1559_v19 }
 0x40c   : > { %v9083_v44 = vpop.f32.mrf.mxu0 }
 0x40d   : > { %v9106_v45 = vpop.f32.mrf.mxu1  ;;  %v1799_v2 = vadd.f32 %v1791_v10, %v1680_v3 }
 0x40e   : > { %v1890_v47 = vpop.f32.mrf.mxu0 }
 0x40f   : > { %v2009_v48 = vpop.f32.mrf.mxu1  ;;  %v1914_v28 = vadd.f32 %v1890_v47, %v1795_v8  ;;  %v11266_v47 = vld [vmem:[%s13547_s5] ss:$0 sm:$0xff] }
 0x410   : > { %v9117_v17 = vpop.f32.mrf.mxu0  ;;  %v2467_v8 = vld [vmem:[%s13555_s13 + $0x20] sm:$0xf] }
 0x411   : > { %v9140_v49 = vpop.f32.mrf.mxu1  ;;  %v2033_v46 = vadd.f32 %v2009_v48, %v1914_v28  ;;  %vm2472_vm13 = vcmp.gt.f32.partialorder %v2467_v8, 0.0  ;;  %v2525_v28 = vld [vmem:[%s13548_s6 + $0x38] sm:$0xff]  ;;  %v2861_v8 = vld [vmem:[%s13548_s6 + $0x68] sm:$0xff] }
 0x412   : > { %v1895_v50 = vpop.f32.mrf.mxu0  ;;  %9223 = vmatpush3.msra.mxu1 %v2525_v28 }
 0x413   : > { %v2014_v51 = vpop.f32.mrf.mxu1  ;;  %v1915_v20 = vadd.f32 %v1895_v50, %v1796_v38  ;;  %9224 = vmatprep.subr.mxu1 %v10501_v25 }
 0x414   : > { %v9120_v7 = vpop.f32.mrf.mxu0 }
 0x415   : > { %v9143_v52 = vpop.f32.mrf.mxu1  ;;  %v2034_v43 = vadd.f32 %v2014_v51, %v1915_v20 }
 0x416   : > { %v1900_v12 = vpop.f32.mrf.mxu0 }
 0x417   : > { %v2019_v18 = vpop.f32.mrf.mxu1  ;;  %v1916_v10 = vadd.f32 %v1900_v12, %v1797_v34 }
 0x418   : > { %v9123_v53 = vpop.f32.mrf.mxu0 }
 0x419   : > { %v9146_v54 = vpop.f32.mrf.mxu1  ;;  %v2035_v48 = vadd.f32 %v2019_v18, %v1916_v10 }
 0x41a   : > { %v1905_v55 = vpop.f32.mrf.mxu0 }
 0x41b   : > { %v2024_v56 = vpop.f32.mrf.mxu1  ;;  %v1917_v57 = vadd.f32 %v1905_v55, %v1798_v42 }
 0x41c   : > { %v9126_v58 = vpop.f32.mrf.mxu0 }
 0x41d   : > { %v9149_v59 = vpop.f32.mrf.mxu1  ;;  %v11253_v22 = vadd.f32 %v2024_v56, %v1917_v57 }
 0x41e   : > { %v1910_v61 = vpop.f32.mrf.mxu0 }
 0x41f   : > { %v2029_v63 = vpop.f32.mrf.mxu1  ;;  %v1918_v0 = vadd.f32 %v1910_v61, %v1799_v2 }
 0x420   : > { %v9129_v23 = vpop.f32.mrf.mxu0 }
 0x421   : > { %v9152_v1 = vpop.f32.mrf.mxu1  ;;  %v2037_v5 = vadd.f32 %v2029_v63, %v1918_v0 }
 0x422   : > { %v2128_v6 = vpop.f32.mrf.mxu0 }
 0x423   : > { %v2247_v9 = vpop.f32.mrf.mxu1  ;;  %v2152_v42 = vadd.f32 %v2128_v6, %v2033_v46  ;;  %v2522_v46 = vld [vmem:[%s13548_s6 + $0x20] sm:$0xff] }
 0x424   : > { %v9163_v30 = vpop.f32.mrf.mxu0 }
 0x425   : > { %v9186_v13 = vpop.f32.mrf.mxu1  ;;  %v2271_v45 = vadd.f32 %v2247_v9, %v2152_v42  ;;  %v2464_v9 = vld [vmem:[%s13555_s13 + $0x8] sm:$0xff]  ;;  %v2466_v42 = vld [vmem:[%s13555_s13 + $0x18] sm:$0xff] }
 0x426   : > { %v2133_v14 = vpop.f32.mrf.mxu0  ;;  %vm2469_vm0 = vcmp.gt.f32.partialorder %v2464_v9, 0.0  ;;  %vm2471_vm14 = vcmp.gt.f32.partialorder %v2466_v42, 0.0  ;;  %v2982_v42 = vld [vmem:[%s13548_s6 + $0x98] sm:$0xff] }
 0x427   : > { %v2252_v15 = vpop.f32.mrf.mxu1  ;;  %v2153_v4 = vadd.f32 %v2133_v14, %v2034_v43  ;;  %v2465_v14 = vld [vmem:[%s13555_s13 + $0x10] sm:$0xff] }
 0x428   : > { %v9166_v16 = vpop.f32.mrf.mxu0  ;;  %vm2470_vm11 = vcmp.gt.f32.partialorder %v2465_v14, 0.0 }
 0x429   : > { %v9189_v19 = vpop.f32.mrf.mxu1  ;;  %v2272_v49 = vadd.f32 %v2252_v15, %v2153_v4  ;;  %v11296_v15 = vsel %vm2469_vm0, 1, %v10506_v60  ;;  %v11300_v16 = vsel %vm2470_vm11, 1, %v10506_v60 }
 0x42a   : > { %v2138_v21 = vpop.f32.mrf.mxu0  ;;  %v2463_v19 = vld [vmem:[%s13555_s13] sm:$0xff] }
 0x42b   : > { %v2257_v24 = vpop.f32.mrf.mxu1  ;;  %v2154_v50 = vadd.f32 %v2138_v21, %v2035_v48  ;;  %vm2468_vm12 = vcmp.gt.f32.partialorder %v2463_v19, 0.0  ;;  %v2477_v21 = vsel %vm2472_vm13, 1, %v10506_v60 }
 0x42c   : > { %v9169_v29 = vpop.f32.mrf.mxu0  ;;  %v11310_v35 = vsel %vm2468_vm12, 1, %v10506_v60 }
 0x42d   : > { %v9192_v33 = vpop.f32.mrf.mxu1  ;;  %v2273_v54 = vadd.f32 %v2257_v24, %v2154_v50  ;;  %v2516_v29 = vld [vmem:[%s13548_s6 + $0x18] sm:$0xff] }
 0x42e   : > { %v11258_v11 = vpop.f32.mrf.mxu0  ;;  %9246 = vmatpush3.msra.mxu0 %v2516_v29  ;;  %v2524_v33 = vld [vmem:[%s13548_s6 + $0x30] sm:$0xff] }
 0x42f   : > { %v11260_v37 = vpop.f32.mrf.mxu1  ;;  %v2155_v24 = vadd.f32 %v11258_v11, %v11253_v22  ;;  %9247 = vmatprep.subr.mxu0 %v10501_v25  ;;  %v2515_v22 = vld [vmem:[%s13548_s6 + $0x10] sm:$0xff]  ;;  %9225 = vmatpush3.msra.mxu1 %v2524_v33  ;;  %v2514_v11 = vld [vmem:[%s13548_s6 + $0x8] sm:$0xff] }
 0x430   : > { %v9172_v40 = vpop.f32.mrf.mxu0  ;;  %9248 = vmatpush3.msra.mxu0 %v2515_v22  ;;  %9226 = vmatprep.subr.mxu1 %v10501_v25 }
 0x431   : > { %v9195_v41 = vpop.f32.mrf.mxu1  ;;  %v2274_v38 = vadd.f32 %v11260_v37, %v2155_v24  ;;  %9249 = vmatprep.subr.mxu0 %v10501_v25  ;;  %v2513_v37 = vld [vmem:[%s13548_s6] sm:$0xff]  ;;  %9227 = vmatpush3.msra.mxu1 %v2523_v36 }
 0x432   : > { %v2148_v62 = vpop.f32.mrf.mxu0  ;;  %9250 = vmatpush3.msra.mxu0 %v2514_v11  ;;  %9228 = vmatprep.subr.mxu1 %v10501_v25  ;;  %v2860_v24 = vld [vmem:[%s13548_s6 + $0x60] sm:$0xff] }
 0x433   : > { %v2267_v26 = vpop.f32.mrf.mxu1  ;;  %v2156_v3 = vadd.f32 %v2148_v62, %v2037_v5  ;;  %9251 = vmatprep.subr.mxu0 %v10501_v25  ;;  %9229 = vmatpush3.msra.mxu1 %v2522_v46  ;;  %v11359_v62 = vsel %vm2471_vm14, 1, %v10506_v60 }
 0x434   : > { %v9175_v44 = vpop.f32.mrf.mxu0  ;;  %9252 = vmatpush3.msra.mxu0 %v2513_v37  ;;  %9268 = vmatprep.subr.mxu1 %v10501_v25 }
 0x435   : > { %v9198_v27 = vpop.f32.mrf.mxu1  ;;  %v2275_v32 = vadd.f32 %v2267_v26, %v2156_v3  ;;  %9291 = vmatprep.subr.mxu0 %v10501_v25 }
 0x436   : > { %v2366_v2 = vpop.f32.mrf.mxu0 }
 0x437   : > { %v2390_v17 = vadd.f32 %v2366_v2, %v2271_v45 }
 0x438   : > { %v9209_v39 = vpop.f32.mrf.mxu0 }
 0x439   : > { %v11269_v51 = vadd.f32 %v11266_v47, %v2390_v17 }
 0x43a   : > { %v2371_v7 = vpop.f32.mrf.mxu0 }
 0x43b   : > { %v2391_v52 = vadd.f32 %v2371_v7, %v2272_v49  ;;  %v2407_v12 = vmul.f32 %v11269_v51, %v11269_v51 }
 0x43c   : > { %v9212_v53 = vpop.f32.mrf.mxu0 }
 0x43d   : > { %v11274_v55 = vadd.f32 %v11266_v47, %v2391_v52  ;;  %v2412_v56 = vsel %vm618_vm1, %v2407_v12, 0.0 }
 0x43e   : > { %v2376_v18 = vpop.f32.mrf.mxu0  ;;  %2413 = vadd.xlane.f32.xlu1 %v2412_v56 }
 0x43f   : > { %v2392_v57 = vadd.f32 %v2376_v18, %v2273_v54  ;;  %v2408_v58 = vmul.f32 %v11274_v55, %v11274_v55 }
 0x440   : > { %v9215_v59 = vpop.f32.mrf.mxu0 }
 0x441   : > { %v11280_v61 = vadd.f32 %v11266_v47, %v2392_v57  ;;  %v2415_v63 = vsel %vm618_vm1, %v2408_v58, 0.0 }
 0x442   : > { %v2381_v0 = vpop.f32.mrf.mxu0  ;;  %2416 = vadd.xlane.f32.xlu0 %v2415_v63 }
 0x443   : > { %v2409_v23 = vmul.f32 %v11280_v61, %v11280_v61  ;;  %v2393_v20 = vadd.f32 %v2381_v0, %v2274_v38 }
 0x444   : > { %v9218_v1 = vpop.f32.mrf.mxu0 }
 0x445   : > { %v2418_v5 = vsel %vm618_vm1, %v2409_v23, 0.0  ;;  %v11350_v40 = vadd.f32 %v11266_v47, %v2393_v20 }
 0x446   : > { %v2386_v6 = vpop.f32.mrf.mxu0  ;;  %2419 = vadd.xlane.f32.xlu0 %v2418_v5  ;;  %v2863_v5 = vld [vmem:[%s13548_s6 + $0x78] sm:$0xff] }
 0x447   : > { %v2394_v30 = vadd.f32 %v2386_v6, %v2275_v32  ;;  %v2410_v41 = vmul.f32 %v11350_v40, %v11350_v40 }
 0x448   : > { %v9221_v13 = vpop.f32.mrf.mxu0 }
 0x449   : > { %v11290_v31 = vadd.f32 %v11266_v47, %v2394_v30  ;;  %v2421_v34 = vsel %vm618_vm1, %v2410_v41, 0.0  ;;  %v2862_v30 = vld [vmem:[%s13548_s6 + $0x70] sm:$0xff]  ;;  %v2742_v13 = vld [vmem:[%s13548_s6 + $0x48] sm:$0xff] }
 0x44b   : > { %v2411_v26 = vmul.f32 %v11290_v31, %v11290_v31 }
 0x44d   : > { %v2425_v43 = vsel %vm2424_vm15, %v2411_v26, 0.0 }
 0x44f   : > { %2482 = vperm.xlu1 %10378, %v11296_v15  }
 0x453   : > { %2485 = vperm.xlu1 %10378, %v11300_v16  }
 0x45c   : > { %2479 = vperm.xlu0 %10377, %v11310_v35  }
 0x460   : > { %2491 = vperm.xlu0 %10377, %v2477_v21   ;;  %v2741_v21 = vld [vmem:[%s13548_s6 + $0x40] sm:$0xff] }
 0x477   : > { %2422 = vadd.xlane.f32.xlu1 %v2421_v34 }
 0x488   : > { %2488 = vperm.xlu1 %10378, %v11359_v62  }
 0x4ac   : > { %2426 = vadd.xlane.f32.xlu1 %v2425_v43 }
 0x4c7   : > { %v2414_v10 = vpop.xlane.xlu1 %2413 }
 0x4c8   : > { %v2428_v3 = vmul.f32 0.03125, %v2414_v10  ;;  %v3101_v10 = vld [vmem:[%s13548_s6 + $0xb8] sm:$0xff] }
 0x4ca   : > { %v2433_v44 = vadd.f32 1e-08, %v2428_v3  ;;  %v2981_v3 = vld [vmem:[%s13548_s6 + $0x90] sm:$0xff] }
 0x4cb   : > { %v2417_v27 = vpop.xlane.xlu0 %2416  ;;  %v2483_v7 = vpop.permute.xlu1 %2482 }
 0x4cc   : > { %10419 = vrsqrt.f32 %v2433_v44  ;;  %v2429_v45 = vmul.f32 0.03125, %v2417_v27  ;;  %vm2494_vm5 = vcmp.eq.s32.totalorder %v2483_v7, 1 }
 0x4ce   : > { %v2434_v4 = vadd.f32 1e-08, %v2429_v45  ;;  %v3100_v45 = vld [vmem:[%s13548_s6 + $0xb0] sm:$0xff] }
 0x4cf   : > { %v2420_v32 = vpop.xlane.xlu0 %2419 }
 0x4d0   : > { %10421 = vrsqrt.f32 %v2434_v4  ;;  %v2430_v2 = vmul.f32 0.03125, %v2420_v32  ;;  %v2980_v4 = vld [vmem:[%s13548_s6 + $0x88] sm:$0xff] }
 0x4d2   : > { %v2435_v47 = vadd.f32 1e-08, %v2430_v2 }
 0x4d4   : > { %10423 = vrsqrt.f32 %v2435_v47  ;;  %v3099_v47 = vld [vmem:[%s13548_s6 + $0xa8] sm:$0xff] }
 0x4d7   : > { %v2480_v17 = vpop.permute.xlu0 %2479 }
 0x4d8   : > { %vm2493_vm3 = vcmp.eq.s32.totalorder %v2480_v17, 1 }
 0x4d9   : > { %v10420_v48 = vpop.eup %10419 }
 0x4da   : > { %v2443_v39 = vmul.f32 %v10420_v48, %v11269_v51  ;;  %v2486_v51 = vpop.permute.xlu1 %2485  ;;  %v2979_v48 = vld [vmem:[%s13548_s6 + $0x80] sm:$0xff] }
 0x4db   : > { %vm2495_vm8 = vcmp.eq.s32.totalorder %v2486_v51, 1 }
 0x4dc   : > { %vm2448_vm2 = vcmp.ge.f32.partialorder %v2443_v39, 0.0  ;;  %v2453_v49 = vmul.f32 0.1, %v2443_v39 }
 0x4dd   : > { %v10422_v50 = vpop.eup %10421 }
 0x4de   : > { %v2444_v52 = vmul.f32 %v10422_v50, %v11274_v55  ;;  %v2458_v12 = vsel %vm2448_vm2, %v2443_v39, %v2453_v49  ;;  %v2744_v55 = vld [vmem:[%s13548_s6 + $0x58] sm:$0xff]  ;;  %v3098_v50 = vld [vmem:[%s13548_s6 + $0xa0] sm:$0xff] }
 0x4df   : > { %v2498_v53 = vsel %vm2493_vm3, %v2458_v12, 0.0 }
 0x4e0   : > { %vm2449_vm4 = vcmp.ge.f32.partialorder %v2444_v52, 0.0  ;;  %v2454_v54 = vmul.f32 0.1, %v2444_v52  ;;  %2503 = vst.msk [vmem:[#allocation2 + $0x7] sm:$0xff] %vm618_vm1, %v2498_v53  ;;  %v3220_v53 = vld [vmem:[%s13548_s6 + $0xd8] sm:$0xff] }
 0x4e1   : > { %v10424_v56 = vpop.eup %10423 }
 0x4e2   : > { %v2459_v18 = vsel %vm2449_vm4, %v2444_v52, %v2454_v54  ;;  %v2445_v57 = vmul.f32 %v10424_v56, %v11280_v61  ;;  %v2743_v61 = vld [vmem:[%s13548_s6 + $0x50] sm:$0xff] }
 0x4e3   : > { %v2499_v58 = vsel %vm2494_vm5, %v2459_v18, 0.0  ;;  %v3219_v56 = vld [vmem:[%s13548_s6 + $0xd0] sm:$0xff]  ;;  %v3218_v18 = vld [vmem:[%s13548_s6 + $0xc8] sm:$0xff]  ;;  %vm3729_vm5 = vcmask 1043456  }
 0x4e4   : > { %2504 = vst.msk [vmem:[#allocation2 + $0xf] sm:$0xff] %vm618_vm1, %v2499_v58  ;;  %vm2450_vm7 = vcmp.ge.f32.partialorder %v2445_v57, 0.0  ;;  %v2455_v59 = vmul.f32 0.1, %v2445_v57  ;;  %v3217_v58 = vld [vmem:[%s13548_s6 + $0xc0] sm:$0xff] }
 0x4e6   : > { %v2460_v63 = vsel %vm2450_vm7, %v2445_v57, %v2455_v59 }
 0x4e7   : > { %v2500_v0 = vsel %vm2495_vm8, %v2460_v63, 0.0  ;;  %v2517_v23 = vld [vmem:[#allocation2 + $0x1] sm:$0xff] }
 0x4e8   : > { %v2508_v1 = vld [vmem:[#allocation2] sm:$0xff]  ;;  %2505 = vst.msk [vmem:[#allocation2 + $0x17] sm:$0xff] %vm618_vm1, %v2500_v0  ;;  %9231 = vmatmul.mubr.msk.f32.vlgmr.msra.gmra.mxu1 %vm618_vm1, %v2517_v23  ;;  %v2492_v0 = vpop.permute.xlu0 %2491 }
 0x4e9   : > { %9254 = vmatmul.mubr.msk.f32.vlgmr.msra.gmra.mxu0 %vm618_vm1, %v2508_v1  ;;  %9233 = vmatprep.mubr.msk.f32.mxu1 %vm10505_vm6, %v10501_v25  ;;  %v2736_v26 = vld [vmem:[#allocation2 + $0x2] sm:$0xff]  ;;  %vm2497_vm11 = vcmp.eq.s32.totalorder %v2492_v0, 1 }
 0x4ea   : > { %9256 = vmatprep.mubr.msk.f32.mxu0 %vm10505_vm6, %v10501_v25  ;;  %9269 = vmatpush3.msra.mxu1 %v2744_v55  ;;  %v2855_v43 = vld [vmem:[#allocation2 + $0x6] sm:$0xff] }
 0x4eb   : > { %9292 = vmatpush3.msra.mxu0 %v2863_v5  ;;  %v2518_v6 = vld [vmem:[#allocation2 + $0x9] sm:$0xff]  ;;  %9270 = vmatprep.subr.mxu1 %v10501_v25 }
 0x4ec   : > { %v11386_v9 = vld [vmem:[#allocation2 + $0x8] sm:$0xff]  ;;  %9293 = vmatprep.subr.mxu0 %v10501_v25  ;;  %9234 = vmatmul.mubr.msk.f32.gmra.mxu1 %vm618_vm1, %v2518_v6 }
 0x4ed   : > { %9257 = vmatmul.mubr.msk.f32.gmra.mxu0 %vm618_vm1, %v11386_v9  ;;  %9236 = vmatprep.mubr.msk.f32.mxu1 %vm10505_vm6, %v10501_v25  ;;  %v2737_v44 = vld [vmem:[#allocation2 + $0xa] sm:$0xff] }
 0x4ee   : > { %9259 = vmatprep.mubr.msk.f32.mxu0 %vm10505_vm6, %v10501_v25  ;;  %9271 = vmatpush3.msra.mxu1 %v2743_v61  ;;  %v11459_v27 = vld [vmem:[#allocation2 + $0xe] sm:$0xff] }
 0x4ef   : > { %9294 = vmatpush3.msra.mxu0 %v2862_v30  ;;  %v2519_v14 = vld [vmem:[#allocation2 + $0x11] sm:$0xff]  ;;  %9272 = vmatprep.subr.mxu1 %v10501_v25  ;;  %v2974_v54 = vld [vmem:[#allocation2 + $0x7] sm:$0xff] }
 0x4f0   : > { %v11403_v19 = vld [vmem:[#allocation2 + $0x10] sm:$0xff]  ;;  %9295 = vmatprep.subr.mxu0 %v10501_v25  ;;  %9237 = vmatmul.mubr.msk.f32.gmra.mxu1 %vm618_vm1, %v2519_v14  ;;  %v3339_v30 = vld [vmem:[%s13548_s6 + $0xf8] sm:$0xff] }
 0x4f1   : > { %9260 = vmatmul.mubr.msk.f32.gmra.mxu0 %vm618_vm1, %v11403_v19  ;;  %9239 = vmatprep.mubr.msk.f32.mxu1 %vm10505_vm6, %v10501_v25  ;;  %v2738_v32 = vld [vmem:[#allocation2 + $0x12] sm:$0xff] }
 0x4f2   : > { %9262 = vmatprep.mubr.msk.f32.mxu0 %vm10505_vm6, %v10501_v25  ;;  %9273 = vmatpush3.msra.mxu1 %v2742_v13  ;;  %v11476_v2 = vld [vmem:[#allocation2 + $0x16] sm:$0xff] }
 0x4f3   : > { %9296 = vmatpush3.msra.mxu0 %v2861_v8  ;;  %9274 = vmatprep.subr.mxu1 %v10501_v25  ;;  %v2975_v57 = vld [vmem:[#allocation2 + $0xf] sm:$0xff]  ;;  %v2976_v51 = vld [vmem:[#allocation2 + $0x17] sm:$0xff] }
 0x4f4   : > { %9297 = vmatprep.subr.mxu0 %v10501_v25  ;;  %9275 = vmatpush3.msra.mxu1 %v2741_v21  ;;  %v3458_v13 = vld [vmem:[%s13548_s6 + $0x118] sm:$0xff]  ;;  %v3338_v8 = vld [vmem:[%s13548_s6 + $0xf0] sm:$0xff] }
 0x4f5   : > { %9298 = vmatpush3.msra.mxu0 %v2860_v24  ;;  %9314 = vmatprep.subr.mxu1 %v10501_v25  ;;  %v3213_v14 = vld [vmem:[#allocation2 + $0x14] sm:$0xff]  ;;  %v3337_v24 = vld [vmem:[%s13548_s6 + $0xe8] sm:$0xff] }
 0x4f6   : > { %9337 = vmatprep.subr.mxu0 %v10501_v25 }
 0x500   : > { %v2423_v28 = vpop.xlane.xlu1 %2422 }
 0x501   : > { %v2431_v29 = vmul.f32 0.03125, %v2423_v28  ;;  %v3336_v28 = vld [vmem:[%s13548_s6 + $0xe0] sm:$0xff] }
 0x503   : > { %v2436_v33 = vadd.f32 1e-08, %v2431_v29 }
 0x504   : > { %v2489_v36 = vpop.permute.xlu1 %2488 }
 0x505   : > { %10425 = vrsqrt.f32 %v2436_v33  ;;  %vm2496_vm10 = vcmp.eq.s32.totalorder %v2489_v36, 1 }
 0x512   : > { %v10426_v22 = vpop.eup %10425 }
 0x513   : > { %v2446_v38 = vmul.f32 %v10426_v22, %v11350_v40  ;;  %v3455_v22 = vld [vmem:[%s13548_s6 + $0x100] sm:$0xff] }
 0x515   : > { %vm2451_vm9 = vcmp.ge.f32.partialorder %v2446_v38, 0.0  ;;  %v2456_v11 = vmul.f32 0.1, %v2446_v38 }
 0x517   : > { %v2461_v46 = vsel %vm2451_vm9, %v2446_v38, %v2456_v11  ;;  %v3216_v38 = vld [vmem:[#allocation2 + $0x2c] sm:$0xf] }
 0x518   : > { %v2501_v37 = vsel %vm2496_vm10, %v2461_v46, 0.0  ;;  %v3331_v11 = vld [vmem:[#allocation2 + $0xd] sm:$0xff]  ;;  %v3332_v46 = vld [vmem:[#allocation2 + $0x15] sm:$0xff] }
 0x519   : > { %2506 = vst.msk [vmem:[#allocation2 + $0x1f] sm:$0xff] %vm618_vm1, %v2501_v37 }
 0x520   : > { %v2520_v20 = vld [vmem:[#allocation2 + $0x19] sm:$0xff]  ;;  %v2521_v40 = vld [vmem:[#allocation2 + $0x21] sm:$0xf] }
 0x521   : > { %v11429_v41 = vld [vmem:[#allocation2 + $0x18] sm:$0xff]  ;;  %9240 = vmatmul.mubr.msk.f32.gmra.mxu1 %vm618_vm1, %v2520_v20  ;;  %v2512_v34 = vld [vmem:[#allocation2 + $0x20] sm:$0xf] }
 0x522   : > { %9263 = vmatmul.mubr.msk.f32.gmra.mxu0 %vm618_vm1, %v11429_v41  ;;  %9242 = vmatprep.mubr.msk.f32.mxu1 %vm10505_vm6, %v10501_v25  ;;  %v2739_v17 = vld [vmem:[#allocation2 + $0x1a] sm:$0xff]  ;;  %v2740_v12 = vld [vmem:[#allocation2 + $0x22] sm:$0xf] }
 0x523   : > { %9265 = vmatprep.mubr.msk.f32.mxu0 %vm10505_vm6, %v10501_v25  ;;  %v11493_v39 = vld [vmem:[#allocation2 + $0x1e] sm:$0xff] }
 0x524   : > { %v2977_v55 = vld [vmem:[#allocation2 + $0x1f] sm:$0xff] }
 0x525   : > { %9243 = vmatmul.mubr.msk.f32.gmra.mxu1 %vm618_vm1, %v2521_v40  ;;  %v3214_v21 = vld [vmem:[#allocation2 + $0x1c] sm:$0xff]  ;;  %v3335_v40 = vld [vmem:[#allocation2 + $0x2d] sm:$0xf] }
 0x526   : > { %9266 = vmatmul.mubr.msk.f32.gmra.mxu0 %vm618_vm1, %v2512_v34  ;;  %9276 = vmatprep.mubr.msk.f32.mxu1 %vm10505_vm6, %v10501_v25  ;;  %v3333_v37 = vld [vmem:[#allocation2 + $0x1d] sm:$0xff]  ;;  %v3454_v34 = vld [vmem:[#allocation2 + $0x2e] sm:$0xf] }
 0x527   : > { %9299 = vmatprep.mubr.msk.f32.mxu0 %vm10505_vm6, %v10501_v25 }
 0x529   : > { %9277 = vmatmul.mubr.msk.f32.vlgmr.msra.gmra.mxu1 %vm618_vm1, %v2736_v26 }
 0x52a   : > { %9300 = vmatmul.mubr.msk.f32.vlgmr.msra.gmra.mxu0 %vm618_vm1, %v2855_v43  ;;  %9279 = vmatprep.mubr.msk.f32.mxu1 %vm10505_vm6, %v10501_v25 }
 0x52b   : > { %9302 = vmatprep.mubr.msk.f32.mxu0 %vm10505_vm6, %v10501_v25  ;;  %9315 = vmatpush3.msra.mxu1 %v2982_v42 }
 0x52c   : > { %9338 = vmatpush3.msra.mxu0 %v3101_v10  ;;  %9316 = vmatprep.subr.mxu1 %v10501_v25 }
 0x52d   : > { %9339 = vmatprep.subr.mxu0 %v10501_v25  ;;  %9280 = vmatmul.mubr.msk.f32.gmra.mxu1 %vm618_vm1, %v2737_v44 }
 0x52e   : > { %9303 = vmatmul.mubr.msk.f32.gmra.mxu0 %vm618_vm1, %v11459_v27  ;;  %9282 = vmatprep.mubr.msk.f32.mxu1 %vm10505_vm6, %v10501_v25 }
 0x52f   : > { %9305 = vmatprep.mubr.msk.f32.mxu0 %vm10505_vm6, %v10501_v25  ;;  %9317 = vmatpush3.msra.mxu1 %v2981_v3 }
 0x530   : > { %9340 = vmatpush3.msra.mxu0 %v3100_v45  ;;  %9318 = vmatprep.subr.mxu1 %v10501_v25 }
 0x531   : > { %9341 = vmatprep.subr.mxu0 %v10501_v25  ;;  %9283 = vmatmul.mubr.msk.f32.gmra.mxu1 %vm618_vm1, %v2738_v32 }
 0x532   : > { %9306 = vmatmul.mubr.msk.f32.gmra.mxu0 %vm618_vm1, %v11476_v2  ;;  %9285 = vmatprep.mubr.msk.f32.mxu1 %vm10505_vm6, %v10501_v25 }
 0x533   : > { %9308 = vmatprep.mubr.msk.f32.mxu0 %vm10505_vm6, %v10501_v25  ;;  %9319 = vmatpush3.msra.mxu1 %v2980_v4 }
 0x534   : > { %9342 = vmatpush3.msra.mxu0 %v3099_v47  ;;  %9320 = vmatprep.subr.mxu1 %v10501_v25 }
 0x535   : > { %9343 = vmatprep.subr.mxu0 %v10501_v25  ;;  %9286 = vmatmul.mubr.msk.f32.gmra.mxu1 %vm618_vm1, %v2739_v17  ;;  %v2427_v49 = vpop.xlane.xlu1 %2426 }
 0x536   : > { %9309 = vmatmul.mubr.msk.f32.gmra.mxu0 %vm618_vm1, %v11493_v39  ;;  %v2432_v7 = vmul.f32 0.03125, %v2427_v49  ;;  %9288 = vmatprep.mubr.msk.f32.mxu1 %vm10505_vm6, %v10501_v25 }
 0x537   : > { %9321 = vmatpush3.msra.mxu1 %v2979_v48  ;;  %9311 = vmatprep.mubr.msk.f32.mxu0 %vm10505_vm6, %v10501_v25 }
 0x538   : > { %9360 = vmatprep.subr.mxu1 %v10501_v25  ;;  %v2437_v52 = vadd.f32 1e-08, %v2432_v7  ;;  %9344 = vmatpush3.msra.mxu0 %v3098_v50 }
 0x539   : > { %9289 = vmatmul.mubr.msk.f32.gmra.mxu1 %vm618_vm1, %v2740_v12  ;;  %9383 = vmatprep.subr.mxu0 %v10501_v25 }
 0x53a   : > { %10427 = vrsqrt.f32 %v2437_v52  ;;  %9322 = vmatprep.mubr.msk.f32.mxu1 %vm10505_vm6, %v10501_v25 }
 0x53d   : > { %9323 = vmatmul.mubr.msk.f32.vlgmr.msra.gmra.mxu1 %vm618_vm1, %v2974_v54 }
 0x53e   : > { %9325 = vmatprep.mubr.msk.f32.mxu1 %vm10505_vm6, %v10501_v25  ;;  %9361 = vmatpush3.msra.mxu1 %v3220_v53 }
 0x53f   : > { %9362 = vmatprep.subr.mxu1 %v10501_v25 }
 0x540   : > { %9363 = vmatpush3.msra.mxu1 %v3219_v56 }
 0x541   : > { %9326 = vmatmul.mubr.msk.f32.gmra.mxu1 %vm618_vm1, %v2975_v57  ;;  %9364 = vmatprep.subr.mxu1 %v10501_v25 }
 0x542   : > { %9328 = vmatprep.mubr.msk.f32.mxu1 %vm10505_vm6, %v10501_v25  ;;  %9365 = vmatpush3.msra.mxu1 %v3218_v18 }
 0x543   : > { %9366 = vmatprep.subr.mxu1 %v10501_v25 }
 0x544   : > { %9367 = vmatpush3.msra.mxu1 %v3217_v58 }
 0x545   : > { %9329 = vmatmul.mubr.msk.f32.gmra.mxu1 %vm618_vm1, %v2976_v51  ;;  %9406 = vmatprep.subr.mxu1 %v10501_v25 }
 0x546   : > { %9331 = vmatprep.mubr.msk.f32.mxu1 %vm10505_vm6, %v10501_v25 }
 0x547   : > { %v10428_v59 = vpop.eup %10427 }
 0x548   : > { %v2447_v63 = vmul.f32 %v10428_v59, %v11290_v31  ;;  %v3212_v31 = vld [vmem:[#allocation2 + $0xc] sm:$0xff] }
 0x549   : > { %9332 = vmatmul.mubr.msk.f32.gmra.mxu1 %vm618_vm1, %v2977_v55 }
 0x54a   : > { %vm2452_vm0 = vcmp.ge.f32.partialorder %v2447_v63, 0.0  ;;  %v2457_v23 = vmul.f32 0.1, %v2447_v63  ;;  %9334 = vmatprep.mubr.msk.f32.mxu1 %vm10505_vm6, %v10501_v25 }
 0x54c   : > { %v2462_v1 = vsel %vm2452_vm0, %v2447_v63, %v2457_v23 }
 0x54d   : > { %v2502_v5 = vsel %vm2497_vm11, %v2462_v1, 0.0 }
 0x54e   : > { %2507 = vst.msk [vmem:[#allocation2 + $0x27] sm:$0xf] %vm2424_vm15, %v2502_v5 }
 0x555   : > { %v2859_v61 = vld [vmem:[#allocation2 + $0x26] sm:$0xf] }
 0x556   : > { %v2978_v6 = vld [vmem:[#allocation2 + $0x27] sm:$0xf]  ;;  %9312 = vmatmul.mubr.msk.f32.gmra.mxu0 %vm618_vm1, %v2859_v61 }
 0x557   : > { %9335 = vmatmul.mubr.msk.f32.gmra.mxu1 %vm618_vm1, %v2978_v6  ;;  %9345 = vmatprep.mubr.msk.f32.mxu0 %vm10505_vm6, %v10501_v25  ;;  %v3096_v29 = vld [vmem:[#allocation2 + $0x20] sm:$0xff]  ;;  %v3097_v36 = vld [vmem:[#allocation2 + $0x28] sm:$0xf] }
 0x558   : > { %9368 = vmatprep.mubr.msk.f32.mxu1 %vm10505_vm6, %v10501_v25  ;;  %v3215_v33 = vld [vmem:[#allocation2 + $0x24] sm:$0xff] }
 0x559   : > { %v3334_v20 = vld [vmem:[#allocation2 + $0x25] sm:$0xff] }
 0x55a   : > { %9346 = vmatmul.mubr.msk.f32.vlgmr.msra.gmra.mxu0 %vm618_vm1, %v11386_v9  ;;  %v3457_v9 = vld [vmem:[%s13548_s6 + $0x110] sm:$0xff] }
 0x55b   : > { %9369 = vmatmul.mubr.msk.f32.vlgmr.msra.gmra.mxu1 %vm618_vm1, %v3212_v31  ;;  %9348 = vmatprep.mubr.msk.f32.mxu0 %vm10505_vm6, %v10501_v25 }
 0x55c   : > { %9371 = vmatprep.mubr.msk.f32.mxu1 %vm10505_vm6, %v10501_v25  ;;  %9384 = vmatpush3.msra.mxu0 %v3339_v30 }
 0x55d   : > { %9407 = vmatpush3.msra.mxu1 %v3458_v13  ;;  %9385 = vmatprep.subr.mxu0 %v10501_v25 }
 0x55e   : > { %9408 = vmatprep.subr.mxu1 %v10501_v25  ;;  %9349 = vmatmul.mubr.msk.f32.gmra.mxu0 %vm618_vm1, %v11403_v19  ;;  %v3456_v19 = vld [vmem:[%s13548_s6 + $0x108] sm:$0xff] }
 0x55f   : > { %9372 = vmatmul.mubr.msk.f32.gmra.mxu1 %vm618_vm1, %v3213_v14  ;;  %9351 = vmatprep.mubr.msk.f32.mxu0 %vm10505_vm6, %v10501_v25 }
 0x560   : > { %9374 = vmatprep.mubr.msk.f32.mxu1 %vm10505_vm6, %v10501_v25  ;;  %9386 = vmatpush3.msra.mxu0 %v3338_v8 }
 0x561   : > { %9409 = vmatpush3.msra.mxu1 %v3457_v9  ;;  %9387 = vmatprep.subr.mxu0 %v10501_v25 }
 0x562   : > { %9410 = vmatprep.subr.mxu1 %v10501_v25  ;;  %9352 = vmatmul.mubr.msk.f32.gmra.mxu0 %vm618_vm1, %v11429_v41  ;;  %v3453_v41 = vld [vmem:[#allocation2 + $0x26] sm:$0xff] }
 0x563   : > { %9375 = vmatmul.mubr.msk.f32.gmra.mxu1 %vm618_vm1, %v3214_v21  ;;  %9354 = vmatprep.mubr.msk.f32.mxu0 %vm10505_vm6, %v10501_v25 }
 0x564   : > { %9377 = vmatprep.mubr.msk.f32.mxu1 %vm10505_vm6, %v10501_v25  ;;  %9388 = vmatpush3.msra.mxu0 %v3337_v24 }
 0x565   : > { %9411 = vmatpush3.msra.mxu1 %v3456_v19  ;;  %9389 = vmatprep.subr.mxu0 %v10501_v25 }
 0x566   : > { %9412 = vmatprep.subr.mxu1 %v10501_v25  ;;  %9355 = vmatmul.mubr.msk.f32.gmra.mxu0 %vm618_vm1, %v3096_v29 }
 0x567   : > { %9378 = vmatmul.mubr.msk.f32.gmra.mxu1 %vm618_vm1, %v3215_v33  ;;  %9357 = vmatprep.mubr.msk.f32.mxu0 %vm10505_vm6, %v10501_v25 }
 0x568   : > { %9380 = vmatprep.mubr.msk.f32.mxu1 %vm10505_vm6, %v10501_v25  ;;  %9390 = vmatpush3.msra.mxu0 %v3336_v28 }
 0x569   : > { %9413 = vmatpush3.msra.mxu1 %v3455_v22  ;;  %9429 = vmatprep.subr.mxu0 %v10501_v25 }
 0x56a   : > { %10353 = vmatprep.subr.mxu1 %v10501_v25  ;;  %9358 = vmatmul.mubr.msk.f32.gmra.mxu0 %vm618_vm1, %v3097_v36 }
 0x56b   : > { %9381 = vmatmul.mubr.msk.f32.gmra.mxu1 %vm618_vm1, %v3216_v38  ;;  %9391 = vmatprep.mubr.msk.f32.mxu0 %vm10505_vm6, %v10501_v25 }
 0x56c   : > { %9414 = vmatprep.mubr.msk.f32.mxu1 %vm10505_vm6, %v10501_v25 }
 0x56e   : > { %9392 = vmatmul.mubr.msk.f32.vlgmr.msra.gmra.mxu0 %vm618_vm1, %v3331_v11 }
 0x56f   : > { %9415 = vmatmul.mubr.msk.f32.vlgmr.msra.gmra.mxu1 %vm618_vm1, %v11459_v27  ;;  %9394 = vmatprep.mubr.msk.f32.mxu0 %vm10505_vm6, %v10501_v25 }
 0x570   : > { %9417 = vmatprep.mubr.msk.f32.mxu1 %vm10505_vm6, %v10501_v25 }
 0x572   : > { %9395 = vmatmul.mubr.msk.f32.gmra.mxu0 %vm618_vm1, %v3332_v46 }
 0x573   : > { %9418 = vmatmul.mubr.msk.f32.gmra.mxu1 %vm618_vm1, %v11476_v2  ;;  %9397 = vmatprep.mubr.msk.f32.mxu0 %vm10505_vm6, %v10501_v25 }
 0x574   : > { %9420 = vmatprep.mubr.msk.f32.mxu1 %vm10505_vm6, %v10501_v25 }
 0x576   : > { %9398 = vmatmul.mubr.msk.f32.gmra.mxu0 %vm618_vm1, %v3333_v37 }
 0x577   : > { %9421 = vmatmul.mubr.msk.f32.gmra.mxu1 %vm618_vm1, %v11493_v39  ;;  %9400 = vmatprep.mubr.msk.f32.mxu0 %vm10505_vm6, %v10501_v25 }
 0x578   : > { %9423 = vmatprep.mubr.msk.f32.mxu1 %vm10505_vm6, %v10501_v25 }
 0x57a   : > { %9401 = vmatmul.mubr.msk.f32.gmra.mxu0 %vm618_vm1, %v3334_v20 }
 0x57b   : > { %9424 = vmatmul.mubr.msk.f32.gmra.mxu1 %vm618_vm1, %v3453_v41  ;;  %9403 = vmatprep.mubr.msk.f32.mxu0 %vm10505_vm6, %v10501_v25 }
 0x57c   : > { %9426 = vmatprep.mubr.msk.f32.mxu1 %vm10505_vm6, %v10501_v25 }
 0x57e   : > { %9404 = vmatmul.mubr.msk.f32.gmra.mxu0 %vm618_vm1, %v3335_v40 }
 0x57f   : > { %9427 = vmatmul.mubr.msk.f32.gmra.mxu1 %vm618_vm1, %v3454_v34  ;;  %9439 = vmatprep.mubr.msk.f32.mxu0 %vm10505_vm6, %v10501_v25 }
 0x580   : > { %9460 = vmatprep.mubr.msk.f32.mxu1 %vm10505_vm6, %v10501_v25 }
 0x5a8   : > { %v2607_v42 = vpop.f32.mrf.mxu1 }
 0x5a9   : > { %v2712_v26 = vpop.f32.mrf.mxu0 }
 0x5aa   : > { %v2713_v43 = vadd.f32 %v2712_v26, %v2607_v42  ;;  %v9232_v10 = vpop.f32.mrf.mxu1 }
 0x5ab   : > { %v9255_v3 = vpop.f32.mrf.mxu0 }
 0x5ac   : > { %v2612_v44 = vpop.f32.mrf.mxu1 }
 0x5ad   : > { %v2717_v27 = vpop.f32.mrf.mxu0 }
 0x5ae   : > { %v2718_v45 = vadd.f32 %v2717_v27, %v2612_v44  ;;  %v9235_v4 = vpop.f32.mrf.mxu1 }
 0x5af   : > { %v9258_v32 = vpop.f32.mrf.mxu0 }
 0x5b0   : > { %v2617_v2 = vpop.f32.mrf.mxu1 }
 0x5b1   : > { %v2722_v47 = vpop.f32.mrf.mxu0 }
 0x5b2   : > { %v11646_v48 = vadd.f32 %v2722_v47, %v2617_v2  ;;  %v9238_v17 = vpop.f32.mrf.mxu1 }
 0x5b3   : > { %v9261_v39 = vpop.f32.mrf.mxu0 }
 0x5e1   : > { %v2622_v49 = vpop.f32.mrf.mxu1 }
 0x5e2   : > { %v2727_v50 = vpop.f32.mrf.mxu0 }
 0x5e3   : > { %v11648_v7 = vadd.f32 %v2727_v50, %v2622_v49  ;;  %v9241_v52 = vpop.f32.mrf.mxu1 }
 0x5e4   : > { %v9264_v12 = vpop.f32.mrf.mxu0 }
 0x5e5   : > { %v2627_v53 = vpop.f32.mrf.mxu1 }
 0x5e6   : > { %v2732_v54 = vpop.f32.mrf.mxu0 }
 0x5e7   : > { %v11650_v56 = vadd.f32 %v2732_v54, %v2627_v53  ;;  %v9244_v18 = vpop.f32.mrf.mxu1 }
 0x5e8   : > { %v9267_v57 = vpop.f32.mrf.mxu0 }
 0x5e9   : > { %v2826_v58 = vpop.f32.mrf.mxu1 }
 0x5ea   : > { %v2945_v51 = vpop.f32.mrf.mxu0  ;;  %v2850_v27 = vadd.f32 %v2826_v58, %v2713_v43 }
 0x5eb   : > { %v9278_v59 = vpop.f32.mrf.mxu1 }
 0x5ec   : > { %v9301_v63 = vpop.f32.mrf.mxu0  ;;  %v2969_v17 = vadd.f32 %v2945_v51, %v2850_v27 }
 0x5ed   : > { %v2831_v55 = vpop.f32.mrf.mxu1 }
 0x5ee   : > { %v2950_v0 = vpop.f32.mrf.mxu0  ;;  %v2851_v39 = vadd.f32 %v2831_v55, %v2718_v45 }
 0x5ef   : > { %v9281_v23 = vpop.f32.mrf.mxu1 }
 0x5f0   : > { %v9304_v1 = vpop.f32.mrf.mxu0  ;;  %v2970_v54 = vadd.f32 %v2950_v0, %v2851_v39 }
 0x5f1   : > { %v2836_v5 = vpop.f32.mrf.mxu1 }
 0x5f2   : > { %v2955_v61 = vpop.f32.mrf.mxu0  ;;  %v2852_v18 = vadd.f32 %v2836_v5, %v11646_v48  ;;  %v8244_v48 = vld [vmem:[%s13549_s7] ss:$0 sm:$0xff] }
 0x5f3   : > { %v9284_v6 = vpop.f32.mrf.mxu1 }
 0x5f4   : > { %v9307_v31 = vpop.f32.mrf.mxu0  ;;  %v2971_v6 = vadd.f32 %v2955_v61, %v2852_v18 }
 0x5f5   : > { %v2841_v30 = vpop.f32.mrf.mxu1 }
 0x5f6   : > { %v2960_v13 = vpop.f32.mrf.mxu0  ;;  %v2853_v43 = vadd.f32 %v2841_v30, %v11648_v7 }
 0x5f7   : > { %v9287_v14 = vpop.f32.mrf.mxu1 }
 0x5f8   : > { %v9310_v8 = vpop.f32.mrf.mxu0 }
 0x5f9   : > { %v2846_v9 = vpop.f32.mrf.mxu1 }
 0x5fb   : > { %v9290_v21 = vpop.f32.mrf.mxu1 }
 0x5fc   : > { %v2972_v21 = vadd.f32 %v2960_v13, %v2853_v43 }
 0x5fd   : > { %v3064_v24 = vpop.f32.mrf.mxu1 }
 0x5fe   : > { %v3088_v52 = vadd.f32 %v3064_v24, %v2969_v17  ;;  %v2854_v24 = vadd.f32 %v2846_v9, %v11650_v56 }
 0x5ff   : > { %v9324_v19 = vpop.f32.mrf.mxu1 }
 0x601   : > { %v3069_v28 = vpop.f32.mrf.mxu1 }
 0x602   : > { %v3089_v23 = vadd.f32 %v3069_v28, %v2970_v54 }
 0x603   : > { %v9327_v29 = vpop.f32.mrf.mxu1 }
 0x605   : > { %v3074_v33 = vpop.f32.mrf.mxu1 }
 0x606   : > { %v3090_v14 = vadd.f32 %v3074_v33, %v2971_v6 }
 0x607   : > { %v9330_v22 = vpop.f32.mrf.mxu1 }
 0x609   : > { %v3079_v38 = vpop.f32.mrf.mxu1 }
 0x60a   : > { %v3091_v29 = vadd.f32 %v3079_v38, %v2972_v21  ;;  %v5807_v21 = vld [vmem:[%s13556_s14 + $0x18] sm:$0xff] }
 0x60b   : > { %v9333_v36 = vpop.f32.mrf.mxu1  ;;  %vm5820_vm14 = vcmp.gt.f32.partialorder %v5807_v21, 0.0  ;;  %v3688_v21 = vld [vmem:[%s13554_s12 + $0x60] sm:$0xf] }
 0x616   : > { %v2965_v11 = vpop.f32.mrf.mxu0 }
 0x617   : > { %v3084_v46 = vpop.f32.mrf.mxu1  ;;  %v2973_v22 = vadd.f32 %v2965_v11, %v2854_v24 }
 0x618   : > { %v9313_v37 = vpop.f32.mrf.mxu0 }
 0x619   : > { %v9336_v20 = vpop.f32.mrf.mxu1  ;;  %v3092_v9 = vadd.f32 %v3084_v46, %v2973_v22 }
 0x61a   : > { %v3183_v41 = vpop.f32.mrf.mxu0 }
 0x61b   : > { %v3302_v40 = vpop.f32.mrf.mxu1  ;;  %v3207_v57 = vadd.f32 %v3183_v41, %v3088_v52 }
 0x61c   : > { %v9347_v34 = vpop.f32.mrf.mxu0 }
 0x61d   : > { %v9370_v42 = vpop.f32.mrf.mxu1  ;;  %v3326_v31 = vadd.f32 %v3302_v40, %v3207_v57 }
 0x61e   : > { %v3188_v26 = vpop.f32.mrf.mxu0 }
 0x61f   : > { %v3307_v10 = vpop.f32.mrf.mxu1  ;;  %v3208_v51 = vadd.f32 %v3188_v26, %v3089_v23 }
 0x620   : > { %v9350_v3 = vpop.f32.mrf.mxu0 }
 0x621   : > { %v9373_v44 = vpop.f32.mrf.mxu1  ;;  %v3327_v19 = vadd.f32 %v3307_v10, %v3208_v51 }
 0x622   : > { %v3193_v4 = vpop.f32.mrf.mxu0 }
 0x623   : > { %v3312_v32 = vpop.f32.mrf.mxu1  ;;  %v3209_v7 = vadd.f32 %v3193_v4, %v3090_v14  ;;  %v5804_v14 = vld [vmem:[%s13556_s14] sm:$0xff] }
 0x624   : > { %v9353_v2 = vpop.f32.mrf.mxu0  ;;  %vm5817_vm13 = vcmp.gt.f32.partialorder %v5804_v14, 0.0  ;;  %v3687_v14 = vld [vmem:[%s13554_s12 + $0x58] sm:$0xff] }
 0x625   : > { %v9376_v47 = vpop.f32.mrf.mxu1  ;;  %v3328_v20 = vadd.f32 %v3312_v32, %v3209_v7 }
 0x626   : > { %v3198_v49 = vpop.f32.mrf.mxu0 }
 0x627   : > { %v3317_v50 = vpop.f32.mrf.mxu1  ;;  %v3210_v41 = vadd.f32 %v3198_v49, %v3091_v29 }
 0x628   : > { %v9356_v12 = vpop.f32.mrf.mxu0 }
 0x629   : > { %v9379_v53 = vpop.f32.mrf.mxu1  ;;  %v3329_v44 = vadd.f32 %v3317_v50, %v3210_v41 }
 0x62a   : > { %v3203_v59 = vpop.f32.mrf.mxu0 }
 0x62b   : > { %v3322_v63 = vpop.f32.mrf.mxu1  ;;  %v3211_v27 = vadd.f32 %v3203_v59, %v3092_v9 }
 0x62c   : > { %v9359_v58 = vpop.f32.mrf.mxu0 }
 0x62d   : > { %v9382_v1 = vpop.f32.mrf.mxu1  ;;  %v3330_v12 = vadd.f32 %v3322_v63, %v3211_v27 }
 0x62e   : > { %v3421_v45 = vpop.f32.mrf.mxu0 }
 0x62f   : > { %v3540_v55 = vpop.f32.mrf.mxu1  ;;  %v3445_v8 = vadd.f32 %v3421_v45, %v3326_v31 }
 0x630   : > { %v9393_v0 = vpop.f32.mrf.mxu0 }
 0x631   : > { %v9416_v5 = vpop.f32.mrf.mxu1  ;;  %v3564_v30 = vadd.f32 %v3540_v55, %v3445_v8  ;;  %v3640_v55 = vld [vmem:[%s13555_s13 + $0x20] sm:$0xf]  ;;  %v5833_v0 = vsel %vm5820_vm14, 1, %v10506_v60  ;;  %vm3689_vm14 = vcmask 293888  }
 0x632   : > { %v3426_v28 = vpop.f32.mrf.mxu0  ;;  %vm3645_vm12 = vcmp.gt.f32.partialorder %v3640_v55, 0.0  ;;  %v3680_v55 = vld [vmem:[%s13554_s12 + $0x20] sm:$0xff] }
 0x633   : > { %v3545_v61 = vpop.f32.mrf.mxu1  ;;  %v11658_v36 = vadd.f32 %v8244_v48, %v3564_v30  ;;  %v3446_v33 = vadd.f32 %v3426_v28, %v3327_v19  ;;  %v3650_v8 = vsel %vm3645_vm12, 1, %v10506_v60 }
 0x634   : > { %v9396_v37 = vpop.f32.mrf.mxu0 }
 0x635   : > { %v9419_v13 = vpop.f32.mrf.mxu1  ;;  %v3565_v40 = vadd.f32 %v3545_v61, %v3446_v33  ;;  %v3581_v34 = vmul.f32 %v11658_v36, %v11658_v36 }
 0x636   : > { %v3431_v42 = vpop.f32.mrf.mxu0 }
 0x637   : > { %v3550_v56 = vpop.f32.mrf.mxu1  ;;  %v11662_v26 = vadd.f32 %v8244_v48, %v3565_v40  ;;  %v3447_v10 = vadd.f32 %v3431_v42, %v3328_v20  ;;  %v3586_v38 = vsel %vm618_vm1, %v3581_v34, 0.0 }
 0x638   : > { %v9399_v11 = vpop.f32.mrf.mxu0  ;;  %3587 = vadd.xlane.f32.xlu1 %v3586_v38 }
 0x639   : > { %v9422_v3 = vpop.f32.mrf.mxu1  ;;  %v3566_v4 = vadd.f32 %v3550_v56, %v3447_v10  ;;  %v3582_v32 = vmul.f32 %v11662_v26, %v11662_v26 }
 0x63a   : > { %v3436_v2 = vpop.f32.mrf.mxu0 }
 0x63b   : > { %v3555_v47 = vpop.f32.mrf.mxu1  ;;  %v11667_v17 = vadd.f32 %v8244_v48, %v3566_v4  ;;  %v3448_v39 = vadd.f32 %v3436_v2, %v3329_v44  ;;  %v3589_v46 = vsel %vm618_vm1, %v3582_v32, 0.0 }
 0x63c   : > { %v9402_v49 = vpop.f32.mrf.mxu0  ;;  %3590 = vadd.xlane.f32.xlu1 %v3589_v46 }
 0x63d   : > { %v9425_v52 = vpop.f32.mrf.mxu1  ;;  %v3567_v53 = vadd.f32 %v3555_v47, %v3448_v39  ;;  %v3583_v50 = vmul.f32 %v11667_v17, %v11667_v17 }
 0x63e   : > { %v3441_v54 = vpop.f32.mrf.mxu0 }
 0x63f   : > { %v3560_v18 = vpop.f32.mrf.mxu1  ;;  %v3579_v57 = vadd.f32 %v8244_v48, %v3567_v53  ;;  %v3449_v59 = vadd.f32 %v3441_v54, %v3330_v12  ;;  %v3592_v23 = vsel %vm618_vm1, %v3583_v50, 0.0 }
 0x640   : > { %v9405_v43 = vpop.f32.mrf.mxu0  ;;  %3593 = vadd.xlane.f32.xlu1 %v3592_v23  ;;  %v3909_v23 = vld [vmem:[%s13550_s8 + $0x38] sm:$0xff] }
 0x641   : > { %v9428_v58 = vpop.f32.mrf.mxu1  ;;  %v3568_v1 = vadd.f32 %v3560_v18, %v3449_v59  ;;  %v3584_v6 = vmul.f32 %v3579_v57, %v3579_v57  ;;  %v3676_v18 = vld [vmem:[%s13554_s12] sm:$0xff]  ;;  %v3892_v43 = vld [vmem:[%s13550_s8 + $0x18] sm:$0xff] }
 0x642   : > { %v3677_v58 = vld [vmem:[%s13554_s12 + $0x8] sm:$0xff] }
 0x643   : > { %v3580_v31 = vadd.f32 %v8244_v48, %v3568_v1  ;;  %v3595_v51 = vsel %vm618_vm1, %v3584_v6, 0.0  ;;  %v5830_v48 = vsel %vm5817_vm13, 1, %v10506_v60  ;;  %v3684_v1 = vld [vmem:[%s13554_s12 + $0x40] sm:$0xff]  ;;  %v3908_v6 = vld [vmem:[%s13550_s8 + $0x30] sm:$0xff] }
 0x644   : > { %3596 = vadd.xlane.f32.xlu1 %v3595_v51  ;;  %v3685_v51 = vld [vmem:[%s13554_s12 + $0x48] sm:$0xff] }
 0x645   : > { %v3585_v63 = vmul.f32 %v3580_v31, %v3580_v31 }
 0x647   : > { %v3598_v45 = vsel %vm2424_vm15, %v3585_v63, 0.0  ;;  %v3679_v63 = vld [vmem:[%s13554_s12 + $0x18] sm:$0xff] }
 0x648   : > { %3599 = vadd.xlane.f32.xlu0 %v3598_v45  ;;  %v3686_v45 = vld [vmem:[%s13554_s12 + $0x50] sm:$0xff] }
 0x655   : > { %3661 = vperm.xlu1 %10378, %v11359_v62   ;;  %v5805_v62 = vld [vmem:[%s13556_s14 + $0x8] sm:$0xff] }
 0x656   : > { %vm5818_vm2 = vcmp.gt.f32.partialorder %v5805_v62, 0.0  ;;  %v3682_v62 = vld [vmem:[%s13554_s12 + $0x30] sm:$0xff] }
 0x659   : > { %3658 = vperm.xlu1 %10378, %v11300_v16   ;;  %v5806_v16 = vld [vmem:[%s13556_s14 + $0x10] sm:$0xff] }
 0x65a   : > { %vm5819_vm3 = vcmp.gt.f32.partialorder %v5806_v16, 0.0  ;;  %v3907_v16 = vld [vmem:[%s13550_s8 + $0x28] sm:$0xff] }
 0x65b   : > { %v5832_v5 = vsel %vm5819_vm3, 1, %v10506_v60 }
 0x65d   : > { %3652 = vperm.xlu1 %10378, %v11310_v35   ;;  %v5831_v35 = vsel %vm5818_vm2, 1, %v10506_v60 }
 0x65e   : > { %3664 = vperm.xlu0 %10377, %v3650_v8   ;;  %v3681_v8 = vld [vmem:[%s13554_s12 + $0x28] sm:$0xff] }
 0x661   : > { %5844 = vperm.xlu1 %10378, %v5830_v48   ;;  %v3891_v48 = vld [vmem:[%s13550_s8 + $0x10] sm:$0xff] }
 0x662   : > { %3655 = vperm.xlu0 %10377, %v11296_v15  }
 0x665   : > { %5853 = vperm.xlu1 %10378, %v5833_v0   ;;  %v3890_v0 = vld [vmem:[%s13550_s8 + $0x8] sm:$0xff] }
 0x666   : > { %5847 = vperm.xlu0 %10377, %v5831_v35   ;;  %v3906_v35 = vld [vmem:[%s13550_s8 + $0x20] sm:$0xff] }
 0x66a   : > { %5850 = vperm.xlu0 %10377, %v5832_v5   ;;  %v3889_v5 = vld [vmem:[%s13550_s8] sm:$0xff] }
 0x6c1   : > { %v3588_v24 = vpop.xlane.xlu1 %3587 }
 0x6c2   : > { %v3601_v33 = vmul.f32 0.03125, %v3588_v24  ;;  %v3893_v24 = vld [vmem:[#allocation3 + $0x1] sm:$0xff] }
 0x6c4   : > { %v3606_v40 = vadd.f32 1e-08, %v3601_v33  ;;  %v4261_v33 = vld [vmem:[%s13550_s8 + $0x40] sm:$0xff] }
 0x6c5   : > { %v3591_v19 = vpop.xlane.xlu1 %3590 }
 0x6c6   : > { %v3602_v29 = vmul.f32 0.03125, %v3591_v19  ;;  %v3876_v19 = vld [vmem:[#allocation3] sm:$0xff] }
 0x6c8   : > { %v3607_v20 = vadd.f32 1e-08, %v3602_v29  ;;  %v4462_v29 = vld [vmem:[%s13550_s8 + $0x70] sm:$0xff] }
 0x6c9   : > { %v3594_v7 = vpop.xlane.xlu1 %3593 }
 0x6ca   : > { %v3603_v30 = vmul.f32 0.03125, %v3594_v7  ;;  %v4264_v7 = vld [vmem:[%s13550_s8 + $0x58] sm:$0xff] }
 0x6cc   : > { %v3608_v15 = vadd.f32 1e-08, %v3603_v30  ;;  %v4263_v30 = vld [vmem:[%s13550_s8 + $0x50] sm:$0xff] }
 0x6cd   : > { %v3597_v28 = vpop.xlane.xlu1 %3596 }
 0x6ce   : > { %v3604_v61 = vmul.f32 0.03125, %v3597_v28  ;;  %v4262_v28 = vld [vmem:[%s13550_s8 + $0x48] sm:$0xff] }
 0x6d0   : > { %v3609_v22 = vadd.f32 1e-08, %v3604_v61  ;;  %v4463_v61 = vld [vmem:[%s13550_s8 + $0x78] sm:$0xff] }
 0x6d1   : > { %v3600_v37 = vpop.xlane.xlu0 %3599  ;;  %v3662_v56 = vpop.permute.xlu1 %3661 }
 0x6d2   : > { %v3605_v13 = vmul.f32 0.03125, %v3600_v37  ;;  %10429 = vrsqrt.f32 %v3609_v22  ;;  %vm3669_vm10 = vcmp.eq.s32.totalorder %v3662_v56, 1  ;;  %v4461_v22 = vld [vmem:[%s13550_s8 + $0x68] sm:$0xff] }
 0x6d3   : > { %10431 = vrsqrt.f32 %v3608_v15  ;;  %v4460_v15 = vld [vmem:[%s13550_s8 + $0x60] sm:$0xff] }
 0x6d4   : > { %v3610_v41 = vadd.f32 1e-08, %v3605_v13 }
 0x6d5   : > { %v3659_v47 = vpop.permute.xlu1 %3658 }
 0x6d6   : > { %10433 = vrsqrt.f32 %v3610_v41  ;;  %vm3668_vm11 = vcmp.eq.s32.totalorder %v3659_v47, 1 }
 0x6d7   : > { %10435 = vrsqrt.f32 %v3607_v20 }
 0x6d8   : > { %10437 = vrsqrt.f32 %v3606_v40 }
 0x6d9   : > { %v3665_v3 = vpop.permute.xlu0 %3664  ;;  %v3653_v50 = vpop.permute.xlu1 %3652 }
 0x6da   : > { %vm3670_vm7 = vcmp.eq.s32.totalorder %v3665_v3, 1  ;;  %vm3666_vm2 = vcmp.eq.s32.totalorder %v3653_v50, 1 }
 0x6dd   : > { %v3656_v53 = vpop.permute.xlu0 %3655 }
 0x6de   : > { %vm3667_vm13 = vcmp.eq.s32.totalorder %v3656_v53, 1 }
 0x6df   : > { %v10430_v34 = vpop.eup %10429 }
 0x6e0   : > { %v10432_v42 = vpop.eup %10431  ;;  %v3619_v10 = vmul.f32 %v10430_v34, %v3579_v57  ;;  %v3683_v57 = vld [vmem:[%s13554_s12 + $0x38] sm:$0xff] }
 0x6e1   : > { %v3618_v44 = vmul.f32 %v10432_v42, %v11667_v17 }
 0x6e2   : > { %v3629_v32 = vmul.f32 0.1, %v3619_v10  ;;  %vm3624_vm8 = vcmp.ge.f32.partialorder %v3619_v10, 0.0 }
 0x6e3   : > { %v10434_v9 = vpop.eup %10433  ;;  %v3628_v49 = vmul.f32 0.1, %v3618_v44  ;;  %vm3623_vm9 = vcmp.ge.f32.partialorder %v3618_v44, 0.0 }
 0x6e4   : > { %v10436_v38 = vpop.eup %10435  ;;  %v3620_v11 = vmul.f32 %v10434_v9, %v3580_v31  ;;  %v3634_v17 = vsel %vm3624_vm8, %v3619_v10, %v3629_v32  ;;  %v3678_v31 = vld [vmem:[%s13554_s12 + $0x10] sm:$0xff] }
 0x6e5   : > { %v10438_v27 = vpop.eup %10437  ;;  %v3617_v2 = vmul.f32 %v10436_v38, %v11662_v26 }
 0x6e6   : > { %vm3625_vm4 = vcmp.ge.f32.partialorder %v3620_v11, 0.0  ;;  %v3630_v4 = vmul.f32 0.1, %v3620_v11  ;;  %v3616_v52 = vmul.f32 %v10438_v27, %v11658_v36  ;;  %v3633_v36 = vsel %vm3623_vm9, %v3618_v44, %v3628_v49 }
 0x6e7   : > { %v3627_v12 = vmul.f32 0.1, %v3617_v2  ;;  %vm3622_vm0 = vcmp.ge.f32.partialorder %v3617_v2, 0.0 }
 0x6e8   : > { %v3635_v39 = vsel %vm3625_vm4, %v3620_v11, %v3630_v4  ;;  %v3626_v26 = vmul.f32 0.1, %v3616_v52  ;;  %vm3621_vm12 = vcmp.ge.f32.partialorder %v3616_v52, 0.0 }
 0x6e9   : > { %v3675_v46 = vsel %vm3670_vm7, %v3635_v39, 0.0  ;;  %v3632_v54 = vsel %vm3622_vm0, %v3617_v2, %v3627_v12 }
 0x6ea   : > { %9430 = vmatpush3.msk.msra.mxu0 %vm3729_vm5, %v3675_v46  ;;  %10358 = vmatpush3.msk.msra.mxu1 %vm3729_vm5, %v3675_v46  ;;  %v3631_v59 = vsel %vm3621_vm12, %v3616_v52, %v3626_v26 }
 0x6eb   : > { %9431 = vmatprep.subr.mxu0 %v10501_v25  ;;  %10354 = vmatprep.subr.mxu1 %v10501_v25 }
 0x6ec   : > { %9432 = vmatpush3.msk.msra.mxu0 %vm3669_vm10, %v3634_v17  ;;  %10359 = vmatpush3.msk.msra.mxu1 %vm3669_vm10, %v3634_v17 }
 0x6ed   : > { %9433 = vmatprep.subr.mxu0 %v10501_v25  ;;  %10355 = vmatprep.subr.mxu1 %v10501_v25 }
 0x6ee   : > { %9434 = vmatpush3.msk.msra.mxu0 %vm3668_vm11, %v3633_v36  ;;  %10360 = vmatpush3.msk.msra.mxu1 %vm3668_vm11, %v3633_v36 }
 0x6ef   : > { %9435 = vmatprep.subr.mxu0 %v10501_v25  ;;  %10356 = vmatprep.subr.mxu1 %v10501_v25 }
 0x6f0   : > { %9436 = vmatpush3.msk.msra.mxu0 %vm3667_vm13, %v3632_v54  ;;  %10361 = vmatpush3.msk.msra.mxu1 %vm3667_vm13, %v3632_v54 }
 0x6f1   : > { %9437 = vmatprep.subr.mxu0 %v10501_v25  ;;  %10357 = vmatprep.subr.mxu1 %v10501_v25 }
 0x6f2   : > { %9438 = vmatpush3.msk.msra.mxu0 %vm3666_vm2, %v3631_v59  ;;  %10362 = vmatpush3.msk.msra.mxu1 %vm3666_vm2, %v3631_v59 }
 0x6f3   : > { %9440 = vmatmul.mubr.msk.f32.vlgmr.msra.gmra.mxu0 %vm3689_vm14, %v3676_v18  ;;  %9461 = vmatmul.mubr.msk.f32.vlgmr.msra.gmra.mxu1 %vm3689_vm14, %v3683_v57 }
 0x6f4   : > { %9442 = vmatprep.mubr.msk.f32.mxu0 %vm10505_vm6, %v10501_v25  ;;  %9463 = vmatprep.mubr.msk.f32.mxu1 %vm10505_vm6, %v10501_v25 }
 0x6f5   : > { %9478 = vmatprep.subr.mxu1 %v10501_v25  ;;  %9525 = vmatprep.subr.mxu0 %v10501_v25 }
 0x6f6   : > { %9479 = vmatpush3.msra.mxu1 %v3909_v23  ;;  %9526 = vmatpush3.msra.mxu0 %v3892_v43 }
 0x6f7   : > { %9443 = vmatmul.mubr.msk.f32.gmra.mxu0 %vm3689_vm14, %v3677_v58  ;;  %9464 = vmatmul.mubr.msk.f32.gmra.mxu1 %vm3689_vm14, %v3684_v1 }
 0x6f8   : > { %9445 = vmatprep.mubr.msk.f32.mxu0 %vm10505_vm6, %v10501_v25  ;;  %9466 = vmatprep.mubr.msk.f32.mxu1 %vm10505_vm6, %v10501_v25 }
 0x6f9   : > { %9480 = vmatprep.subr.mxu1 %v10501_v25  ;;  %9527 = vmatprep.subr.mxu0 %v10501_v25 }
 0x6fa   : > { %9481 = vmatpush3.msra.mxu1 %v3908_v6  ;;  %9528 = vmatpush3.msra.mxu0 %v3891_v48 }
 0x6fb   : > { %9446 = vmatmul.mubr.msk.f32.gmra.mxu0 %vm3689_vm14, %v3678_v31  ;;  %9467 = vmatmul.mubr.msk.f32.gmra.mxu1 %vm3689_vm14, %v3685_v51 }
 0x6fc   : > { %9448 = vmatprep.mubr.msk.f32.mxu0 %vm10505_vm6, %v10501_v25  ;;  %9469 = vmatprep.mubr.msk.f32.mxu1 %vm10505_vm6, %v10501_v25 }
 0x6fd   : > { %9482 = vmatprep.subr.mxu1 %v10501_v25  ;;  %9529 = vmatprep.subr.mxu0 %v10501_v25 }
 0x6fe   : > { %9483 = vmatpush3.msra.mxu1 %v3907_v16  ;;  %9530 = vmatpush3.msra.mxu0 %v3890_v0 }
 0x6ff   : > { %9449 = vmatmul.mubr.msk.f32.gmra.mxu0 %vm3689_vm14, %v3679_v63  ;;  %9470 = vmatmul.mubr.msk.f32.gmra.mxu1 %vm3689_vm14, %v3686_v45 }
 0x700   : > { %9451 = vmatprep.mubr.msk.f32.mxu0 %vm10505_vm6, %v10501_v25  ;;  %9472 = vmatprep.mubr.msk.f32.mxu1 %vm10505_vm6, %v10501_v25 }
 0x701   : > { %9484 = vmatprep.subr.mxu1 %v10501_v25  ;;  %9531 = vmatprep.subr.mxu0 %v10501_v25 }
 0x702   : > { %9485 = vmatpush3.msra.mxu1 %v3906_v35  ;;  %9532 = vmatpush3.msra.mxu0 %v3889_v5  ;;  %v4248_v35 = vld [vmem:[#allocation3 + $0x2] sm:$0xff] }
 0x703   : > { %9452 = vmatmul.mubr.msk.f32.gmra.mxu0 %vm3689_vm14, %v3680_v55  ;;  %9473 = vmatmul.mubr.msk.f32.gmra.mxu1 %vm3689_vm14, %v3687_v14 }
 0x704   : > { %9454 = vmatprep.mubr.msk.f32.mxu0 %vm10505_vm6, %v10501_v25  ;;  %9475 = vmatprep.mubr.msk.f32.mxu1 %vm10505_vm6, %v10501_v25 }
 0x705   : > { %9572 = vmatprep.subr.mxu1 %v10501_v25  ;;  %9619 = vmatprep.subr.mxu0 %v10501_v25 }
 0x707   : > { %9455 = vmatmul.mubr.msk.f32.gmra.mxu0 %vm3689_vm14, %v3681_v8  ;;  %9476 = vmatmul.mubr.msk.f32.gmra.mxu1 %vm3689_vm14, %v3688_v21 }
 0x708   : > { %9457 = vmatprep.mubr.msk.f32.mxu0 %vm10505_vm6, %v10501_v25  ;;  %9486 = vmatprep.mubr.msk.f32.mxu1 %vm10505_vm6, %v10501_v25 }
 0x70b   : > { %9458 = vmatmul.mubr.msk.f32.gmra.mxu0 %vm3689_vm14, %v3682_v62  ;;  %9487 = vmatmul.mubr.msk.f32.vlgmr.msra.gmra.mxu1 %vm618_vm1, %v3893_v24  ;;  %v4662_v24 = vld [vmem:[%s13550_s8 + $0x98] sm:$0xff] }
 0x70c   : > { %9533 = vmatprep.mubr.msk.f32.mxu0 %vm10505_vm6, %v10501_v25  ;;  %9489 = vmatprep.mubr.msk.f32.mxu1 %vm10505_vm6, %v10501_v25 }
 0x70d   : > { %9573 = vmatpush3.msra.mxu1 %v4264_v7 }
 0x70e   : > { %9574 = vmatprep.subr.mxu1 %v10501_v25 }
 0x70f   : > { %9534 = vmatmul.mubr.msk.f32.vlgmr.msra.gmra.mxu0 %vm618_vm1, %v3876_v19  ;;  %9575 = vmatpush3.msra.mxu1 %v4263_v30  ;;  %v4861_v19 = vld [vmem:[%s13550_s8 + $0xb8] sm:$0xff]  ;;  %v4661_v30 = vld [vmem:[%s13550_s8 + $0x90] sm:$0xff] }
 0x710   : > { %9536 = vmatprep.mubr.msk.f32.mxu0 %vm10505_vm6, %v10501_v25  ;;  %9576 = vmatprep.subr.mxu1 %v10501_v25 }
 0x711   : > { %9577 = vmatpush3.msra.mxu1 %v4262_v28  ;;  %9620 = vmatpush3.msra.mxu0 %v4463_v61  ;;  %v4860_v28 = vld [vmem:[%s13550_s8 + $0xb0] sm:$0xff] }
 0x712   : > { %9578 = vmatprep.subr.mxu1 %v10501_v25  ;;  %9621 = vmatprep.subr.mxu0 %v10501_v25 }
 0x713   : > { %9622 = vmatpush3.msra.mxu0 %v4462_v29  ;;  %9579 = vmatpush3.msra.mxu1 %v4261_v33  ;;  %v4660_v29 = vld [vmem:[%s13550_s8 + $0x88] sm:$0xff] }
 0x714   : > { %9623 = vmatprep.subr.mxu0 %v10501_v25  ;;  %9666 = vmatprep.subr.mxu1 %v10501_v25 }
 0x715   : > { %9624 = vmatpush3.msra.mxu0 %v4461_v22  ;;  %v4859_v22 = vld [vmem:[%s13550_s8 + $0xa8] sm:$0xff] }
 0x716   : > { %9625 = vmatprep.subr.mxu0 %v10501_v25 }
 0x717   : > { %9626 = vmatpush3.msra.mxu0 %v4460_v15  ;;  %v4659_v15 = vld [vmem:[%s13550_s8 + $0x80] sm:$0xff] }
 0x718   : > { %9713 = vmatprep.subr.mxu0 %v10501_v25 }
 0x7b3   : > { %v3799_v37 = vpop.f32.mrf.mxu0  ;;  %v3834_v13 = vpop.f32.mrf.mxu1 }
 0x7b4   : > { %3863 = vst.msk [vmem:[#allocation3 + $0xb] sm:$0xff] %vm618_vm1, %v3799_v37  ;;  %3870 = vst.msk [vmem:[#allocation3 + $0x43] sm:$0xff] %vm618_vm1, %v3834_v13  ;;  %v4858_v37 = vld [vmem:[%s13550_s8 + $0xa0] sm:$0xff] }
 0x7b5   : > { %v9441_v20 = vpop.f32.mrf.mxu0  ;;  %v9462_v41 = vpop.f32.mrf.mxu1 }
 0x7b7   : > { %v3804_v40 = vpop.f32.mrf.mxu0  ;;  %v3839_v34 = vpop.f32.mrf.mxu1 }
 0x7b8   : > { %3864 = vst.msk [vmem:[#allocation3 + $0x13] sm:$0xff] %vm618_vm1, %v3804_v40  ;;  %3871 = vst.msk [vmem:[#allocation3 + $0x4b] sm:$0xff] %vm618_vm1, %v3839_v34 }
 0x7b9   : > { %v9444_v42 = vpop.f32.mrf.mxu0  ;;  %v9465_v56 = vpop.f32.mrf.mxu1 }
 0x7bb   : > { %v3809_v9 = vpop.f32.mrf.mxu0  ;;  %v3894_v10 = vld [vmem:[#allocation3 + $0x9] sm:$0xff]  ;;  %v3844_v11 = vpop.f32.mrf.mxu1 }
 0x7bc   : > { %v3877_v38 = vld [vmem:[#allocation3 + $0x8] sm:$0xff]  ;;  %3865 = vst.msk [vmem:[#allocation3 + $0x1b] sm:$0xff] %vm618_vm1, %v3809_v9  ;;  %9490 = vmatmul.mubr.msk.f32.gmra.mxu1 %vm618_vm1, %v3894_v10  ;;  %3872 = vst.msk [vmem:[#allocation3 + $0x53] sm:$0xff] %vm618_vm1, %v3844_v11 }
 0x7bd   : > { %9537 = vmatmul.mubr.msk.f32.gmra.mxu0 %vm618_vm1, %v3877_v38  ;;  %v9447_v3 = vpop.f32.mrf.mxu0  ;;  %9492 = vmatprep.mubr.msk.f32.mxu1 %vm10505_vm6, %v10501_v25  ;;  %v9468_v44 = vpop.f32.mrf.mxu1  ;;  %v4447_v5 = vld [vmem:[#allocation3 + $0xa] sm:$0xff] }
 0x7be   : > { %9539 = vmatprep.mubr.msk.f32.mxu0 %vm10505_vm6, %v10501_v25 }
 0x7bf   : > { %v3814_v27 = vpop.f32.mrf.mxu0  ;;  %v3895_v4 = vld [vmem:[#allocation3 + $0x11] sm:$0xff]  ;;  %v3849_v2 = vpop.f32.mrf.mxu1  ;;  %v3902_v55 = vld [vmem:[#allocation3 + $0x49] sm:$0xff] }
 0x7c0   : > { %v3878_v32 = vld [vmem:[#allocation3 + $0x10] sm:$0xff]  ;;  %3866 = vst.msk [vmem:[#allocation3 + $0x23] sm:$0xff] %vm618_vm1, %v3814_v27  ;;  %9493 = vmatmul.mubr.msk.f32.gmra.mxu1 %vm618_vm1, %v3895_v4  ;;  %3873 = vst.msk [vmem:[#allocation3 + $0x5b] sm:$0xff] %vm618_vm1, %v3849_v2  ;;  %v3885_v14 = vld [vmem:[#allocation3 + $0x48] sm:$0xff] }
 0x7c1   : > { %9540 = vmatmul.mubr.msk.f32.gmra.mxu0 %vm618_vm1, %v3878_v32  ;;  %v9450_v47 = vpop.f32.mrf.mxu0  ;;  %9495 = vmatprep.mubr.msk.f32.mxu1 %vm10505_vm6, %v10501_v25  ;;  %v9471_v39 = vpop.f32.mrf.mxu1  ;;  %v4448_v7 = vld [vmem:[#allocation3 + $0x12] sm:$0xff]  ;;  %v4455_v38 = vld [vmem:[#allocation3 + $0x4a] sm:$0xff]  ;;  %v5060_v32 = vld [vmem:[%s13550_s8 + $0xd8] sm:$0xff] }
 0x7c2   : > { %9542 = vmatprep.mubr.msk.f32.mxu0 %vm10505_vm6, %v10501_v25  ;;  %v4646_v2 = vld [vmem:[#allocation3 + $0xb] sm:$0xff]  ;;  %v5259_v39 = vld [vmem:[%s13550_s8 + $0xf8] sm:$0xff] }
 0x7c3   : > { %v3819_v46 = vpop.f32.mrf.mxu0  ;;  %v3896_v49 = vld [vmem:[#allocation3 + $0x19] sm:$0xff]  ;;  %v3854_v17 = vpop.f32.mrf.mxu1  ;;  %v3903_v8 = vld [vmem:[#allocation3 + $0x51] sm:$0xff] }
 0x7c4   : > { %v3879_v52 = vld [vmem:[#allocation3 + $0x18] sm:$0xff]  ;;  %3867 = vst.msk [vmem:[#allocation3 + $0x2b] sm:$0xff] %vm618_vm1, %v3819_v46  ;;  %9496 = vmatmul.mubr.msk.f32.gmra.mxu1 %vm618_vm1, %v3896_v49  ;;  %3874 = vst.msk [vmem:[#allocation3 + $0x63] sm:$0xff] %vm618_vm1, %v3854_v17  ;;  %v3886_v21 = vld [vmem:[#allocation3 + $0x50] sm:$0xff] }
 0x7c5   : > { %9543 = vmatmul.mubr.msk.f32.gmra.mxu0 %vm618_vm1, %v3879_v52  ;;  %v9453_v12 = vpop.f32.mrf.mxu0  ;;  %9498 = vmatprep.mubr.msk.f32.mxu1 %vm10505_vm6, %v10501_v25  ;;  %v9474_v53 = vpop.f32.mrf.mxu1  ;;  %v4449_v61 = vld [vmem:[#allocation3 + $0x1a] sm:$0xff]  ;;  %v4456_v11 = vld [vmem:[#allocation3 + $0x52] sm:$0xff] }
 0x7c6   : > { %9545 = vmatprep.mubr.msk.f32.mxu0 %vm10505_vm6, %v10501_v25  ;;  %v4845_v47 = vld [vmem:[#allocation3 + $0xc] sm:$0xff]  ;;  %v5059_v46 = vld [vmem:[%s13550_s8 + $0xd0] sm:$0xff] }
 0x7c7   : > { %v3824_v36 = vpop.f32.mrf.mxu0  ;;  %v3897_v26 = vld [vmem:[#allocation3 + $0x21] sm:$0xff]  ;;  %v3859_v54 = vpop.f32.mrf.mxu1  ;;  %v3904_v62 = vld [vmem:[#allocation3 + $0x59] sm:$0xff] }
 0x7c8   : > { %v3880_v50 = vld [vmem:[#allocation3 + $0x20] sm:$0xff]  ;;  %3868 = vst.msk [vmem:[#allocation3 + $0x33] sm:$0xff] %vm618_vm1, %v3824_v36  ;;  %9499 = vmatmul.mubr.msk.f32.gmra.mxu1 %vm618_vm1, %v3897_v26  ;;  %v3887_v48 = vld [vmem:[#allocation3 + $0x58] sm:$0xff]  ;;  %v5058_v36 = vld [vmem:[%s13550_s8 + $0xc8] sm:$0xff] }
 0x7c9   : > { %9546 = vmatmul.mubr.msk.f32.gmra.mxu0 %vm618_vm1, %v3880_v50  ;;  %3875 = vst.msk [vmem:[#allocation3 + $0x6b] sm:$0xf] %vm2424_vm15, %v3859_v54  ;;  %v9456_v18 = vpop.f32.mrf.mxu0  ;;  %9501 = vmatprep.mubr.msk.f32.mxu1 %vm10505_vm6, %v10501_v25  ;;  %v9477_v57 = vpop.f32.mrf.mxu1  ;;  %v4450_v33 = vld [vmem:[#allocation3 + $0x22] sm:$0xff]  ;;  %v4457_v3 = vld [vmem:[#allocation3 + $0x5a] sm:$0xff]  ;;  %v5257_v26 = vld [vmem:[%s13550_s8 + $0xe8] sm:$0xff] }
 0x7ca   : > { %9548 = vmatprep.mubr.msk.f32.mxu0 %vm10505_vm6, %v10501_v25  ;;  %v4647_v49 = vld [vmem:[#allocation3 + $0x13] sm:$0xff]  ;;  %v4648_v12 = vld [vmem:[#allocation3 + $0x1b] sm:$0xff]  ;;  %v4649_v50 = vld [vmem:[#allocation3 + $0x23] sm:$0xff] }
 0x7cb   : > { %v3829_v59 = vpop.f32.mrf.mxu0  ;;  %v3898_v23 = vld [vmem:[#allocation3 + $0x29] sm:$0xff]  ;;  %v3905_v16 = vld [vmem:[#allocation3 + $0x61] sm:$0xf]  ;;  %v4015_v13 = vpop.f32.mrf.mxu1  ;;  %v12072_v52 = vld [vmem:[#allocation3 + $0x14] sm:$0xff] }
 0x7cc   : > { %v3881_v43 = vld [vmem:[#allocation3 + $0x28] sm:$0xff]  ;;  %3869 = vst.msk [vmem:[#allocation3 + $0x3b] sm:$0xff] %vm618_vm1, %v3829_v59  ;;  %9502 = vmatmul.mubr.msk.f32.gmra.mxu1 %vm618_vm1, %v3898_v23  ;;  %v3888_v0 = vld [vmem:[#allocation3 + $0x60] sm:$0xf]  ;;  %v5258_v17 = vld [vmem:[%s13550_s8 + $0xf0] sm:$0xff] }
 0x7cd   : > { %9549 = vmatmul.mubr.msk.f32.gmra.mxu0 %vm618_vm1, %v3881_v43  ;;  %9504 = vmatprep.mubr.msk.f32.mxu1 %vm10505_vm6, %v10501_v25  ;;  %v9459_v58 = vpop.f32.mrf.mxu0  ;;  %v4451_v41 = vld [vmem:[#allocation3 + $0x2a] sm:$0xff]  ;;  %v9488_v34 = vpop.f32.mrf.mxu1  ;;  %v4458_v44 = vld [vmem:[#allocation3 + $0x62] sm:$0xff] }
 0x7ce   : > { %9551 = vmatprep.mubr.msk.f32.mxu0 %vm10505_vm6, %v10501_v25  ;;  %v4260_v27 = vld [vmem:[#allocation3 + $0x62] sm:$0xf]  ;;  %v5057_v18 = vld [vmem:[%s13550_s8 + $0xc0] sm:$0xff] }
 0x7cf   : > { %v3899_v1 = vld [vmem:[#allocation3 + $0x31] sm:$0xff]  ;;  %v4184_v20 = vpop.f32.mrf.mxu0  ;;  %v12086_v53 = vld [vmem:[#allocation3 + $0x1c] sm:$0xff]  ;;  %v12103_v54 = vld [vmem:[#allocation3 + $0x24] sm:$0xff] }
 0x7d0   : > { %v3882_v6 = vld [vmem:[#allocation3 + $0x30] sm:$0xff]  ;;  %9505 = vmatmul.mubr.msk.f32.gmra.mxu1 %vm618_vm1, %v3899_v1  ;;  %v12001_v40 = vadd.f32 %v4184_v20, %v4015_v13  ;;  %v4459_v4 = vld [vmem:[#allocation3 + $0x6a] sm:$0xf]  ;;  %v5252_v13 = vld [vmem:[#allocation3 + $0x5d] sm:$0xff] }
 0x7d1   : > { %9552 = vmatmul.mubr.msk.f32.gmra.mxu0 %vm618_vm1, %v3882_v6  ;;  %9507 = vmatprep.mubr.msk.f32.mxu1 %vm10505_vm6, %v10501_v25  ;;  %v9535_v42 = vpop.f32.mrf.mxu0  ;;  %v4452_v56 = vld [vmem:[#allocation3 + $0x32] sm:$0xff]  ;;  %v5256_v57 = vld [vmem:[%s13550_s8 + $0xe0] sm:$0xff] }
 0x7d2   : > { %9554 = vmatprep.mubr.msk.f32.mxu0 %vm10505_vm6, %v10501_v25  ;;  %v4650_v59 = vld [vmem:[#allocation3 + $0x2b] sm:$0xff]  ;;  %v4651_v43 = vld [vmem:[#allocation3 + $0x33] sm:$0xff] }
 0x7d3   : > { %v3900_v31 = vld [vmem:[#allocation3 + $0x39] sm:$0xff]  ;;  %v3901_v63 = vld [vmem:[#allocation3 + $0x41] sm:$0xff]  ;;  %v12120_v23 = vld [vmem:[#allocation3 + $0x2c] sm:$0xff] }
 0x7d4   : > { %v3883_v51 = vld [vmem:[#allocation3 + $0x38] sm:$0xff]  ;;  %9508 = vmatmul.mubr.msk.f32.gmra.mxu1 %vm618_vm1, %v3900_v31  ;;  %v3884_v45 = vld [vmem:[#allocation3 + $0x40] sm:$0xff] }
 0x7d5   : > { %9555 = vmatmul.mubr.msk.f32.gmra.mxu0 %vm618_vm1, %v3883_v51  ;;  %9510 = vmatprep.mubr.msk.f32.mxu1 %vm10505_vm6, %v10501_v25  ;;  %v4453_v9 = vld [vmem:[#allocation3 + $0x3a] sm:$0xff]  ;;  %v4454_v10 = vld [vmem:[#allocation3 + $0x42] sm:$0xff] }
 0x7d6   : > { %9557 = vmatprep.mubr.msk.f32.mxu0 %vm10505_vm6, %v10501_v25  ;;  %v12131_v58 = vld [vmem:[#allocation3 + $0x34] sm:$0xff]  ;;  %v12140_v6 = vld [vmem:[#allocation3 + $0x3c] sm:$0xff]  ;;  %v12149_v51 = vld [vmem:[#allocation3 + $0x44] sm:$0xff] }
 0x7d7   : > { %v4652_v1 = vld [vmem:[#allocation3 + $0x3b] sm:$0xff]  ;;  %v4653_v31 = vld [vmem:[#allocation3 + $0x43] sm:$0xff] }
 0x7d8   : > { %9511 = vmatmul.mubr.msk.f32.gmra.mxu1 %vm618_vm1, %v3901_v63  ;;  %v4654_v63 = vld [vmem:[#allocation3 + $0x4b] sm:$0xff] }
 0x7d9   : > { %9558 = vmatmul.mubr.msk.f32.gmra.mxu0 %vm618_vm1, %v3884_v45  ;;  %9513 = vmatprep.mubr.msk.f32.mxu1 %vm10505_vm6, %v10501_v25  ;;  %v12158_v45 = vld [vmem:[#allocation3 + $0x4c] sm:$0xff] }
 0x7da   : > { %9560 = vmatprep.mubr.msk.f32.mxu0 %vm10505_vm6, %v10501_v25  ;;  %v5253_v20 = vld [vmem:[#allocation3 + $0x65] sm:$0xff] }
 0x7dc   : > { %9514 = vmatmul.mubr.msk.f32.gmra.mxu1 %vm618_vm1, %v3902_v55  ;;  %v4655_v55 = vld [vmem:[#allocation3 + $0x53] sm:$0xff] }
 0x7dd   : > { %9561 = vmatmul.mubr.msk.f32.gmra.mxu0 %vm618_vm1, %v3885_v14  ;;  %9516 = vmatprep.mubr.msk.f32.mxu1 %vm10505_vm6, %v10501_v25  ;;  %v12167_v14 = vld [vmem:[#allocation3 + $0x54] sm:$0xff] }
 0x7de   : > { %9563 = vmatprep.mubr.msk.f32.mxu0 %vm10505_vm6, %v10501_v25 }
 0x7e0   : > { %9517 = vmatmul.mubr.msk.f32.gmra.mxu1 %vm618_vm1, %v3903_v8  ;;  %v4656_v8 = vld [vmem:[#allocation3 + $0x5b] sm:$0xff] }
 0x7e1   : > { %9564 = vmatmul.mubr.msk.f32.gmra.mxu0 %vm618_vm1, %v3886_v21  ;;  %9519 = vmatprep.mubr.msk.f32.mxu1 %vm10505_vm6, %v10501_v25  ;;  %v12176_v21 = vld [vmem:[#allocation3 + $0x5c] sm:$0xff] }
 0x7e2   : > { %9566 = vmatprep.mubr.msk.f32.mxu0 %vm10505_vm6, %v10501_v25 }
 0x7e4   : > { %9520 = vmatmul.mubr.msk.f32.gmra.mxu1 %vm618_vm1, %v3904_v62  ;;  %v4657_v62 = vld [vmem:[#allocation3 + $0x63] sm:$0xff] }
 0x7e5   : > { %9567 = vmatmul.mubr.msk.f32.gmra.mxu0 %vm618_vm1, %v3887_v48  ;;  %9522 = vmatprep.mubr.msk.f32.mxu1 %vm10505_vm6, %v10501_v25  ;;  %v12185_v48 = vld [vmem:[#allocation3 + $0x64] sm:$0xff] }
 0x7e6   : > { %9569 = vmatprep.mubr.msk.f32.mxu0 %vm10505_vm6, %v10501_v25 }
 0x7e8   : > { %9523 = vmatmul.mubr.msk.f32.gmra.mxu1 %vm618_vm1, %v3905_v16  ;;  %v4658_v16 = vld [vmem:[#allocation3 + $0x6b] sm:$0xf] }
 0x7e9   : > { %9570 = vmatmul.mubr.msk.f32.gmra.mxu0 %vm618_vm1, %v3888_v0  ;;  %9580 = vmatprep.mubr.msk.f32.mxu1 %vm10505_vm6, %v10501_v25  ;;  %v4857_v0 = vld [vmem:[#allocation3 + $0x6c] sm:$0xf] }
 0x7ea   : > { %9627 = vmatprep.mubr.msk.f32.mxu0 %vm10505_vm6, %v10501_v25 }
 0x7ec   : > { %9581 = vmatmul.mubr.msk.f32.vlgmr.msra.gmra.mxu1 %vm618_vm1, %v4248_v35  ;;  %v5243_v35 = vld [vmem:[#allocation3 + $0x15] sm:$0xff] }
 0x7ed   : > { %9628 = vmatmul.mubr.msk.f32.vlgmr.msra.gmra.mxu0 %vm618_vm1, %v4447_v5  ;;  %9583 = vmatprep.mubr.msk.f32.mxu1 %vm10505_vm6, %v10501_v25 }
 0x7ee   : > { %9630 = vmatprep.mubr.msk.f32.mxu0 %vm10505_vm6, %v10501_v25  ;;  %9667 = vmatpush3.msra.mxu1 %v4662_v24  ;;  %v5244_v24 = vld [vmem:[#allocation3 + $0x1d] sm:$0xff] }
 0x7ef   : > { %9714 = vmatpush3.msra.mxu0 %v4861_v19  ;;  %9668 = vmatprep.subr.mxu1 %v10501_v25  ;;  %v5457_v19 = vld [vmem:[%s13550_s8 + $0x110] sm:$0xff] }
 0x7f0   : > { %9715 = vmatprep.subr.mxu0 %v10501_v25  ;;  %9584 = vmatmul.mubr.msk.f32.gmra.mxu1 %vm618_vm1, %v4447_v5  ;;  %v5458_v5 = vld [vmem:[%s13550_s8 + $0x118] sm:$0xff] }
 0x7f1   : > { %9631 = vmatmul.mubr.msk.f32.gmra.mxu0 %vm618_vm1, %v4448_v7  ;;  %9586 = vmatprep.mubr.msk.f32.mxu1 %vm10505_vm6, %v10501_v25 }
 0x7f2   : > { %9633 = vmatprep.mubr.msk.f32.mxu0 %vm10505_vm6, %v10501_v25  ;;  %9669 = vmatpush3.msra.mxu1 %v4661_v30  ;;  %v5456_v30 = vld [vmem:[%s13550_s8 + $0x108] sm:$0xff] }
 0x7f3   : > { %9716 = vmatpush3.msra.mxu0 %v4860_v28  ;;  %9670 = vmatprep.subr.mxu1 %v10501_v25  ;;  %v5246_v28 = vld [vmem:[#allocation3 + $0x2d] sm:$0xff] }
 0x7f4   : > { %9717 = vmatprep.subr.mxu0 %v10501_v25  ;;  %9587 = vmatmul.mubr.msk.f32.gmra.mxu1 %vm618_vm1, %v4448_v7  ;;  %v5245_v7 = vld [vmem:[#allocation3 + $0x25] sm:$0xff] }
 0x7f5   : > { %9634 = vmatmul.mubr.msk.f32.gmra.mxu0 %vm618_vm1, %v4449_v61  ;;  %9589 = vmatprep.mubr.msk.f32.mxu1 %vm10505_vm6, %v10501_v25 }
 0x7f6   : > { %9636 = vmatprep.mubr.msk.f32.mxu0 %vm10505_vm6, %v10501_v25  ;;  %9671 = vmatpush3.msra.mxu1 %v4660_v29  ;;  %v5247_v29 = vld [vmem:[#allocation3 + $0x35] sm:$0xff] }
 0x7f7   : > { %9718 = vmatpush3.msra.mxu0 %v4859_v22  ;;  %9672 = vmatprep.subr.mxu1 %v10501_v25  ;;  %v5248_v22 = vld [vmem:[#allocation3 + $0x3d] sm:$0xff] }
 0x7f8   : > { %9719 = vmatprep.subr.mxu0 %v10501_v25  ;;  %9590 = vmatmul.mubr.msk.f32.gmra.mxu1 %vm618_vm1, %v4449_v61  ;;  %v5455_v61 = vld [vmem:[%s13550_s8 + $0x100] sm:$0xff] }
 0x7f9   : > { %9637 = vmatmul.mubr.msk.f32.gmra.mxu0 %vm618_vm1, %v4450_v33  ;;  %9592 = vmatprep.mubr.msk.f32.mxu1 %vm10505_vm6, %v10501_v25 }
 0x7fa   : > { %9639 = vmatprep.mubr.msk.f32.mxu0 %vm10505_vm6, %v10501_v25  ;;  %9673 = vmatpush3.msra.mxu1 %v4659_v15  ;;  %v5250_v15 = vld [vmem:[#allocation3 + $0x4d] sm:$0xff] }
 0x7fb   : > { %9720 = vmatpush3.msra.mxu0 %v4858_v37  ;;  %9760 = vmatprep.subr.mxu1 %v10501_v25  ;;  %v5251_v37 = vld [vmem:[#allocation3 + $0x55] sm:$0xff] }
 0x7fc   : > { %9807 = vmatprep.subr.mxu0 %v10501_v25  ;;  %9593 = vmatmul.mubr.msk.f32.gmra.mxu1 %vm618_vm1, %v4450_v33  ;;  %v5249_v33 = vld [vmem:[#allocation3 + $0x45] sm:$0xff] }
 0x7fd   : > { %9640 = vmatmul.mubr.msk.f32.gmra.mxu0 %vm618_vm1, %v4451_v41  ;;  %9595 = vmatprep.mubr.msk.f32.mxu1 %vm10505_vm6, %v10501_v25 }
 0x7fe   : > { %9642 = vmatprep.mubr.msk.f32.mxu0 %vm10505_vm6, %v10501_v25 }
 0x800   : > { %9596 = vmatmul.mubr.msk.f32.gmra.mxu1 %vm618_vm1, %v4451_v41 }
 0x801   : > { %9643 = vmatmul.mubr.msk.f32.gmra.mxu0 %vm618_vm1, %v4452_v56  ;;  %9598 = vmatprep.mubr.msk.f32.mxu1 %vm10505_vm6, %v10501_v25 }
 0x802   : > { %9645 = vmatprep.mubr.msk.f32.mxu0 %vm10505_vm6, %v10501_v25 }
 0x804   : > { %9599 = vmatmul.mubr.msk.f32.gmra.mxu1 %vm618_vm1, %v4452_v56 }
 0x805   : > { %9646 = vmatmul.mubr.msk.f32.gmra.mxu0 %vm618_vm1, %v4453_v9  ;;  %9601 = vmatprep.mubr.msk.f32.mxu1 %vm10505_vm6, %v10501_v25 }
 0x806   : > { %9648 = vmatprep.mubr.msk.f32.mxu0 %vm10505_vm6, %v10501_v25 }
 0x808   : > { %9602 = vmatmul.mubr.msk.f32.gmra.mxu1 %vm618_vm1, %v4453_v9 }
 0x809   : > { %9649 = vmatmul.mubr.msk.f32.gmra.mxu0 %vm618_vm1, %v4454_v10  ;;  %9604 = vmatprep.mubr.msk.f32.mxu1 %vm10505_vm6, %v10501_v25 }
 0x80a   : > { %9651 = vmatprep.mubr.msk.f32.mxu0 %vm10505_vm6, %v10501_v25 }
 0x80c   : > { %9605 = vmatmul.mubr.msk.f32.gmra.mxu1 %vm618_vm1, %v4454_v10  ;;  %v5055_v10 = vld [vmem:[#allocation3 + $0x6c] sm:$0xff] }
 0x80d   : > { %9652 = vmatmul.mubr.msk.f32.gmra.mxu0 %vm618_vm1, %v4455_v38  ;;  %9607 = vmatprep.mubr.msk.f32.mxu1 %vm10505_vm6, %v10501_v25 }
 0x80e   : > { %9654 = vmatprep.mubr.msk.f32.mxu0 %vm10505_vm6, %v10501_v25 }
 0x810   : > { %9608 = vmatmul.mubr.msk.f32.gmra.mxu1 %vm618_vm1, %v4455_v38  ;;  %v5254_v38 = vld [vmem:[#allocation3 + $0x6d] sm:$0xff] }
 0x811   : > { %9655 = vmatmul.mubr.msk.f32.gmra.mxu0 %vm618_vm1, %v4456_v11  ;;  %9610 = vmatprep.mubr.msk.f32.mxu1 %vm10505_vm6, %v10501_v25 }
 0x812   : > { %9657 = vmatprep.mubr.msk.f32.mxu0 %vm10505_vm6, %v10501_v25 }
 0x814   : > { %9611 = vmatmul.mubr.msk.f32.gmra.mxu1 %vm618_vm1, %v4456_v11 }
 0x815   : > { %9658 = vmatmul.mubr.msk.f32.gmra.mxu0 %vm618_vm1, %v4457_v3  ;;  %9613 = vmatprep.mubr.msk.f32.mxu1 %vm10505_vm6, %v10501_v25 }
 0x816   : > { %9660 = vmatprep.mubr.msk.f32.mxu0 %vm10505_vm6, %v10501_v25 }
 0x818   : > { %9614 = vmatmul.mubr.msk.f32.gmra.mxu1 %vm618_vm1, %v4457_v3 }
 0x819   : > { %9661 = vmatmul.mubr.msk.f32.gmra.mxu0 %vm618_vm1, %v4458_v44  ;;  %9616 = vmatprep.mubr.msk.f32.mxu1 %vm10505_vm6, %v10501_v25 }
 0x81a   : > { %9663 = vmatprep.mubr.msk.f32.mxu0 %vm10505_vm6, %v10501_v25 }
 0x81c   : > { %9617 = vmatmul.mubr.msk.f32.gmra.mxu1 %vm618_vm1, %v4260_v27  ;;  %v5056_v27 = vld [vmem:[#allocation3 + $0x74] sm:$0xf] }
 0x81d   : > { %9664 = vmatmul.mubr.msk.f32.gmra.mxu0 %vm618_vm1, %v4459_v4  ;;  %9674 = vmatprep.mubr.msk.f32.mxu1 %vm10505_vm6, %v10501_v25  ;;  %v5255_v4 = vld [vmem:[#allocation3 + $0x75] sm:$0xf] }
 0x81e   : > { %9721 = vmatprep.mubr.msk.f32.mxu0 %vm10505_vm6, %v10501_v25 }
 0x820   : > { %9675 = vmatmul.mubr.msk.f32.vlgmr.msra.gmra.mxu1 %vm618_vm1, %v4646_v2 }
 0x821   : > { %9722 = vmatmul.mubr.msk.f32.vlgmr.msra.gmra.mxu0 %vm618_vm1, %v4845_v47  ;;  %9677 = vmatprep.mubr.msk.f32.mxu1 %vm10505_vm6, %v10501_v25 }
 0x822   : > { %9724 = vmatprep.mubr.msk.f32.mxu0 %vm10505_vm6, %v10501_v25  ;;  %9761 = vmatpush3.msra.mxu1 %v5060_v32 }
 0x823   : > { %9808 = vmatpush3.msra.mxu0 %v5259_v39  ;;  %9762 = vmatprep.subr.mxu1 %v10501_v25 }
 0x824   : > { %9809 = vmatprep.subr.mxu0 %v10501_v25  ;;  %9678 = vmatmul.mubr.msk.f32.gmra.mxu1 %vm618_vm1, %v4647_v49 }
 0x825   : > { %9725 = vmatmul.mubr.msk.f32.gmra.mxu0 %vm618_vm1, %v12072_v52  ;;  %9680 = vmatprep.mubr.msk.f32.mxu1 %vm10505_vm6, %v10501_v25 }
 0x826   : > { %9727 = vmatprep.mubr.msk.f32.mxu0 %vm10505_vm6, %v10501_v25  ;;  %9763 = vmatpush3.msra.mxu1 %v5059_v46 }
 0x827   : > { %9810 = vmatpush3.msra.mxu0 %v5258_v17  ;;  %9764 = vmatprep.subr.mxu1 %v10501_v25  ;;  %v5442_v17 = vld [vmem:[#allocation3 + $0x16] sm:$0xff] }
 0x828   : > { %9811 = vmatprep.subr.mxu0 %v10501_v25  ;;  %9681 = vmatmul.mubr.msk.f32.gmra.mxu1 %vm618_vm1, %v4648_v12 }
 0x829   : > { %9728 = vmatmul.mubr.msk.f32.gmra.mxu0 %vm618_vm1, %v12086_v53  ;;  %9683 = vmatprep.mubr.msk.f32.mxu1 %vm10505_vm6, %v10501_v25 }
 0x82a   : > { %9730 = vmatprep.mubr.msk.f32.mxu0 %vm10505_vm6, %v10501_v25  ;;  %9765 = vmatpush3.msra.mxu1 %v5058_v36 }
 0x82b   : > { %9812 = vmatpush3.msra.mxu0 %v5257_v26  ;;  %9766 = vmatprep.subr.mxu1 %v10501_v25 }
 0x82c   : > { %9813 = vmatprep.subr.mxu0 %v10501_v25  ;;  %9684 = vmatmul.mubr.msk.f32.gmra.mxu1 %vm618_vm1, %v4649_v50 }
 0x82d   : > { %9731 = vmatmul.mubr.msk.f32.gmra.mxu0 %vm618_vm1, %v12103_v54  ;;  %9686 = vmatprep.mubr.msk.f32.mxu1 %vm10505_vm6, %v10501_v25 }
 0x82e   : > { %9733 = vmatprep.mubr.msk.f32.mxu0 %vm10505_vm6, %v10501_v25  ;;  %9767 = vmatpush3.msra.mxu1 %v5057_v18 }
 0x82f   : > { %9814 = vmatpush3.msra.mxu0 %v5256_v57  ;;  %9854 = vmatprep.subr.mxu1 %v10501_v25 }
 0x830   : > { %9901 = vmatprep.subr.mxu0 %v10501_v25  ;;  %9687 = vmatmul.mubr.msk.f32.gmra.mxu1 %vm618_vm1, %v4650_v59 }
 0x831   : > { %9734 = vmatmul.mubr.msk.f32.gmra.mxu0 %vm618_vm1, %v12120_v23  ;;  %9689 = vmatprep.mubr.msk.f32.mxu1 %vm10505_vm6, %v10501_v25 }
 0x832   : > { %9736 = vmatprep.mubr.msk.f32.mxu0 %vm10505_vm6, %v10501_v25 }
 0x834   : > { %9690 = vmatmul.mubr.msk.f32.gmra.mxu1 %vm618_vm1, %v4651_v43 }
 0x835   : > { %9737 = vmatmul.mubr.msk.f32.gmra.mxu0 %vm618_vm1, %v12131_v58  ;;  %9692 = vmatprep.mubr.msk.f32.mxu1 %vm10505_vm6, %v10501_v25 }
 0x836   : > { %9739 = vmatprep.mubr.msk.f32.mxu0 %vm10505_vm6, %v10501_v25 }
 0x838   : > { %9693 = vmatmul.mubr.msk.f32.gmra.mxu1 %vm618_vm1, %v4652_v1 }
 0x839   : > { %9740 = vmatmul.mubr.msk.f32.gmra.mxu0 %vm618_vm1, %v12140_v6  ;;  %9695 = vmatprep.mubr.msk.f32.mxu1 %vm10505_vm6, %v10501_v25 }
 0x83a   : > { %9742 = vmatprep.mubr.msk.f32.mxu0 %vm10505_vm6, %v10501_v25 }
 0x83c   : > { %9696 = vmatmul.mubr.msk.f32.gmra.mxu1 %vm618_vm1, %v4653_v31 }
 0x83d   : > { %9743 = vmatmul.mubr.msk.f32.gmra.mxu0 %vm618_vm1, %v12149_v51  ;;  %9698 = vmatprep.mubr.msk.f32.mxu1 %vm10505_vm6, %v10501_v25 }
 0x83e   : > { %9745 = vmatprep.mubr.msk.f32.mxu0 %vm10505_vm6, %v10501_v25 }
 0x840   : > { %9699 = vmatmul.mubr.msk.f32.gmra.mxu1 %vm618_vm1, %v4654_v63 }
 0x841   : > { %9746 = vmatmul.mubr.msk.f32.gmra.mxu0 %vm618_vm1, %v12158_v45  ;;  %9701 = vmatprep.mubr.msk.f32.mxu1 %vm10505_vm6, %v10501_v25 }
 0x842   : > { %9748 = vmatprep.mubr.msk.f32.mxu0 %vm10505_vm6, %v10501_v25 }
 0x844   : > { %9702 = vmatmul.mubr.msk.f32.gmra.mxu1 %vm618_vm1, %v4655_v55 }
 0x845   : > { %9749 = vmatmul.mubr.msk.f32.gmra.mxu0 %vm618_vm1, %v12167_v14  ;;  %9704 = vmatprep.mubr.msk.f32.mxu1 %vm10505_vm6, %v10501_v25 }
 0x846   : > { %9751 = vmatprep.mubr.msk.f32.mxu0 %vm10505_vm6, %v10501_v25 }
 0x848   : > { %9705 = vmatmul.mubr.msk.f32.gmra.mxu1 %vm618_vm1, %v4656_v8 }
 0x849   : > { %9752 = vmatmul.mubr.msk.f32.gmra.mxu0 %vm618_vm1, %v12176_v21  ;;  %9707 = vmatprep.mubr.msk.f32.mxu1 %vm10505_vm6, %v10501_v25 }
 0x84a   : > { %9754 = vmatprep.mubr.msk.f32.mxu0 %vm10505_vm6, %v10501_v25 }
 0x84c   : > { %9708 = vmatmul.mubr.msk.f32.gmra.mxu1 %vm618_vm1, %v4657_v62 }
 0x84d   : > { %9755 = vmatmul.mubr.msk.f32.gmra.mxu0 %vm618_vm1, %v12185_v48  ;;  %9710 = vmatprep.mubr.msk.f32.mxu1 %vm10505_vm6, %v10501_v25 }
 0x84e   : > { %9757 = vmatprep.mubr.msk.f32.mxu0 %vm10505_vm6, %v10501_v25 }
 0x850   : > { %9711 = vmatmul.mubr.msk.f32.gmra.mxu1 %vm618_vm1, %v4658_v16 }
 0x851   : > { %9758 = vmatmul.mubr.msk.f32.gmra.mxu0 %vm618_vm1, %v4857_v0  ;;  %9768 = vmatprep.mubr.msk.f32.mxu1 %vm10505_vm6, %v10501_v25 }
 0x852   : > { %9815 = vmatprep.mubr.msk.f32.mxu0 %vm10505_vm6, %v10501_v25 }
 0x854   : > { %9769 = vmatmul.mubr.msk.f32.vlgmr.msra.gmra.mxu1 %vm618_vm1, %v12072_v52 }
 0x855   : > { %9816 = vmatmul.mubr.msk.f32.vlgmr.msra.gmra.mxu0 %vm618_vm1, %v5243_v35  ;;  %9771 = vmatprep.mubr.msk.f32.mxu1 %vm10505_vm6, %v10501_v25 }
 0x856   : > { %9818 = vmatprep.mubr.msk.f32.mxu0 %vm10505_vm6, %v10501_v25  ;;  %9855 = vmatpush3.msra.mxu1 %v5458_v5 }
 0x857   : > { %9856 = vmatprep.subr.mxu1 %v10501_v25 }
 0x858   : > { %9772 = vmatmul.mubr.msk.f32.gmra.mxu1 %vm618_vm1, %v12086_v53 }
 0x859   : > { %9819 = vmatmul.mubr.msk.f32.gmra.mxu0 %vm618_vm1, %v5244_v24  ;;  %9774 = vmatprep.mubr.msk.f32.mxu1 %vm10505_vm6, %v10501_v25 }
 0x85a   : > { %9821 = vmatprep.mubr.msk.f32.mxu0 %vm10505_vm6, %v10501_v25  ;;  %9857 = vmatpush3.msra.mxu1 %v5457_v19  ;;  %v5447_v19 = vld [vmem:[#allocation3 + $0x3e] sm:$0xff] }
 0x85b   : > { %9858 = vmatprep.subr.mxu1 %v10501_v25 }
 0x85c   : > { %9775 = vmatmul.mubr.msk.f32.gmra.mxu1 %vm618_vm1, %v12103_v54  ;;  %v5443_v54 = vld [vmem:[#allocation3 + $0x1e] sm:$0xff] }
 0x85d   : > { %9822 = vmatmul.mubr.msk.f32.gmra.mxu0 %vm618_vm1, %v5245_v7  ;;  %9777 = vmatprep.mubr.msk.f32.mxu1 %vm10505_vm6, %v10501_v25 }
 0x85e   : > { %9824 = vmatprep.mubr.msk.f32.mxu0 %vm10505_vm6, %v10501_v25  ;;  %9859 = vmatpush3.msra.mxu1 %v5456_v30 }
 0x85f   : > { %9860 = vmatprep.subr.mxu1 %v10501_v25 }
 0x860   : > { %9778 = vmatmul.mubr.msk.f32.gmra.mxu1 %vm618_vm1, %v12120_v23 }
 0x861   : > { %9825 = vmatmul.mubr.msk.f32.gmra.mxu0 %vm618_vm1, %v5246_v28  ;;  %9780 = vmatprep.mubr.msk.f32.mxu1 %vm10505_vm6, %v10501_v25 }
 0x862   : > { %9827 = vmatprep.mubr.msk.f32.mxu0 %vm10505_vm6, %v10501_v25  ;;  %9861 = vmatpush3.msra.mxu1 %v5455_v61 }
 0x863   : > { %9948 = vmatprep.subr.mxu1 %v10501_v25 }
 0x864   : > { %9781 = vmatmul.mubr.msk.f32.gmra.mxu1 %vm618_vm1, %v12131_v58  ;;  %v5444_v58 = vld [vmem:[#allocation3 + $0x26] sm:$0xff] }
 0x865   : > { %9828 = vmatmul.mubr.msk.f32.gmra.mxu0 %vm618_vm1, %v5247_v29  ;;  %9783 = vmatprep.mubr.msk.f32.mxu1 %vm10505_vm6, %v10501_v25 }
 0x866   : > { %9830 = vmatprep.mubr.msk.f32.mxu0 %vm10505_vm6, %v10501_v25 }
 0x868   : > { %9784 = vmatmul.mubr.msk.f32.gmra.mxu1 %vm618_vm1, %v12140_v6 }
 0x869   : > { %9831 = vmatmul.mubr.msk.f32.gmra.mxu0 %vm618_vm1, %v5248_v22  ;;  %9786 = vmatprep.mubr.msk.f32.mxu1 %vm10505_vm6, %v10501_v25  ;;  %v5448_v22 = vld [vmem:[#allocation3 + $0x46] sm:$0xff] }
 0x86a   : > { %9833 = vmatprep.mubr.msk.f32.mxu0 %vm10505_vm6, %v10501_v25 }
 0x86c   : > { %9787 = vmatmul.mubr.msk.f32.gmra.mxu1 %vm618_vm1, %v12149_v51 }
 0x86d   : > { %9834 = vmatmul.mubr.msk.f32.gmra.mxu0 %vm618_vm1, %v5249_v33  ;;  %9789 = vmatprep.mubr.msk.f32.mxu1 %vm10505_vm6, %v10501_v25 }
 0x86e   : > { %9836 = vmatprep.mubr.msk.f32.mxu0 %vm10505_vm6, %v10501_v25 }
 0x870   : > { %9790 = vmatmul.mubr.msk.f32.gmra.mxu1 %vm618_vm1, %v12158_v45  ;;  %v5445_v45 = vld [vmem:[#allocation3 + $0x2e] sm:$0xff] }
 0x871   : > { %9837 = vmatmul.mubr.msk.f32.gmra.mxu0 %vm618_vm1, %v5250_v15  ;;  %9792 = vmatprep.mubr.msk.f32.mxu1 %vm10505_vm6, %v10501_v25 }
 0x872   : > { %9839 = vmatprep.mubr.msk.f32.mxu0 %vm10505_vm6, %v10501_v25 }
 0x874   : > { %9793 = vmatmul.mubr.msk.f32.gmra.mxu1 %vm618_vm1, %v12167_v14 }
 0x875   : > { %9840 = vmatmul.mubr.msk.f32.gmra.mxu0 %vm618_vm1, %v5251_v37  ;;  %9795 = vmatprep.mubr.msk.f32.mxu1 %vm10505_vm6, %v10501_v25 }
 0x876   : > { %9842 = vmatprep.mubr.msk.f32.mxu0 %vm10505_vm6, %v10501_v25 }
 0x878   : > { %9796 = vmatmul.mubr.msk.f32.gmra.mxu1 %vm618_vm1, %v12176_v21 }
 0x879   : > { %9843 = vmatmul.mubr.msk.f32.gmra.mxu0 %vm618_vm1, %v5252_v13  ;;  %9798 = vmatprep.mubr.msk.f32.mxu1 %vm10505_vm6, %v10501_v25 }
 0x87a   : > { %9845 = vmatprep.mubr.msk.f32.mxu0 %vm10505_vm6, %v10501_v25 }
 0x87c   : > { %v4020_v41 = vpop.f32.mrf.mxu1  ;;  %9799 = vmatmul.mubr.msk.f32.gmra.mxu1 %vm618_vm1, %v12185_v48  ;;  %v5446_v48 = vld [vmem:[#allocation3 + $0x36] sm:$0xff] }
 0x87d   : > { %v4189_v34 = vpop.f32.mrf.mxu0  ;;  %9846 = vmatmul.mubr.msk.f32.gmra.mxu0 %vm618_vm1, %v5253_v20  ;;  %9801 = vmatprep.mubr.msk.f32.mxu1 %vm10505_vm6, %v10501_v25 }
 0x87e   : > { %v12289_v42 = vadd.f32 %v4189_v34, %v4020_v41  ;;  %9848 = vmatprep.mubr.msk.f32.mxu0 %vm10505_vm6, %v10501_v25  ;;  %v9491_v56 = vpop.f32.mrf.mxu1  ;;  %v5449_v41 = vld [vmem:[#allocation3 + $0x4e] sm:$0xff] }
 0x87f   : > { %v9538_v9 = vpop.f32.mrf.mxu0 }
 0x880   : > { %v4025_v11 = vpop.f32.mrf.mxu1  ;;  %9802 = vmatmul.mubr.msk.f32.gmra.mxu1 %vm618_vm1, %v5055_v10 }
 0x881   : > { %v4194_v3 = vpop.f32.mrf.mxu0  ;;  %9849 = vmatmul.mubr.msk.f32.gmra.mxu0 %vm618_vm1, %v5254_v38  ;;  %9804 = vmatprep.mubr.msk.f32.mxu1 %vm10505_vm6, %v10501_v25 }
 0x882   : > { %v12297_v44 = vadd.f32 %v4194_v3, %v4025_v11  ;;  %9851 = vmatprep.mubr.msk.f32.mxu0 %vm10505_vm6, %v10501_v25  ;;  %v9494_v32 = vpop.f32.mrf.mxu1  ;;  %v5450_v11 = vld [vmem:[#allocation3 + $0x56] sm:$0xff] }
 0x883   : > { %v9541_v2 = vpop.f32.mrf.mxu0 }
 0x884   : > { %v4030_v47 = vpop.f32.mrf.mxu1  ;;  %9805 = vmatmul.mubr.msk.f32.gmra.mxu1 %vm618_vm1, %v5056_v27 }
 0x885   : > { %v4199_v39 = vpop.f32.mrf.mxu0  ;;  %9852 = vmatmul.mubr.msk.f32.gmra.mxu0 %vm618_vm1, %v5255_v4  ;;  %9862 = vmatprep.mubr.msk.f32.mxu1 %vm10505_vm6, %v10501_v25 }
 0x886   : > { %v12305_v46 = vadd.f32 %v4199_v39, %v4030_v47  ;;  %9909 = vmatprep.mubr.msk.f32.mxu0 %vm10505_vm6, %v10501_v25  ;;  %v9497_v49 = vpop.f32.mrf.mxu1  ;;  %v5451_v47 = vld [vmem:[#allocation3 + $0x5e] sm:$0xff] }
 0x887   : > { %v9544_v52 = vpop.f32.mrf.mxu0 }
 0x888   : > { %v4035_v12 = vpop.f32.mrf.mxu1  ;;  %9863 = vmatmul.mubr.msk.f32.vlgmr.msra.gmra.mxu1 %vm618_vm1, %v5442_v17 }
 0x889   : > { %v4204_v53 = vpop.f32.mrf.mxu0  ;;  %9865 = vmatprep.mubr.msk.f32.mxu1 %vm10505_vm6, %v10501_v25 }
 0x88a   : > { %v12312_v36 = vadd.f32 %v4204_v53, %v4035_v12  ;;  %v9500_v26 = vpop.f32.mrf.mxu1 }
 0x88b   : > { %v9547_v50 = vpop.f32.mrf.mxu0  ;;  %v5452_v26 = vld [vmem:[#allocation3 + $0x66] sm:$0xff] }
 0x88c   : > { %v4040_v18 = vpop.f32.mrf.mxu1  ;;  %9866 = vmatmul.mubr.msk.f32.gmra.mxu1 %vm618_vm1, %v5443_v54 }
 0x88d   : > { %v4209_v57 = vpop.f32.mrf.mxu0  ;;  %9868 = vmatprep.mubr.msk.f32.mxu1 %vm10505_vm6, %v10501_v25 }
 0x88e   : > { %v12317_v59 = vadd.f32 %v4209_v57, %v4040_v18  ;;  %v9503_v23 = vpop.f32.mrf.mxu1 }
 0x88f   : > { %v9550_v43 = vpop.f32.mrf.mxu0 }
 0x890   : > { %v4045_v1 = vpop.f32.mrf.mxu1  ;;  %9869 = vmatmul.mubr.msk.f32.gmra.mxu1 %vm618_vm1, %v5444_v58  ;;  %v5453_v43 = vld [vmem:[#allocation3 + $0x6e] sm:$0xff] }
 0x891   : > { %v4214_v6 = vpop.f32.mrf.mxu0  ;;  %9871 = vmatprep.mubr.msk.f32.mxu1 %vm10505_vm6, %v10501_v25 }
 0x892   : > { %v12322_v31 = vadd.f32 %v4214_v6, %v4045_v1  ;;  %v9506_v51 = vpop.f32.mrf.mxu1 }
 0x893   : > { %v9553_v63 = vpop.f32.mrf.mxu0  ;;  %v5454_v51 = vld [vmem:[#allocation3 + $0x76] sm:$0xf] }
 0x894   : > { %v4050_v55 = vpop.f32.mrf.mxu1  ;;  %9872 = vmatmul.mubr.msk.f32.gmra.mxu1 %vm618_vm1, %v5445_v45 }
 0x895   : > { %v4219_v14 = vpop.f32.mrf.mxu0  ;;  %9874 = vmatprep.mubr.msk.f32.mxu1 %vm10505_vm6, %v10501_v25 }
 0x896   : > { %v12327_v8 = vadd.f32 %v4219_v14, %v4050_v55  ;;  %v9509_v21 = vpop.f32.mrf.mxu1 }
 0x897   : > { %v9556_v62 = vpop.f32.mrf.mxu0 }
 0x898   : > { %v4055_v16 = vpop.f32.mrf.mxu1  ;;  %9875 = vmatmul.mubr.msk.f32.gmra.mxu1 %vm618_vm1, %v5446_v48 }
 0x899   : > { %v4224_v0 = vpop.f32.mrf.mxu0  ;;  %9877 = vmatprep.mubr.msk.f32.mxu1 %vm10505_vm6, %v10501_v25 }
 0x89a   : > { %v12332_v35 = vadd.f32 %v4224_v0, %v4055_v16  ;;  %v9512_v5 = vpop.f32.mrf.mxu1 }
 0x89b   : > { %v9559_v24 = vpop.f32.mrf.mxu0 }
 0x89c   : > { %v4060_v7 = vpop.f32.mrf.mxu1  ;;  %9878 = vmatmul.mubr.msk.f32.gmra.mxu1 %vm618_vm1, %v5447_v19 }
 0x89d   : > { %v4229_v30 = vpop.f32.mrf.mxu0  ;;  %9880 = vmatprep.mubr.msk.f32.mxu1 %vm10505_vm6, %v10501_v25 }
 0x89e   : > { %v12337_v28 = vadd.f32 %v4229_v30, %v4060_v7  ;;  %v9515_v61 = vpop.f32.mrf.mxu1 }
 0x89f   : > { %v9562_v29 = vpop.f32.mrf.mxu0 }
 0x8a0   : > { %v4065_v33 = vpop.f32.mrf.mxu1  ;;  %9881 = vmatmul.mubr.msk.f32.gmra.mxu1 %vm618_vm1, %v5448_v22 }
 0x8a1   : > { %v4234_v15 = vpop.f32.mrf.mxu0  ;;  %9883 = vmatprep.mubr.msk.f32.mxu1 %vm10505_vm6, %v10501_v25 }
 0x8a2   : > { %v12342_v37 = vadd.f32 %v4234_v15, %v4065_v33  ;;  %v9518_v13 = vpop.f32.mrf.mxu1 }
 0x8a3   : > { %v9565_v20 = vpop.f32.mrf.mxu0 }
 0x8a4   : > { %v4070_v34 = vpop.f32.mrf.mxu1  ;;  %9884 = vmatmul.mubr.msk.f32.gmra.mxu1 %vm618_vm1, %v5449_v41 }
 0x8a5   : > { %v4239_v56 = vpop.f32.mrf.mxu0  ;;  %9886 = vmatprep.mubr.msk.f32.mxu1 %vm10505_vm6, %v10501_v25 }
 0x8a6   : > { %v12347_v9 = vadd.f32 %v4239_v56, %v4070_v34  ;;  %v9521_v10 = vpop.f32.mrf.mxu1 }
 0x8a7   : > { %v9568_v38 = vpop.f32.mrf.mxu0 }
 0x8a8   : > { %v4075_v3 = vpop.f32.mrf.mxu1  ;;  %9887 = vmatmul.mubr.msk.f32.gmra.mxu1 %vm618_vm1, %v5450_v11 }
 0x8a9   : > { %v4244_v27 = vpop.f32.mrf.mxu0  ;;  %9889 = vmatprep.mubr.msk.f32.mxu1 %vm10505_vm6, %v10501_v25 }
 0x8aa   : > { %v12352_v4 = vadd.f32 %v4244_v27, %v4075_v3  ;;  %v9524_v32 = vpop.f32.mrf.mxu1 }
 0x8ab   : > { %v9571_v2 = vpop.f32.mrf.mxu0 }
 0x8ac   : > { %v4370_v39 = vpop.f32.mrf.mxu1  ;;  %9890 = vmatmul.mubr.msk.f32.gmra.mxu1 %vm618_vm1, %v5451_v47 }
 0x8ad   : > { %v4569_v49 = vpop.f32.mrf.mxu0  ;;  %v4434_v52 = vadd.f32 %v4370_v39, %v12001_v40  ;;  %9892 = vmatprep.mubr.msk.f32.mxu1 %vm10505_vm6, %v10501_v25 }
 0x8ae   : > { %v9582_v17 = vpop.f32.mrf.mxu1 }
 0x8af   : > { %v9629_v12 = vpop.f32.mrf.mxu0  ;;  %v12360_v53 = vadd.f32 %v4569_v49, %v4434_v52 }
 0x8b0   : > { %v4375_v50 = vpop.f32.mrf.mxu1  ;;  %9893 = vmatmul.mubr.msk.f32.gmra.mxu1 %vm618_vm1, %v5452_v26 }
 0x8b1   : > { %v4574_v54 = vpop.f32.mrf.mxu0  ;;  %v4435_v18 = vadd.f32 %v4375_v50, %v12289_v42  ;;  %9895 = vmatprep.mubr.msk.f32.mxu1 %vm10505_vm6, %v10501_v25 }
 0x8b2   : > { %v9585_v57 = vpop.f32.mrf.mxu1 }
 0x8b3   : > { %v9632_v23 = vpop.f32.mrf.mxu0  ;;  %v12366_v40 = vadd.f32 %v4574_v54, %v4435_v18 }
 0x8b4   : > { %v4380_v58 = vpop.f32.mrf.mxu1  ;;  %9896 = vmatmul.mubr.msk.f32.gmra.mxu1 %vm618_vm1, %v5453_v43 }
 0x8b5   : > { %v4579_v1 = vpop.f32.mrf.mxu0  ;;  %v4436_v6 = vadd.f32 %v4380_v58, %v12297_v44  ;;  %9898 = vmatprep.mubr.msk.f32.mxu1 %vm10505_vm6, %v10501_v25 }
 0x8b6   : > { %v9588_v63 = vpop.f32.mrf.mxu1 }
 0x8b7   : > { %v9635_v42 = vpop.f32.mrf.mxu0  ;;  %v12372_v45 = vadd.f32 %v4579_v1, %v4436_v6 }
 0x8b8   : > { %v4385_v55 = vpop.f32.mrf.mxu1  ;;  %9899 = vmatmul.mubr.msk.f32.gmra.mxu1 %vm618_vm1, %v5454_v51 }
 0x8b9   : > { %v4584_v14 = vpop.f32.mrf.mxu0  ;;  %v4437_v21 = vadd.f32 %v4385_v55, %v12305_v46  ;;  %9956 = vmatprep.mubr.msk.f32.mxu1 %vm10505_vm6, %v10501_v25 }
 0x8ba   : > { %v9591_v62 = vpop.f32.mrf.mxu1 }
 0x8bb   : > { %v9638_v48 = vpop.f32.mrf.mxu0  ;;  %v12378_v44 = vadd.f32 %v4584_v14, %v4437_v21 }
 0x8bc   : > { %v4390_v16 = vpop.f32.mrf.mxu1 }
 0x8bd   : > { %v4589_v0 = vpop.f32.mrf.mxu0  ;;  %v4438_v5 = vadd.f32 %v4390_v16, %v12312_v36 }
 0x8be   : > { %v9594_v24 = vpop.f32.mrf.mxu1 }
 0x8bf   : > { %v9641_v19 = vpop.f32.mrf.mxu0  ;;  %v12381_v7 = vadd.f32 %v4589_v0, %v4438_v5 }
 0x8c0   : > { %v4395_v30 = vpop.f32.mrf.mxu1 }
 0x8c1   : > { %v4594_v61 = vpop.f32.mrf.mxu0  ;;  %v4439_v29 = vadd.f32 %v4395_v30, %v12317_v59 }
 0x8c2   : > { %v9597_v46 = vpop.f32.mrf.mxu1 }
 0x8c3   : > { %v9644_v22 = vpop.f32.mrf.mxu0  ;;  %v12384_v33 = vadd.f32 %v4594_v61, %v4439_v29 }
 0x8c4   : > { %v4400_v15 = vpop.f32.mrf.mxu1 }
 0x8c5   : > { %v4599_v13 = vpop.f32.mrf.mxu0  ;;  %v4440_v20 = vadd.f32 %v4400_v15, %v12322_v31 }
 0x8c6   : > { %v9600_v41 = vpop.f32.mrf.mxu1 }
 0x8c7   : > { %v9647_v34 = vpop.f32.mrf.mxu0  ;;  %v12387_v56 = vadd.f32 %v4599_v13, %v4440_v20 }
 0x8c8   : > { %v4405_v36 = vpop.f32.mrf.mxu1 }
 0x8c9   : > { %v4604_v10 = vpop.f32.mrf.mxu0  ;;  %v4441_v38 = vadd.f32 %v4405_v36, %v12327_v8 }
 0x8ca   : > { %v9603_v11 = vpop.f32.mrf.mxu1 }
 0x8cb   : > { %v9650_v3 = vpop.f32.mrf.mxu0  ;;  %v12390_v27 = vadd.f32 %v4604_v10, %v4441_v38 }
 0x8cc   : > { %v4410_v59 = vpop.f32.mrf.mxu1 }
 0x8cd   : > { %v4609_v32 = vpop.f32.mrf.mxu0  ;;  %v4442_v2 = vadd.f32 %v4410_v59, %v12332_v35 }
 0x8ce   : > { %v9606_v47 = vpop.f32.mrf.mxu1 }
 0x8cf   : > { %v9653_v39 = vpop.f32.mrf.mxu0  ;;  %v12393_v49 = vadd.f32 %v4609_v32, %v4442_v2 }
 0x8d0   : > { %v4415_v31 = vpop.f32.mrf.mxu1 }
 0x8d1   : > { %v4614_v52 = vpop.f32.mrf.mxu0  ;;  %v4443_v17 = vadd.f32 %v4415_v31, %v12337_v28 }
 0x8d2   : > { %v9609_v12 = vpop.f32.mrf.mxu1 }
 0x8d3   : > { %v9656_v26 = vpop.f32.mrf.mxu0  ;;  %v12396_v50 = vadd.f32 %v4614_v52, %v4443_v17 }
 0x8d4   : > { %v4420_v8 = vpop.f32.mrf.mxu1 }
 0x8d5   : > { %v4619_v54 = vpop.f32.mrf.mxu0  ;;  %v4444_v18 = vadd.f32 %v4420_v8, %v12342_v37 }
 0x8d6   : > { %v9612_v57 = vpop.f32.mrf.mxu1 }
 0x8d7   : > { %v9659_v23 = vpop.f32.mrf.mxu0  ;;  %v12399_v43 = vadd.f32 %v4619_v54, %v4444_v18 }
 0x8d8   : > { %v4425_v35 = vpop.f32.mrf.mxu1 }
 0x8d9   : > { %v4624_v58 = vpop.f32.mrf.mxu0  ;;  %v4445_v1 = vadd.f32 %v4425_v35, %v12347_v9 }
 0x8da   : > { %v9615_v6 = vpop.f32.mrf.mxu1 }
 0x8db   : > { %v9662_v51 = vpop.f32.mrf.mxu0  ;;  %v12402_v63 = vadd.f32 %v4624_v58, %v4445_v1 }
 0x8dc   : > { %v4430_v28 = vpop.f32.mrf.mxu1 }
 0x8dd   : > { %v4629_v42 = vpop.f32.mrf.mxu0  ;;  %v4446_v55 = vadd.f32 %v4430_v28, %v12352_v4 }
 0x8de   : > { %v9618_v14 = vpop.f32.mrf.mxu1 }
 0x8df   : > { %v9665_v21 = vpop.f32.mrf.mxu0  ;;  %v12405_v62 = vadd.f32 %v4629_v42, %v4446_v55 }
 0x8e0   : > { %v4768_v37 = vpop.f32.mrf.mxu1 }
 0x8e1   : > { %v4967_v48 = vpop.f32.mrf.mxu0  ;;  %v4832_v16 = vadd.f32 %v4768_v37, %v12360_v53 }
 0x8e2   : > { %v9676_v0 = vpop.f32.mrf.mxu1 }
 0x8e3   : > { %v9723_v5 = vpop.f32.mrf.mxu0  ;;  %v12408_v24 = vadd.f32 %v4967_v48, %v4832_v16 }
 0x8e4   : > { %v4773_v9 = vpop.f32.mrf.mxu1 }
 0x8e5   : > { %v4972_v19 = vpop.f32.mrf.mxu0  ;;  %v4833_v30 = vadd.f32 %v4773_v9, %v12366_v40 }
 0x8e6   : > { %v9679_v61 = vpop.f32.mrf.mxu1 }
 0x8e7   : > { %v9726_v29 = vpop.f32.mrf.mxu0  ;;  %v12411_v46 = vadd.f32 %v4972_v19, %v4833_v30 }
 0x8e8   : > { %v4778_v4 = vpop.f32.mrf.mxu1 }
 0x8e9   : > { %v4977_v22 = vpop.f32.mrf.mxu0  ;;  %v4834_v15 = vadd.f32 %v4778_v4, %v12372_v45 }
 0x8ea   : > { %v9682_v13 = vpop.f32.mrf.mxu1 }
 0x8eb   : > { %v9729_v20 = vpop.f32.mrf.mxu0  ;;  %v12414_v41 = vadd.f32 %v4977_v22, %v4834_v15 }
 0x8ec   : > { %v4783_v53 = vpop.f32.mrf.mxu1 }
 0x8ed   : > { %v4982_v34 = vpop.f32.mrf.mxu0  ;;  %v4835_v36 = vadd.f32 %v4783_v53, %v12378_v44 }
 0x8ee   : > { %v9685_v10 = vpop.f32.mrf.mxu1 }
 0x8ef   : > { %v9732_v38 = vpop.f32.mrf.mxu0  ;;  %v12417_v11 = vadd.f32 %v4982_v34, %v4835_v36 }
 0x8f0   : > { %v4788_v40 = vpop.f32.mrf.mxu1 }
 0x8f1   : > { %v4987_v3 = vpop.f32.mrf.mxu0  ;;  %v4836_v59 = vadd.f32 %v4788_v40, %v12381_v7 }
 0x8f2   : > { %v9688_v32 = vpop.f32.mrf.mxu1 }
 0x8f3   : > { %v9735_v2 = vpop.f32.mrf.mxu0  ;;  %v12420_v47 = vadd.f32 %v4987_v3, %v4836_v59 }
 0x8f4   : > { %v4793_v45 = vpop.f32.mrf.mxu1 }
 0x8f5   : > { %v4992_v39 = vpop.f32.mrf.mxu0  ;;  %v4837_v31 = vadd.f32 %v4793_v45, %v12384_v33 }
 0x8f6   : > { %v9691_v52 = vpop.f32.mrf.mxu1 }
 0x8f7   : > { %v9738_v17 = vpop.f32.mrf.mxu0  ;;  %v12423_v12 = vadd.f32 %v4992_v39, %v4837_v31 }
 0x8f8   : > { %v4798_v44 = vpop.f32.mrf.mxu1 }
 0x8f9   : > { %v4997_v26 = vpop.f32.mrf.mxu0  ;;  %v4838_v8 = vadd.f32 %v4798_v44, %v12387_v56 }
 0x8fa   : > { %v9694_v54 = vpop.f32.mrf.mxu1 }
 0x8fb   : > { %v9741_v18 = vpop.f32.mrf.mxu0  ;;  %v12426_v57 = vadd.f32 %v4997_v26, %v4838_v8 }
 0x8fc   : > { %v4803_v7 = vpop.f32.mrf.mxu1 }
 0x8fd   : > { %v5002_v23 = vpop.f32.mrf.mxu0  ;;  %v4839_v35 = vadd.f32 %v4803_v7, %v12390_v27 }
 0x8fe   : > { %v9697_v58 = vpop.f32.mrf.mxu1 }
 0x8ff   : > { %v9744_v1 = vpop.f32.mrf.mxu0  ;;  %v12429_v6 = vadd.f32 %v5002_v23, %v4839_v35 }
 0x900   : > { %v4808_v33 = vpop.f32.mrf.mxu1 }
 0x901   : > { %v5007_v51 = vpop.f32.mrf.mxu0  ;;  %v4840_v28 = vadd.f32 %v4808_v33, %v12393_v49 }
 0x902   : > { %v9700_v42 = vpop.f32.mrf.mxu1 }
 0x903   : > { %v9747_v55 = vpop.f32.mrf.mxu0  ;;  %v12432_v14 = vadd.f32 %v5007_v51, %v4840_v28 }
 0x904   : > { %v4813_v56 = vpop.f32.mrf.mxu1 }
 0x905   : > { %v5012_v21 = vpop.f32.mrf.mxu0  ;;  %v4841_v37 = vadd.f32 %v4813_v56, %v12396_v50 }
 0x906   : > { %v9703_v48 = vpop.f32.mrf.mxu1 }
 0x907   : > { %v9750_v16 = vpop.f32.mrf.mxu0  ;;  %v12435_v0 = vadd.f32 %v5012_v21, %v4841_v37 }
 0x908   : > { %v4818_v27 = vpop.f32.mrf.mxu1 }
 0x909   : > { %v5017_v5 = vpop.f32.mrf.mxu0  ;;  %v4842_v9 = vadd.f32 %v4818_v27, %v12399_v43 }
 0x90a   : > { %v9706_v19 = vpop.f32.mrf.mxu1 }
 0x90b   : > { %v9753_v30 = vpop.f32.mrf.mxu0  ;;  %v12438_v61 = vadd.f32 %v5017_v5, %v4842_v9 }
 0x90c   : > { %v4823_v49 = vpop.f32.mrf.mxu1 }
 0x90d   : > { %v5022_v29 = vpop.f32.mrf.mxu0  ;;  %v4843_v4 = vadd.f32 %v4823_v49, %v12402_v63 }
 0x90e   : > { %v9709_v22 = vpop.f32.mrf.mxu1 }
 0x90f   : > { %v9756_v15 = vpop.f32.mrf.mxu0  ;;  %v12441_v13 = vadd.f32 %v5022_v29, %v4843_v4 }
 0x910   : > { %v4828_v50 = vpop.f32.mrf.mxu1 }
 0x911   : > { %v5027_v20 = vpop.f32.mrf.mxu0  ;;  %v4844_v53 = vadd.f32 %v4828_v50, %v12405_v62 }
 0x912   : > { %v9712_v34 = vpop.f32.mrf.mxu1 }
 0x913   : > { %v9759_v36 = vpop.f32.mrf.mxu0  ;;  %v12444_v10 = vadd.f32 %v5027_v20, %v4844_v53 }
 0x914   : > { %v5166_v43 = vpop.f32.mrf.mxu1 }
 0x915   : > { %v12446_v38 = vpop.f32.mrf.mxu0 }
 0x916   : > { %v9770_v40 = vpop.f32.mrf.mxu1 }
 0x917   : > { %v9817_v3 = vpop.f32.mrf.mxu0 }
 0x918   : > { %v12448_v59 = vpop.f32.mrf.mxu1 }
 0x919   : > { %v12450_v63 = vpop.f32.mrf.mxu0 }
 0x91a   : > { %v9773_v32 = vpop.f32.mrf.mxu1 }
 0x91b   : > { %v9820_v2 = vpop.f32.mrf.mxu0 }
 0x91c   : > { %v12452_v45 = vpop.f32.mrf.mxu1 }
 0x91d   : > { %v12454_v39 = vpop.f32.mrf.mxu0 }
 0x91e   : > { %v9776_v62 = vpop.f32.mrf.mxu1 }
 0x91f   : > { %v9823_v31 = vpop.f32.mrf.mxu0 }
 0x920   : > { %v12456_v52 = vpop.f32.mrf.mxu1 }
 0x921   : > { %v12458_v17 = vpop.f32.mrf.mxu0 }
 0x922   : > { %v9779_v44 = vpop.f32.mrf.mxu1 }
 0x923   : > { %v9826_v26 = vpop.f32.mrf.mxu0 }
 0x924   : > { %v12460_v8 = vpop.f32.mrf.mxu1 }
 0x925   : > { %v12462_v54 = vpop.f32.mrf.mxu0 }
 0x926   : > { %v9782_v18 = vpop.f32.mrf.mxu1 }
 0x927   : > { %v9829_v7 = vpop.f32.mrf.mxu0 }
 0x928   : > { %v12464_v23 = vpop.f32.mrf.mxu1 }
 0x929   : > { %v12466_v35 = vpop.f32.mrf.mxu0 }
 0x92a   : > { %v9785_v58 = vpop.f32.mrf.mxu1 }
 0x92b   : > { %v9832_v1 = vpop.f32.mrf.mxu0 }
 0x92c   : > { %v5196_v33 = vpop.f32.mrf.mxu1 }
 0x92d   : > { %v5395_v51 = vpop.f32.mrf.mxu0  ;;  %v5236_v28 = vadd.f32 %v5196_v33, %v12426_v57 }
 0x92e   : > { %v9788_v42 = vpop.f32.mrf.mxu1 }
 0x92f   : > { %v9835_v55 = vpop.f32.mrf.mxu0  ;;  %v12469_v56 = vadd.f32 %v5395_v51, %v5236_v28  ;;  %v5231_v51 = vadd.f32 %v12448_v59, %v12411_v46 }
 0x930   : > { %v5201_v21 = vpop.f32.mrf.mxu1 }
 0x931   : > { %v5400_v37 = vpop.f32.mrf.mxu0  ;;  %v5237_v48 = vadd.f32 %v5201_v21, %v12429_v6  ;;  %v5430_v55 = vadd.f32 %v12450_v63, %v5231_v51 }
 0x932   : > { %v9791_v16 = vpop.f32.mrf.mxu1 }
 0x933   : > { %v9838_v27 = vpop.f32.mrf.mxu0  ;;  %v12472_v5 = vadd.f32 %v5400_v37, %v5237_v48  ;;  %v5233_v16 = vadd.f32 %v12456_v52, %v12417_v11 }
 0x934   : > { %v5206_v9 = vpop.f32.mrf.mxu1 }
 0x935   : > { %v5405_v19 = vpop.f32.mrf.mxu0  ;;  %v5238_v30 = vadd.f32 %v5206_v9, %v12432_v14 }
 0x936   : > { %v9794_v49 = vpop.f32.mrf.mxu1 }
 0x937   : > { %v9841_v29 = vpop.f32.mrf.mxu0  ;;  %v12475_v4 = vadd.f32 %v5405_v19, %v5238_v30  ;;  %v5432_v30 = vadd.f32 %v12458_v17, %v5233_v16  ;;  %v5235_v17 = vadd.f32 %v12464_v23, %v12423_v12  ;;  %v5808_v16 = vld [vmem:[%s13556_s14 + $0x20] sm:$0xff] }
 0x938   : > { %v5211_v57 = vpop.f32.mrf.mxu1  ;;  %vm5821_vm7 = vcmp.gt.f32.partialorder %v5808_v16, 0.0  ;;  %v5815_v16 = vld [vmem:[%s13556_s14 + $0x58] sm:$0xff] }
 0x939   : > { %v5410_v22 = vpop.f32.mrf.mxu0  ;;  %v5239_v15 = vadd.f32 %v5211_v57, %v12435_v0  ;;  %v5230_v0 = vadd.f32 %v5166_v43, %v12408_v24  ;;  %v12496_v24 = vld [vmem:[%s13551_s9] ss:$0 sm:$0xff]  ;;  %vm5828_vm0 = vcmp.gt.f32.partialorder %v5815_v16, 0.0 }
 0x93a   : > { %v9797_v50 = vpop.f32.mrf.mxu1 }
 0x93b   : > { %v9844_v20 = vpop.f32.mrf.mxu0  ;;  %v12478_v53 = vadd.f32 %v5410_v22, %v5239_v15  ;;  %v5429_v33 = vadd.f32 %v12446_v38, %v5230_v0 }
 0x93c   : > { %v5216_v6 = vpop.f32.mrf.mxu1 }
 0x93d   : > { %v5415_v34 = vpop.f32.mrf.mxu0  ;;  %v5240_v36 = vadd.f32 %v5216_v6, %v12438_v61 }
 0x93e   : > { %v9800_v40 = vpop.f32.mrf.mxu1 }
 0x93f   : > { %v9847_v3 = vpop.f32.mrf.mxu0  ;;  %v12481_v32 = vadd.f32 %v5415_v34, %v5240_v36  ;;  %v5434_v36 = vadd.f32 %v12466_v35, %v5235_v17  ;;  %v5935_v17 = vld [vmem:[%s13552_s10 + $0x8] sm:$0xff] }
 0x940   : > { %v5221_v14 = vpop.f32.mrf.mxu1 }
 0x941   : > { %v5420_v2 = vpop.f32.mrf.mxu0  ;;  %v5241_v62 = vadd.f32 %v5221_v14, %v12441_v13 }
 0x942   : > { %v9803_v31 = vpop.f32.mrf.mxu1 }
 0x943   : > { %v9850_v44 = vpop.f32.mrf.mxu0  ;;  %v12485_v26 = vadd.f32 %v5420_v2, %v5241_v62 }
 0x944   : > { %v5226_v18 = vpop.f32.mrf.mxu1 }
 0x945   : > { %v5425_v7 = vpop.f32.mrf.mxu0  ;;  %v5242_v58 = vadd.f32 %v5226_v18, %v12444_v10  ;;  %v5232_v10 = vadd.f32 %v12452_v45, %v12414_v41 }
 0x946   : > { %v9806_v1 = vpop.f32.mrf.mxu1 }
 0x947   : > { %v9853_v61 = vpop.f32.mrf.mxu0  ;;  %v12491_v28 = vadd.f32 %v5425_v7, %v5242_v58  ;;  %v5431_v48 = vadd.f32 %v12454_v39, %v5232_v10  ;;  %v5234_v39 = vadd.f32 %v12460_v8, %v12420_v47 }
 0x948   : > { %v5564_v13 = vpop.f32.mrf.mxu1 }
 0x949   : > { %v5628_v43 = vadd.f32 %v5564_v13, %v5429_v33  ;;  %v5433_v15 = vadd.f32 %v12462_v54, %v5234_v39  ;;  %v5834_v39 = vsel %vm5821_vm7, 1, %v10506_v60 }
 0x94a   : > { %v9864_v42 = vpop.f32.mrf.mxu1 }
 0x94b   : > { %v12502_v38 = vadd.f32 %v12496_v24, %v5628_v43 }
 0x94c   : > { %v5569_v21 = vpop.f32.mrf.mxu1 }
 0x94d   : > { %v5629_v46 = vadd.f32 %v5569_v21, %v5430_v55  ;;  %v5661_v59 = vmul.f32 %v12502_v38, %v12502_v38 }
 0x94e   : > { %v9867_v37 = vpop.f32.mrf.mxu1 }
 0x94f   : > { %v12510_v27 = vadd.f32 %v12496_v24, %v5629_v46  ;;  %v5674_v63 = vsel %vm618_vm1, %v5661_v59, 0.0  ;;  %v5811_v37 = vld [vmem:[%s13556_s14 + $0x38] sm:$0xff] }
 0x950   : > { %5675 = vadd.xlane.f32.xlu0 %v5674_v63  ;;  %v5574_v41 = vpop.f32.mrf.mxu1  ;;  %vm5824_vm5 = vcmp.gt.f32.partialorder %v5811_v37, 0.0 }
 0x951   : > { %v5630_v45 = vadd.f32 %v5574_v41, %v5431_v48  ;;  %v5662_v9 = vmul.f32 %v12510_v27, %v12510_v27 }
 0x952   : > { %v9870_v19 = vpop.f32.mrf.mxu1 }
 0x953   : > { %v12519_v49 = vadd.f32 %v12496_v24, %v5630_v45  ;;  %v5677_v11 = vsel %vm618_vm1, %v5662_v9, 0.0 }
 0x954   : > { %5678 = vadd.xlane.f32.xlu1 %v5677_v11  ;;  %v5579_v52 = vpop.f32.mrf.mxu1 }
 0x955   : > { %v5631_v29 = vadd.f32 %v5579_v52, %v5432_v30  ;;  %v5663_v57 = vmul.f32 %v12519_v49, %v12519_v49 }
 0x956   : > { %v9873_v22 = vpop.f32.mrf.mxu1 }
 0x957   : > { %v12528_v50 = vadd.f32 %v12496_v24, %v5631_v29  ;;  %v5680_v47 = vsel %vm618_vm1, %v5663_v57, 0.0  ;;  %v5937_v22 = vld [vmem:[%s13552_s10 + $0x18] sm:$0xff] }
 0x958   : > { %5681 = vadd.xlane.f32.xlu0 %v5680_v47  ;;  %v5584_v8 = vpop.f32.mrf.mxu1  ;;  %9949 = vmatpush3.msra.mxu1 %v5937_v22  ;;  %v5951_v47 = vld [vmem:[%s13552_s10 + $0x20] sm:$0xff] }
 0x959   : > { %v5632_v20 = vadd.f32 %v5584_v8, %v5433_v15  ;;  %v5664_v6 = vmul.f32 %v12528_v50, %v12528_v50  ;;  %9950 = vmatprep.subr.mxu1 %v10501_v25  ;;  %v5952_v15 = vld [vmem:[%s13552_s10 + $0x28] sm:$0xff]  ;;  %v5934_v8 = vld [vmem:[%s13552_s10] sm:$0xff] }
 0x95a   : > { %v9876_v34 = vpop.f32.mrf.mxu1 }
 0x95b   : > { %v12535_v40 = vadd.f32 %v12496_v24, %v5632_v20  ;;  %v5683_v54 = vsel %vm618_vm1, %v5664_v6, 0.0  ;;  %v5938_v20 = vld [vmem:[#allocation3 + $0x1] sm:$0xff] }
 0x95c   : > { %5684 = vadd.xlane.f32.xlu0 %v5683_v54  ;;  %v5589_v12 = vpop.f32.mrf.mxu1  ;;  %v5921_v6 = vld [vmem:[#allocation3] sm:$0xff] }
 0x95d   : > { %v5633_v23 = vadd.f32 %v5589_v12, %v5434_v36  ;;  %v5665_v3 = vmul.f32 %v12535_v40, %v12535_v40 }
 0x95e   : > { %v9879_v14 = vpop.f32.mrf.mxu1 }
 0x95f   : > { %v12541_v2 = vadd.f32 %v12496_v24, %v5633_v23  ;;  %v5686_v62 = vsel %vm618_vm1, %v5665_v3, 0.0 }
 0x960   : > { %5687 = vadd.xlane.f32.xlu1 %v5686_v62  ;;  %v5594_v31 = vpop.f32.mrf.mxu1 }
 0x961   : > { %v5634_v35 = vadd.f32 %v5594_v31, %v12469_v56  ;;  %v5666_v44 = vmul.f32 %v12541_v2, %v12541_v2  ;;  %v5809_v56 = vld [vmem:[%s13556_s14 + $0x28] sm:$0xff] }
 0x962   : > { %v9882_v0 = vpop.f32.mrf.mxu1  ;;  %vm5822_vm3 = vcmp.gt.f32.partialorder %v5809_v56, 0.0  ;;  %v5845_v56 = vpop.permute.xlu1 %5844 }
 0x963   : > { %v12548_v18 = vadd.f32 %v12496_v24, %v5634_v35  ;;  %v5689_v7 = vsel %vm618_vm1, %v5666_v44, 0.0  ;;  %v5835_v46 = vsel %vm5822_vm3, 1, %v10506_v60  ;;  %v5812_v44 = vld [vmem:[%s13556_s14 + $0x40] sm:$0xff]  ;;  %vm5882_vm14 = vcmp.eq.s32.totalorder %v5845_v56, 1 }
 0x964   : > { %5690 = vadd.xlane.f32.xlu0 %v5689_v7  ;;  %v5599_v58 = vpop.f32.mrf.mxu1  ;;  %vm5825_vm8 = vcmp.gt.f32.partialorder %v5812_v44, 0.0  ;;  %v5814_v7 = vld [vmem:[%s13556_s14 + $0x50] sm:$0xff] }
 0x965   : > { %v5635_v1 = vadd.f32 %v5599_v58, %v12472_v5  ;;  %v5810_v5 = vld [vmem:[%s13556_s14 + $0x30] sm:$0xff]  ;;  %v5667_v54 = vmul.f32 %v12548_v18, %v12548_v18  ;;  %v5838_v0 = vsel %vm5825_vm8, 1, %v10506_v60  ;;  %vm5827_vm9 = vcmp.gt.f32.partialorder %v5814_v7, 0.0 }
 0x966   : > { %v9885_v61 = vpop.f32.mrf.mxu1  ;;  %vm5823_vm4 = vcmp.gt.f32.partialorder %v5810_v5, 0.0  ;;  %v5840_v58 = vsel %vm5827_vm9, 1, %v10506_v60 }
 0x967   : > { %v12553_v33 = vadd.f32 %v12496_v24, %v5635_v1  ;;  %v5836_v63 = vsel %vm5823_vm4, 1, %v10506_v60  ;;  %v5692_v23 = vsel %vm618_vm1, %v5667_v54, 0.0  ;;  %v12654_v61 = vpop.permute.xlu0 %5847 }
 0x968   : > { %v5604_v51 = vpop.f32.mrf.mxu1  ;;  %vm5883_vm3 = vcmp.eq.s32.totalorder %v12654_v61, 1 }
 0x969   : > { %v5636_v13 = vadd.f32 %v5604_v51, %v12475_v4  ;;  %v5668_v34 = vmul.f32 %v12553_v33, %v12553_v33 }
 0x96a   : > { %v9888_v43 = vpop.f32.mrf.mxu1 }
 0x96b   : > { %v12560_v42 = vadd.f32 %v12496_v24, %v5636_v13  ;;  %v5695_v36 = vsel %vm618_vm1, %v5668_v34, 0.0  ;;  %v12657_v13 = vpop.permute.xlu0 %5850 }
 0x96c   : > { %v5609_v55 = vpop.f32.mrf.mxu1 }
 0x96d   : > { %v5637_v10 = vadd.f32 %v5609_v55, %v12478_v53  ;;  %v5669_v12 = vmul.f32 %v12560_v42, %v12560_v42  ;;  %v12661_v55 = vpop.permute.xlu1 %5853 }
 0x96e   : > { %v9891_v21 = vpop.f32.mrf.mxu1  ;;  %vm5885_vm8 = vcmp.eq.s32.totalorder %v12661_v55, 1 }
 0x96f   : > { %v12568_v59 = vadd.f32 %v12496_v24, %v5637_v10  ;;  %v5698_v3 = vsel %vm618_vm1, %v5669_v12, 0.0 }
 0x970   : > { %v5614_v4 = vpop.f32.mrf.mxu1 }
 0x971   : > { %v5638_v48 = vadd.f32 %v5614_v4, %v12481_v32  ;;  %5859 = vperm.xlu1 %10378, %v5835_v46   ;;  %v5837_v32 = vsel %vm5824_vm5, 1, %v10506_v60  ;;  %v5670_v1 = vmul.f32 %v12568_v59, %v12568_v59  ;;  %v5813_v46 = vld [vmem:[%s13556_s14 + $0x48] sm:$0xff]  ;;  %vm5884_vm5 = vcmp.eq.s32.totalorder %v12657_v13, 1 }
 0x972   : > { %v9894_v53 = vpop.f32.mrf.mxu1  ;;  %vm5826_vm10 = vcmp.gt.f32.partialorder %v5813_v46, 0.0 }
 0x973   : > { %v12579_v41 = vadd.f32 %v12496_v24, %v5638_v48  ;;  %v5701_v51 = vsel %vm618_vm1, %v5670_v1, 0.0 }
 0x974   : > { %v5619_v45 = vpop.f32.mrf.mxu1 }
 0x975   : > { %v5639_v9 = vadd.f32 %v5619_v45, %v12485_v26  ;;  %5862 = vperm.xlu1 %10378, %v5836_v63   ;;  %v5954_v26 = vld [vmem:[%s13552_s10 + $0x38] sm:$0xff]  ;;  %v5671_v14 = vmul.f32 %v12579_v41, %v12579_v41  ;;  %v5839_v63 = vsel %vm5826_vm10, 1, %v10506_v60 }
 0x976   : > { %v9897_v19 = vpop.f32.mrf.mxu1  ;;  %9902 = vmatpush3.msra.mxu0 %v5954_v26  ;;  %v6309_v45 = vld [vmem:[%s13552_s10 + $0x58] sm:$0xff]  ;;  %v7861_v26 = vld [vmem:[%s13556_s14 + $0x60] sm:$0xf] }
 0x977   : > { %v12584_v30 = vadd.f32 %v12496_v24, %v5639_v9  ;;  %9903 = vmatprep.subr.mxu0 %v10501_v25  ;;  %v5704_v62 = vsel %vm618_vm1, %v5671_v14, 0.0  ;;  %vm7874_vm12 = vcmp.gt.f32.partialorder %v7861_v26, 0.0  ;;  %v6506_v26 = vld [vmem:[%s13552_s10 + $0x68] sm:$0xff] }
 0x978   : > { %v5624_v11 = vpop.f32.mrf.mxu1 }
 0x979   : > { %v5640_v52 = vadd.f32 %v5624_v11, %v12491_v28  ;;  %5865 = vperm.xlu1 %10378, %v5837_v32   ;;  %v5953_v28 = vld [vmem:[%s13552_s10 + $0x30] sm:$0xff]  ;;  %v5672_v31 = vmul.f32 %v12584_v30, %v12584_v30  ;;  %v5816_v32 = vld [vmem:[%s13556_s14 + $0x60] sm:$0xf]  ;;  %v5841_v11 = vsel %vm5828_vm0, 1, %v10506_v60 }
 0x97a   : > { %5856 = vperm.xlu0 %10377, %v5834_v39   ;;  %v9900_v29 = vpop.f32.mrf.mxu1  ;;  %9904 = vmatpush3.msra.mxu0 %v5953_v28  ;;  %vm5829_vm11 = vcmp.gt.f32.partialorder %v5816_v32, 0.0 }
 0x97b   : > { %v12589_v57 = vadd.f32 %v12496_v24, %v5640_v52  ;;  %v5936_v24 = vld [vmem:[%s13552_s10 + $0x10] sm:$0xff]  ;;  %9905 = vmatprep.subr.mxu0 %v10501_v25  ;;  %v5707_v35 = vsel %vm618_vm1, %v5672_v31, 0.0  ;;  %v5842_v28 = vsel %vm5829_vm11, 1, %v10506_v60 }
 0x97c   : > { %9951 = vmatpush3.msra.mxu1 %v5936_v24  ;;  %9906 = vmatpush3.msra.mxu0 %v5952_v15 }
 0x97d   : > { %9952 = vmatprep.subr.mxu1 %v10501_v25  ;;  %9907 = vmatprep.subr.mxu0 %v10501_v25  ;;  %v5673_v43 = vmul.f32 %v12589_v57, %v12589_v57 }
 0x97e   : > { %9953 = vmatpush3.msra.mxu1 %v5935_v17  ;;  %9908 = vmatpush3.msra.mxu0 %v5951_v47 }
 0x97f   : > { %9954 = vmatprep.subr.mxu1 %v10501_v25  ;;  %9910 = vmatmul.mubr.msk.f32.vlgmr.msra.gmra.mxu0 %vm618_vm1, %v5938_v20  ;;  %v5710_v10 = vsel %vm2424_vm15, %v5673_v43, 0.0  ;;  %v7887_v20 = vsel %vm7874_vm12, 1, %v10506_v60  ;;  %v6308_v43 = vld [vmem:[%s13552_s10 + $0x50] sm:$0xff] }
 0x980   : > { %9955 = vmatpush3.msra.mxu1 %v5934_v8  ;;  %9912 = vmatprep.mubr.msk.f32.mxu0 %vm10505_vm6, %v10501_v25 }
 0x981   : > { %9957 = vmatmul.mubr.msk.f32.vlgmr.msra.gmra.mxu1 %vm618_vm1, %v5921_v6  ;;  %9995 = vmatprep.subr.mxu0 %v10501_v25 }
 0x982   : > { %9959 = vmatprep.mubr.msk.f32.mxu1 %vm10505_vm6, %v10501_v25  ;;  %10042 = vmatprep.subr.mxu1 %v10501_v25 }
 0x983   : > { %9996 = vmatpush3.msra.mxu0 %v6309_v45 }
 0x984   : > { %9997 = vmatprep.subr.mxu0 %v10501_v25 }
 0x985   : > { %9998 = vmatpush3.msra.mxu0 %v6308_v43 }
 0x986   : > { %9999 = vmatprep.subr.mxu0 %v10501_v25 }
 0x999   : > { %5696 = vadd.xlane.f32.xlu0 %v5695_v36 }
 0x99d   : > { %5693 = vadd.xlane.f32.xlu1 %v5692_v23  ;;  %5699 = vadd.xlane.f32.xlu0 %v5698_v3 }
 0x9a1   : > { %5705 = vadd.xlane.f32.xlu0 %v5704_v62 }
 0x9a5   : > { %5708 = vadd.xlane.f32.xlu0 %v5707_v35 }
 0x9ae   : > { %5868 = vperm.xlu1 %10378, %v5838_v0  }
 0x9bb   : > { %5874 = vperm.xlu0 %10377, %v5840_v58  }
 0x9d2   : > { %5702 = vadd.xlane.f32.xlu1 %v5701_v51 }
 0x9d9   : > { %v5676_v5 = vpop.xlane.xlu0 %5675 }
 0x9da   : > { %v5713_v21 = vmul.f32 0.03125, %v5676_v5  ;;  %5711 = vadd.xlane.f32.xlu0 %v5710_v10 }
 0x9dc   : > { %v5726_v4 = vadd.f32 1e-08, %v5713_v21 }
 0x9dd   : > { %v5679_v37 = vpop.xlane.xlu1 %5678 }
 0x9de   : > { %10439 = vrsqrt.f32 %v5726_v4  ;;  %v5714_v48 = vmul.f32 0.03125, %v5679_v37 }
 0x9e0   : > { %v5727_v53 = vadd.f32 1e-08, %v5714_v48  ;;  %v6508_v48 = vld [vmem:[%s13552_s10 + $0x78] sm:$0xff] }
 0x9e1   : > { %v5682_v9 = vpop.xlane.xlu0 %5681  ;;  %10043 = vmatpush3.msra.mxu1 %v6508_v48 }
 0x9e2   : > { %10441 = vrsqrt.f32 %v5727_v53  ;;  %v5715_v19 = vmul.f32 0.03125, %v5682_v9  ;;  %10044 = vmatprep.subr.mxu1 %v10501_v25 }
 0x9e3   : > { %5871 = vperm.xlu1 %10378, %v5839_v63  }
 0x9e4   : > { %v5728_v39 = vadd.f32 1e-08, %v5715_v19  ;;  %v6507_v19 = vld [vmem:[%s13552_s10 + $0x70] sm:$0xff] }
 0x9e5   : > { %v5685_v52 = vpop.xlane.xlu0 %5684  ;;  %10045 = vmatpush3.msra.mxu1 %v6507_v19 }
 0x9e6   : > { %10443 = vrsqrt.f32 %v5728_v39  ;;  %v5716_v29 = vmul.f32 0.03125, %v5685_v52  ;;  %10046 = vmatprep.subr.mxu1 %v10501_v25 }
 0x9e7   : > { %5877 = vperm.xlu1 %10378, %v5841_v11   ;;  %10047 = vmatpush3.msra.mxu1 %v6506_v26 }
 0x9e8   : > { %v5729_v22 = vadd.f32 1e-08, %v5716_v29  ;;  %10048 = vmatprep.subr.mxu1 %v10501_v25 }
 0x9e9   : > { %v5688_v24 = vpop.xlane.xlu1 %5687 }
 0x9ea   : > { %10445 = vrsqrt.f32 %v5729_v22  ;;  %v5717_v15 = vmul.f32 0.03125, %v5688_v24  ;;  %v6505_v24 = vld [vmem:[%s13552_s10 + $0x60] sm:$0xff] }
 0x9eb   : > { %v10440_v17 = vpop.eup %10439  ;;  %5880 = vperm.xlu1 %10378, %v5842_v28   ;;  %10049 = vmatpush3.msra.mxu1 %v6505_v24 }
 0x9ec   : > { %v5752_v47 = vmul.f32 %v10440_v17, %v12502_v38  ;;  %v5730_v8 = vadd.f32 1e-08, %v5717_v15  ;;  %10136 = vmatprep.subr.mxu1 %v10501_v25 }
 0x9ed   : > { %v5691_v6 = vpop.xlane.xlu0 %5690  ;;  %v5860_v9 = vpop.permute.xlu1 %5859 }
 0x9ee   : > { %vm5765_vm13 = vcmp.ge.f32.partialorder %v5752_v47, 0.0  ;;  %v5778_v34 = vmul.f32 0.1, %v5752_v47  ;;  %10447 = vrsqrt.f32 %v5730_v8  ;;  %v5718_v54 = vmul.f32 0.03125, %v5691_v6 }
 0x9ef   : > { %v10442_v36 = vpop.eup %10441  ;;  %7925 = vperm.xlu1 %10378, %v7887_v20   ;;  %vm5887_vm11 = vcmp.eq.s32.totalorder %v5860_v9, 1 }
 0x9f0   : > { %v5791_v12 = vsel %vm5765_vm13, %v5752_v47, %v5778_v34  ;;  %v5753_v23 = vmul.f32 %v10442_v36, %v12510_v27  ;;  %7922 = vperm.xlu0 %10377, %v5841_v11   ;;  %v5731_v14 = vadd.f32 1e-08, %v5718_v54 }
 0x9f1   : > { %v5895_v3 = vsel %vm5882_vm14, %v5791_v12, 0.0  ;;  %v5863_v47 = vpop.permute.xlu1 %5862 }
 0x9f2   : > { %5908 = vst.msk [vmem:[#allocation3 + $0xb] sm:$0xff] %vm618_vm1, %v5895_v3  ;;  %vm5766_vm2 = vcmp.ge.f32.partialorder %v5753_v23, 0.0  ;;  %v5779_v38 = vmul.f32 0.1, %v5753_v23  ;;  %10449 = vrsqrt.f32 %v5731_v14 }
 0x9f3   : > { %v10444_v62 = vpop.eup %10443 }
 0x9f4   : > { %v5792_v31 = vsel %vm5766_vm2, %v5753_v23, %v5779_v38  ;;  %v5754_v35 = vmul.f32 %v10444_v62, %v12519_v49 }
 0x9f5   : > { %v5896_v44 = vsel %vm5883_vm3, %v5792_v31, 0.0  ;;  %v5857_v10 = vpop.permute.xlu0 %5856  ;;  %v5866_v8 = vpop.permute.xlu1 %5865  ;;  %vm5888_vm3 = vcmp.eq.s32.totalorder %v5863_v47, 1 }
 0x9f6   : > { %5909 = vst.msk [vmem:[#allocation3 + $0x13] sm:$0xff] %vm618_vm1, %v5896_v44  ;;  %vm5767_vm4 = vcmp.ge.f32.partialorder %v5754_v35, 0.0  ;;  %v5780_v0 = vmul.f32 0.1, %v5754_v35  ;;  %vm5886_vm10 = vcmp.eq.s32.totalorder %v5857_v10, 1  ;;  %vm5889_vm13 = vcmp.eq.s32.totalorder %v5866_v8, 1 }
 0x9f7   : > { %v10446_v27 = vpop.eup %10445 }
 0x9f8   : > { %v5793_v7 = vsel %vm5767_vm4, %v5754_v35, %v5780_v0  ;;  %v5755_v58 = vmul.f32 %v10446_v27, %v12528_v50 }
 0x9f9   : > { %v5897_v1 = vsel %vm5884_vm5, %v5793_v7, 0.0  ;;  %v5939_v51 = vld [vmem:[#allocation3 + $0x9] sm:$0xff] }
 0x9fa   : > { %v5922_v56 = vld [vmem:[#allocation3 + $0x8] sm:$0xff]  ;;  %5910 = vst.msk [vmem:[#allocation3 + $0x1b] sm:$0xff] %vm618_vm1, %v5897_v1  ;;  %vm5768_vm7 = vcmp.ge.f32.partialorder %v5755_v58, 0.0  ;;  %v5781_v61 = vmul.f32 0.1, %v5755_v58  ;;  %9913 = vmatmul.mubr.msk.f32.gmra.mxu0 %vm618_vm1, %v5939_v51 }
 0x9fb   : > { %9960 = vmatmul.mubr.msk.f32.gmra.mxu1 %vm618_vm1, %v5922_v56  ;;  %v10448_v49 = vpop.eup %10447  ;;  %9915 = vmatprep.mubr.msk.f32.mxu0 %vm10505_vm6, %v10501_v25 }
 0x9fc   : > { %9962 = vmatprep.mubr.msk.f32.mxu1 %vm10505_vm6, %v10501_v25  ;;  %v5794_v50 = vsel %vm5768_vm7, %v5755_v58, %v5781_v61  ;;  %v5756_v13 = vmul.f32 %v10448_v49, %v12535_v40  ;;  %v6307_v40 = vld [vmem:[%s13552_s10 + $0x48] sm:$0xff] }
 0x9fd   : > { %v5898_v5 = vsel %vm5885_vm8, %v5794_v50, 0.0  ;;  %v5940_v21 = vld [vmem:[#allocation3 + $0x11] sm:$0xff]  ;;  %10000 = vmatpush3.msra.mxu0 %v6307_v40 }
 0x9fe   : > { %v5923_v46 = vld [vmem:[#allocation3 + $0x10] sm:$0xff]  ;;  %5911 = vst.msk [vmem:[#allocation3 + $0x23] sm:$0xff] %vm618_vm1, %v5898_v5  ;;  %vm5769_vm9 = vcmp.ge.f32.partialorder %v5756_v13, 0.0  ;;  %v5782_v4 = vmul.f32 0.1, %v5756_v13  ;;  %9916 = vmatmul.mubr.msk.f32.gmra.mxu0 %vm618_vm1, %v5940_v21  ;;  %10001 = vmatprep.subr.mxu0 %v10501_v25 }
 0x9ff   : > { %9963 = vmatmul.mubr.msk.f32.gmra.mxu1 %vm618_vm1, %v5923_v46  ;;  %9918 = vmatprep.mubr.msk.f32.mxu0 %vm10505_vm6, %v10501_v25  ;;  %v10450_v55 = vpop.eup %10449 }
 0xa00   : > { %9965 = vmatprep.mubr.msk.f32.mxu1 %vm10505_vm6, %v10501_v25  ;;  %v5795_v37 = vsel %vm5769_vm9, %v5756_v13, %v5782_v4  ;;  %v5757_v16 = vmul.f32 %v10450_v55, %v12541_v2  ;;  %v6306_v2 = vld [vmem:[%s13552_s10 + $0x40] sm:$0xff] }
 0xa01   : > { %v5899_v53 = vsel %vm5886_vm10, %v5795_v37, 0.0  ;;  %v5941_v63 = vld [vmem:[#allocation3 + $0x19] sm:$0xff]  ;;  %10002 = vmatpush3.msra.mxu0 %v6306_v2 }
 0xa02   : > { %v5924_v45 = vld [vmem:[#allocation3 + $0x18] sm:$0xff]  ;;  %5912 = vst.msk [vmem:[#allocation3 + $0x2b] sm:$0xff] %vm618_vm1, %v5899_v53  ;;  %9919 = vmatmul.mubr.msk.f32.gmra.mxu0 %vm618_vm1, %v5941_v63  ;;  %vm5770_vm0 = vcmp.ge.f32.partialorder %v5757_v16, 0.0  ;;  %v5783_v32 = vmul.f32 0.1, %v5757_v16  ;;  %10089 = vmatprep.subr.mxu0 %v10501_v25 }
 0xa03   : > { %9966 = vmatmul.mubr.msk.f32.gmra.mxu1 %vm618_vm1, %v5924_v45  ;;  %9921 = vmatprep.mubr.msk.f32.mxu0 %vm10505_vm6, %v10501_v25 }
 0xa04   : > { %9968 = vmatprep.mubr.msk.f32.mxu1 %vm10505_vm6, %v10501_v25  ;;  %v5796_v39 = vsel %vm5770_vm0, %v5757_v16, %v5783_v32 }
 0xa05   : > { %v5942_v11 = vld [vmem:[#allocation3 + $0x21] sm:$0xff]  ;;  %v5900_v29 = vsel %vm5887_vm11, %v5796_v39, 0.0 }
 0xa06   : > { %v5925_v52 = vld [vmem:[#allocation3 + $0x20] sm:$0xff]  ;;  %9922 = vmatmul.mubr.msk.f32.gmra.mxu0 %vm618_vm1, %v5942_v11  ;;  %5913 = vst.msk [vmem:[#allocation3 + $0x33] sm:$0xff] %vm618_vm1, %v5900_v29 }
 0xa07   : > { %9969 = vmatmul.mubr.msk.f32.gmra.mxu1 %vm618_vm1, %v5925_v52  ;;  %9924 = vmatprep.mubr.msk.f32.mxu0 %vm10505_vm6, %v10501_v25 }
 0xa08   : > { %9971 = vmatprep.mubr.msk.f32.mxu1 %vm10505_vm6, %v10501_v25 }
 0xa09   : > { %v5943_v22 = vld [vmem:[#allocation3 + $0x29] sm:$0xff] }
 0xa0a   : > { %v5926_v28 = vld [vmem:[#allocation3 + $0x28] sm:$0xff]  ;;  %9925 = vmatmul.mubr.msk.f32.gmra.mxu0 %vm618_vm1, %v5943_v22 }
 0xa0b   : > { %9972 = vmatmul.mubr.msk.f32.gmra.mxu1 %vm618_vm1, %v5926_v28  ;;  %9927 = vmatprep.mubr.msk.f32.mxu0 %vm10505_vm6, %v10501_v25 }
 0xa0c   : > { %9974 = vmatprep.mubr.msk.f32.mxu1 %vm10505_vm6, %v10501_v25 }
 0xa0d   : > { %v5944_v15 = vld [vmem:[#allocation3 + $0x31] sm:$0xff] }
 0xa0e   : > { %v5927_v17 = vld [vmem:[#allocation3 + $0x30] sm:$0xff]  ;;  %9928 = vmatmul.mubr.msk.f32.gmra.mxu0 %vm618_vm1, %v5944_v15 }
 0xa0f   : > { %9975 = vmatmul.mubr.msk.f32.gmra.mxu1 %vm618_vm1, %v5927_v17  ;;  %9930 = vmatprep.mubr.msk.f32.mxu0 %vm10505_vm6, %v10501_v25 }
 0xa10   : > { %9977 = vmatprep.mubr.msk.f32.mxu1 %vm10505_vm6, %v10501_v25 }
 0xa22   : > { %v5697_v20 = vpop.xlane.xlu0 %5696 }
 0xa23   : > { %v5720_v6 = vmul.f32 0.03125, %v5697_v20 }
 0xa25   : > { %v5733_v34 = vadd.f32 1e-08, %v5720_v6 }
 0xa26   : > { %v5694_v36 = vpop.xlane.xlu1 %5693  ;;  %v5700_v54 = vpop.xlane.xlu0 %5699 }
 0xa27   : > { %10451 = vrsqrt.f32 %v5733_v34  ;;  %v5719_v12 = vmul.f32 0.03125, %v5694_v36  ;;  %v5721_v23 = vmul.f32 0.03125, %v5700_v54 }
 0xa29   : > { %v5732_v3 = vadd.f32 1e-08, %v5719_v12  ;;  %v5734_v14 = vadd.f32 1e-08, %v5721_v23 }
 0xa2a   : > { %v5706_v38 = vpop.xlane.xlu0 %5705  ;;  %v5869_v50 = vpop.permute.xlu1 %5868 }
 0xa2b   : > { %10453 = vrsqrt.f32 %v5732_v3  ;;  %v5723_v62 = vmul.f32 0.03125, %v5706_v38  ;;  %vm5890_vm4 = vcmp.eq.s32.totalorder %v5869_v50, 1  ;;  %v6494_v50 = vld [vmem:[#allocation3 + $0x1a] sm:$0xff] }
 0xa2c   : > { %10455 = vrsqrt.f32 %v5734_v14 }
 0xa2d   : > { %v5736_v31 = vadd.f32 1e-08, %v5723_v62 }
 0xa2e   : > { %v5709_v61 = vpop.xlane.xlu0 %5708 }
 0xa2f   : > { %10457 = vrsqrt.f32 %v5736_v31  ;;  %v5724_v55 = vmul.f32 0.03125, %v5709_v61  ;;  %v6706_v61 = vld [vmem:[%s13552_s10 + $0x90] sm:$0xff] }
 0xa34   : > { %v10452_v35 = vpop.eup %10451 }
 0xa35   : > { %v5759_v44 = vmul.f32 %v10452_v35, %v12553_v33 }
 0xa37   : > { %vm5772_vm12 = vcmp.ge.f32.partialorder %v5759_v44, 0.0  ;;  %v5785_v0 = vmul.f32 0.1, %v5759_v44 }
 0xa38   : > { %v10454_v27 = vpop.eup %10453 }
 0xa39   : > { %v10456_v7 = vpop.eup %10455  ;;  %v5798_v58 = vsel %vm5772_vm12, %v5759_v44, %v5785_v0  ;;  %v5758_v1 = vmul.f32 %v10454_v27, %v12548_v18  ;;  %v5875_v18 = vpop.permute.xlu0 %5874 }
 0xa3a   : > { %v5902_v51 = vsel %vm5889_vm13, %v5798_v58, 0.0  ;;  %v5760_v56 = vmul.f32 %v10456_v7, %v12560_v42  ;;  %vm5892_vm7 = vcmp.eq.s32.totalorder %v5875_v18, 1  ;;  %v6293_v7 = vld [vmem:[#allocation3 + $0x2] sm:$0xff]  ;;  %v6492_v58 = vld [vmem:[#allocation3 + $0xa] sm:$0xff]  ;;  %v6497_v18 = vld [vmem:[#allocation3 + $0x32] sm:$0xff] }
 0xa3b   : > { %5915 = vst.msk [vmem:[#allocation3 + $0x43] sm:$0xff] %vm618_vm1, %v5902_v51  ;;  %vm5771_vm14 = vcmp.ge.f32.partialorder %v5758_v1, 0.0  ;;  %v5784_v49 = vmul.f32 0.1, %v5758_v1  ;;  %v6906_v51 = vld [vmem:[%s13552_s10 + $0xb8] sm:$0xff] }
 0xa3c   : > { %v10458_v13 = vpop.eup %10457  ;;  %vm5773_vm2 = vcmp.ge.f32.partialorder %v5760_v56, 0.0  ;;  %v5786_v33 = vmul.f32 0.1, %v5760_v56 }
 0xa3d   : > { %v5797_v43 = vsel %vm5771_vm14, %v5758_v1, %v5784_v49  ;;  %v5762_v5 = vmul.f32 %v10458_v13, %v12579_v41  ;;  %v5737_v41 = vadd.f32 1e-08, %v5724_v55  ;;  %v6707_v1 = vld [vmem:[%s13552_s10 + $0x98] sm:$0xff]  ;;  %v6905_v49 = vld [vmem:[%s13552_s10 + $0xb0] sm:$0xff]  ;;  %v6705_v13 = vld [vmem:[%s13552_s10 + $0x88] sm:$0xff] }
 0xa3e   : > { %v5901_v10 = vsel %vm5888_vm3, %v5797_v43, 0.0  ;;  %v5799_v21 = vsel %vm5773_vm2, %v5760_v56, %v5786_v33  ;;  %v6493_v56 = vld [vmem:[#allocation3 + $0x12] sm:$0xff]  ;;  %v6495_v43 = vld [vmem:[#allocation3 + $0x22] sm:$0xff] }
 0xa3f   : > { %5914 = vst.msk [vmem:[#allocation3 + $0x3b] sm:$0xff] %vm618_vm1, %v5901_v10  ;;  %v5903_v42 = vsel %vm5890_vm4, %v5799_v21, 0.0  ;;  %vm5775_vm5 = vcmp.ge.f32.partialorder %v5762_v5, 0.0  ;;  %v5788_v46 = vmul.f32 0.1, %v5762_v5  ;;  %10459 = vrsqrt.f32 %v5737_v41  ;;  %v6060_v63 = vpop.f32.mrf.mxu0  ;;  %v6904_v33 = vld [vmem:[%s13552_s10 + $0xa8] sm:$0xff] }
 0xa40   : > { %5916 = vst.msk [vmem:[#allocation3 + $0x4b] sm:$0xff] %vm618_vm1, %v5903_v42  ;;  %v6903_v10 = vld [vmem:[%s13552_s10 + $0xa0] sm:$0xff] }
 0xa41   : > { %v5801_v4 = vsel %vm5775_vm5, %v5762_v5, %v5788_v46  ;;  %v6229_v45 = vpop.f32.mrf.mxu1  ;;  %v9911_v2 = vpop.f32.mrf.mxu0  ;;  %v6704_v5 = vld [vmem:[%s13552_s10 + $0x80] sm:$0xff] }
 0xa42   : > { %v5905_v40 = vsel %vm5892_vm7, %v5801_v4, 0.0  ;;  %v12783_v9 = vadd.f32 %v6229_v45, %v6060_v63  ;;  %v6496_v21 = vld [vmem:[#allocation3 + $0x2a] sm:$0xff]  ;;  %v7304_v2 = vld [vmem:[%s13552_s10 + $0xf8] sm:$0xff] }
 0xa43   : > { %5918 = vst.msk [vmem:[#allocation3 + $0x5b] sm:$0xff] %vm618_vm1, %v5905_v40  ;;  %v9958_v39 = vpop.f32.mrf.mxu1  ;;  %v6691_v63 = vld [vmem:[#allocation3 + $0xb] sm:$0xff] }
 0xa46   : > { %v5945_v37 = vld [vmem:[#allocation3 + $0x39] sm:$0xff]  ;;  %v5946_v16 = vld [vmem:[#allocation3 + $0x41] sm:$0xff] }
 0xa47   : > { %v5928_v48 = vld [vmem:[#allocation3 + $0x38] sm:$0xff]  ;;  %9931 = vmatmul.mubr.msk.f32.gmra.mxu0 %vm618_vm1, %v5945_v37  ;;  %v5929_v53 = vld [vmem:[#allocation3 + $0x40] sm:$0xff]  ;;  %v5947_v19 = vld [vmem:[#allocation3 + $0x49] sm:$0xff] }
 0xa48   : > { %9978 = vmatmul.mubr.msk.f32.gmra.mxu1 %vm618_vm1, %v5928_v48  ;;  %9933 = vmatprep.mubr.msk.f32.mxu0 %vm10505_vm6, %v10501_v25  ;;  %v5930_v32 = vld [vmem:[#allocation3 + $0x48] sm:$0xff]  ;;  %v6498_v42 = vld [vmem:[#allocation3 + $0x3a] sm:$0xff] }
 0xa49   : > { %9980 = vmatprep.mubr.msk.f32.mxu1 %vm10505_vm6, %v10501_v25  ;;  %v6499_v46 = vld [vmem:[#allocation3 + $0x42] sm:$0xff]  ;;  %v6500_v4 = vld [vmem:[#allocation3 + $0x4a] sm:$0xff] }
 0xa4b   : > { %9934 = vmatmul.mubr.msk.f32.gmra.mxu0 %vm618_vm1, %v5946_v16 }
 0xa4c   : > { %9981 = vmatmul.mubr.msk.f32.gmra.mxu1 %vm618_vm1, %v5929_v53  ;;  %9936 = vmatprep.mubr.msk.f32.mxu0 %vm10505_vm6, %v10501_v25  ;;  %v10460_v11 = vpop.eup %10459 }
 0xa4d   : > { %9983 = vmatprep.mubr.msk.f32.mxu1 %vm10505_vm6, %v10501_v25  ;;  %v5763_v26 = vmul.f32 %v10460_v11, %v12584_v30 }
 0xa4f   : > { %9937 = vmatmul.mubr.msk.f32.gmra.mxu0 %vm618_vm1, %v5947_v19  ;;  %v5789_v24 = vmul.f32 0.1, %v5763_v26  ;;  %vm5776_vm8 = vcmp.ge.f32.partialorder %v5763_v26, 0.0  ;;  %v6890_v19 = vld [vmem:[#allocation3 + $0xc] sm:$0xff] }
 0xa50   : > { %9984 = vmatmul.mubr.msk.f32.gmra.mxu1 %vm618_vm1, %v5930_v32  ;;  %9939 = vmatprep.mubr.msk.f32.mxu0 %vm10505_vm6, %v10501_v25  ;;  %v7105_v32 = vld [vmem:[%s13552_s10 + $0xd8] sm:$0xff] }
 0xa51   : > { %9986 = vmatprep.mubr.msk.f32.mxu1 %vm10505_vm6, %v10501_v25  ;;  %v5802_v47 = vsel %vm5776_vm8, %v5763_v26, %v5789_v24  ;;  %v6692_v26 = vld [vmem:[#allocation3 + $0x13] sm:$0xff] }
 0xa52   : > { %v7104_v24 = vld [vmem:[%s13552_s10 + $0xd0] sm:$0xff] }
 0xa5b   : > { %v5703_v52 = vpop.xlane.xlu1 %5702 }
 0xa5c   : > { %v5722_v29 = vmul.f32 0.03125, %v5703_v52 }
 0xa5e   : > { %v5735_v22 = vadd.f32 1e-08, %v5722_v29 }
 0xa5f   : > { %v5872_v28 = vpop.permute.xlu1 %5871 }
 0xa60   : > { %10461 = vrsqrt.f32 %v5735_v22  ;;  %vm5891_vm0 = vcmp.eq.s32.totalorder %v5872_v28, 1  ;;  %v12941_v28 = vld [vmem:[#allocation3 + $0x14] sm:$0xff] }
 0xa63   : > { %v5878_v15 = vpop.permute.xlu1 %5877  ;;  %v5712_v17 = vpop.xlane.xlu0 %5711 }
 0xa64   : > { %vm5893_vm9 = vcmp.eq.s32.totalorder %v5878_v15, 1  ;;  %v5725_v8 = vmul.f32 0.03125, %v5712_v17  ;;  %v7303_v15 = vld [vmem:[%s13552_s10 + $0xf0] sm:$0xff] }
 0xa65   : > { %v5906_v20 = vsel %vm5893_vm9, %v5802_v47, 0.0 }
 0xa66   : > { %5919 = vst.msk [vmem:[#allocation3 + $0x63] sm:$0xff] %vm618_vm1, %v5906_v20  ;;  %v5738_v6 = vadd.f32 1e-08, %v5725_v8 }
 0xa67   : > { %v5881_v14 = vpop.permute.xlu1 %5880 }
 0xa68   : > { %10463 = vrsqrt.f32 %v5738_v6  ;;  %vm5894_vm12 = vcmp.eq.s32.totalorder %v5881_v14, 1  ;;  %v6693_v6 = vld [vmem:[#allocation3 + $0x1b] sm:$0xff] }
 0xa6d   : > { %v10462_v34 = vpop.eup %10461  ;;  %v5950_v0 = vld [vmem:[#allocation3 + $0x61] sm:$0xf] }
 0xa6e   : > { %v5761_v36 = vmul.f32 %v10462_v34, %v12568_v59  ;;  %v5933_v27 = vld [vmem:[#allocation3 + $0x60] sm:$0xf] }
 0xa6f   : > { %v6503_v37 = vld [vmem:[#allocation3 + $0x62] sm:$0xff] }
 0xa70   : > { %vm5774_vm10 = vcmp.ge.f32.partialorder %v5761_v36, 0.0  ;;  %v5787_v30 = vmul.f32 0.1, %v5761_v36  ;;  %v6305_v48 = vld [vmem:[#allocation3 + $0x62] sm:$0xf] }
 0xa72   : > { %v5800_v54 = vsel %vm5774_vm10, %v5761_v36, %v5787_v30  ;;  %v12960_v36 = vld [vmem:[#allocation3 + $0x1c] sm:$0xff]  ;;  %v7103_v30 = vld [vmem:[%s13552_s10 + $0xc8] sm:$0xff] }
 0xa73   : > { %v5904_v12 = vsel %vm5891_vm0, %v5800_v54, 0.0  ;;  %v7302_v54 = vld [vmem:[%s13552_s10 + $0xe8] sm:$0xff] }
 0xa74   : > { %5917 = vst.msk [vmem:[#allocation3 + $0x53] sm:$0xff] %vm618_vm1, %v5904_v12 }
 0xa75   : > { %v10464_v23 = vpop.eup %10463 }
 0xa76   : > { %v5764_v3 = vmul.f32 %v10464_v23, %v12589_v57 }
 0xa78   : > { %vm5777_vm11 = vcmp.ge.f32.partialorder %v5764_v3, 0.0  ;;  %v5790_v38 = vmul.f32 0.1, %v5764_v3 }
 0xa7a   : > { %v5803_v62 = vsel %vm5777_vm11, %v5764_v3, %v5790_v38  ;;  %v6694_v38 = vld [vmem:[#allocation3 + $0x23] sm:$0xff] }
 0xa7b   : > { %v5907_v31 = vsel %vm5894_vm12, %v5803_v62, 0.0  ;;  %v5948_v35 = vld [vmem:[#allocation3 + $0x51] sm:$0xff]  ;;  %v5949_v59 = vld [vmem:[#allocation3 + $0x59] sm:$0xff] }
 0xa7c   : > { %v5931_v44 = vld [vmem:[#allocation3 + $0x50] sm:$0xff]  ;;  %5920 = vst.msk [vmem:[#allocation3 + $0x6b] sm:$0xf] %vm2424_vm15, %v5907_v31  ;;  %9940 = vmatmul.mubr.msk.f32.gmra.mxu0 %vm618_vm1, %v5948_v35  ;;  %v5932_v57 = vld [vmem:[#allocation3 + $0x58] sm:$0xff]  ;;  %v12979_v31 = vld [vmem:[#allocation3 + $0x24] sm:$0xff] }
 0xa7d   : > { %9987 = vmatmul.mubr.msk.f32.gmra.mxu1 %vm618_vm1, %v5931_v44  ;;  %9942 = vmatprep.mubr.msk.f32.mxu0 %vm10505_vm6, %v10501_v25  ;;  %v6501_v40 = vld [vmem:[#allocation3 + $0x52] sm:$0xff]  ;;  %v6502_v55 = vld [vmem:[#allocation3 + $0x5a] sm:$0xff]  ;;  %v7102_v35 = vld [vmem:[%s13552_s10 + $0xc0] sm:$0xff] }
 0xa7e   : > { %9989 = vmatprep.mubr.msk.f32.mxu1 %vm10505_vm6, %v10501_v25  ;;  %v7301_v44 = vld [vmem:[%s13552_s10 + $0xe0] sm:$0xff] }
 0xa80   : > { %9943 = vmatmul.mubr.msk.f32.gmra.mxu0 %vm618_vm1, %v5949_v59 }
 0xa81   : > { %9990 = vmatmul.mubr.msk.f32.gmra.mxu1 %vm618_vm1, %v5932_v57  ;;  %9945 = vmatprep.mubr.msk.f32.mxu0 %vm10505_vm6, %v10501_v25 }
 0xa82   : > { %9992 = vmatprep.mubr.msk.f32.mxu1 %vm10505_vm6, %v10501_v25 }
 0xa83   : > { %v6504_v41 = vld [vmem:[#allocation3 + $0x6a] sm:$0xf] }
 0xa84   : > { %9946 = vmatmul.mubr.msk.f32.gmra.mxu0 %vm618_vm1, %v5950_v0 }
 0xa85   : > { %9993 = vmatmul.mubr.msk.f32.gmra.mxu1 %vm618_vm1, %v5933_v27  ;;  %10003 = vmatprep.mubr.msk.f32.mxu0 %vm10505_vm6, %v10501_v25 }
 0xa86   : > { %10050 = vmatprep.mubr.msk.f32.mxu1 %vm10505_vm6, %v10501_v25 }
 0xa88   : > { %10004 = vmatmul.mubr.msk.f32.vlgmr.msra.gmra.mxu0 %vm618_vm1, %v6293_v7 }
 0xa89   : > { %10051 = vmatmul.mubr.msk.f32.vlgmr.msra.gmra.mxu1 %vm618_vm1, %v6492_v58  ;;  %10006 = vmatprep.mubr.msk.f32.mxu0 %vm10505_vm6, %v10501_v25 }
 0xa8a   : > { %10053 = vmatprep.mubr.msk.f32.mxu1 %vm10505_vm6, %v10501_v25  ;;  %10090 = vmatpush3.msra.mxu0 %v6707_v1  ;;  %v12998_v1 = vld [vmem:[#allocation3 + $0x2c] sm:$0xff] }
 0xa8b   : > { %10137 = vmatpush3.msra.mxu1 %v6906_v51  ;;  %10091 = vmatprep.subr.mxu0 %v10501_v25 }
 0xa8c   : > { %10138 = vmatprep.subr.mxu1 %v10501_v25  ;;  %10007 = vmatmul.mubr.msk.f32.gmra.mxu0 %vm618_vm1, %v6492_v58  ;;  %v6695_v58 = vld [vmem:[#allocation3 + $0x2b] sm:$0xff] }
 0xa8d   : > { %10054 = vmatmul.mubr.msk.f32.gmra.mxu1 %vm618_vm1, %v6493_v56  ;;  %10009 = vmatprep.mubr.msk.f32.mxu0 %vm10505_vm6, %v10501_v25 }
 0xa8e   : > { %10056 = vmatprep.mubr.msk.f32.mxu1 %vm10505_vm6, %v10501_v25  ;;  %10092 = vmatpush3.msra.mxu0 %v6706_v61 }
 0xa8f   : > { %10139 = vmatpush3.msra.mxu1 %v6905_v49  ;;  %10093 = vmatprep.subr.mxu0 %v10501_v25 }
 0xa90   : > { %10140 = vmatprep.subr.mxu1 %v10501_v25  ;;  %10010 = vmatmul.mubr.msk.f32.gmra.mxu0 %vm618_vm1, %v6493_v56 }
 0xa91   : > { %10057 = vmatmul.mubr.msk.f32.gmra.mxu1 %vm618_vm1, %v6494_v50  ;;  %10012 = vmatprep.mubr.msk.f32.mxu0 %vm10505_vm6, %v10501_v25 }
 0xa92   : > { %10059 = vmatprep.mubr.msk.f32.mxu1 %vm10505_vm6, %v10501_v25  ;;  %10094 = vmatpush3.msra.mxu0 %v6705_v13  ;;  %v13009_v13 = vld [vmem:[#allocation3 + $0x34] sm:$0xff] }
 0xa93   : > { %10141 = vmatpush3.msra.mxu1 %v6904_v33  ;;  %10095 = vmatprep.subr.mxu0 %v10501_v25 }
 0xa94   : > { %10142 = vmatprep.subr.mxu1 %v10501_v25  ;;  %10013 = vmatmul.mubr.msk.f32.gmra.mxu0 %vm618_vm1, %v6494_v50  ;;  %v6696_v50 = vld [vmem:[#allocation3 + $0x33] sm:$0xff] }
 0xa95   : > { %10060 = vmatmul.mubr.msk.f32.gmra.mxu1 %vm618_vm1, %v6495_v43  ;;  %10015 = vmatprep.mubr.msk.f32.mxu0 %vm10505_vm6, %v10501_v25 }
 0xa96   : > { %10062 = vmatprep.mubr.msk.f32.mxu1 %vm10505_vm6, %v10501_v25  ;;  %10096 = vmatpush3.msra.mxu0 %v6704_v5 }
 0xa97   : > { %10143 = vmatpush3.msra.mxu1 %v6903_v10  ;;  %10183 = vmatprep.subr.mxu0 %v10501_v25  ;;  %v6697_v10 = vld [vmem:[#allocation3 + $0x3b] sm:$0xff] }
 0xa98   : > { %10230 = vmatprep.subr.mxu1 %v10501_v25  ;;  %10016 = vmatmul.mubr.msk.f32.gmra.mxu0 %vm618_vm1, %v6495_v43 }
 0xa99   : > { %10063 = vmatmul.mubr.msk.f32.gmra.mxu1 %vm618_vm1, %v6496_v21  ;;  %10018 = vmatprep.mubr.msk.f32.mxu0 %vm10505_vm6, %v10501_v25 }
 0xa9a   : > { %10065 = vmatprep.mubr.msk.f32.mxu1 %vm10505_vm6, %v10501_v25 }
 0xa9c   : > { %10019 = vmatmul.mubr.msk.f32.gmra.mxu0 %vm618_vm1, %v6496_v21  ;;  %v13020_v21 = vld [vmem:[#allocation3 + $0x3c] sm:$0xff] }
 0xa9d   : > { %10066 = vmatmul.mubr.msk.f32.gmra.mxu1 %vm618_vm1, %v6497_v18  ;;  %10021 = vmatprep.mubr.msk.f32.mxu0 %vm10505_vm6, %v10501_v25 }
 0xa9e   : > { %10068 = vmatprep.mubr.msk.f32.mxu1 %vm10505_vm6, %v10501_v25 }
 0xaa0   : > { %10022 = vmatmul.mubr.msk.f32.gmra.mxu0 %vm618_vm1, %v6497_v18  ;;  %v6698_v18 = vld [vmem:[#allocation3 + $0x43] sm:$0xff] }
 0xaa1   : > { %10069 = vmatmul.mubr.msk.f32.gmra.mxu1 %vm618_vm1, %v6498_v42  ;;  %10024 = vmatprep.mubr.msk.f32.mxu0 %vm10505_vm6, %v10501_v25 }
 0xaa2   : > { %10071 = vmatprep.mubr.msk.f32.mxu1 %vm10505_vm6, %v10501_v25 }
 0xaa4   : > { %10025 = vmatmul.mubr.msk.f32.gmra.mxu0 %vm618_vm1, %v6498_v42  ;;  %v13029_v42 = vld [vmem:[#allocation3 + $0x44] sm:$0xff] }
 0xaa5   : > { %10072 = vmatmul.mubr.msk.f32.gmra.mxu1 %vm618_vm1, %v6499_v46  ;;  %10027 = vmatprep.mubr.msk.f32.mxu0 %vm10505_vm6, %v10501_v25 }
 0xaa6   : > { %10074 = vmatprep.mubr.msk.f32.mxu1 %vm10505_vm6, %v10501_v25 }
 0xaa8   : > { %10028 = vmatmul.mubr.msk.f32.gmra.mxu0 %vm618_vm1, %v6499_v46  ;;  %v6699_v46 = vld [vmem:[#allocation3 + $0x4b] sm:$0xff] }
 0xaa9   : > { %10075 = vmatmul.mubr.msk.f32.gmra.mxu1 %vm618_vm1, %v6500_v4  ;;  %10030 = vmatprep.mubr.msk.f32.mxu0 %vm10505_vm6, %v10501_v25 }
 0xaaa   : > { %10077 = vmatprep.mubr.msk.f32.mxu1 %vm10505_vm6, %v10501_v25 }
 0xaac   : > { %10031 = vmatmul.mubr.msk.f32.gmra.mxu0 %vm618_vm1, %v6500_v4  ;;  %v13038_v4 = vld [vmem:[#allocation3 + $0x4c] sm:$0xff] }
 0xaad   : > { %10078 = vmatmul.mubr.msk.f32.gmra.mxu1 %vm618_vm1, %v6501_v40  ;;  %10033 = vmatprep.mubr.msk.f32.mxu0 %vm10505_vm6, %v10501_v25 }
 0xaae   : > { %10080 = vmatprep.mubr.msk.f32.mxu1 %vm10505_vm6, %v10501_v25 }
 0xab0   : > { %10034 = vmatmul.mubr.msk.f32.gmra.mxu0 %vm618_vm1, %v6501_v40  ;;  %v6700_v40 = vld [vmem:[#allocation3 + $0x53] sm:$0xff] }
 0xab1   : > { %10081 = vmatmul.mubr.msk.f32.gmra.mxu1 %vm618_vm1, %v6502_v55  ;;  %10036 = vmatprep.mubr.msk.f32.mxu0 %vm10505_vm6, %v10501_v25 }
 0xab2   : > { %10083 = vmatprep.mubr.msk.f32.mxu1 %vm10505_vm6, %v10501_v25 }
 0xab4   : > { %10037 = vmatmul.mubr.msk.f32.gmra.mxu0 %vm618_vm1, %v6502_v55  ;;  %v13047_v55 = vld [vmem:[#allocation3 + $0x54] sm:$0xff] }
 0xab5   : > { %10084 = vmatmul.mubr.msk.f32.gmra.mxu1 %vm618_vm1, %v6503_v37  ;;  %10039 = vmatprep.mubr.msk.f32.mxu0 %vm10505_vm6, %v10501_v25  ;;  %v6701_v37 = vld [vmem:[#allocation3 + $0x5b] sm:$0xff] }
 0xab6   : > { %10086 = vmatprep.mubr.msk.f32.mxu1 %vm10505_vm6, %v10501_v25 }
 0xab8   : > { %10040 = vmatmul.mubr.msk.f32.gmra.mxu0 %vm618_vm1, %v6305_v48  ;;  %v13056_v48 = vld [vmem:[#allocation3 + $0x5c] sm:$0xff] }
 0xab9   : > { %10087 = vmatmul.mubr.msk.f32.gmra.mxu1 %vm618_vm1, %v6504_v41  ;;  %10097 = vmatprep.mubr.msk.f32.mxu0 %vm10505_vm6, %v10501_v25  ;;  %v6702_v41 = vld [vmem:[#allocation3 + $0x63] sm:$0xff] }
 0xaba   : > { %10144 = vmatprep.mubr.msk.f32.mxu1 %vm10505_vm6, %v10501_v25  ;;  %v6065_v16 = vpop.f32.mrf.mxu0 }
 0xabb   : > { %v6234_v53 = vpop.f32.mrf.mxu1 }
 0xabc   : > { %v12925_v45 = vadd.f32 %v6234_v53, %v6065_v16  ;;  %v9914_v39 = vpop.f32.mrf.mxu0  ;;  %10098 = vmatmul.mubr.msk.f32.vlgmr.msra.gmra.mxu0 %vm618_vm1, %v6691_v63  ;;  %v13065_v16 = vld [vmem:[#allocation3 + $0x64] sm:$0xff]  ;;  %v6902_v63 = vld [vmem:[#allocation3 + $0x6c] sm:$0xf] }
 0xabd   : > { %v9961_v11 = vpop.f32.mrf.mxu1  ;;  %10145 = vmatmul.mubr.msk.f32.vlgmr.msra.gmra.mxu1 %vm618_vm1, %v6890_v19  ;;  %10100 = vmatprep.mubr.msk.f32.mxu0 %vm10505_vm6, %v10501_v25  ;;  %v6703_v53 = vld [vmem:[#allocation3 + $0x6b] sm:$0xf]  ;;  %v7288_v19 = vld [vmem:[#allocation3 + $0x15] sm:$0xff] }
 0xabe   : > { %10147 = vmatprep.mubr.msk.f32.mxu1 %vm10505_vm6, %v10501_v25  ;;  %v6070_v52 = vpop.f32.mrf.mxu0  ;;  %10184 = vmatpush3.msra.mxu0 %v7105_v32  ;;  %v7503_v32 = vld [vmem:[%s13552_s10 + $0x118] sm:$0xff]  ;;  %v7502_v39 = vld [vmem:[%s13552_s10 + $0x110] sm:$0xff] }
 0xabf   : > { %v6239_v29 = vpop.f32.mrf.mxu1  ;;  %10231 = vmatpush3.msra.mxu1 %v7304_v2  ;;  %10185 = vmatprep.subr.mxu0 %v10501_v25  ;;  %v7289_v2 = vld [vmem:[#allocation3 + $0x1d] sm:$0xff]  ;;  %v7290_v11 = vld [vmem:[#allocation3 + $0x25] sm:$0xff] }
 0xac0   : > { %v12939_v22 = vadd.f32 %v6239_v29, %v6070_v52  ;;  %10232 = vmatprep.subr.mxu1 %v10501_v25  ;;  %v9917_v17 = vpop.f32.mrf.mxu0  ;;  %10101 = vmatmul.mubr.msk.f32.gmra.mxu0 %vm618_vm1, %v6692_v26  ;;  %v7501_v52 = vld [vmem:[%s13552_s10 + $0x108] sm:$0xff]  ;;  %v7500_v26 = vld [vmem:[%s13552_s10 + $0x100] sm:$0xff] }
 0xac1   : > { %v9964_v47 = vpop.f32.mrf.mxu1  ;;  %10148 = vmatmul.mubr.msk.f32.gmra.mxu1 %vm618_vm1, %v12941_v28  ;;  %10103 = vmatprep.mubr.msk.f32.mxu0 %vm10505_vm6, %v10501_v25  ;;  %v7291_v29 = vld [vmem:[#allocation3 + $0x2d] sm:$0xff] }
 0xac2   : > { %10150 = vmatprep.mubr.msk.f32.mxu1 %vm10505_vm6, %v10501_v25  ;;  %v6075_v8 = vpop.f32.mrf.mxu0  ;;  %10186 = vmatpush3.msra.mxu0 %v7104_v24  ;;  %v7293_v24 = vld [vmem:[#allocation3 + $0x3d] sm:$0xff]  ;;  %v7294_v47 = vld [vmem:[#allocation3 + $0x45] sm:$0xff] }
 0xac3   : > { %v6244_v20 = vpop.f32.mrf.mxu1  ;;  %10233 = vmatpush3.msra.mxu1 %v7303_v15  ;;  %10187 = vmatprep.subr.mxu0 %v10501_v25 }
 0xac4   : > { %v12958_v34 = vadd.f32 %v6244_v20, %v6075_v8  ;;  %10234 = vmatprep.subr.mxu1 %v10501_v25  ;;  %v9920_v12 = vpop.f32.mrf.mxu0  ;;  %10104 = vmatmul.mubr.msk.f32.gmra.mxu0 %vm618_vm1, %v6693_v6 }
 0xac5   : > { %v9967_v23 = vpop.f32.mrf.mxu1  ;;  %10151 = vmatmul.mubr.msk.f32.gmra.mxu1 %vm618_vm1, %v12960_v36  ;;  %10106 = vmatprep.mubr.msk.f32.mxu0 %vm10505_vm6, %v10501_v25 }
 0xac6   : > { %10153 = vmatprep.mubr.msk.f32.mxu1 %vm10505_vm6, %v10501_v25  ;;  %v6080_v3 = vpop.f32.mrf.mxu0  ;;  %10188 = vmatpush3.msra.mxu0 %v7103_v30 }
 0xac7   : > { %v6249_v14 = vpop.f32.mrf.mxu1  ;;  %10235 = vmatpush3.msra.mxu1 %v7302_v54  ;;  %10189 = vmatprep.subr.mxu0 %v10501_v25  ;;  %v7295_v54 = vld [vmem:[#allocation3 + $0x4d] sm:$0xff] }
 0xac8   : > { %v12977_v62 = vadd.f32 %v6249_v14, %v6080_v3  ;;  %10236 = vmatprep.subr.mxu1 %v10501_v25  ;;  %v9923_v59 = vpop.f32.mrf.mxu0  ;;  %10107 = vmatmul.mubr.msk.f32.gmra.mxu0 %vm618_vm1, %v6694_v38 }
 0xac9   : > { %v9970_v57 = vpop.f32.mrf.mxu1  ;;  %10154 = vmatmul.mubr.msk.f32.gmra.mxu1 %vm618_vm1, %v12979_v31  ;;  %10109 = vmatprep.mubr.msk.f32.mxu0 %vm10505_vm6, %v10501_v25 }
 0xaca   : > { %10156 = vmatprep.mubr.msk.f32.mxu1 %vm10505_vm6, %v10501_v25  ;;  %v6085_v0 = vpop.f32.mrf.mxu0  ;;  %10190 = vmatpush3.msra.mxu0 %v7102_v35  ;;  %v7297_v57 = vld [vmem:[#allocation3 + $0x5d] sm:$0xff] }
 0xacb   : > { %v6254_v27 = vpop.f32.mrf.mxu1  ;;  %10237 = vmatpush3.msra.mxu1 %v7301_v44  ;;  %10277 = vmatprep.subr.mxu0 %v10501_v25 }
 0xacc   : > { %v12996_v7 = vadd.f32 %v6254_v27, %v6085_v0  ;;  %10324 = vmatprep.subr.mxu1 %v10501_v25  ;;  %v9926_v51 = vpop.f32.mrf.mxu0  ;;  %10110 = vmatmul.mubr.msk.f32.gmra.mxu0 %vm618_vm1, %v6695_v58  ;;  %v7298_v0 = vld [vmem:[#allocation3 + $0x65] sm:$0xff]  ;;  %v7299_v58 = vld [vmem:[#allocation3 + $0x6d] sm:$0xff] }
 0xacd   : > { %v9973_v56 = vpop.f32.mrf.mxu1  ;;  %10157 = vmatmul.mubr.msk.f32.gmra.mxu1 %vm618_vm1, %v12998_v1  ;;  %10112 = vmatprep.mubr.msk.f32.mxu0 %vm10505_vm6, %v10501_v25  ;;  %v7100_v27 = vld [vmem:[#allocation3 + $0x6c] sm:$0xff]  ;;  %v7300_v51 = vld [vmem:[#allocation3 + $0x75] sm:$0xf] }
 0xace   : > { %10159 = vmatprep.mubr.msk.f32.mxu1 %vm10505_vm6, %v10501_v25  ;;  %v6090_v61 = vpop.f32.mrf.mxu0  ;;  %v7487_v56 = vld [vmem:[#allocation3 + $0x16] sm:$0xff] }
 0xacf   : > { %v6259_v49 = vpop.f32.mrf.mxu1 }
 0xad0   : > { %v13011_v33 = vadd.f32 %v6259_v49, %v6090_v61  ;;  %10113 = vmatmul.mubr.msk.f32.gmra.mxu0 %vm618_vm1, %v6696_v50  ;;  %v9929_v43 = vpop.f32.mrf.mxu0  ;;  %v7488_v61 = vld [vmem:[#allocation3 + $0x1e] sm:$0xff]  ;;  %v7489_v49 = vld [vmem:[#allocation3 + $0x26] sm:$0xff]  ;;  %v7490_v50 = vld [vmem:[#allocation3 + $0x2e] sm:$0xff] }
 0xad1   : > { %10160 = vmatmul.mubr.msk.f32.gmra.mxu1 %vm618_vm1, %v13009_v13  ;;  %v9976_v5 = vpop.f32.mrf.mxu1  ;;  %10115 = vmatprep.mubr.msk.f32.mxu0 %vm10505_vm6, %v10501_v25  ;;  %v7492_v43 = vld [vmem:[#allocation3 + $0x3e] sm:$0xff] }
 0xad2   : > { %10162 = vmatprep.mubr.msk.f32.mxu1 %vm10505_vm6, %v10501_v25  ;;  %v7493_v5 = vld [vmem:[#allocation3 + $0x46] sm:$0xff] }
 0xad4   : > { %10116 = vmatmul.mubr.msk.f32.gmra.mxu0 %vm618_vm1, %v6697_v10 }
 0xad5   : > { %10163 = vmatmul.mubr.msk.f32.gmra.mxu1 %vm618_vm1, %v13020_v21  ;;  %10118 = vmatprep.mubr.msk.f32.mxu0 %vm10505_vm6, %v10501_v25 }
 0xad6   : > { %10165 = vmatprep.mubr.msk.f32.mxu1 %vm10505_vm6, %v10501_v25 }
 0xad8   : > { %10119 = vmatmul.mubr.msk.f32.gmra.mxu0 %vm618_vm1, %v6698_v18 }
 0xad9   : > { %10166 = vmatmul.mubr.msk.f32.gmra.mxu1 %vm618_vm1, %v13029_v42  ;;  %10121 = vmatprep.mubr.msk.f32.mxu0 %vm10505_vm6, %v10501_v25 }
 0xada   : > { %10168 = vmatprep.mubr.msk.f32.mxu1 %vm10505_vm6, %v10501_v25 }
 0xadc   : > { %10122 = vmatmul.mubr.msk.f32.gmra.mxu0 %vm618_vm1, %v6699_v46 }
 0xadd   : > { %10169 = vmatmul.mubr.msk.f32.gmra.mxu1 %vm618_vm1, %v13038_v4  ;;  %10124 = vmatprep.mubr.msk.f32.mxu0 %vm10505_vm6, %v10501_v25 }
 0xade   : > { %10171 = vmatprep.mubr.msk.f32.mxu1 %vm10505_vm6, %v10501_v25 }
 0xae0   : > { %10125 = vmatmul.mubr.msk.f32.gmra.mxu0 %vm618_vm1, %v6700_v40 }
 0xae1   : > { %10172 = vmatmul.mubr.msk.f32.gmra.mxu1 %vm618_vm1, %v13047_v55  ;;  %10127 = vmatprep.mubr.msk.f32.mxu0 %vm10505_vm6, %v10501_v25 }
 0xae2   : > { %10174 = vmatprep.mubr.msk.f32.mxu1 %vm10505_vm6, %v10501_v25 }
 0xae4   : > { %10128 = vmatmul.mubr.msk.f32.gmra.mxu0 %vm618_vm1, %v6701_v37 }
 0xae5   : > { %10175 = vmatmul.mubr.msk.f32.gmra.mxu1 %vm618_vm1, %v13056_v48  ;;  %10130 = vmatprep.mubr.msk.f32.mxu0 %vm10505_vm6, %v10501_v25 }
 0xae6   : > { %10177 = vmatprep.mubr.msk.f32.mxu1 %vm10505_vm6, %v10501_v25 }
 0xae8   : > { %10131 = vmatmul.mubr.msk.f32.gmra.mxu0 %vm618_vm1, %v6702_v41 }
 0xae9   : > { %10178 = vmatmul.mubr.msk.f32.gmra.mxu1 %vm618_vm1, %v13065_v16  ;;  %10133 = vmatprep.mubr.msk.f32.mxu0 %vm10505_vm6, %v10501_v25 }
 0xaea   : > { %10180 = vmatprep.mubr.msk.f32.mxu1 %vm10505_vm6, %v10501_v25 }
 0xaec   : > { %10134 = vmatmul.mubr.msk.f32.gmra.mxu0 %vm618_vm1, %v6703_v53 }
 0xaed   : > { %10181 = vmatmul.mubr.msk.f32.gmra.mxu1 %vm618_vm1, %v6902_v63  ;;  %10191 = vmatprep.mubr.msk.f32.mxu0 %vm10505_vm6, %v10501_v25 }
 0xaee   : > { %10238 = vmatprep.mubr.msk.f32.mxu1 %vm10505_vm6, %v10501_v25 }
 0xaf0   : > { %10192 = vmatmul.mubr.msk.f32.vlgmr.msra.gmra.mxu0 %vm618_vm1, %v12941_v28  ;;  %v7292_v28 = vld [vmem:[#allocation3 + $0x35] sm:$0xff] }
 0xaf1   : > { %10239 = vmatmul.mubr.msk.f32.vlgmr.msra.gmra.mxu1 %vm618_vm1, %v7288_v19  ;;  %10194 = vmatprep.mubr.msk.f32.mxu0 %vm10505_vm6, %v10501_v25 }
 0xaf2   : > { %10241 = vmatprep.mubr.msk.f32.mxu1 %vm10505_vm6, %v10501_v25  ;;  %10278 = vmatpush3.msra.mxu0 %v7503_v32 }
 0xaf3   : > { %10279 = vmatprep.subr.mxu0 %v10501_v25 }
 0xaf4   : > { %10195 = vmatmul.mubr.msk.f32.gmra.mxu0 %vm618_vm1, %v12960_v36 }
 0xaf5   : > { %10242 = vmatmul.mubr.msk.f32.gmra.mxu1 %vm618_vm1, %v7289_v2  ;;  %10197 = vmatprep.mubr.msk.f32.mxu0 %vm10505_vm6, %v10501_v25 }
 0xaf6   : > { %10244 = vmatprep.mubr.msk.f32.mxu1 %vm10505_vm6, %v10501_v25  ;;  %10280 = vmatpush3.msra.mxu0 %v7502_v39  ;;  %v7496_v39 = vld [vmem:[#allocation3 + $0x5e] sm:$0xff] }
 0xaf7   : > { %10281 = vmatprep.subr.mxu0 %v10501_v25 }
 0xaf8   : > { %10198 = vmatmul.mubr.msk.f32.gmra.mxu0 %vm618_vm1, %v12979_v31  ;;  %v7296_v31 = vld [vmem:[#allocation3 + $0x55] sm:$0xff] }
 0xaf9   : > { %10245 = vmatmul.mubr.msk.f32.gmra.mxu1 %vm618_vm1, %v7290_v11  ;;  %10200 = vmatprep.mubr.msk.f32.mxu0 %vm10505_vm6, %v10501_v25 }
 0xafa   : > { %10247 = vmatprep.mubr.msk.f32.mxu1 %vm10505_vm6, %v10501_v25  ;;  %10282 = vmatpush3.msra.mxu0 %v7501_v52 }
 0xafb   : > { %10283 = vmatprep.subr.mxu0 %v10501_v25 }
 0xafc   : > { %10201 = vmatmul.mubr.msk.f32.gmra.mxu0 %vm618_vm1, %v12998_v1  ;;  %v7101_v1 = vld [vmem:[#allocation3 + $0x74] sm:$0xf] }
 0xafd   : > { %10248 = vmatmul.mubr.msk.f32.gmra.mxu1 %vm618_vm1, %v7291_v29  ;;  %10203 = vmatprep.mubr.msk.f32.mxu0 %vm10505_vm6, %v10501_v25 }
 0xafe   : > { %10250 = vmatprep.mubr.msk.f32.mxu1 %vm10505_vm6, %v10501_v25  ;;  %10284 = vmatpush3.msra.mxu0 %v7500_v26 }
 0xb00   : > { %10204 = vmatmul.mubr.msk.f32.gmra.mxu0 %vm618_vm1, %v13009_v13  ;;  %v7491_v13 = vld [vmem:[#allocation3 + $0x36] sm:$0xff] }
 0xb01   : > { %10251 = vmatmul.mubr.msk.f32.gmra.mxu1 %vm618_vm1, %v7292_v28  ;;  %10206 = vmatprep.mubr.msk.f32.mxu0 %vm10505_vm6, %v10501_v25 }
 0xb02   : > { %10253 = vmatprep.mubr.msk.f32.mxu1 %vm10505_vm6, %v10501_v25 }
 0xb04   : > { %10207 = vmatmul.mubr.msk.f32.gmra.mxu0 %vm618_vm1, %v13020_v21 }
 0xb05   : > { %10254 = vmatmul.mubr.msk.f32.gmra.mxu1 %vm618_vm1, %v7293_v24  ;;  %10209 = vmatprep.mubr.msk.f32.mxu0 %vm10505_vm6, %v10501_v25 }
 0xb06   : > { %10256 = vmatprep.mubr.msk.f32.mxu1 %vm10505_vm6, %v10501_v25 }
 0xb07   : > { %v6095_v15 = vpop.f32.mrf.mxu0 }
 0xb08   : > { %v6264_v17 = vpop.f32.mrf.mxu1  ;;  %10210 = vmatmul.mubr.msk.f32.gmra.mxu0 %vm618_vm1, %v13029_v42 }
 0xb09   : > { %v13137_v8 = vadd.f32 %v6264_v17, %v6095_v15  ;;  %10257 = vmatmul.mubr.msk.f32.gmra.mxu1 %vm618_vm1, %v7294_v47  ;;  %v9932_v20 = vpop.f32.mrf.mxu0  ;;  %10212 = vmatprep.mubr.msk.f32.mxu0 %vm10505_vm6, %v10501_v25  ;;  %v7497_v15 = vld [vmem:[#allocation3 + $0x66] sm:$0xff] }
 0xb0a   : > { %v9979_v6 = vpop.f32.mrf.mxu1  ;;  %10259 = vmatprep.mubr.msk.f32.mxu1 %vm10505_vm6, %v10501_v25 }
 0xb0b   : > { %v6100_v36 = vpop.f32.mrf.mxu0 }
 0xb0c   : > { %v6269_v30 = vpop.f32.mrf.mxu1  ;;  %10213 = vmatmul.mubr.msk.f32.gmra.mxu0 %vm618_vm1, %v13038_v4  ;;  %v7494_v4 = vld [vmem:[#allocation3 + $0x4e] sm:$0xff] }
 0xb0d   : > { %v13146_v12 = vadd.f32 %v6269_v30, %v6100_v36  ;;  %10260 = vmatmul.mubr.msk.f32.gmra.mxu1 %vm618_vm1, %v7295_v54  ;;  %v9935_v23 = vpop.f32.mrf.mxu0  ;;  %10215 = vmatprep.mubr.msk.f32.mxu0 %vm10505_vm6, %v10501_v25  ;;  %v7498_v30 = vld [vmem:[#allocation3 + $0x6e] sm:$0xff] }
 0xb0e   : > { %v9982_v3 = vpop.f32.mrf.mxu1  ;;  %10262 = vmatprep.mubr.msk.f32.mxu1 %vm10505_vm6, %v10501_v25 }
 0xb0f   : > { %v6105_v14 = vpop.f32.mrf.mxu0 }
 0xb10   : > { %v6274_v38 = vpop.f32.mrf.mxu1  ;;  %10216 = vmatmul.mubr.msk.f32.gmra.mxu0 %vm618_vm1, %v13047_v55 }
 0xb11   : > { %v13155_v35 = vadd.f32 %v6274_v38, %v6105_v14  ;;  %10263 = vmatmul.mubr.msk.f32.gmra.mxu1 %vm618_vm1, %v7296_v31  ;;  %v9938_v44 = vpop.f32.mrf.mxu0  ;;  %10218 = vmatprep.mubr.msk.f32.mxu0 %vm10505_vm6, %v10501_v25  ;;  %v7499_v14 = vld [vmem:[#allocation3 + $0x76] sm:$0xf] }
 0xb12   : > { %v9985_v59 = vpop.f32.mrf.mxu1  ;;  %10265 = vmatprep.mubr.msk.f32.mxu1 %vm10505_vm6, %v10501_v25 }
 0xb14   : > { %10219 = vmatmul.mubr.msk.f32.gmra.mxu0 %vm618_vm1, %v13056_v48 }
 0xb15   : > { %10266 = vmatmul.mubr.msk.f32.gmra.mxu1 %vm618_vm1, %v7297_v57  ;;  %10221 = vmatprep.mubr.msk.f32.mxu0 %vm10505_vm6, %v10501_v25 }
 0xb16   : > { %10268 = vmatprep.mubr.msk.f32.mxu1 %vm10505_vm6, %v10501_v25 }
 0xb18   : > { %10222 = vmatmul.mubr.msk.f32.gmra.mxu0 %vm618_vm1, %v13065_v16  ;;  %v7495_v16 = vld [vmem:[#allocation3 + $0x56] sm:$0xff] }
 0xb19   : > { %10269 = vmatmul.mubr.msk.f32.gmra.mxu1 %vm618_vm1, %v7298_v0  ;;  %10224 = vmatprep.mubr.msk.f32.mxu0 %vm10505_vm6, %v10501_v25 }
 0xb1a   : > { %10271 = vmatprep.mubr.msk.f32.mxu1 %vm10505_vm6, %v10501_v25 }
 0xb1c   : > { %10225 = vmatmul.mubr.msk.f32.gmra.mxu0 %vm618_vm1, %v7100_v27 }
 0xb1d   : > { %10272 = vmatmul.mubr.msk.f32.gmra.mxu1 %vm618_vm1, %v7299_v58  ;;  %10227 = vmatprep.mubr.msk.f32.mxu0 %vm10505_vm6, %v10501_v25 }
 0xb1e   : > { %10274 = vmatprep.mubr.msk.f32.mxu1 %vm10505_vm6, %v10501_v25 }
 0xb20   : > { %10228 = vmatmul.mubr.msk.f32.gmra.mxu0 %vm618_vm1, %v7101_v1 }
 0xb21   : > { %10275 = vmatmul.mubr.msk.f32.gmra.mxu1 %vm618_vm1, %v7300_v51  ;;  %10285 = vmatprep.mubr.msk.f32.mxu0 %vm10505_vm6, %v10501_v25 }
 0xb22   : > { %10350 = vmatprep.mubr.msk.f32.mxu1 %vm10505_vm6, %v10501_v25 }
 0xb24   : > { %10286 = vmatmul.mubr.msk.f32.vlgmr.msra.gmra.mxu0 %vm618_vm1, %v7487_v56 }
 0xb25   : > { %10288 = vmatprep.mubr.msk.f32.mxu0 %vm10505_vm6, %v10501_v25 }
 0xb28   : > { %10289 = vmatmul.mubr.msk.f32.gmra.mxu0 %vm618_vm1, %v7488_v61 }
 0xb29   : > { %10291 = vmatprep.mubr.msk.f32.mxu0 %vm10505_vm6, %v10501_v25 }
 0xb2c   : > { %10292 = vmatmul.mubr.msk.f32.gmra.mxu0 %vm618_vm1, %v7489_v49 }
 0xb2d   : > { %10294 = vmatprep.mubr.msk.f32.mxu0 %vm10505_vm6, %v10501_v25 }
 0xb30   : > { %10295 = vmatmul.mubr.msk.f32.gmra.mxu0 %vm618_vm1, %v7490_v50 }
 0xb31   : > { %10297 = vmatprep.mubr.msk.f32.mxu0 %vm10505_vm6, %v10501_v25 }
 0xb34   : > { %10298 = vmatmul.mubr.msk.f32.gmra.mxu0 %vm618_vm1, %v7491_v13 }
 0xb35   : > { %10300 = vmatprep.mubr.msk.f32.mxu0 %vm10505_vm6, %v10501_v25 }
 0xb38   : > { %10301 = vmatmul.mubr.msk.f32.gmra.mxu0 %vm618_vm1, %v7492_v43 }
 0xb39   : > { %10303 = vmatprep.mubr.msk.f32.mxu0 %vm10505_vm6, %v10501_v25 }
 0xb3c   : > { %v6110_v10 = vpop.f32.mrf.mxu0  ;;  %10304 = vmatmul.mubr.msk.f32.gmra.mxu0 %vm618_vm1, %v7493_v5 }
 0xb3d   : > { %v6279_v21 = vpop.f32.mrf.mxu1  ;;  %10306 = vmatprep.mubr.msk.f32.mxu0 %vm10505_vm6, %v10501_v25 }
 0xb3e   : > { %v13209_v18 = vadd.f32 %v6279_v21, %v6110_v10  ;;  %v9941_v42 = vpop.f32.mrf.mxu0 }
 0xb3f   : > { %v9988_v46 = vpop.f32.mrf.mxu1 }
 0xb40   : > { %v6115_v40 = vpop.f32.mrf.mxu0  ;;  %10307 = vmatmul.mubr.msk.f32.gmra.mxu0 %vm618_vm1, %v7494_v4 }
 0xb41   : > { %v6284_v55 = vpop.f32.mrf.mxu1  ;;  %10309 = vmatprep.mubr.msk.f32.mxu0 %vm10505_vm6, %v10501_v25 }
 0xb42   : > { %v13214_v37 = vadd.f32 %v6284_v55, %v6115_v40  ;;  %v9944_v48 = vpop.f32.mrf.mxu0 }
 0xb43   : > { %v9991_v41 = vpop.f32.mrf.mxu1 }
 0xb44   : > { %v6120_v53 = vpop.f32.mrf.mxu0  ;;  %10310 = vmatmul.mubr.msk.f32.gmra.mxu0 %vm618_vm1, %v7495_v16 }
 0xb45   : > { %v6289_v63 = vpop.f32.mrf.mxu1  ;;  %10312 = vmatprep.mubr.msk.f32.mxu0 %vm10505_vm6, %v10501_v25 }
 0xb46   : > { %v13219_v19 = vadd.f32 %v6289_v63, %v6120_v53  ;;  %v9947_v32 = vpop.f32.mrf.mxu0 }
 0xb47   : > { %v9994_v2 = vpop.f32.mrf.mxu1 }
 0xb48   : > { %v6415_v11 = vpop.f32.mrf.mxu0  ;;  %10313 = vmatmul.mubr.msk.f32.gmra.mxu0 %vm618_vm1, %v7496_v39 }
 0xb49   : > { %v6614_v52 = vpop.f32.mrf.mxu1  ;;  %v6479_v29 = vadd.f32 %v6415_v11, %v12783_v9  ;;  %10315 = vmatprep.mubr.msk.f32.mxu0 %vm10505_vm6, %v10501_v25 }
 0xb4a   : > { %v10005_v26 = vpop.f32.mrf.mxu0 }
 0xb4b   : > { %v10052_v28 = vpop.f32.mrf.mxu1  ;;  %v13227_v24 = vadd.f32 %v6614_v52, %v6479_v29 }
 0xb4c   : > { %v6420_v17 = vpop.f32.mrf.mxu0  ;;  %10316 = vmatmul.mubr.msk.f32.gmra.mxu0 %vm618_vm1, %v7497_v15 }
 0xb4d   : > { %v6619_v47 = vpop.f32.mrf.mxu1  ;;  %v6480_v20 = vadd.f32 %v6420_v17, %v12925_v45  ;;  %10318 = vmatprep.mubr.msk.f32.mxu0 %vm10505_vm6, %v10501_v25 }
 0xb4e   : > { %v10008_v6 = vpop.f32.mrf.mxu0 }
 0xb4f   : > { %v10055_v36 = vpop.f32.mrf.mxu1  ;;  %v13233_v9 = vadd.f32 %v6619_v47, %v6480_v20 }
 0xb50   : > { %v6425_v54 = vpop.f32.mrf.mxu0  ;;  %10319 = vmatmul.mubr.msk.f32.gmra.mxu0 %vm618_vm1, %v7498_v30 }
 0xb51   : > { %v6624_v23 = vpop.f32.mrf.mxu1  ;;  %v6481_v3 = vadd.f32 %v6425_v54, %v12939_v22  ;;  %10321 = vmatprep.mubr.msk.f32.mxu0 %vm10505_vm6, %v10501_v25 }
 0xb52   : > { %v10011_v38 = vpop.f32.mrf.mxu0 }
 0xb53   : > { %v10058_v45 = vpop.f32.mrf.mxu1  ;;  %v13239_v31 = vadd.f32 %v6624_v23, %v6481_v3 }
 0xb54   : > { %v6430_v44 = vpop.f32.mrf.mxu0  ;;  %10322 = vmatmul.mubr.msk.f32.gmra.mxu0 %vm618_vm1, %v7499_v14 }
 0xb55   : > { %v6629_v59 = vpop.f32.mrf.mxu1  ;;  %v6482_v57 = vadd.f32 %v6430_v44, %v12958_v34 }
 0xb56   : > { %v10014_v0 = vpop.f32.mrf.mxu0 }
 0xb57   : > { %v10061_v27 = vpop.f32.mrf.mxu1  ;;  %v13243_v58 = vadd.f32 %v6629_v59, %v6482_v57 }
 0xb58   : > { %v6435_v1 = vpop.f32.mrf.mxu0 }
 0xb59   : > { %v6634_v22 = vpop.f32.mrf.mxu1  ;;  %v6483_v51 = vadd.f32 %v6435_v1, %v12977_v62 }
 0xb5a   : > { %v10017_v56 = vpop.f32.mrf.mxu0 }
 0xb5b   : > { %v10064_v61 = vpop.f32.mrf.mxu1  ;;  %v13246_v49 = vadd.f32 %v6634_v22, %v6483_v51 }
 0xb5c   : > { %v6440_v50 = vpop.f32.mrf.mxu0 }
 0xb5d   : > { %v6639_v13 = vpop.f32.mrf.mxu1  ;;  %v6484_v43 = vadd.f32 %v6440_v50, %v12996_v7 }
 0xb5e   : > { %v10020_v5 = vpop.f32.mrf.mxu0 }
 0xb5f   : > { %v10067_v10 = vpop.f32.mrf.mxu1  ;;  %v13249_v21 = vadd.f32 %v6639_v13, %v6484_v43 }
 0xb60   : > { %v6445_v34 = vpop.f32.mrf.mxu0 }
 0xb61   : > { %v6644_v42 = vpop.f32.mrf.mxu1  ;;  %v6485_v46 = vadd.f32 %v6445_v34, %v13011_v33 }
 0xb62   : > { %v10023_v4 = vpop.f32.mrf.mxu0 }
 0xb63   : > { %v10070_v40 = vpop.f32.mrf.mxu1  ;;  %v13252_v55 = vadd.f32 %v6644_v42, %v6485_v46 }
 0xb64   : > { %v6450_v62 = vpop.f32.mrf.mxu0 }
 0xb65   : > { %v6649_v48 = vpop.f32.mrf.mxu1  ;;  %v6486_v41 = vadd.f32 %v6450_v62, %v13137_v8 }
 0xb66   : > { %v10026_v16 = vpop.f32.mrf.mxu0 }
 0xb67   : > { %v10073_v53 = vpop.f32.mrf.mxu1  ;;  %v13255_v63 = vadd.f32 %v6649_v48, %v6486_v41 }
 0xb68   : > { %v6455_v7 = vpop.f32.mrf.mxu0 }
 0xb69   : > { %v6654_v32 = vpop.f32.mrf.mxu1  ;;  %v6487_v2 = vadd.f32 %v6455_v7, %v13146_v12 }
 0xb6a   : > { %v10029_v39 = vpop.f32.mrf.mxu0 }
 0xb6b   : > { %v10076_v11 = vpop.f32.mrf.mxu1  ;;  %v13258_v52 = vadd.f32 %v6654_v32, %v6487_v2 }
 0xb6c   : > { %v6460_v33 = vpop.f32.mrf.mxu0 }
 0xb6d   : > { %v6659_v29 = vpop.f32.mrf.mxu1  ;;  %v6488_v26 = vadd.f32 %v6460_v33, %v13155_v35 }
 0xb6e   : > { %v10032_v28 = vpop.f32.mrf.mxu0 }
 0xb6f   : > { %v10079_v15 = vpop.f32.mrf.mxu1  ;;  %v13261_v17 = vadd.f32 %v6659_v29, %v6488_v26 }
 0xb70   : > { %v6465_v8 = vpop.f32.mrf.mxu0 }
 0xb71   : > { %v6664_v47 = vpop.f32.mrf.mxu1  ;;  %v6489_v20 = vadd.f32 %v6465_v8, %v13209_v18 }
 0xb72   : > { %v10035_v6 = vpop.f32.mrf.mxu0 }
 0xb73   : > { %v10082_v36 = vpop.f32.mrf.mxu1  ;;  %v13264_v30 = vadd.f32 %v6664_v47, %v6489_v20 }
 0xb74   : > { %v6470_v12 = vpop.f32.mrf.mxu0 }
 0xb75   : > { %v6669_v54 = vpop.f32.mrf.mxu1  ;;  %v6490_v23 = vadd.f32 %v6470_v12, %v13214_v37 }
 0xb76   : > { %v10038_v3 = vpop.f32.mrf.mxu0 }
 0xb77   : > { %v10085_v14 = vpop.f32.mrf.mxu1  ;;  %v13267_v38 = vadd.f32 %v6669_v54, %v6490_v23 }
 0xb78   : > { %v6475_v35 = vpop.f32.mrf.mxu0 }
 0xb79   : > { %v6674_v45 = vpop.f32.mrf.mxu1  ;;  %v6491_v44 = vadd.f32 %v6475_v35, %v13219_v19 }
 0xb7a   : > { %v10041_v59 = vpop.f32.mrf.mxu0 }
 0xb7b   : > { %v10088_v57 = vpop.f32.mrf.mxu1  ;;  %v13270_v0 = vadd.f32 %v6674_v45, %v6491_v44 }
 0xb7c   : > { %v6813_v18 = vpop.f32.mrf.mxu0 }
 0xb7d   : > { %v7012_v27 = vpop.f32.mrf.mxu1  ;;  %v6877_v1 = vadd.f32 %v6813_v18, %v13227_v24 }
 0xb7e   : > { %v10099_v22 = vpop.f32.mrf.mxu0 }
 0xb7f   : > { %v10146_v51 = vpop.f32.mrf.mxu1  ;;  %v13273_v56 = vadd.f32 %v7012_v27, %v6877_v1 }
 0xb80   : > { %v6818_v37 = vpop.f32.mrf.mxu0 }
 0xb81   : > { %v7017_v61 = vpop.f32.mrf.mxu1  ;;  %v6878_v50 = vadd.f32 %v6818_v37, %v13233_v9 }
 0xb82   : > { %v10102_v13 = vpop.f32.mrf.mxu0 }
 0xb83   : > { %v10149_v43 = vpop.f32.mrf.mxu1  ;;  %v13276_v5 = vadd.f32 %v7017_v61, %v6878_v50 }
 0xb84   : > { %v6823_v19 = vpop.f32.mrf.mxu0 }
 0xb85   : > { %v7022_v10 = vpop.f32.mrf.mxu1  ;;  %v6879_v34 = vadd.f32 %v6823_v19, %v13239_v31 }
 0xb86   : > { %v10105_v42 = vpop.f32.mrf.mxu0 }
 0xb87   : > { %v10152_v46 = vpop.f32.mrf.mxu1  ;;  %v13279_v4 = vadd.f32 %v7022_v10, %v6879_v34 }
 0xb88   : > { %v6828_v24 = vpop.f32.mrf.mxu0 }
 0xb89   : > { %v7027_v40 = vpop.f32.mrf.mxu1  ;;  %v6880_v62 = vadd.f32 %v6828_v24, %v13243_v58 }
 0xb8a   : > { %v10108_v48 = vpop.f32.mrf.mxu0 }
 0xb8b   : > { %v10155_v41 = vpop.f32.mrf.mxu1  ;;  %v13282_v16 = vadd.f32 %v7027_v40, %v6880_v62 }
 0xb8c   : > { %v6833_v9 = vpop.f32.mrf.mxu0 }
 0xb8d   : > { %v7032_v53 = vpop.f32.mrf.mxu1  ;;  %v6881_v7 = vadd.f32 %v6833_v9, %v13246_v49 }
 0xb8e   : > { %v10111_v32 = vpop.f32.mrf.mxu0 }
 0xb8f   : > { %v10158_v2 = vpop.f32.mrf.mxu1  ;;  %v13285_v39 = vadd.f32 %v7032_v53, %v6881_v7 }
 0xb90   : > { %v6838_v31 = vpop.f32.mrf.mxu0 }
 0xb91   : > { %v7037_v11 = vpop.f32.mrf.mxu1  ;;  %v6882_v33 = vadd.f32 %v6838_v31, %v13249_v21 }
 0xb92   : > { %v10114_v29 = vpop.f32.mrf.mxu0 }
 0xb93   : > { %v10161_v26 = vpop.f32.mrf.mxu1  ;;  %v13288_v28 = vadd.f32 %v7037_v11, %v6882_v33 }
 0xb94   : > { %v6843_v58 = vpop.f32.mrf.mxu0 }
 0xb95   : > { %v7042_v15 = vpop.f32.mrf.mxu1  ;;  %v6883_v8 = vadd.f32 %v6843_v58, %v13252_v55 }
 0xb96   : > { %v10117_v47 = vpop.f32.mrf.mxu0 }
 0xb97   : > { %v10164_v20 = vpop.f32.mrf.mxu1  ;;  %v13291_v6 = vadd.f32 %v7042_v15, %v6883_v8 }
 0xb98   : > { %v6848_v49 = vpop.f32.mrf.mxu0 }
 0xb99   : > { %v7047_v36 = vpop.f32.mrf.mxu1  ;;  %v6884_v12 = vadd.f32 %v6848_v49, %v13255_v63 }
 0xb9a   : > { %v10120_v54 = vpop.f32.mrf.mxu0 }
 0xb9b   : > { %v10167_v23 = vpop.f32.mrf.mxu1  ;;  %v13294_v3 = vadd.f32 %v7047_v36, %v6884_v12 }
 0xb9c   : > { %v6853_v21 = vpop.f32.mrf.mxu0 }
 0xb9d   : > { %v7052_v14 = vpop.f32.mrf.mxu1  ;;  %v6885_v35 = vadd.f32 %v6853_v21, %v13258_v52 }
 0xb9e   : > { %v10123_v45 = vpop.f32.mrf.mxu0 }
 0xb9f   : > { %v10170_v44 = vpop.f32.mrf.mxu1  ;;  %v13297_v59 = vadd.f32 %v7052_v14, %v6885_v35 }
 0xba0   : > { %v6858_v55 = vpop.f32.mrf.mxu0 }
 0xba1   : > { %v7057_v57 = vpop.f32.mrf.mxu1  ;;  %v6886_v18 = vadd.f32 %v6858_v55, %v13261_v17 }
 0xba2   : > { %v10126_v27 = vpop.f32.mrf.mxu0 }
 0xba3   : > { %v10173_v1 = vpop.f32.mrf.mxu1  ;;  %v13300_v22 = vadd.f32 %v7057_v57, %v6886_v18 }
 0xba4   : > { %v6863_v63 = vpop.f32.mrf.mxu0 }
 0xba5   : > { %v7062_v51 = vpop.f32.mrf.mxu1  ;;  %v6887_v37 = vadd.f32 %v6863_v63, %v13264_v30 }
 0xba6   : > { %v10129_v61 = vpop.f32.mrf.mxu0 }
 0xba7   : > { %v10176_v50 = vpop.f32.mrf.mxu1  ;;  %v13303_v13 = vadd.f32 %v7062_v51, %v6887_v37 }
 0xba8   : > { %v6868_v52 = vpop.f32.mrf.mxu0 }
 0xba9   : > { %v7067_v43 = vpop.f32.mrf.mxu1  ;;  %v6888_v19 = vadd.f32 %v6868_v52, %v13267_v38 }
 0xbaa   : > { %v10132_v10 = vpop.f32.mrf.mxu0 }
 0xbab   : > { %v10179_v34 = vpop.f32.mrf.mxu1  ;;  %v13306_v42 = vadd.f32 %v7067_v43, %v6888_v19 }
 0xbac   : > { %v6873_v17 = vpop.f32.mrf.mxu0 }
 0xbad   : > { %v7072_v46 = vpop.f32.mrf.mxu1  ;;  %v6889_v24 = vadd.f32 %v6873_v17, %v13270_v0 }
 0xbae   : > { %v10135_v40 = vpop.f32.mrf.mxu0 }
 0xbaf   : > { %v10182_v62 = vpop.f32.mrf.mxu1  ;;  %v13309_v48 = vadd.f32 %v7072_v46, %v6889_v24 }
 0xbb0   : > { %v7211_v30 = vpop.f32.mrf.mxu0 }
 0xbb1   : > { %v7410_v41 = vpop.f32.mrf.mxu1  ;;  %v7275_v9 = vadd.f32 %v7211_v30, %v13273_v56 }
 0xbb2   : > { %v10193_v53 = vpop.f32.mrf.mxu0 }
 0xbb3   : > { %v10240_v7 = vpop.f32.mrf.mxu1  ;;  %v7474_v32 = vadd.f32 %v7410_v41, %v7275_v9 }
 0xbb4   : > { %v7216_v38 = vpop.f32.mrf.mxu0 }
 0xbb5   : > { %v7415_v2 = vpop.f32.mrf.mxu1  ;;  %v7276_v31 = vadd.f32 %v7216_v38, %v13276_v5 }
 0xbb6   : > { %v10196_v11 = vpop.f32.mrf.mxu0 }
 0xbb7   : > { %v10243_v33 = vpop.f32.mrf.mxu1  ;;  %v7475_v29 = vadd.f32 %v7415_v2, %v7276_v31  ;;  %v13339_v31 = vld [vmem:[%s13553_s11] ss:$0 sm:$0xff] }
 0xbb8   : > { %v7221_v26 = vpop.f32.mrf.mxu0 }
 0xbb9   : > { %v7420_v0 = vpop.f32.mrf.mxu1  ;;  %v7277_v58 = vadd.f32 %v7221_v26, %v13279_v4 }
 0xbba   : > { %v10199_v15 = vpop.f32.mrf.mxu0 }
 0xbbb   : > { %v10246_v8 = vpop.f32.mrf.mxu1  ;;  %v7476_v47 = vadd.f32 %v7420_v0, %v7277_v58 }
 0xbbc   : > { %v7226_v20 = vpop.f32.mrf.mxu0 }
 0xbbd   : > { %v7425_v49 = vpop.f32.mrf.mxu1  ;;  %v7278_v8 = vadd.f32 %v7226_v20, %v13282_v16 }
 0xbbe   : > { %v10202_v56 = vpop.f32.mrf.mxu0 }
 0xbbf   : > { %v10249_v36 = vpop.f32.mrf.mxu1 }
 0xbc0   : > { %v7231_v12 = vpop.f32.mrf.mxu0 }
 0xbc1   : > { %v7430_v54 = vpop.f32.mrf.mxu1 }
 0xbc2   : > { %v10205_v23 = vpop.f32.mrf.mxu0 }
 0xbc3   : > { %v10252_v21 = vpop.f32.mrf.mxu1 }
 0xbc4   : > { %v7236_v14 = vpop.f32.mrf.mxu0 }
 0xbc5   : > { %v7435_v5 = vpop.f32.mrf.mxu1 }
 0xbc6   : > { %v10208_v35 = vpop.f32.mrf.mxu0 }
 0xbc7   : > { %v10255_v45 = vpop.f32.mrf.mxu1  ;;  %v7477_v35 = vadd.f32 %v7425_v49, %v7278_v8 }
 0xbc8   : > { %v7241_v44 = vpop.f32.mrf.mxu0  ;;  %v7279_v45 = vadd.f32 %v7231_v12, %v13285_v39 }
 0xbc9   : > { %v7440_v55 = vpop.f32.mrf.mxu1  ;;  %v7281_v39 = vadd.f32 %v7241_v44, %v13291_v6 }
 0xbca   : > { %v10211_v57 = vpop.f32.mrf.mxu0 }
 0xbcb   : > { %v10258_v18 = vpop.f32.mrf.mxu1 }
 0xbcc   : > { %v7246_v4 = vpop.f32.mrf.mxu0 }
 0xbcd   : > { %v13314_v27 = vpop.f32.mrf.mxu1 }
 0xbce   : > { %v10214_v1 = vpop.f32.mrf.mxu0 }
 0xbcf   : > { %v10261_v63 = vpop.f32.mrf.mxu1 }
 0xbd0   : > { %v13316_v51 = vpop.f32.mrf.mxu0  ;;  %v7478_v63 = vadd.f32 %v7430_v54, %v7279_v45 }
 0xbd1   : > { %v13318_v37 = vpop.f32.mrf.mxu1 }
 0xbd2   : > { %v10217_v61 = vpop.f32.mrf.mxu0 }
 0xbd3   : > { %v10264_v50 = vpop.f32.mrf.mxu1 }
 0xbd4   : > { %v13320_v52 = vpop.f32.mrf.mxu0 }
 0xbd5   : > { %v13322_v43 = vpop.f32.mrf.mxu1 }
 0xbd6   : > { %v10220_v19 = vpop.f32.mrf.mxu0 }
 0xbd7   : > { %v10267_v10 = vpop.f32.mrf.mxu1 }
 0xbd8   : > { %v13324_v34 = vpop.f32.mrf.mxu0 }
 0xbd9   : > { %v13326_v17 = vpop.f32.mrf.mxu1 }
 0xbda   : > { %v10223_v46 = vpop.f32.mrf.mxu0 }
 0xbdb   : > { %v10270_v24 = vpop.f32.mrf.mxu1  ;;  %v7480_v46 = vadd.f32 %v7440_v55, %v7281_v39 }
 0xbdc   : > { %v13328_v40 = vpop.f32.mrf.mxu0  ;;  %v7282_v24 = vadd.f32 %v7246_v4, %v13294_v3 }
 0xbdd   : > { %v13330_v62 = vpop.f32.mrf.mxu1 }
 0xbde   : > { %v10226_v30 = vpop.f32.mrf.mxu0 }
 0xbdf   : > { %v10273_v41 = vpop.f32.mrf.mxu1 }
 0xbe0   : > { %v13332_v9 = vpop.f32.mrf.mxu0 }
 0xbe1   : > { %v13334_v53 = vpop.f32.mrf.mxu1 }
 0xbe2   : > { %v10229_v7 = vpop.f32.mrf.mxu0 }
 0xbe3   : > { %v10276_v38 = vpop.f32.mrf.mxu1 }
 0xbe4   : > { %v7609_v2 = vpop.f32.mrf.mxu0  ;;  %v7481_v38 = vadd.f32 %v13314_v27, %v7282_v24  ;;  %v7284_v27 = vadd.f32 %v13320_v52, %v13300_v22 }
 0xbe5   : > { %v7673_v11 = vadd.f32 %v7609_v2, %v7474_v32  ;;  %v7283_v2 = vadd.f32 %v13316_v51, %v13297_v59 }
 0xbe6   : > { %v10287_v33 = vpop.f32.mrf.mxu0 }
 0xbe7   : > { %v13342_v26 = vadd.f32 %v13339_v31, %v7673_v11 }
 0xbe8   : > { %v7614_v0 = vpop.f32.mrf.mxu0 }
 0xbe9   : > { %v7674_v58 = vadd.f32 %v7614_v0, %v7475_v29  ;;  %v7280_v29 = vadd.f32 %v7236_v14, %v13288_v28 }
 0xbea   : > { %v10290_v15 = vpop.f32.mrf.mxu0 }
 0xbeb   : > { %v13346_v56 = vadd.f32 %v13339_v31, %v7674_v58  ;;  %v7479_v50 = vadd.f32 %v7435_v5, %v7280_v29  ;;  %v7482_v58 = vadd.f32 %v13318_v37, %v7283_v2  ;;  %v7285_v37 = vadd.f32 %v13324_v34, %v13303_v13 }
 0xbec   : > { %v7619_v36 = vpop.f32.mrf.mxu0 }
 0xbed   : > { %v7675_v23 = vadd.f32 %v7619_v36, %v7476_v47  ;;  %v7707_v2 = vmul.f32 %v13346_v56, %v13346_v56 }
 0xbee   : > { %v10293_v21 = vpop.f32.mrf.mxu0 }
 0xbef   : > { %v13350_v32 = vadd.f32 %v13339_v31, %v7675_v23  ;;  %v7483_v21 = vadd.f32 %v13322_v43, %v7284_v27  ;;  %v7286_v43 = vadd.f32 %v13328_v40, %v13306_v42  ;;  %v7856_v27 = vld [vmem:[%s13556_s14 + $0x38] sm:$0xff] }
 0xbf0   : > { %v7624_v57 = vpop.f32.mrf.mxu0  ;;  %vm7869_vm2 = vcmp.gt.f32.partialorder %v7856_v27, 0.0 }
 0xbf1   : > { %v7676_v18 = vadd.f32 %v7624_v57, %v7477_v35 }
 0xbf2   : > { %v10296_v1 = vpop.f32.mrf.mxu0 }
 0xbf3   : > { %v13354_v16 = vadd.f32 %v13339_v31, %v7676_v18  ;;  %v7484_v1 = vadd.f32 %v13326_v17, %v7285_v37  ;;  %v7287_v17 = vadd.f32 %v13332_v9, %v13309_v48 }
 0xbf4   : > { %v7629_v20 = vpop.f32.mrf.mxu0 }
 0xbf5   : > { %v7677_v61 = vadd.f32 %v7629_v20, %v7478_v63  ;;  %v7709_v47 = vmul.f32 %v13354_v16, %v13354_v16 }
 0xbf6   : > { %v10299_v49 = vpop.f32.mrf.mxu0 }
 0xbf7   : > { %v13360_v12 = vadd.f32 %v13339_v31, %v7677_v61  ;;  %v7728_v19 = vsel %vm618_vm1, %v7709_v47, 0.0  ;;  %v7485_v47 = vadd.f32 %v13330_v62, %v7286_v43 }
 0xbf8   : > { %v7634_v54 = vpop.f32.mrf.mxu0  ;;  %7729 = vadd.xlane.f32.xlu1 %v7728_v19 }
 0xbf9   : > { %v7678_v28 = vadd.f32 %v7634_v54, %v7479_v50  ;;  %v7710_v14 = vmul.f32 %v13360_v12, %v13360_v12  ;;  %v7486_v54 = vadd.f32 %v13334_v53, %v7287_v17 }
 0xbfa   : > { %v10302_v10 = vpop.f32.mrf.mxu0 }
 0xbfb   : > { %v13367_v30 = vadd.f32 %v13339_v31, %v7678_v28  ;;  %v7731_v6 = vsel %vm618_vm1, %v7710_v14, 0.0 }
 0xbfc   : > { %v7639_v5 = vpop.f32.mrf.mxu0  ;;  %7732 = vadd.xlane.f32.xlu0 %v7731_v6 }
 0xbfd   : > { %v7679_v44 = vadd.f32 %v7639_v5, %v7480_v46  ;;  %v7711_v41 = vmul.f32 %v13367_v30, %v13367_v30  ;;  %v7858_v5 = vld [vmem:[%s13556_s14 + $0x48] sm:$0xff] }
 0xbfe   : > { %v10305_v7 = vpop.f32.mrf.mxu0  ;;  %vm7871_vm6 = vcmp.gt.f32.partialorder %v7858_v5, 0.0 }
 0xbff   : > { %v13376_v55 = vadd.f32 %v13339_v31, %v7679_v44  ;;  %v7734_v3 = vsel %vm618_vm1, %v7711_v41, 0.0  ;;  %v7859_v44 = vld [vmem:[%s13556_s14 + $0x50] sm:$0xff]  ;;  %v7708_v7 = vmul.f32 %v13350_v32, %v13350_v32 }
 0xc00   : > { %v7644_v4 = vpop.f32.mrf.mxu0  ;;  %7735 = vadd.xlane.f32.xlu0 %v7734_v3  ;;  %vm7872_vm13 = vcmp.gt.f32.partialorder %v7859_v44, 0.0  ;;  %v7706_v3 = vmul.f32 %v13342_v26, %v13342_v26 }
 0xc01   : > { %v7680_v11 = vadd.f32 %v7644_v4, %v7481_v38  ;;  %v7712_v33 = vmul.f32 %v13376_v55, %v13376_v55  ;;  %v7885_v41 = vsel %vm7872_vm13, 1, %v10506_v60  ;;  %v7725_v38 = vsel %vm618_vm1, %v7708_v7, 0.0 }
 0xc02   : > { %v10308_v0 = vpop.f32.mrf.mxu0  ;;  %v7722_v4 = vsel %vm618_vm1, %v7707_v2, 0.0 }
 0xc03   : > { %v13385_v15 = vadd.f32 %v13339_v31, %v7680_v11  ;;  %v7737_v59 = vsel %vm618_vm1, %v7712_v33, 0.0  ;;  %v7719_v11 = vsel %vm618_vm1, %v7706_v3, 0.0  ;;  %v7851_v33 = vld [vmem:[%s13556_s14 + $0x10] sm:$0xff]  ;;  %v7857_v0 = vld [vmem:[%s13556_s14 + $0x40] sm:$0xff] }
 0xc04   : > { %v7649_v51 = vpop.f32.mrf.mxu0  ;;  %7738 = vadd.xlane.f32.xlu1 %v7737_v59  ;;  %vm7870_vm14 = vcmp.gt.f32.partialorder %v7857_v0, 0.0 }
 0xc05   : > { %v7681_v8 = vadd.f32 %v7649_v51, %v7482_v58  ;;  %v7713_v36 = vmul.f32 %v13385_v15, %v13385_v15  ;;  %v7883_v59 = vsel %vm7870_vm14, 1, %v10506_v60  ;;  %v7855_v51 = vld [vmem:[%s13556_s14 + $0x30] sm:$0xff] }
 0xc06   : > { %v10311_v23 = vpop.f32.mrf.mxu0  ;;  %vm7868_vm3 = vcmp.gt.f32.partialorder %v7855_v51, 0.0 }
 0xc07   : > { %v13394_v35 = vadd.f32 %v13339_v31, %v7681_v8  ;;  %v7740_v22 = vsel %vm618_vm1, %v7713_v36, 0.0  ;;  %v7882_v8 = vsel %vm7869_vm2, 1, %v10506_v60  ;;  %v7854_v36 = vld [vmem:[%s13556_s14 + $0x28] sm:$0xff]  ;;  %v7881_v23 = vsel %vm7868_vm3, 1, %v10506_v60 }
 0xc08   : > { %v7654_v52 = vpop.f32.mrf.mxu0  ;;  %7741 = vadd.xlane.f32.xlu0 %v7740_v22  ;;  %vm7867_vm4 = vcmp.gt.f32.partialorder %v7854_v36, 0.0  ;;  %v7852_v22 = vld [vmem:[%s13556_s14 + $0x18] sm:$0xff] }
 0xc09   : > { %v7682_v45 = vadd.f32 %v7654_v52, %v7483_v21  ;;  %v7714_v57 = vmul.f32 %v13394_v35, %v13394_v35  ;;  %v7853_v21 = vld [vmem:[%s13556_s14 + $0x20] sm:$0xff]  ;;  %v7880_v37 = vsel %vm7867_vm4, 1, %v10506_v60  ;;  %vm7865_vm7 = vcmp.gt.f32.partialorder %v7852_v22, 0.0 }
 0xc0a   : > { %v10314_v18 = vpop.f32.mrf.mxu0  ;;  %vm7866_vm5 = vcmp.gt.f32.partialorder %v7853_v21, 0.0 }
 0xc0b   : > { %v13403_v63 = vadd.f32 %v13339_v31, %v7682_v45  ;;  %v7743_v13 = vsel %vm618_vm1, %v7714_v57, 0.0  ;;  %v7879_v52 = vsel %vm7866_vm5, 1, %v10506_v60  ;;  %v7850_v45 = vld [vmem:[%s13556_s14 + $0x8] sm:$0xff]  ;;  %v7878_v57 = vsel %vm7865_vm7, 1, %v10506_v60  ;;  %v7849_v18 = vld [vmem:[%s13556_s14] sm:$0xff] }
 0xc0c   : > { %v7659_v34 = vpop.f32.mrf.mxu0  ;;  %7744 = vadd.xlane.f32.xlu1 %v7743_v13  ;;  %vm7863_vm8 = vcmp.gt.f32.partialorder %v7850_v45, 0.0  ;;  %vm7862_vm9 = vcmp.gt.f32.partialorder %v7849_v18, 0.0  ;;  %v7954_v13 = vld [vmem:[#allocation4] sm:$0x1] }
 0xc0d   : > { %v7683_v29 = vadd.f32 %v7659_v34, %v7484_v1  ;;  %v7715_v20 = vmul.f32 %v13403_v63, %v13403_v63  ;;  %v7876_v1 = vsel %vm7863_vm8, 1, %v10506_v60  ;;  %v7875_v43 = vsel %vm7862_vm9, 1, %v10506_v60  ;;  %v7923_v34 = vpop.permute.xlu0 %7922 }
 0xc0e   : > { %v10317_v61 = vpop.f32.mrf.mxu0 }
 0xc0f   : > { %v13412_v49 = vadd.f32 %v13339_v31, %v7683_v29  ;;  %v7746_v42 = vsel %vm618_vm1, %v7715_v20, 0.0  ;;  %v7926_v61 = vpop.permute.xlu1 %7925 }
 0xc10   : > { %v7664_v40 = vpop.f32.mrf.mxu0  ;;  %7747 = vadd.xlane.f32.xlu0 %v7746_v42  ;;  %vm7939_vm11 = vcmp.eq.s32.totalorder %v7926_v61, 1 }
 0xc11   : > { %v7684_v50 = vadd.f32 %v7664_v40, %v7485_v47  ;;  %v7716_v39 = vmul.f32 %v13412_v49, %v13412_v49 }
 0xc12   : > { %v10320_v19 = vpop.f32.mrf.mxu0 }
 0xc13   : > { %v13419_v28 = vadd.f32 %v13339_v31, %v7684_v50  ;;  %v7749_v62 = vsel %vm618_vm1, %v7716_v39, 0.0 }
 0xc14   : > { %v7669_v48 = vpop.f32.mrf.mxu0  ;;  %7750 = vadd.xlane.f32.xlu0 %v7749_v62 }
 0xc15   : > { %v7685_v9 = vadd.f32 %v7669_v48, %v7486_v54  ;;  %v7717_v14 = vmul.f32 %v13419_v28, %v13419_v28 }
 0xc16   : > { %v10323_v10 = vpop.f32.mrf.mxu0 }
 0xc17   : > { %v13425_v46 = vadd.f32 %v13339_v31, %v7685_v9  ;;  %v7752_v24 = vsel %vm618_vm1, %v7717_v14, 0.0  ;;  %v7884_v31 = vsel %vm7871_vm6, 1, %v10506_v60  ;;  %vm7938_vm6 = vcmp.eq.s32.totalorder %v7923_v34, 1 }
 0xc18   : > { %7753 = vadd.xlane.f32.xlu0 %v7752_v24 }
 0xc19   : > { %v7718_v53 = vmul.f32 %v13425_v46, %v13425_v46 }
 0xc1b   : > { %v7755_v6 = vsel %vm2424_vm15, %v7718_v53, 0.0  ;;  %vm7864_vm15 = vcmp.gt.f32.partialorder %v7851_v33, 0.0 }
 0xc1c   : > { %7756 = vadd.xlane.f32.xlu1 %v7755_v6  ;;  %v7877_v58 = vsel %vm7864_vm15, 1, %v10506_v60 }
 0xc2d   : > { %7916 = vperm.xlu1 %10378, %v7884_v31  }
 0xc2e   : > { %7919 = vperm.xlu0 %10377, %v7885_v41  }
 0xc4d   : > { %7726 = vadd.xlane.f32.xlu0 %v7725_v38 }
 0xc51   : > { %7723 = vadd.xlane.f32.xlu0 %v7722_v4  ;;  %7720 = vadd.xlane.f32.xlu1 %v7719_v11 }
 0xc62   : > { %7895 = vperm.xlu1 %10378, %v7877_v58  }
 0xc67   : > { %7913 = vperm.xlu0 %10377, %v7883_v59  }
 0xc6b   : > { %7910 = vperm.xlu0 %10377, %v7882_v8  }
 0xc6f   : > { %7907 = vperm.xlu0 %10377, %v7881_v23  }
 0xc73   : > { %7904 = vperm.xlu0 %10377, %v7880_v37  }
 0xc77   : > { %7901 = vperm.xlu0 %10377, %v7879_v52  }
 0xc7b   : > { %7898 = vperm.xlu0 %10377, %v7878_v57  }
 0xc7f   : > { %7892 = vperm.xlu0 %10377, %v7876_v1  }
 0xc81   : > { %v13488_v17 = vpop.xlane.xlu1 %7729 }
 0xc83   : > { %7889 = vperm.xlu0 %10377, %v7875_v43  }
 0xc85   : > { %v13484_v29 = vpop.xlane.xlu0 %7732 }
 0xc86   : > { %v7762_v57 = vmul.f32 0.03125, %v13484_v29 }
 0xc87   : > { %7957 = vperm.xlu0 %10377, %v7954_v13   ;;  %v7761_v13 = vmul.f32 0.03125, %v13488_v17 }
 0xc88   : > { %v7775_v1 = vadd.f32 1e-08, %v7762_v57 }
 0xc89   : > { %v13486_v20 = vpop.xlane.xlu0 %7735 }
 0xc8a   : > { %v7763_v52 = vmul.f32 0.03125, %v13486_v20 }
 0xc8c   : > { %v7776_v18 = vadd.f32 1e-08, %v7763_v52 }
 0xc8d   : > { %v7739_v40 = vpop.xlane.xlu1 %7738 }
 0xc8e   : > { %v7764_v37 = vmul.f32 0.03125, %v7739_v40 }
 0xc90   : > { %v7777_v45 = vadd.f32 1e-08, %v7764_v37 }
 0xc91   : > { %v7742_v47 = vpop.xlane.xlu0 %7741 }
 0xc92   : > { %v7765_v8 = vmul.f32 0.03125, %v7742_v47 }
 0xc94   : > { %v7778_v22 = vadd.f32 1e-08, %v7765_v8 }
 0xc95   : > { %v7745_v39 = vpop.xlane.xlu1 %7744 }
 0xc96   : > { %v7766_v59 = vmul.f32 0.03125, %v7745_v39 }
 0xc98   : > { %v7779_v23 = vadd.f32 1e-08, %v7766_v59 }
 0xc99   : > { %v7748_v42 = vpop.xlane.xlu0 %7747 }
 0xc9a   : > { %v7767_v14 = vmul.f32 0.03125, %v7748_v42  ;;  %v7774_v42 = vadd.f32 1e-08, %v7761_v13 }
 0xc9c   : > { %v7780_v53 = vadd.f32 1e-08, %v7767_v14 }
 0xc9d   : > { %v7751_v50 = vpop.xlane.xlu0 %7750 }
 0xc9e   : > { %v7768_v19 = vmul.f32 0.03125, %v7751_v50 }
 0xca0   : > { %v7781_v48 = vadd.f32 1e-08, %v7768_v19 }
 0xca1   : > { %v7754_v54 = vpop.xlane.xlu0 %7753 }
 0xca2   : > { %v7769_v62 = vmul.f32 0.03125, %v7754_v54 }
 0xca4   : > { %v7782_v60 = vadd.f32 1e-08, %v7769_v62 }
 0xca5   : > { %v7757_v9 = vpop.xlane.xlu1 %7756 }
 0xca6   : > { %10465 = vrsqrt.f32 %v7782_v60  ;;  %v7770_v10 = vmul.f32 0.03125, %v7757_v9 }
 0xca7   : > { %10467 = vrsqrt.f32 %v7781_v48 }
 0xca8   : > { %v7783_v24 = vadd.f32 1e-08, %v7770_v10 }
 0xcaa   : > { %10469 = vrsqrt.f32 %v7783_v24 }
 0xcab   : > { %10471 = vrsqrt.f32 %v7780_v53 }
 0xcac   : > { %10473 = vrsqrt.f32 %v7779_v23 }
 0xcad   : > { %10475 = vrsqrt.f32 %v7778_v22 }
 0xcae   : > { %10477 = vrsqrt.f32 %v7777_v45 }
 0xcaf   : > { %10479 = vrsqrt.f32 %v7776_v18 }
 0xcb0   : > { %10481 = vrsqrt.f32 %v7775_v1 }
 0xcb1   : > { %10483 = vrsqrt.f32 %v7774_v42 }
 0xcb3   : > { %v10466_v6 = vpop.eup %10465 }
 0xcb4   : > { %v10468_v5 = vpop.eup %10467  ;;  %v7808_v44 = vmul.f32 %v10466_v6, %v13419_v28  ;;  %v7920_v28 = vpop.permute.xlu0 %7919 }
 0xcb5   : > { %v7807_v7 = vmul.f32 %v10468_v5, %v13412_v49  ;;  %vm7937_vm15 = vcmp.eq.s32.totalorder %v7920_v28, 1 }
 0xcb6   : > { %v7834_v2 = vmul.f32 0.1, %v7808_v44  ;;  %vm7821_vm0 = vcmp.ge.f32.partialorder %v7808_v44, 0.0 }
 0xcb7   : > { %v10470_v31 = vpop.eup %10469  ;;  %v7833_v33 = vmul.f32 0.1, %v7807_v7  ;;  %vm7820_vm12 = vcmp.ge.f32.partialorder %v7807_v7, 0.0 }
 0xcb8   : > { %v7809_v41 = vmul.f32 %v10470_v31, %v13425_v46  ;;  %v10472_v3 = vpop.eup %10471  ;;  %v7847_v58 = vsel %vm7821_vm0, %v7808_v44, %v7834_v2 }
 0xcb9   : > { %v7806_v0 = vmul.f32 %v10472_v3, %v13403_v63  ;;  %v7951_v49 = vsel %vm7938_vm6, %v7847_v58, 0.0  ;;  %v7846_v46 = vsel %vm7820_vm12, %v7807_v7, %v7833_v33  ;;  %v7917_v63 = vpop.permute.xlu1 %7916  ;;  %v10474_v34 = vpop.eup %10473 }
 0xcba   : > { %vm7822_vm10 = vcmp.ge.f32.partialorder %v7809_v41, 0.0  ;;  %v7835_v38 = vmul.f32 0.1, %v7809_v41  ;;  %v7950_v51 = vsel %vm7937_vm15, %v7846_v46, 0.0  ;;  %vm7936_vm14 = vcmp.eq.s32.totalorder %v7917_v63, 1  ;;  %v10476_v47 = vpop.eup %10475 }
 0xcbb   : > { %v7832_v27 = vmul.f32 0.1, %v7806_v0  ;;  %vm7819_vm13 = vcmp.ge.f32.partialorder %v7806_v0, 0.0  ;;  %v7805_v40 = vmul.f32 %v10474_v34, %v13394_v35  ;;  %v7804_v39 = vmul.f32 %v10476_v47, %v13385_v15  ;;  %v10478_v19 = vpop.eup %10477  ;;  %v7953_v34 = vld [vmem:[%s13557_s15] sm:$0x1] }
 0xcbc   : > { %v7848_v4 = vsel %vm7822_vm10, %v7809_v41, %v7835_v38  ;;  %v7803_v48 = vmul.f32 %v10478_v19, %v13376_v55  ;;  %v10480_v9 = vpop.eup %10479 }
 0xcbd   : > { %v7952_v11 = vsel %vm7939_vm11, %v7848_v4, 0.0  ;;  %v7845_v36 = vsel %vm7819_vm13, %v7806_v0, %v7832_v27  ;;  %v7831_v54 = vmul.f32 0.1, %v7805_v40  ;;  %vm7818_vm2 = vcmp.ge.f32.partialorder %v7805_v40, 0.0  ;;  %v10482_v5 = vpop.eup %10481 }
 0xcbe   : > { %10325 = vmatpush3.xpose.msk.msra.mxu1 %vm618_vm1, %v7952_v11  ;;  %v7949_v21 = vsel %vm7936_vm14, %v7845_v36, 0.0  ;;  %v7830_v17 = vmul.f32 0.1, %v7804_v39  ;;  %vm7817_vm4 = vcmp.ge.f32.partialorder %v7804_v39, 0.0  ;;  %v7829_v53 = vmul.f32 0.1, %v7803_v48  ;;  %v10484_v3 = vpop.eup %10483 }
 0xcbf   : > { %10326 = vmatprep.subr.mxu1 %v10501_v25  ;;  %v7844_v24 = vsel %vm7818_vm2, %v7805_v40, %v7831_v54  ;;  %v7802_v6 = vmul.f32 %v10480_v9, %v13367_v30  ;;  %vm7816_vm7 = vcmp.ge.f32.partialorder %v7803_v48, 0.0  ;;  %v7801_v7 = vmul.f32 %v10482_v5, %v13360_v12 }
 0xcc0   : > { %v7843_v31 = vsel %vm7817_vm4, %v7804_v39, %v7830_v17  ;;  %v7842_v38 = vsel %vm7816_vm7, %v7803_v48, %v7829_v53  ;;  %v7800_v58 = vmul.f32 %v10484_v3, %v13354_v16 }
 0xcc1   : > { %v7828_v2 = vmul.f32 0.1, %v7802_v6  ;;  %vm7815_vm9 = vcmp.ge.f32.partialorder %v7802_v6, 0.0  ;;  %v7827_v0 = vmul.f32 0.1, %v7801_v7  ;;  %vm7814_vm0 = vcmp.ge.f32.partialorder %v7801_v7, 0.0 }
 0xcc2   : > { %10327 = vmatpush3.xpose.msk.msra.mxu1 %vm618_vm1, %v7951_v49  ;;  %v7826_v27 = vmul.f32 0.1, %v7800_v58  ;;  %vm7813_vm12 = vcmp.ge.f32.partialorder %v7800_v58, 0.0 }
 0xcc3   : > { %10328 = vmatprep.subr.mxu1 %v10501_v25  ;;  %v7841_v33 = vsel %vm7815_vm9, %v7802_v6, %v7828_v2  ;;  %v7840_v46 = vsel %vm7814_vm0, %v7801_v7, %v7827_v0 }
 0xcc4   : > { %v7839_v8 = vsel %vm7813_vm12, %v7800_v58, %v7826_v27 }
 0xcc6   : > { %10329 = vmatpush3.xpose.msk.msra.mxu1 %vm618_vm1, %v7950_v51 }
 0xcc7   : > { %10330 = vmatprep.subr.mxu1 %v10501_v25 }
 0xcca   : > { %10331 = vmatpush3.xpose.msk.msra.mxu1 %vm618_vm1, %v7949_v21 }
 0xccb   : > { %10332 = vmatprep.subr.mxu1 %v10501_v25 }
 0xcd6   : > { %v7727_v43 = vpop.xlane.xlu0 %7726 }
 0xcd7   : > { %v7760_v61 = vmul.f32 0.03125, %v7727_v43 }
 0xcd9   : > { %v7773_v20 = vadd.f32 1e-08, %v7760_v61  ;;  %v7960_v61 = vlaneseq }
 0xcda   : > { %v7724_v50 = vpop.xlane.xlu0 %7723  ;;  %v7721_v62 = vpop.xlane.xlu1 %7720 }
 0xcdb   : > { %v7759_v29 = vmul.f32 0.03125, %v7724_v50  ;;  %10485 = vrsqrt.f32 %v7773_v20  ;;  %v7758_v10 = vmul.f32 0.03125, %v7721_v62  ;;  %v7961_v47 = vshrl.u32 %v7960_v61, 7 }
 0xcdd   : > { %v7772_v14 = vadd.f32 1e-08, %v7759_v29  ;;  %v7771_v44 = vadd.f32 1e-08, %v7758_v10  ;;  %v7962_v42 = vsub.s32 0, %v7961_v47 }
 0xcde   : > { %v7896_v23 = vpop.permute.xlu1 %7895 }
 0xcdf   : > { %10487 = vrsqrt.f32 %v7772_v14  ;;  %vm7929_vm15 = vcmp.eq.s32.totalorder %v7896_v23, 1 }
 0xce0   : > { %10489 = vrsqrt.f32 %v7771_v44 }
 0xce2   : > { %v7914_v60 = vpop.permute.xlu0 %7913 }
 0xce3   : > { %vm7935_vm3 = vcmp.eq.s32.totalorder %v7914_v60, 1 }
 0xce4   : > { %v7948_v35 = vsel %vm7935_vm3, %v7844_v24, 0.0 }
 0xce5   : > { %10333 = vmatpush3.xpose.msk.msra.mxu1 %vm618_vm1, %v7948_v35 }
 0xce6   : > { %v7911_v15 = vpop.permute.xlu0 %7910  ;;  %10334 = vmatprep.subr.mxu1 %v10501_v25 }
 0xce7   : > { %vm7934_vm5 = vcmp.eq.s32.totalorder %v7911_v15, 1 }
 0xce8   : > { %v7947_v55 = vsel %vm7934_vm5, %v7843_v31, 0.0  ;;  %v10486_v4 = vpop.eup %10485  ;;  %vm8077_vm5 = vcmask 811008  }
 0xce9   : > { %10335 = vmatpush3.xpose.msk.msra.mxu1 %vm618_vm1, %v7947_v55  ;;  %v7799_v12 = vmul.f32 %v10486_v4, %v13350_v32 }
 0xcea   : > { %v7908_v41 = vpop.permute.xlu0 %7907  ;;  %10336 = vmatprep.subr.mxu1 %v10501_v25 }
 0xceb   : > { %vm7933_vm8 = vcmp.eq.s32.totalorder %v7908_v41, 1  ;;  %v7825_v63 = vmul.f32 0.1, %v7799_v12  ;;  %vm7812_vm6 = vcmp.ge.f32.partialorder %v7799_v12, 0.0 }
 0xcec   : > { %v7946_v30 = vsel %vm7933_vm8, %v7842_v38, 0.0  ;;  %v10488_v59 = vpop.eup %10487 }
 0xced   : > { %10337 = vmatpush3.xpose.msk.msra.mxu1 %vm618_vm1, %v7946_v30  ;;  %v7798_v32 = vmul.f32 %v10488_v59, %v13346_v56  ;;  %v10490_v36 = vpop.eup %10489  ;;  %v7838_v37 = vsel %vm7812_vm6, %v7799_v12, %v7825_v63 }
 0xcee   : > { %v7905_v11 = vpop.permute.xlu0 %7904  ;;  %10338 = vmatprep.subr.mxu1 %v10501_v25  ;;  %v7797_v45 = vmul.f32 %v10490_v36, %v13342_v26  ;;  %v7942_v57 = vsel %vm7929_vm15, %v7838_v37, 0.0 }
 0xcef   : > { %vm7932_vm10 = vcmp.eq.s32.totalorder %v7905_v11, 1  ;;  %v7824_v52 = vmul.f32 0.1, %v7798_v32  ;;  %vm7811_vm14 = vcmp.ge.f32.partialorder %v7798_v32, 0.0 }
 0xcf0   : > { %v7945_v28 = vsel %vm7932_vm10, %v7841_v33, 0.0  ;;  %v7823_v1 = vmul.f32 0.1, %v7797_v45  ;;  %vm7810_vm3 = vcmp.ge.f32.partialorder %v7797_v45, 0.0 }
 0xcf1   : > { %10339 = vmatpush3.xpose.msk.msra.mxu1 %vm618_vm1, %v7945_v28  ;;  %v7837_v56 = vsel %vm7811_vm14, %v7798_v32, %v7824_v52 }
 0xcf2   : > { %v7902_v49 = vpop.permute.xlu0 %7901  ;;  %10340 = vmatprep.subr.mxu1 %v10501_v25  ;;  %v7836_v13 = vsel %vm7810_vm3, %v7797_v45, %v7823_v1 }
 0xcf3   : > { %vm7931_vm11 = vcmp.eq.s32.totalorder %v7902_v49, 1 }
 0xcf4   : > { %v7944_v51 = vsel %vm7931_vm11, %v7840_v46, 0.0 }
 0xcf5   : > { %10341 = vmatpush3.xpose.msk.msra.mxu1 %vm618_vm1, %v7944_v51 }
 0xcf6   : > { %v7899_v16 = vpop.permute.xlu0 %7898  ;;  %10342 = vmatprep.subr.mxu1 %v10501_v25 }
 0xcf7   : > { %vm7930_vm13 = vcmp.eq.s32.totalorder %v7899_v16, 1 }
 0xcf8   : > { %v7943_v21 = vsel %vm7930_vm13, %v7839_v8, 0.0 }
 0xcf9   : > { %10343 = vmatpush3.xpose.msk.msra.mxu1 %vm618_vm1, %v7943_v21 }
 0xcfa   : > { %v7893_v22 = vpop.permute.xlu0 %7892  ;;  %10344 = vmatprep.subr.mxu1 %v10501_v25 }
 0xcfb   : > { %vm7928_vm2 = vcmp.eq.s32.totalorder %v7893_v22, 1 }
 0xcfc   : > { %v7941_v43 = vsel %vm7928_vm2, %v7837_v56, 0.0 }
 0xcfd   : > { %10345 = vmatpush3.xpose.msk.msra.mxu1 %vm618_vm1, %v7942_v57 }
 0xcfe   : > { %v7890_v18 = vpop.permute.xlu0 %7889  ;;  %10346 = vmatprep.subr.mxu1 %v10501_v25 }
 0xcff   : > { %vm7927_vm4 = vcmp.eq.s32.totalorder %v7890_v18, 1 }
 0xd00   : > { %v7940_v26 = vsel %vm7927_vm4, %v7836_v13, 0.0 }
 0xd01   : > { %10347 = vmatpush3.xpose.msk.msra.mxu1 %vm618_vm1, %v7941_v43 }
 0xd02   : > { %10348 = vmatprep.subr.mxu1 %v10501_v25  ;;  %v7958_v40 = vpop.permute.xlu0 %7957 }
 0xd03   : > { %v7963_v50 = vrot.slane %v7958_v40, %v7962_v42 }
 0xd05   : > { %10349 = vmatpush3.xpose.msk.msra.mxu1 %vm618_vm1, %v7940_v26 }
 0xd08   : > { %10351 = vmatmul.mubr.msk.f32.vlgmr.msra.gmra.mxu1 %vm618_vm1, %v7953_v34 }
 0xdc8   : > { %v8072_v20 = vpop.f32.mrf.mxu1 }
 0xdc9   : > { %v8073_v39 = vadd.f32 %v8072_v20, %v7963_v50 }
 0xdca   : > { %v10352_v19 = vpop.f32.mrf.mxu1 }
 0xdcb   : > { %10491 = vtanh.f32 %v8073_v39 }
 0xdd8   : > { %v10492_v25 = vpop.eup %10491 }
 0xdd9   : > { %8078 = vst.msk [vmem:[%s554_s24] sm:$0x1] %vm8077_vm5, %v10492_v25 }
 0xdda PF: > { %s29_s26 = sadd.s32 1, %s10499_s26  }
 0xddb   : > { %p26_p4 = scmp.ge.s32.totalorder %s29_s26, 4  }
 0xddd   :  { %28 = sbr.rel (!%p26_p4) target bundleno = 3 (0x3), region = 121 }

</bundles_post_ra>
